<compile_context>
chip_gen: v5e
topology: v5e:2x2
jax: 0.10.0
libtpu: 0.0.40
codegen_flags: <defaults>
</compile_context>

<pallas_src>
from functools import partial

import numpy as np
import jax
import jax.numpy as jnp
from jax import lax
from jax.experimental import pallas as pl
from jax.experimental.pallas import tpu as pltpu

INPUT_WINDOW = 101
K = 5                                  # conv kernel size
C1, C2 = 6, 16                         # conv channel counts
L1 = INPUT_WINDOW - (K - 1)            # 97  (after conv1, 'VALID')
L2 = L1 - (K - 1)                      # 93  (after conv2, 'VALID')
FLAT = C2 * L2                         # 16 * 93 = 1488
H1, H2, H3, OUT = 600, 120, 84, 16
BN_EPS = 1e-5


def _round_up(n, m):
    return ((n + m - 1) // m) * m


# Lane-padded feature widths (all multiples of 128)
IN_PAD = _round_up(INPUT_WINDOW, 128)      # 128
F1 = _round_up(C1 * L1, 128)               # 582  -> 640
F2 = _round_up(FLAT, 128)                  # 1488 -> 1536
F3 = _round_up(H1, 128)                    # 600  -> 640
F4 = _round_up(H2, 128)                    # 120  -> 128
F5 = _round_up(H3, 128)                    # 84   -> 128
F6 = _round_up(OUT, 128)                   # 16   -> 128


# ---------------------------------------------------------------------------
# Fused kernel: conv1->bn1->relu->conv2->bn2->relu->fc1..fc3(+bn,relu)->fc4
# Everything is (batch_tile, features) with features on lanes.
# Weights are bf16 (BN scale pre-folded into columns); shifts are f32.
# ---------------------------------------------------------------------------
def _net_kernel(x_ref,
                w1_ref, t1_ref,
                w2_ref, t2_ref,
                w3_ref, t3_ref,
                w4_ref, t4_ref,
                w5_ref, t5_ref,
                w6_ref, b6_ref,
                out_ref):
    a = x_ref[...].astype(jnp.bfloat16)                      # (BT, 128), bf16 for the MXU
    for w_ref, t_ref in (
            (w1_ref, t1_ref),   # conv1 (banded matmul, bn1 scale folded) + bias/bn shift + relu
            (w2_ref, t2_ref),   # conv2 (banded matmul, bn2 scale folded) + bias/bn shift + relu
            (w3_ref, t3_ref),   # fc1 (+bn3) + relu
            (w4_ref, t4_ref),   # fc2 (+bn4) + relu
            (w5_ref, t5_ref)):  # fc3 (+bn5) + relu
        h = jnp.dot(a, w_ref[...], preferred_element_type=jnp.float32)   # f32 accumulate
        a = jnp.maximum(h + t_ref[...], 0.0).astype(jnp.bfloat16)        # f32 epilogue
    out_ref[...] = (jnp.dot(a, w6_ref[...], preferred_element_type=jnp.float32)
                    + b6_ref[...])                           # fc4 (+bias), dropout = id


# ---------------------------------------------------------------------------
# Wrapper
# ---------------------------------------------------------------------------
@partial(jax.jit, static_argnames=("batch_tile",))
def net_forward(x, p, *, batch_tile=256):
    # batch_tile: 128-256 is ideal on v5e; 256-512 on v6e/v7x (weights stay VMEM-resident).
    B = x.shape[0]
    # Pick a tile that yields >= 2 grid steps whenever B allows it, so the "parallel"
    # grid axis can be split across v7x's two TensorCores.
    bt = min(batch_tile, max(_round_up(-(-B // 2), 8), 8))
    b_pad = _round_up(B, bt)

    # zero-pad batch to a multiple of the tile and the 101-sample window to 128 lanes
    xp = jnp.zeros((b_pad, IN_PAD), jnp.float32)
    xp = xp.at[:B, :INPUT_WINDOW].set(x.astype(jnp.float32))

    def const_spec(shape):
        return pl.BlockSpec(shape, lambda i: (0, 0))         # constant index -> DMA'd once

    out = pl.pallas_call(
        _net_kernel,
        out_shape=jax.ShapeDtypeStruct((b_pad, F6), jnp.float32),
        grid=(b_pad // bt,),
        in_specs=[
            pl.BlockSpec((bt, IN_PAD), lambda i: (i, 0)),
            const_spec((IN_PAD, F1)), const_spec((1, F1)),
            const_spec((F1, F2)), const_spec((1, F2)),
            const_spec((F2, F3)), const_spec((1, F3)),
            const_spec((F3, F4)), const_spec((1, F4)),
            const_spec((F4, F5)), const_spec((1, F5)),
            const_spec((F5, F6)), const_spec((1, F6)),
        ],
        out_specs=pl.BlockSpec((bt, F6), lambda i: (i, 0)),
        compiler_params=pltpu.CompilerParams(
            dimension_semantics=("parallel",),
            vmem_limit_bytes=32 * 1024 * 1024),
    )(xp, p["w1"], p["t1"],
      p["w2"], p["t2"],
      p["w3"], p["t3"],
      p["w4"], p["t4"],
      p["w5"], p["t5"],
      p["w6"], p["b6"])
    return out[:B, :OUT]


# ---------------------------------------------------------------------------
# Deterministic parameter init (mirrors the module's __init__ shapes)
# ---------------------------------------------------------------------------
def init_raw_params(key):
    ks = jax.random.split(key, 12)

    def kaiming(k, shape, fan_in):
        return jax.random.normal(k, shape, jnp.float32) * jnp.sqrt(2.0 / fan_in)

    raw = {
        "conv1_w": kaiming(ks[0], (C1, 1, K), 1 * K),
        "conv1_b": jax.random.uniform(ks[1], (C1,), jnp.float32, -0.1, 0.1),
        "conv2_w": kaiming(ks[2], (C2, C1, K), C1 * K),
        "conv2_b": jax.random.uniform(ks[3], (C2,), jnp.float32, -0.1, 0.1),
        "fc1_w": kaiming(ks[4], (H1, FLAT), FLAT),
        "fc1_b": jax.random.uniform(ks[5], (H1,), jnp.float32, -0.1, 0.1),
        "fc2_w": kaiming(ks[6], (H2, H1), H1),
        "fc2_b": jax.random.uniform(ks[7], (H2,), jnp.float32, -0.1, 0.1),
        "fc3_w": kaiming(ks[8], (H3, H2), H2),
        "fc3_b": jax.random.uniform(ks[9], (H3,), jnp.float32, -0.1, 0.1),
        "fc4_w": kaiming(ks[10], (OUT, H3), H3),
        "fc4_b": jax.random.uniform(ks[11], (OUT,), jnp.float32, -0.1, 0.1),
    }
    # BatchNorm: PyTorch default init, eval mode (gamma=1, beta=0, mean=0, var=1)
    for name, c in [("bn1", C1), ("bn2", C2), ("bn3", H1), ("bn4", H2), ("bn5", H3)]:
        raw[name + "_gamma"] = jnp.ones((c,), jnp.float32)
        raw[name + "_beta"] = jnp.zeros((c,), jnp.float32)
        raw[name + "_mean"] = jnp.zeros((c,), jnp.float32)
        raw[name + "_var"] = jnp.ones((c,), jnp.float32)
    return raw


def _bn_fold(raw, name):
    scale = raw[name + "_gamma"] / jnp.sqrt(raw[name + "_var"] + BN_EPS)
    shift = raw[name + "_beta"] - raw[name + "_mean"] * scale
    return scale, shift


# ---------------------------------------------------------------------------
# Host-side packing: convs -> banded matrices, BN scale -> folded into weight
# columns, conv/fc bias + BN shift -> per-feature shift, zero-padded to
# 128-multiple lane widths, weights cast to bf16.
# ---------------------------------------------------------------------------
def pack_kernel_params(raw):
    def np32(a):
        return np.asarray(jax.device_get(a), np.float32)

    def bn_fold_np(name):
        g, b = np32(raw[name + "_gamma"]), np32(raw[name + "_beta"])
        m, v = np32(raw[name + "_mean"]), np32(raw[name + "_var"])
        s = g / np.sqrt(v + BN_EPS)
        return s, b - m * s

    def pad_vec(v, n):
        out = np.zeros((1, n), np.float32)
        out[0, :v.shape[0]] = v
        return out

    def pad_mat(m, r, c):
        out = np.zeros((r, c), np.float32)
        out[:m.shape[0], :m.shape[1]] = m
        return out

    # conv1 as a banded matrix: (x @ W1)[b, c*L1 + l] = sum_k x[b, l+k] * w1[c, 0, k]
    w1 = np32(raw["conv1_w"])                                  # (6, 1, 5)
    W1 = np.zeros((IN_PAD, F1), np.float32)
    l1 = np.arange(L1)
    for c in range(C1):
        for k in range(K):
            W1[l1 + k, c * L1 + l1] = w1[c, 0, k]

    # conv2 as a banded matrix on the (c1*L1 + l) flat layout, producing the
    # torch-order (c2*L2 + l2) flat layout that fc1 expects.
    w2 = np32(raw["conv2_w"])                                  # (16, 6, 5)
    W2 = np.zeros((F1, F2), np.float32)
    l2 = np.arange(L2)
    for co in range(C2):
        for ci in range(C1):
            for k in range(K):
                W2[ci * L1 + l2 + k, co * L2 + l2] = w2[co, ci, k]

    W3 = pad_mat(np32(raw["fc1_w"]).T, F2, F3)
    W4 = pad_mat(np32(raw["fc2_w"]).T, F3, F4)
    W5 = pad_mat(np32(raw["fc3_w"]).T, F4, F5)
    W6 = pad_mat(np32(raw["fc4_w"]).T, F5, F6)

    # BN fold: relu(((a@W) + b) * s + t) == relu(a @ (W * diag(s)) + (b*s + t))
    s1, t1 = bn_fold_np("bn1"); t1 = np32(raw["conv1_b"]) * s1 + t1
    s2, t2 = bn_fold_np("bn2"); t2 = np32(raw["conv2_b"]) * s2 + t2
    s3, t3 = bn_fold_np("bn3"); t3 = np32(raw["fc1_b"]) * s3 + t3
    s4, t4 = bn_fold_np("bn4"); t4 = np32(raw["fc2_b"]) * s4 + t4
    s5, t5 = bn_fold_np("bn5"); t5 = np32(raw["fc3_b"]) * s5 + t5

    # Fold the BN scale into the output columns of each weight matrix.
    W1 *= pad_vec(np.repeat(s1, L1), F1)
    W2 *= pad_vec(np.repeat(s2, L2), F2)
    W3 *= pad_vec(s3, F3)
    W4 *= pad_vec(s4, F4)
    W5 *= pad_vec(s5, F5)

    p = {
        "w1": W1, "t1": pad_vec(np.repeat(t1, L1), F1),
        "w2": W2, "t2": pad_vec(np.repeat(t2, L2), F2),
        "w3": W3, "t3": pad_vec(t3, F3),
        "w4": W4, "t4": pad_vec(t4, F4),
        "w5": W5, "t5": pad_vec(t5, F5),
        "w6": W6, "b6": pad_vec(np32(raw["fc4_b"]), F6),
    }
    out = {}
    for k, v in p.items():
        if k.startswith("w"):
            out[k] = jnp.asarray(v, dtype=jnp.bfloat16)   # MXU-native weights (half the VMEM/DMA)
        else:
            out[k] = jnp.asarray(v, dtype=jnp.float32)    # f32 epilogue shifts
    return out


# ---------------------------------------------------------------------------
# Pure-JAX emulation of the packed bf16 kernel math (tight correctness check)
# ---------------------------------------------------------------------------
def kernel_emulation(x, p):
    B = x.shape[0]
    a = jnp.zeros((B, IN_PAD), jnp.float32).at[:, :INPUT_WINDOW].set(x.astype(jnp.float32))
    a = a.astype(jnp.bfloat16)
    for wn, tn in (("w1", "t1"), ("w2", "t2"), ("w3", "t3"), ("w4", "t4"), ("w5", "t5")):
        h = jnp.dot(a, p[wn], preferred_element_type=jnp.float32)
        a = jnp.maximum(h + p[tn], 0.0).astype(jnp.bfloat16)
    y = jnp.dot(a, p["w6"], preferred_element_type=jnp.float32) + p["b6"]
    return y[:, :OUT]


# ---------------------------------------------------------------------------
# Pure-JAX f32 reference (same eval-mode semantics, raw un-packed weights)
# ---------------------------------------------------------------------------
def ref_forward(x, raw):
    hp = lax.Precision.HIGHEST
    y = x[:, None, :]                                          # (B, 1, 101)
    y = lax.conv_general_dilated(y, raw["conv1_w"], (1,), "VALID",
                                 dimension_numbers=("NCH", "OIH", "NCH"),
                                 precision=hp)
    y = y + raw["conv1_b"][None, :, None]
    s, t = _bn_fold(raw, "bn1")
    y = jnp.maximum(y * s[None, :, None] + t[None, :, None], 0.0)
    y = lax.conv_general_dilated(y, raw["conv2_w"], (1,), "VALID",
                                 dimension_numbers=("NCH", "OIH", "NCH"),
                                 precision=hp)
    y = y + raw["conv2_b"][None, :, None]
    s, t = _bn_fold(raw, "bn2")
    y = jnp.maximum(y * s[None, :, None] + t[None, :, None], 0.0)
    y = y.reshape(y.shape[0], -1)                              # (B, 1488), C-major
    for w, b, bn in [("fc1_w", "fc1_b", "bn3"),
                     ("fc2_w", "fc2_b", "bn4"),
                     ("fc3_w", "fc3_b", "bn5")]:
        y = jnp.dot(y, raw[w].T, precision=hp) + raw[b][None, :]
        s, t = _bn_fold(raw, bn)
        y = jnp.maximum(y * s[None, :] + t[None, :], 0.0)
    y = jnp.dot(y, raw["fc4_w"].T, precision=hp) + raw["fc4_b"][None, :]
    return y


if __name__ == "__main__":
    key = jax.random.PRNGKey(0)
    pkey, xkey = jax.random.split(key)

    raw = init_raw_params(pkey)
    params = pack_kernel_params(raw)

    B = 4
    x = jax.random.normal(xkey, (B, INPUT_WINDOW), jnp.float32)

    out = net_forward(x, params)
    out = jax.block_until_ready(out)
    assert out.shape == (B, OUT), out.shape

    # Tight check: kernel vs a pure-JAX emulation of the exact packed bf16 math.
    emu = kernel_emulation(x, params)
    if not jnp.allclose(out, emu, rtol=2e-3, atol=2e-3):
        raise AssertionError(
            f"kernel/emulation mismatch, max abs diff = {jnp.max(jnp.abs(out - emu))}")

    # Sanity check vs the full-precision (f32) reference of the original module semantics;
    # loose tolerance accounts for bf16 matmul operands (f32 accumulation).
    ref = ref_forward(x, raw)
    if not jnp.allclose(out, ref, rtol=1e-1, atol=1e-1):
        raise AssertionError(
            f"kernel/f32-reference mismatch, max abs diff = {jnp.max(jnp.abs(out - ref))}")

    print("KERNEL_OK")
</pallas_src>

<mosaic_0001>
module attributes {stable_mosaic.version = 11 : i64} {
  func.func @_net_kernel(%arg0: i32, %arg1: memref<8x128xf32, #tpu.memory_space<vmem>>, %arg2: memref<128x640xbf16, #tpu.memory_space<vmem>>, %arg3: memref<1x640xf32, #tpu.memory_space<vmem>>, %arg4: memref<640x1536xbf16, #tpu.memory_space<vmem>>, %arg5: memref<1x1536xf32, #tpu.memory_space<vmem>>, %arg6: memref<1536x640xbf16, #tpu.memory_space<vmem>>, %arg7: memref<1x640xf32, #tpu.memory_space<vmem>>, %arg8: memref<640x128xbf16, #tpu.memory_space<vmem>>, %arg9: memref<1x128xf32, #tpu.memory_space<vmem>>, %arg10: memref<128x128xbf16, #tpu.memory_space<vmem>>, %arg11: memref<1x128xf32, #tpu.memory_space<vmem>>, %arg12: memref<128x128xbf16, #tpu.memory_space<vmem>>, %arg13: memref<1x128xf32, #tpu.memory_space<vmem>>, %arg14: memref<8x128xf32, #tpu.memory_space<vmem>>) attributes {dimension_semantics = [#tpu.dimension_semantics<parallel>], iteration_bounds = array<i64: 1>, scalar_prefetch = 0 : i64, scratch_operands = 0 : i64, tpu.core_type = #tpu.core_type<tc>, window_params = [{transform_indices = @transform_0, window_bounds = array<i64: 8, 128>}, {pipeline_mode = #tpu.pipeline_mode<synchronous>, transform_indices = @transform_1, window_bounds = array<i64: 128, 640>}, {pipeline_mode = #tpu.pipeline_mode<synchronous>, transform_indices = @transform_2, window_bounds = array<i64: 1, 640>}, {pipeline_mode = #tpu.pipeline_mode<synchronous>, transform_indices = @transform_3, window_bounds = array<i64: 640, 1536>}, {pipeline_mode = #tpu.pipeline_mode<synchronous>, transform_indices = @transform_4, window_bounds = array<i64: 1, 1536>}, {pipeline_mode = #tpu.pipeline_mode<synchronous>, transform_indices = @transform_5, window_bounds = array<i64: 1536, 640>}, {pipeline_mode = #tpu.pipeline_mode<synchronous>, transform_indices = @transform_6, window_bounds = array<i64: 1, 640>}, {pipeline_mode = #tpu.pipeline_mode<synchronous>, transform_indices = @transform_7, window_bounds = array<i64: 640, 128>}, {pipeline_mode = #tpu.pipeline_mode<synchronous>, transform_indices = @transform_8, window_bounds = array<i64: 1, 128>}, {pipeline_mode = #tpu.pipeline_mode<synchronous>, transform_indices = @transform_9, window_bounds = array<i64: 128, 128>}, {pipeline_mode = #tpu.pipeline_mode<synchronous>, transform_indices = @transform_10, window_bounds = array<i64: 1, 128>}, {pipeline_mode = #tpu.pipeline_mode<synchronous>, transform_indices = @transform_11, window_bounds = array<i64: 128, 128>}, {pipeline_mode = #tpu.pipeline_mode<synchronous>, transform_indices = @transform_12, window_bounds = array<i64: 1, 128>}, {transform_indices = @transform_13, window_bounds = array<i64: 8, 128>}]} {
    %c0 = arith.constant 0 : index
    %c0_0 = arith.constant 0 : index
    %0 = vector.load %arg1[%c0, %c0_0] : memref<8x128xf32, #tpu.memory_space<vmem>>, vector<8x128xf32>
    %1 = arith.truncf %0 : vector<8x128xf32> to vector<8x128xbf16>
    %c0_1 = arith.constant 0 : index
    %c0_2 = arith.constant 0 : index
    %2 = vector.load %arg2[%c0_1, %c0_2] : memref<128x640xbf16, #tpu.memory_space<vmem>>, vector<128x640xbf16>
    %cst = arith.constant dense<0.000000e+00> : vector<8x640xf32>
    %3 = tpu.matmul %1, %2, %cst {dimension_numbers = #tpu.dot_dimension_numbers<[1], [0], [0], [1], [0, 0, 1, 1], [], []>} : vector<8x128xbf16>, vector<128x640xbf16>, vector<8x640xf32> -> vector<8x640xf32>
    %c0_3 = arith.constant 0 : index
    %c0_4 = arith.constant 0 : index
    %4 = vector.load %arg3[%c0_3, %c0_4] : memref<1x640xf32, #tpu.memory_space<vmem>>, vector<1x640xf32>
    %5 = vector.broadcast %4 : vector<1x640xf32> to vector<8x640xf32>
    %6 = arith.addf %3, %5 : vector<8x640xf32>
    %cst_5 = arith.constant 0.000000e+00 : f32
    %7 = vector.broadcast %cst_5 : f32 to vector<8x640xf32>
    %8 = arith.maximumf %6, %7 : vector<8x640xf32>
    %9 = arith.truncf %8 : vector<8x640xf32> to vector<8x640xbf16>
    %c0_6 = arith.constant 0 : index
    %c0_7 = arith.constant 0 : index
    %10 = vector.load %arg4[%c0_6, %c0_7] : memref<640x1536xbf16, #tpu.memory_space<vmem>>, vector<640x1536xbf16>
    %cst_8 = arith.constant dense<0.000000e+00> : vector<8x1536xf32>
    %11 = tpu.matmul %9, %10, %cst_8 {dimension_numbers = #tpu.dot_dimension_numbers<[1], [0], [0], [1], [0, 0, 1, 1], [], []>} : vector<8x640xbf16>, vector<640x1536xbf16>, vector<8x1536xf32> -> vector<8x1536xf32>
    %c0_9 = arith.constant 0 : index
    %c0_10 = arith.constant 0 : index
    %12 = vector.load %arg5[%c0_9, %c0_10] : memref<1x1536xf32, #tpu.memory_space<vmem>>, vector<1x1536xf32>
    %13 = vector.broadcast %12 : vector<1x1536xf32> to vector<8x1536xf32>
    %14 = arith.addf %11, %13 : vector<8x1536xf32>
    %cst_11 = arith.constant 0.000000e+00 : f32
    %15 = vector.broadcast %cst_11 : f32 to vector<8x1536xf32>
    %16 = arith.maximumf %14, %15 : vector<8x1536xf32>
    %17 = arith.truncf %16 : vector<8x1536xf32> to vector<8x1536xbf16>
    %c0_12 = arith.constant 0 : index
    %c0_13 = arith.constant 0 : index
    %18 = vector.load %arg6[%c0_12, %c0_13] : memref<1536x640xbf16, #tpu.memory_space<vmem>>, vector<1536x640xbf16>
    %cst_14 = arith.constant dense<0.000000e+00> : vector<8x640xf32>
    %19 = tpu.matmul %17, %18, %cst_14 {dimension_numbers = #tpu.dot_dimension_numbers<[1], [0], [0], [1], [0, 0, 1, 1], [], []>} : vector<8x1536xbf16>, vector<1536x640xbf16>, vector<8x640xf32> -> vector<8x640xf32>
    %c0_15 = arith.constant 0 : index
    %c0_16 = arith.constant 0 : index
    %20 = vector.load %arg7[%c0_15, %c0_16] : memref<1x640xf32, #tpu.memory_space<vmem>>, vector<1x640xf32>
    %21 = vector.broadcast %20 : vector<1x640xf32> to vector<8x640xf32>
    %22 = arith.addf %19, %21 : vector<8x640xf32>
    %cst_17 = arith.constant 0.000000e+00 : f32
    %23 = vector.broadcast %cst_17 : f32 to vector<8x640xf32>
    %24 = arith.maximumf %22, %23 : vector<8x640xf32>
    %25 = arith.truncf %24 : vector<8x640xf32> to vector<8x640xbf16>
    %c0_18 = arith.constant 0 : index
    %c0_19 = arith.constant 0 : index
    %26 = vector.load %arg8[%c0_18, %c0_19] : memref<640x128xbf16, #tpu.memory_space<vmem>>, vector<640x128xbf16>
    %cst_20 = arith.constant dense<0.000000e+00> : vector<8x128xf32>
    %27 = tpu.matmul %25, %26, %cst_20 {dimension_numbers = #tpu.dot_dimension_numbers<[1], [0], [0], [1], [0, 0, 1, 1], [], []>} : vector<8x640xbf16>, vector<640x128xbf16>, vector<8x128xf32> -> vector<8x128xf32>
    %c0_21 = arith.constant 0 : index
    %c0_22 = arith.constant 0 : index
    %28 = vector.load %arg9[%c0_21, %c0_22] : memref<1x128xf32, #tpu.memory_space<vmem>>, vector<1x128xf32>
    %29 = vector.broadcast %28 : vector<1x128xf32> to vector<8x128xf32>
    %30 = arith.addf %27, %29 : vector<8x128xf32>
    %cst_23 = arith.constant 0.000000e+00 : f32
    %31 = vector.broadcast %cst_23 : f32 to vector<8x128xf32>
    %32 = arith.maximumf %30, %31 : vector<8x128xf32>
    %33 = arith.truncf %32 : vector<8x128xf32> to vector<8x128xbf16>
    %c0_24 = arith.constant 0 : index
    %c0_25 = arith.constant 0 : index
    %34 = vector.load %arg10[%c0_24, %c0_25] : memref<128x128xbf16, #tpu.memory_space<vmem>>, vector<128x128xbf16>
    %cst_26 = arith.constant dense<0.000000e+00> : vector<8x128xf32>
    %35 = tpu.matmul %33, %34, %cst_26 {dimension_numbers = #tpu.dot_dimension_numbers<[1], [0], [0], [1], [0, 0, 1, 1], [], []>} : vector<8x128xbf16>, vector<128x128xbf16>, vector<8x128xf32> -> vector<8x128xf32>
    %c0_27 = arith.constant 0 : index
    %c0_28 = arith.constant 0 : index
    %36 = vector.load %arg11[%c0_27, %c0_28] : memref<1x128xf32, #tpu.memory_space<vmem>>, vector<1x128xf32>
    %37 = vector.broadcast %36 : vector<1x128xf32> to vector<8x128xf32>
    %38 = arith.addf %35, %37 : vector<8x128xf32>
    %cst_29 = arith.constant 0.000000e+00 : f32
    %39 = vector.broadcast %cst_29 : f32 to vector<8x128xf32>
    %40 = arith.maximumf %38, %39 : vector<8x128xf32>
    %41 = arith.truncf %40 : vector<8x128xf32> to vector<8x128xbf16>
    %c0_30 = arith.constant 0 : index
    %c0_31 = arith.constant 0 : index
    %42 = vector.load %arg12[%c0_30, %c0_31] : memref<128x128xbf16, #tpu.memory_space<vmem>>, vector<128x128xbf16>
    %cst_32 = arith.constant dense<0.000000e+00> : vector<8x128xf32>
    %43 = tpu.matmul %41, %42, %cst_32 {dimension_numbers = #tpu.dot_dimension_numbers<[1], [0], [0], [1], [0, 0, 1, 1], [], []>} : vector<8x128xbf16>, vector<128x128xbf16>, vector<8x128xf32> -> vector<8x128xf32>
    %c0_33 = arith.constant 0 : index
    %c0_34 = arith.constant 0 : index
    %44 = vector.load %arg13[%c0_33, %c0_34] : memref<1x128xf32, #tpu.memory_space<vmem>>, vector<1x128xf32>
    %45 = vector.broadcast %44 : vector<1x128xf32> to vector<8x128xf32>
    %46 = arith.addf %43, %45 : vector<8x128xf32>
    %c0_35 = arith.constant 0 : index
    %c0_36 = arith.constant 0 : index
    %47 = vector.load %arg14[%c0_35, %c0_36] : memref<8x128xf32, #tpu.memory_space<vmem>>, vector<8x128xf32>
    tpu.vector_store %arg14[%c0_35, %c0_36], %46 {strides = array<i32>} : memref<8x128xf32, #tpu.memory_space<vmem>>, vector<8x128xf32>,
    return
  }
  func.func @transform_0(%arg0: i32) -> (i32, i32) {
    %c0_i32 = arith.constant 0 : i32
    %c0_i32_0 = arith.constant 0 : i32
    return %arg0, %c0_i32 : i32, i32
  }
  func.func @transform_1(%arg0: i32) -> (i32, i32) {
    %c0_i32 = arith.constant 0 : i32
    %c0_i32_0 = arith.constant 0 : i32
    %c0_i32_1 = arith.constant 0 : i32
    return %c0_i32, %c0_i32_0 : i32, i32
  }
  func.func @transform_2(%arg0: i32) -> (i32, i32) {
    %c0_i32 = arith.constant 0 : i32
    %c0_i32_0 = arith.constant 0 : i32
    %c0_i32_1 = arith.constant 0 : i32
    return %c0_i32, %c0_i32_0 : i32, i32
  }
  func.func @transform_3(%arg0: i32) -> (i32, i32) {
    %c0_i32 = arith.constant 0 : i32
    %c0_i32_0 = arith.constant 0 : i32
    %c0_i32_1 = arith.constant 0 : i32
    return %c0_i32, %c0_i32_0 : i32, i32
  }
  func.func @transform_4(%arg0: i32) -> (i32, i32) {
    %c0_i32 = arith.constant 0 : i32
    %c0_i32_0 = arith.constant 0 : i32
    %c0_i32_1 = arith.constant 0 : i32
    return %c0_i32, %c0_i32_0 : i32, i32
  }
  func.func @transform_5(%arg0: i32) -> (i32, i32) {
    %c0_i32 = arith.constant 0 : i32
    %c0_i32_0 = arith.constant 0 : i32
    %c0_i32_1 = arith.constant 0 : i32
    return %c0_i32, %c0_i32_0 : i32, i32
  }
  func.func @transform_6(%arg0: i32) -> (i32, i32) {
    %c0_i32 = arith.constant 0 : i32
    %c0_i32_0 = arith.constant 0 : i32
    %c0_i32_1 = arith.constant 0 : i32
    return %c0_i32, %c0_i32_0 : i32, i32
  }
  func.func @transform_7(%arg0: i32) -> (i32, i32) {
    %c0_i32 = arith.constant 0 : i32
    %c0_i32_0 = arith.constant 0 : i32
    %c0_i32_1 = arith.constant 0 : i32
    return %c0_i32, %c0_i32_0 : i32, i32
  }
  func.func @transform_8(%arg0: i32) -> (i32, i32) {
    %c0_i32 = arith.constant 0 : i32
    %c0_i32_0 = arith.constant 0 : i32
    %c0_i32_1 = arith.constant 0 : i32
    return %c0_i32, %c0_i32_0 : i32, i32
  }
  func.func @transform_9(%arg0: i32) -> (i32, i32) {
    %c0_i32 = arith.constant 0 : i32
    %c0_i32_0 = arith.constant 0 : i32
    %c0_i32_1 = arith.constant 0 : i32
    return %c0_i32, %c0_i32_0 : i32, i32
  }
  func.func @transform_10(%arg0: i32) -> (i32, i32) {
    %c0_i32 = arith.constant 0 : i32
    %c0_i32_0 = arith.constant 0 : i32
    %c0_i32_1 = arith.constant 0 : i32
    return %c0_i32, %c0_i32_0 : i32, i32
  }
  func.func @transform_11(%arg0: i32) -> (i32, i32) {
    %c0_i32 = arith.constant 0 : i32
    %c0_i32_0 = arith.constant 0 : i32
    %c0_i32_1 = arith.constant 0 : i32
    return %c0_i32, %c0_i32_0 : i32, i32
  }
  func.func @transform_12(%arg0: i32) -> (i32, i32) {
    %c0_i32 = arith.constant 0 : i32
    %c0_i32_0 = arith.constant 0 : i32
    %c0_i32_1 = arith.constant 0 : i32
    return %c0_i32, %c0_i32_0 : i32, i32
  }
  func.func @transform_13(%arg0: i32) -> (i32, i32) {
    %c0_i32 = arith.constant 0 : i32
    %c0_i32_0 = arith.constant 0 : i32
    return %arg0, %c0_i32 : i32, i32
  }
}

</mosaic_0001>

<bundles_post_ra>
// kernel: net_forward.1
= control target key start
LH: loop header
LB: loop body
LE: loop exit
PB: predicated region body
PF: predicated region fallthrough
CT: control target
= control target key end

     0   :  { %18 = vsyncpa [#allocation3], 0  ;;  %s14794_s0 = inlined_call_operand.vmem [shape: f32[8,128], index: 0, kind: input, shape index: {}]   ;;  %s14795_s1 = inlined_call_operand.hbm [shape: bf16[128,640], index: 1, kind: input, shape index: {}]   ;;  %s14796_s2 = inlined_call_operand.hbm [shape: f32[1,640], index: 2, kind: input, shape index: {}]   ;;  %s14797_s3 = inlined_call_operand.hbm [shape: bf16[640,1536], index: 3, kind: input, shape index: {}]   ;;  %s14798_s4 = inlined_call_operand.hbm [shape: f32[1,1536], index: 4, kind: input, shape index: {}]   ;;  %s14799_s5 = inlined_call_operand.hbm [shape: bf16[1536,640], index: 5, kind: input, shape index: {}]   ;;  %s14800_s6 = inlined_call_operand.hbm [shape: f32[1,640], index: 6, kind: input, shape index: {}]   ;;  %s14801_s7 = inlined_call_operand.hbm [shape: bf16[640,128], index: 7, kind: input, shape index: {}]   ;;  %s14802_s8 = inlined_call_operand.hbm [shape: f32[1,128], index: 8, kind: input, shape index: {}]   ;;  %s14803_s9 = inlined_call_operand.hbm [shape: bf16[128,128], index: 9, kind: input, shape index: {}]   ;;  %s14804_s10 = inlined_call_operand.hbm [shape: f32[1,128], index: 10, kind: input, shape index: {}]   ;;  %s14805_s11 = inlined_call_operand.hbm [shape: bf16[128,128], index: 11, kind: input, shape index: {}]   ;;  %s14806_s12 = inlined_call_operand.hbm [shape: f32[1,128], index: 12, kind: input, shape index: {}]   ;;  %s14807_s13 = inlined_call_operand.vmem [shape: f32[8,128], index: 13, kind: output, shape index: {}]  }
   0x1   :  { %19 = vsyncpa [#allocation5], 0 }
   0x2   :  { %20 = vsyncpa [#allocation8], 0 }
   0x3   :  { %21 = vsyncpa [#allocation11], 0 }
   0x4   :  { %22 = vsyncpa [#allocation14], 0 }
   0x5   :  { %23 = vsyncpa [#allocation17], 0  ;;  %s45_s27 = sshll.u32 %s14796_s2, 4  ;;  %s46_s27 = int_to_ptr.hbm [resolvable:$true] %s45_s27 }
   0x6   :  { %24 = vsyncpa [#allocation20], 0  ;;  %s14324_s28 = smov [#allocation4]   ;;  %s69_s15 = sshll.u32 %s14798_s4, 4  ;;  %s70_s15 = int_to_ptr.hbm [resolvable:$true] %s69_s15 }
   0x7   :  { %s47_s29 = sshll.u32 %s14324_s28, 4  ;;  %s14325_s16 = smov [#allocation7]   ;;  %s48_s29 = int_to_ptr.vmem [resolvable:$true] %s47_s29 }
   0x8   :  { %50 = dma.hbm_to_vmem [thread:$0]  %s46_s27, 80, %s48_s29, [#allocation5]  }
   0x9   :  { %s71_s17 = sshll.u32 %s14325_s16, 4  ;;  %s93_s20 = sshll.u32 %s14800_s6, 4  ;;  %s72_s17 = int_to_ptr.vmem [resolvable:$true] %s71_s17  ;;  %s94_s20 = int_to_ptr.hbm [resolvable:$true] %s93_s20 }
   0xa   :  { %74 = dma.hbm_to_vmem [thread:$0]  %s70_s15, 192, %s72_s17, [#allocation8]  }
   0xb   :  { %s117_s22 = sshll.u32 %s14802_s8, 4  ;;  %s14326_s23 = smov [#allocation10]   ;;  %s118_s22 = int_to_ptr.hbm [resolvable:$true] %s117_s22 }
   0xc   :  { %s95_s24 = sshll.u32 %s14326_s23, 4  ;;  %s14327_s4 = smov [#allocation13]   ;;  %s96_s24 = int_to_ptr.vmem [resolvable:$true] %s95_s24 }
   0xd   :  { %98 = dma.hbm_to_vmem [thread:$0]  %s94_s20, 80, %s96_s24, [#allocation11]  }
   0xe   :  { %s119_s25 = sshll.u32 %s14327_s4, 4  ;;  %s141_s28 = sshll.u32 %s14804_s10, 4  ;;  %s120_s25 = int_to_ptr.vmem [resolvable:$true] %s119_s25  ;;  %s142_s28 = int_to_ptr.hbm [resolvable:$true] %s141_s28 }
   0xf   :  { %122 = dma.hbm_to_vmem [thread:$0]  %s118_s22, 16, %s120_s25, [#allocation14]  }
  0x10   :  { %s31_s30 = sshll.u32 %s14795_s1, 4  ;;  %s14328_s14 = smov [#allocation16]   ;;  %s32_s30 = int_to_ptr.hbm [resolvable:$true] %s31_s30 }
  0x11   :  { %s143_s8 = sshll.u32 %s14328_s14, 4  ;;  %s14329_s15 = smov [#allocation2]   ;;  %s144_s8 = int_to_ptr.vmem [resolvable:$true] %s143_s8 }
  0x12   :  { %146 = dma.hbm_to_vmem [thread:$0]  %s142_s28, 16, %s144_s8, [#allocation17]  }
  0x13   :  { %s33_s16 = sshll.u32 %s14329_s15, 4  ;;  %s14330_s17 = smov 320   ;;  %s34_s16 = int_to_ptr.vmem [resolvable:$true] %s33_s16 }
  0x14   :  { %s14331_s18 = smov 20   ;;  %s55_s20 = sshll.u32 %s14797_s3, 4  ;;  %s56_s20 = int_to_ptr.hbm [resolvable:$true] %s55_s20 }
  0x15   :  { %39 = dma.hbm_to_vmem [thread:$0]  %s32_s30, 5120, %s34_s16, [#allocation3], %s14330_s17, %s14330_s17, %s14331_s18  }
  0x16   :  { %s14332_s2 = smov [#allocation6]   ;;  %s79_s23 = sshll.u32 %s14799_s5, 4  ;;  %s80_s23 = int_to_ptr.hbm [resolvable:$true] %s79_s23 }
  0x17   :  { %s57_s21 = sshll.u32 %s14332_s2, 4  ;;  %s14333_s24 = smov 768   ;;  %s58_s21 = int_to_ptr.vmem [resolvable:$true] %s57_s21 }
  0x18   :  { %s14334_s4 = smov 48   ;;  %s14335_s25 = smov [#allocation9]  }
  0x19   :  { %63 = dma.hbm_to_vmem [thread:$0]  %s56_s20, 61440, %s58_s21, [#allocation5], %s14333_s24, %s14333_s24, %s14334_s4  }
  0x1a   :  { %s81_s26 = sshll.u32 %s14335_s25, 4  ;;  %s103_s6 = sshll.u32 %s14801_s7, 4  ;;  %s82_s26 = int_to_ptr.vmem [resolvable:$true] %s81_s26  ;;  %s104_s6 = int_to_ptr.hbm [resolvable:$true] %s103_s6 }
  0x1b   :  { %87 = dma.hbm_to_vmem [thread:$0]  %s80_s23, 61440, %s82_s26, [#allocation8], %s14330_s17, %s14330_s17, %s14331_s18  }
  0x1c   :  { %s14336_s3 = smov [#allocation12]   ;;  %s127_s5 = sshll.u32 %s14803_s9, 4  ;;  %s128_s5 = int_to_ptr.hbm [resolvable:$true] %s127_s5 }
  0x1d   :  { %s105_s29 = sshll.u32 %s14336_s3, 4  ;;  %s14337_s8 = smov 64   ;;  %s106_s29 = int_to_ptr.vmem [resolvable:$true] %s105_s29 }
  0x1e   :  { %s14338_s15 = smov 4   ;;  %s14339_s16 = smov [#allocation15]  }
  0x1f   :  { %111 = dma.hbm_to_vmem [thread:$0]  %s104_s6, 5120, %s106_s29, [#allocation11], %s14337_s8, %s14337_s8, %s14338_s15  }
  0x20   :  { %s129_s19 = sshll.u32 %s14339_s16, 4  ;;  %s151_s7 = sshll.u32 %s14805_s11, 4  ;;  %s130_s19 = int_to_ptr.vmem [resolvable:$true] %s129_s19  ;;  %s152_s7 = int_to_ptr.hbm [resolvable:$true] %s151_s7 }
  0x21   :  { %135 = dma.hbm_to_vmem [thread:$0]  %s128_s5, 1024, %s130_s19, [#allocation14], %s14337_s8, %s14337_s8, %s14338_s15  }
  0x22   :  { %s165_s2 = sshll.u32 %s14806_s12, 4  ;;  %s14340_s21 = smov [#allocation18]   ;;  %s166_s2 = int_to_ptr.hbm [resolvable:$true] %s165_s2 }
  0x23   :  { %s153_s1 = sshll.u32 %s14340_s21, 4  ;;  %s14341_s9 = smov [#allocation19]   ;;  %s154_s1 = int_to_ptr.vmem [resolvable:$true] %s153_s1 }
  0x24   :  { %159 = dma.hbm_to_vmem [thread:$0]  %s152_s7, 1024, %s154_s1, [#allocation17], %s14337_s8, %s14337_s8, %s14338_s15  }
  0x25   :  { %s167_s22 = sshll.u32 %s14341_s9, 4  ;;  %s168_s22 = int_to_ptr.vmem [resolvable:$true] %s167_s22 }
  0x26   :  { %170 = dma.hbm_to_vmem [thread:$0]  %s166_s2, 16, %s168_s22, [#allocation20]  }
  0x27   :  { %14310 = dma.done.wait [#allocation3], 5120  }
  0x28   :  { %14311 = vsyncadd [#allocation3], 4294962176 }
  0x29   :  { %14312 = dma.done.wait [#allocation5], 61520  }
  0x2a   :  { %14313 = vsyncadd [#allocation5], 4294905776 }
  0x2b   :  { %14314 = dma.done.wait [#allocation8], 61632  }
  0x2c   :  { %14315 = vsyncadd [#allocation8], 4294905664 }
  0x2d   :  { %14316 = dma.done.wait [#allocation11], 5200  }
  0x2e   :  { %14317 = vsyncadd [#allocation11], 4294962096 }
  0x2f   :  { %14318 = dma.done.wait [#allocation14], 1040  }
  0x30   :  { %14319 = vsyncadd [#allocation14], 4294966256 }
  0x31   :  { %14320 = dma.done.wait [#allocation17], 1040  }
  0x32   :  { %14321 = vsyncadd [#allocation17], 4294966256 }
  0x33   :  { %14322 = dma.done.wait [#allocation20], 16  }
  0x34   :  { %14323 = vsyncadd [#allocation20], 4294967280  ;;  %v8859_v0 = vld [vmem:[#allocation2 + $0x118] sm:$0xf]  ;;  %v12978_v1 = vld [vmem:[#allocation2 + $0x128] sm:$0xf0] }
  0x35   :  { %v12976_v2 = vld [vmem:[#allocation2 + $0x11c] sm:$0xf]  ;;  %v8860_v3 = vor.u32 %v12978_v1, %v8859_v0  ;;  %v8861_v4 = vld [vmem:[#allocation2 + $0x12c] sm:$0xf0]  ;;  %v8867_v5 = vld [vmem:[#allocation2 + $0x120] sm:$0xf] }
  0x36   :  { %v12979_v6 = vld [vmem:[#allocation2 + $0x130] sm:$0xf0]  ;;  %v8864_v7 = vor.u32 %v12976_v2, %v8861_v4  ;;  %v12977_v9 = vld [vmem:[#allocation2 + $0x124] sm:$0xf]  ;;  %v8869_v10 = vld [vmem:[#allocation2 + $0x134] sm:$0xf0] }
  0x37   :  { %v8868_v8 = vor.u32 %v12979_v6, %v8867_v5  ;;  %v8839_v11 = vld [vmem:[#allocation2 + $0xf0] sm:$0xf]  ;;  %489 = vmatpush.bf16.msra.mxu0 %v8860_v3  ;;  %v8872_v12 = vor.u32 %v12977_v9, %v8869_v10  ;;  %v12973_v13 = vld [vmem:[#allocation2 + $0x100] sm:$0xf0]  ;;  %v12971_v14 = vld [vmem:[#allocation2 + $0xf4] sm:$0xf] }
  0x38   :  { %v8841_v15 = vld [vmem:[#allocation2 + $0x104] sm:$0xf0]  ;;  %502 = vmatpush.bf16.msra.mxu1 %v8864_v7  ;;  %v8840_v16 = vor.u32 %v12973_v13, %v8839_v11  ;;  %v8847_v18 = vld [vmem:[#allocation2 + $0xf8] sm:$0xf]  ;;  %v12974_v19 = vld [vmem:[#allocation2 + $0x108] sm:$0xf0] }
  0x39   :  { %515 = vmatpush.bf16.msra.mxu2 %v8868_v8  ;;  %v8844_v17 = vor.u32 %v12971_v14, %v8841_v15  ;;  %v12972_v20 = vld [vmem:[#allocation2 + $0xfc] sm:$0xf]  ;;  %528 = vmatpush.bf16.msra.mxu3 %v8872_v12  ;;  %v8848_v21 = vor.u32 %v12974_v19, %v8847_v18  ;;  %v8849_v22 = vld [vmem:[#allocation2 + $0x10c] sm:$0xf0]  ;;  %v8819_v23 = vld [vmem:[#allocation2 + $0xc8] sm:$0xf] }
  0x3a   :  { %v12968_v24 = vld [vmem:[#allocation2 + $0xd8] sm:$0xf0]  ;;  %v8852_v25 = vor.u32 %v12972_v20, %v8849_v22  ;;  %v12966_v26 = vld [vmem:[#allocation2 + $0xcc] sm:$0xf]  ;;  %v8821_v27 = vld [vmem:[#allocation2 + $0xdc] sm:$0xf0] }
  0x3b   :  { %v8827_v28 = vld [vmem:[#allocation2 + $0xd0] sm:$0xf]  ;;  %490 = vmatpush.bf16.msra.mxu0 %v8840_v16  ;;  %v8820_v29 = vor.u32 %v12968_v24, %v8819_v23  ;;  %v12969_v30 = vld [vmem:[#allocation2 + $0xe0] sm:$0xf0]  ;;  %v12967_v31 = vld [vmem:[#allocation2 + $0xd4] sm:$0xf]  ;;  %v8824_v33 = vor.u32 %v12966_v26, %v8821_v27 }
  0x3c   :  { %v8829_v32 = vld [vmem:[#allocation2 + $0xe4] sm:$0xf0]  ;;  %503 = vmatpush.bf16.msra.mxu1 %v8844_v17  ;;  %v8828_v34 = vor.u32 %v12969_v30, %v8827_v28  ;;  %v8799_v35 = vld [vmem:[#allocation2 + $0xa0] sm:$0xf]  ;;  %v12963_v36 = vld [vmem:[#allocation2 + $0xb0] sm:$0xf0] }
  0x3d   :  { %516 = vmatpush.bf16.msra.mxu2 %v8848_v21  ;;  %v12961_v37 = vld [vmem:[#allocation2 + $0xa4] sm:$0xf]  ;;  %529 = vmatpush.bf16.msra.mxu3 %v8852_v25  ;;  %v8832_v38 = vor.u32 %v12967_v31, %v8829_v32  ;;  %v8801_v39 = vld [vmem:[#allocation2 + $0xb4] sm:$0xf0]  ;;  %v8807_v40 = vld [vmem:[#allocation2 + $0xa8] sm:$0xf]  ;;  %v8800_v44 = vor.u32 %v12963_v36, %v8799_v35 }
  0x3e   :  { %v12964_v41 = vld [vmem:[#allocation2 + $0xb8] sm:$0xf0]  ;;  %v12962_v42 = vld [vmem:[#allocation2 + $0xac] sm:$0xf]  ;;  %v8809_v43 = vld [vmem:[#allocation2 + $0xbc] sm:$0xf0]  ;;  %v8804_v45 = vor.u32 %v12961_v37, %v8801_v39 }
  0x3f   :  { %491 = vmatpush.bf16.msra.mxu0 %v8820_v29  ;;  %v8808_v46 = vor.u32 %v12964_v41, %v8807_v40  ;;  %v8779_v47 = vld [vmem:[#allocation2 + $0x78] sm:$0xf]  ;;  %v12958_v48 = vld [vmem:[#allocation2 + $0x88] sm:$0xf0]  ;;  %v12956_v49 = vld [vmem:[#allocation2 + $0x7c] sm:$0xf]  ;;  %v8812_v50 = vor.u32 %v12962_v42, %v8809_v43 }
  0x40   :  { %504 = vmatpush.bf16.msra.mxu1 %v8824_v33  ;;  %v8781_v51 = vld [vmem:[#allocation2 + $0x8c] sm:$0xf0]  ;;  %v8787_v52 = vld [vmem:[#allocation2 + $0x80] sm:$0xf]  ;;  %v12959_v53 = vld [vmem:[#allocation2 + $0x90] sm:$0xf0]  ;;  %v8780_v56 = vor.u32 %v12958_v48, %v8779_v47 }
  0x41   :  { %517 = vmatpush.bf16.msra.mxu2 %v8828_v34  ;;  %530 = vmatpush.bf16.msra.mxu3 %v8832_v38  ;;  %v12957_v54 = vld [vmem:[#allocation2 + $0x84] sm:$0xf]  ;;  %v8789_v55 = vld [vmem:[#allocation2 + $0x94] sm:$0xf0]  ;;  %v8784_v57 = vor.u32 %v12956_v49, %v8781_v51  ;;  %v8788_v58 = vor.u32 %v12959_v53, %v8787_v52  ;;  %v8759_v59 = vld [vmem:[#allocation2 + $0x50] sm:$0xf] }
  0x42   :  { %v12953_v60 = vld [vmem:[#allocation2 + $0x60] sm:$0xf0]  ;;  %v12951_v61 = vld [vmem:[#allocation2 + $0x54] sm:$0xf]  ;;  %v8792_v62 = vor.u32 %v12957_v54, %v8789_v55  ;;  %v8761_v63 = vld [vmem:[#allocation2 + $0x64] sm:$0xf0] }
  0x43   :  { %492 = vmatpush.bf16.msra.mxu0 %v8800_v44  ;;  %v8767_v0 = vld [vmem:[#allocation2 + $0x58] sm:$0xf]  ;;  %v12954_v1 = vld [vmem:[#allocation2 + $0x68] sm:$0xf0]  ;;  %v12952_v2 = vld [vmem:[#allocation2 + $0x5c] sm:$0xf]  ;;  %v8760_v4 = vor.u32 %v12953_v60, %v8759_v59  ;;  %v8764_v5 = vor.u32 %v12951_v61, %v8761_v63 }
  0x44   :  { %505 = vmatpush.bf16.msra.mxu1 %v8804_v45  ;;  %v8769_v3 = vld [vmem:[#allocation2 + $0x6c] sm:$0xf0]  ;;  %v8768_v6 = vor.u32 %v12954_v1, %v8767_v0  ;;  %v8739_v7 = vld [vmem:[#allocation2 + $0x28] sm:$0xf]  ;;  %v12948_v8 = vld [vmem:[#allocation2 + $0x38] sm:$0xf0] }
  0x45   :  { %518 = vmatpush.bf16.msra.mxu2 %v8808_v46  ;;  %531 = vmatpush.bf16.msra.mxu3 %v8812_v50  ;;  %v12946_v9 = vld [vmem:[#allocation2 + $0x2c] sm:$0xf]  ;;  %v8772_v10 = vor.u32 %v12952_v2, %v8769_v3  ;;  %v8741_v11 = vld [vmem:[#allocation2 + $0x3c] sm:$0xf0]  ;;  %v8747_v12 = vld [vmem:[#allocation2 + $0x30] sm:$0xf]  ;;  %v8740_v16 = vor.u32 %v12948_v8, %v8739_v7 }
  0x46   :  { %v12949_v13 = vld [vmem:[#allocation2 + $0x40] sm:$0xf0]  ;;  %v12947_v14 = vld [vmem:[#allocation2 + $0x34] sm:$0xf]  ;;  %v8749_v15 = vld [vmem:[#allocation2 + $0x44] sm:$0xf0]  ;;  %v8744_v19 = vor.u32 %v12946_v9, %v8741_v11 }
  0x47   :  { %493 = vmatpush.bf16.msra.mxu0 %v8780_v56  ;;  %v8719_v17 = vld [vmem:[#allocation2] sm:$0xf]  ;;  %v12943_v18 = vld [vmem:[#allocation2 + $0x10] sm:$0xf0]  ;;  %v8748_v20 = vor.u32 %v12949_v13, %v8747_v12  ;;  %v12941_v21 = vld [vmem:[#allocation2 + $0x4] sm:$0xf]  ;;  %v8752_v24 = vor.u32 %v12947_v14, %v8749_v15 }
  0x48   :  { %506 = vmatpush.bf16.msra.mxu1 %v8784_v57  ;;  %v8721_v22 = vld [vmem:[#allocation2 + $0x14] sm:$0xf0]  ;;  %v8727_v23 = vld [vmem:[#allocation2 + $0x8] sm:$0xf]  ;;  %v12944_v25 = vld [vmem:[#allocation2 + $0x18] sm:$0xf0]  ;;  %v8720_v31 = vor.u32 %v12943_v18, %v8719_v17 }
  0x49   :  { %519 = vmatpush.bf16.msra.mxu2 %v8788_v58  ;;  %532 = vmatpush.bf16.msra.mxu3 %v8792_v62  ;;  %v12942_v26 = vld [vmem:[#allocation2 + $0xc] sm:$0xf]  ;;  %v8729_v27 = vld [vmem:[#allocation2 + $0x1c] sm:$0xf0]  ;;  %v8875_v28 = vld [vmem:[#allocation2 + $0x128] sm:$0xf]  ;;  %v8724_v32 = vor.u32 %v12941_v21, %v8721_v22  ;;  %v8728_v33 = vor.u32 %v12944_v25, %v8727_v23 }
  0x4a   :  { %v12980_v29 = vld [vmem:[#allocation2 + $0x138] sm:$0xf0]  ;;  %v219_v30 = vld [vmem:[%s14794_s0] sm:$0xff]  ;;  %v8732_v34 = vor.u32 %v12942_v26, %v8729_v27  ;;  %v12975_v38 = vld [vmem:[#allocation2 + $0x110] sm:$0xf0] }
  0x4b   :  { %494 = vmatpush.bf16.msra.mxu0 %v8760_v4  ;;  %v8876_v35 = vor.u32 %v12980_v29, %v8875_v28  ;;  %v14451_v36 = vpack.c.bf16 %v219_v30, %v219_v30  ;;  %v8855_v37 = vld [vmem:[#allocation2 + $0x100] sm:$0xf]  ;;  %v8835_v39 = vld [vmem:[#allocation2 + $0xd8] sm:$0xf]  ;;  %v12970_v40 = vld [vmem:[#allocation2 + $0xe8] sm:$0xf0] }
  0x4c   :  { %507 = vmatpush.bf16.msra.mxu1 %v8764_v5  ;;  %v9215_v41 = vld [vmem:[#allocation6 + $0x2a0] sm:$0xf]  ;;  %v13071_v42 = vld [vmem:[#allocation6 + $0x2cc] sm:$0xf0]  ;;  %v8856_v44 = vor.u32 %v12975_v38, %v8855_v37  ;;  %v8815_v54 = vld [vmem:[#allocation2 + $0xb0] sm:$0xf]  ;;  %v8836_v58 = vor.u32 %v12970_v40, %v8835_v39 }
  0x4d   :  { %520 = vmatpush.bf16.msra.mxu2 %v8768_v6  ;;  %533 = vmatpush.bf16.msra.mxu3 %v8772_v10  ;;  %v9599_v43 = vld [vmem:[#allocation6 + $0x5a0] sm:$0xf]  ;;  %v9216_v45 = vor.u32 %v13071_v42, %v9215_v41  ;;  %v13167_v46 = vld [vmem:[#allocation6 + $0x5cc] sm:$0xf0]  ;;  %v12960_v11 = vld [vmem:[#allocation2 + $0x98] sm:$0xf0] }
  0x4e   :  { %v9167_v47 = vld [vmem:[#allocation6 + $0x240] sm:$0xf]  ;;  %v13059_v48 = vld [vmem:[#allocation6 + $0x26c] sm:$0xf0]  ;;  %v9600_v49 = vor.u32 %v13167_v46, %v9599_v43  ;;  %v8735_v42 = vld [vmem:[#allocation2 + $0x10] sm:$0xf] }
  0x4f   :  { %495 = vmatpush.bf16.msra.mxu0 %v8740_v16  ;;  %v9551_v50 = vld [vmem:[#allocation6 + $0x540] sm:$0xf]  ;;  %v13155_v51 = vld [vmem:[#allocation6 + $0x56c] sm:$0xf0]  ;;  %v9168_v55 = vor.u32 %v13059_v48, %v9167_v47 }
  0x50   :  { %508 = vmatpush.bf16.msra.mxu1 %v8744_v19  ;;  %v9983_v52 = vld [vmem:[#allocation6 + $0x8a0] sm:$0xf]  ;;  %v13263_v53 = vld [vmem:[#allocation6 + $0x8cc] sm:$0xf0]  ;;  %v9552_v59 = vor.u32 %v13155_v51, %v9551_v50  ;;  %v8775_v19 = vld [vmem:[#allocation2 + $0x60] sm:$0xf] }
  0x51   :  { %521 = vmatpush.bf16.msra.mxu2 %v8748_v20  ;;  %534 = vmatpush.bf16.msra.mxu3 %v8752_v24  ;;  %v9984_v56 = vor.u32 %v13263_v53, %v9983_v52  ;;  %v9119_v57 = vld [vmem:[#allocation6 + $0x1e0] sm:$0xf]  ;;  %v13047_v60 = vld [vmem:[#allocation6 + $0x20c] sm:$0xf0] }
  0x52   :  { %v9935_v61 = vld [vmem:[#allocation6 + $0x840] sm:$0xf]  ;;  %v13251_v62 = vld [vmem:[#allocation6 + $0x86c] sm:$0xf0]  ;;  %v9120_v3 = vor.u32 %v13047_v60, %v9119_v57 }
  0x53   :  { %496 = vmatpush.bf16.msra.mxu0 %v8720_v31  ;;  %v12965_v63 = vld [vmem:[#allocation2 + $0xc0] sm:$0xf0]  ;;  %v13143_v1 = vld [vmem:[#allocation6 + $0x50c] sm:$0xf0]  ;;  %v9936_v2 = vor.u32 %v13251_v62, %v9935_v61  ;;  %v8795_v7 = vld [vmem:[#allocation2 + $0x88] sm:$0xf] }
  0x54   :  { %509 = vmatpush.bf16.msra.mxu1 %v8724_v32  ;;  %v9503_v0 = vld [vmem:[#allocation6 + $0x4e0] sm:$0xf]  ;;  %v13239_v5 = vld [vmem:[#allocation6 + $0x80c] sm:$0xf0]  ;;  %v8816_v6 = vor.u32 %v12965_v63, %v8815_v54  ;;  %v8796_v18 = vor.u32 %v12960_v11, %v8795_v7 }
  0x55   :  { %522 = vmatpush.bf16.msra.mxu2 %v8728_v33  ;;  %535 = vmatpush.bf16.msra.mxu3 %v8732_v34  ;;  %v9887_v4 = vld [vmem:[#allocation6 + $0x7e0] sm:$0xf]  ;;  %v9504_v8 = vor.u32 %v13143_v1, %v9503_v0  ;;  %v13035_v10 = vld [vmem:[#allocation6 + $0x1ac] sm:$0xf0] }
  0x56   :  { %497 = vmatmul.bf16.vlgmr.msra.gmra.mxu0 %v14451_v36  ;;  %v9071_v9 = vld [vmem:[#allocation6 + $0x180] sm:$0xf]  ;;  %v13131_v13 = vld [vmem:[#allocation6 + $0x4ac] sm:$0xf0]  ;;  %v9888_v14 = vor.u32 %v13239_v5, %v9887_v4  ;;  %v13065_v5 = vld [vmem:[#allocation6 + $0x2a4] sm:$0xf] }
  0x57   :  { %541 = vmatpush.bf16.msrb.mxu0 %v8876_v35  ;;  %510 = vmatmul.bf16.vlgmr.msra.gmra.mxu1 %v14451_v36  ;;  %v9455_v12 = vld [vmem:[#allocation6 + $0x480] sm:$0xf]  ;;  %v13227_v16 = vld [vmem:[#allocation6 + $0x7ac] sm:$0xf0]  ;;  %v9072_v17 = vor.u32 %v13035_v10, %v9071_v9  ;;  %v12950_v35 = vld [vmem:[#allocation2 + $0x48] sm:$0xf0] }
  0x58   :  { %523 = vmatmul.bf16.vlgmr.msra.gmra.mxu2 %v14451_v36  ;;  %536 = vmatmul.bf16.vlgmr.msra.gmra.mxu3 %v14451_v36  ;;  %v9839_v15 = vld [vmem:[#allocation6 + $0x780] sm:$0xf]  ;;  %v9456_v20 = vor.u32 %v13131_v13, %v9455_v12  ;;  %v13023_v22 = vld [vmem:[#allocation6 + $0x14c] sm:$0xf0]  ;;  %v13161_v12 = vld [vmem:[#allocation6 + $0x5a4] sm:$0xf] }
  0x59   :  { %3472 = vmatpush.bf16.msrb.mxu1 %v9216_v45  ;;  %3485 = vmatpush.bf16.msrb.mxu2 %v9600_v49  ;;  %v9023_v21 = vld [vmem:[#allocation6 + $0x120] sm:$0xf]  ;;  %v12955_v23 = vld [vmem:[#allocation2 + $0x70] sm:$0xf0]  ;;  %v9840_v26 = vor.u32 %v13227_v16, %v9839_v15  ;;  %v8755_v31 = vld [vmem:[#allocation2 + $0x38] sm:$0xf] }
  0x5a   :  { %3498 = vmatpush.bf16.msrb.mxu3 %v9984_v56  ;;  %v9407_v24 = vld [vmem:[#allocation6 + $0x420] sm:$0xf]  ;;  %v13119_v25 = vld [vmem:[#allocation6 + $0x44c] sm:$0xf0]  ;;  %v9024_v29 = vor.u32 %v13023_v22, %v9023_v21  ;;  %v8776_v30 = vor.u32 %v12955_v23, %v8775_v19  ;;  %v9601_v13 = vld [vmem:[#allocation6 + $0x5d0] sm:$0xf0] }
  0x5b   :  { %542 = vmatpush.bf16.msrb.mxu0 %v8856_v44  ;;  %v9791_v27 = vld [vmem:[#allocation6 + $0x720] sm:$0xf]  ;;  %v13215_v28 = vld [vmem:[#allocation6 + $0x74c] sm:$0xf0]  ;;  %v9408_v32 = vor.u32 %v13119_v25, %v9407_v24  ;;  %v8756_v44 = vor.u32 %v12950_v35, %v8755_v31  ;;  %v9169_v21 = vld [vmem:[#allocation6 + $0x270] sm:$0xf0]  ;;  %v9604_v23 = vor.u32 %v13161_v12, %v9601_v13 }
  0x5c   :  { %v8975_v33 = vld [vmem:[#allocation6 + $0xc0] sm:$0xf]  ;;  %v13011_v34 = vld [vmem:[#allocation6 + $0xec] sm:$0xf0]  ;;  %v9792_v39 = vor.u32 %v13215_v28, %v9791_v27  ;;  %v13149_v25 = vld [vmem:[#allocation6 + $0x544] sm:$0xf] }
  0x5d   :  { %3473 = vmatpush.bf16.msrb.mxu1 %v9168_v55  ;;  %3486 = vmatpush.bf16.msrb.mxu2 %v9552_v59  ;;  %v9359_v37 = vld [vmem:[#allocation6 + $0x3c0] sm:$0xf]  ;;  %v13107_v38 = vld [vmem:[#allocation6 + $0x3ec] sm:$0xf0]  ;;  %v8976_v43 = vor.u32 %v13011_v34, %v8975_v33  ;;  %v13041_v33 = vld [vmem:[#allocation6 + $0x1e4] sm:$0xf] }
  0x5e   :  { %3499 = vmatpush.bf16.msrb.mxu3 %v9936_v2  ;;  %v9743_v40 = vld [vmem:[#allocation6 + $0x6c0] sm:$0xf]  ;;  %v13203_v41 = vld [vmem:[#allocation6 + $0x6ec] sm:$0xf0]  ;;  %v9360_v46 = vor.u32 %v13107_v38, %v9359_v37  ;;  %v9121_v34 = vld [vmem:[#allocation6 + $0x210] sm:$0xf0] }
  0x5f   :  { %543 = vmatpush.bf16.msrb.mxu0 %v8836_v58  ;;  %v12945_v45 = vld [vmem:[#allocation2 + $0x20] sm:$0xf0]  ;;  %v12999_v48 = vld [vmem:[#allocation6 + $0x8c] sm:$0xf0]  ;;  %v9744_v52 = vor.u32 %v13203_v41, %v9743_v40  ;;  %v13137_v37 = vld [vmem:[#allocation6 + $0x4e4] sm:$0xf]  ;;  %v9124_v41 = vor.u32 %v13041_v33, %v9121_v34 }
  0x60   :  { %v8927_v47 = vld [vmem:[#allocation6 + $0x60] sm:$0xf]  ;;  %v13095_v51 = vld [vmem:[#allocation6 + $0x38c] sm:$0xf0]  ;;  %v8736_v57 = vor.u32 %v12945_v45, %v8735_v42  ;;  %v9505_v38 = vld [vmem:[#allocation6 + $0x510] sm:$0xf0] }
  0x61   :  { %3474 = vmatpush.bf16.msrb.mxu1 %v9120_v3  ;;  %3487 = vmatpush.bf16.msrb.mxu2 %v9504_v8  ;;  %v10367_v49 = vld [vmem:[#allocation6 + $0xba0] sm:$0xf]  ;;  %v13359_v53 = vld [vmem:[#allocation6 + $0xbcc] sm:$0xf0]  ;;  %v8928_v56 = vor.u32 %v12999_v48, %v8927_v47  ;;  %v13029_v45 = vld [vmem:[#allocation6 + $0x184] sm:$0xf]  ;;  %v9508_v47 = vor.u32 %v13137_v37, %v9505_v38 }
  0x62   :  { %3500 = vmatpush.bf16.msrb.mxu3 %v9888_v14  ;;  %v9311_v50 = vld [vmem:[#allocation6 + $0x360] sm:$0xf]  ;;  %v13191_v55 = vld [vmem:[#allocation6 + $0x68c] sm:$0xf0]  ;;  %v10368_v63 = vor.u32 %v13359_v53, %v10367_v49  ;;  %v13125_v49 = vld [vmem:[#allocation6 + $0x484] sm:$0xf] }
  0x63   :  { %544 = vmatpush.bf16.msrb.mxu0 %v8816_v6  ;;  %v9695_v54 = vld [vmem:[#allocation6 + $0x660] sm:$0xf]  ;;  %v9312_v59 = vor.u32 %v13095_v51, %v9311_v50  ;;  %v12987_v61 = vld [vmem:[#allocation6 + $0x2c] sm:$0xf0]  ;;  %v9217_v6 = vld [vmem:[#allocation6 + $0x2d0] sm:$0xf0] }
  0x64   :  { %v10319_v58 = vld [vmem:[#allocation6 + $0xb40] sm:$0xf]  ;;  %v13083_v0 = vld [vmem:[#allocation6 + $0x32c] sm:$0xf0]  ;;  %v9696_v3 = vor.u32 %v13191_v55, %v9695_v54  ;;  %v9220_v16 = vor.u32 %v13065_v5, %v9217_v6  ;;  %v9457_v50 = vld [vmem:[#allocation6 + $0x4b0] sm:$0xf0] }
  0x65   :  { %3475 = vmatpush.bf16.msrb.mxu1 %v9072_v17  ;;  %3488 = vmatpush.bf16.msrb.mxu2 %v9456_v20  ;;  %v8879_v60 = vld [vmem:[#allocation6] sm:$0xf]  ;;  %v13455_v2 = vld [vmem:[#allocation6 + $0xecc] sm:$0xf0]  ;;  %v13053_v20 = vld [vmem:[#allocation6 + $0x244] sm:$0xf] }
  0x66   :  { %3501 = vmatpush.bf16.msrb.mxu3 %v9840_v26  ;;  %v9263_v62 = vld [vmem:[#allocation6 + $0x300] sm:$0xf]  ;;  %v13347_v4 = vld [vmem:[#allocation6 + $0xb6c] sm:$0xf0]  ;;  %v8880_v7 = vor.u32 %v12987_v61, %v8879_v60  ;;  %v9553_v26 = vld [vmem:[#allocation6 + $0x570] sm:$0xf0] }
  0x67   :  { %545 = vmatpush.bf16.msrb.mxu0 %v8796_v18  ;;  %v10751_v1 = vld [vmem:[#allocation6 + $0xea0] sm:$0xf]  ;;  %v13179_v9 = vld [vmem:[#allocation6 + $0x62c] sm:$0xf0]  ;;  %v9264_v10 = vor.u32 %v13083_v0, %v9263_v62  ;;  %v10320_v14 = vor.u32 %v13347_v4, %v10319_v58  ;;  %v9025_v58 = vld [vmem:[#allocation6 + $0x150] sm:$0xf0] }
  0x68   :  { %v9647_v8 = vld [vmem:[#allocation6 + $0x600] sm:$0xf]  ;;  %v10752_v11 = vor.u32 %v13455_v2, %v10751_v1  ;;  %v13443_v18 = vld [vmem:[#allocation6 + $0xe6c] sm:$0xf0]  ;;  %v8977_v4 = vld [vmem:[#allocation6 + $0xf0] sm:$0xf0] }
  0x69   :  { %3476 = vmatpush.bf16.msrb.mxu1 %v9024_v29  ;;  %3489 = vmatpush.bf16.msrb.mxu2 %v9408_v32  ;;  %v10271_v15 = vld [vmem:[#allocation6 + $0xae0] sm:$0xf]  ;;  %v13335_v19 = vld [vmem:[#allocation6 + $0xb0c] sm:$0xf0]  ;;  %v9648_v22 = vor.u32 %v13179_v9, %v9647_v8  ;;  %v9172_v29 = vor.u32 %v13053_v20, %v9169_v21  ;;  %v13221_v20 = vld [vmem:[#allocation6 + $0x784] sm:$0xf] }
  0x6a   :  { %3502 = vmatpush.bf16.msrb.mxu3 %v9792_v39  ;;  %v10703_v17 = vld [vmem:[#allocation6 + $0xe40] sm:$0xf]  ;;  %v10272_v27 = vor.u32 %v13335_v19, %v10271_v15  ;;  %v13431_v31 = vld [vmem:[#allocation6 + $0xe0c] sm:$0xf0]  ;;  %v9937_v15 = vld [vmem:[#allocation6 + $0x870] sm:$0xf0] }
  0x6b   :  { %546 = vmatpush.bf16.msrb.mxu0 %v8776_v30  ;;  %v10704_v24 = vor.u32 %v13443_v18, %v10703_v17  ;;  %v10223_v28 = vld [vmem:[#allocation6 + $0xa80] sm:$0xf]  ;;  %v13323_v32 = vld [vmem:[#allocation6 + $0xaac] sm:$0xf0]  ;;  %v13233_v17 = vld [vmem:[#allocation6 + $0x7e4] sm:$0xf] }
  0x6c   :  { %v10655_v30 = vld [vmem:[#allocation6 + $0xde0] sm:$0xf]  ;;  %v10224_v39 = vor.u32 %v13323_v32, %v10223_v28  ;;  %v13407_v55 = vld [vmem:[#allocation6 + $0xd4c] sm:$0xf0]  ;;  %v9889_v18 = vld [vmem:[#allocation6 + $0x810] sm:$0xf0] }
  0x6d   :  { %3477 = vmatpush.bf16.msrb.mxu1 %v8976_v43  ;;  %3490 = vmatpush.bf16.msrb.mxu2 %v9360_v46  ;;  %v10656_v35 = vor.u32 %v13431_v31, %v10655_v30  ;;  %v10175_v40 = vld [vmem:[#allocation6 + $0xa20] sm:$0xf]  ;;  %v13419_v43 = vld [vmem:[#allocation6 + $0xdac] sm:$0xf0]  ;;  %v9073_v46 = vld [vmem:[#allocation6 + $0x1b0] sm:$0xf0]  ;;  %v9892_v19 = vor.u32 %v13233_v17, %v9889_v18 }
  0x6e   :  { %3503 = vmatpush.bf16.msrb.mxu3 %v9744_v52  ;;  %v10607_v42 = vld [vmem:[#allocation6 + $0xd80] sm:$0xf]  ;;  %v9076_v53 = vor.u32 %v13029_v45, %v9073_v46  ;;  %v13395_v1 = vld [vmem:[#allocation6 + $0xcec] sm:$0xf0]  ;;  %v9841_v21 = vld [vmem:[#allocation6 + $0x7b0] sm:$0xf0] }
  0x6f   :  { %547 = vmatpush.bf16.msrb.mxu0 %v8756_v44  ;;  %v13311_v44 = vld [vmem:[#allocation6 + $0xa4c] sm:$0xf0]  ;;  %v10608_v48 = vor.u32 %v13419_v43, %v10607_v42  ;;  %v10127_v52 = vld [vmem:[#allocation6 + $0x9c0] sm:$0xf]  ;;  %v12993_v32 = vld [vmem:[#allocation6 + $0x64] sm:$0xf] }
  0x70   :  { %v10176_v51 = vor.u32 %v13311_v44, %v10175_v40  ;;  %v10559_v54 = vld [vmem:[#allocation6 + $0xd20] sm:$0xf]  ;;  %v13287_v2 = vld [vmem:[#allocation6 + $0x98c] sm:$0xf0]  ;;  %v8929_v33 = vld [vmem:[#allocation6 + $0x90] sm:$0xf0] }
  0x71   :  { %3478 = vmatpush.bf16.msrb.mxu1 %v8928_v56  ;;  %3491 = vmatpush.bf16.msrb.mxu2 %v9312_v59  ;;  %v13299_v56 = vld [vmem:[#allocation6 + $0x9ec] sm:$0xf0]  ;;  %v9460_v59 = vor.u32 %v13125_v49, %v9457_v50  ;;  %v10560_v60 = vor.u32 %v13407_v55, %v10559_v54  ;;  %v10079_v62 = vld [vmem:[#allocation6 + $0x960] sm:$0xf]  ;;  %v8932_v34 = vor.u32 %v12993_v32, %v8929_v33  ;;  %v13197_v37 = vld [vmem:[#allocation6 + $0x6c4] sm:$0xf] }
  0x72   :  { %3504 = vmatpush.bf16.msrb.mxu3 %v9696_v3  ;;  %v10128_v61 = vor.u32 %v13299_v56, %v10127_v52  ;;  %v10511_v0 = vld [vmem:[#allocation6 + $0xcc0] sm:$0xf]  ;;  %v13005_v3 = vld [vmem:[#allocation6 + $0xc4] sm:$0xf]  ;;  %v10080_v6 = vor.u32 %v13287_v2, %v10079_v62  ;;  %v13275_v9 = vld [vmem:[#allocation6 + $0x92c] sm:$0xf0] }
  0x73   :  { %548 = vmatpush.bf16.msrb.mxu0 %v8736_v57  ;;  %v13017_v57 = vld [vmem:[#allocation6 + $0x124] sm:$0xf]  ;;  %v10512_v5 = vor.u32 %v13395_v1, %v10511_v0  ;;  %v10031_v8 = vld [vmem:[#allocation6 + $0x900] sm:$0xf]  ;;  %v13383_v30 = vld [vmem:[#allocation6 + $0xc8c] sm:$0xf0] }
  0x74   :  { %v10032_v12 = vor.u32 %v13275_v9, %v10031_v8  ;;  %v13371_v42 = vld [vmem:[#allocation6 + $0xc2c] sm:$0xf0]  ;;  %v12981_v43 = vld [vmem:[#allocation6 + $0x4] sm:$0xf]  ;;  %v8881_v45 = vld [vmem:[#allocation6 + $0x30] sm:$0xf0] }
  0x75   :  { %3479 = vmatpush.bf16.msrb.mxu1 %v8880_v7  ;;  %3492 = vmatpush.bf16.msrb.mxu2 %v9264_v10  ;;  %v8980_v7 = vor.u32 %v13005_v3, %v8977_v4  ;;  %v13257_v10 = vld [vmem:[#allocation6 + $0x8a4] sm:$0xf]  ;;  %v8884_v46 = vor.u32 %v12981_v43, %v8881_v45  ;;  %v9265_v54 = vld [vmem:[#allocation6 + $0x330] sm:$0xf0]  ;;  %v13156_v45 = vld [vmem:[#allocation6 + $0x574] sm:$0xf0] }
  0x76   :  { %549 = vmatmul.bf16.vlgmr.msrb.gmra.mxu0 %v14451_v36  ;;  %3505 = vmatpush.bf16.msrb.mxu3 %v9648_v22  ;;  %v9556_v36 = vor.u32 %v13149_v25, %v9553_v26  ;;  %v9844_v22 = vor.u32 %v13221_v20, %v9841_v21  ;;  %v13209_v25 = vld [vmem:[#allocation6 + $0x724] sm:$0xf]  ;;  %v10369_v2 = vld [vmem:[#allocation6 + $0xbd0] sm:$0xf0] }
  0x77   :  { %3511 = vmatpush.bf16.msra.mxu0 %v10368_v63  ;;  %v9028_v63 = vor.u32 %v13017_v57, %v9025_v58  ;;  %v13185_v50 = vld [vmem:[#allocation6 + $0x664] sm:$0xf]  ;;  %v9649_v57 = vld [vmem:[#allocation6 + $0x630] sm:$0xf0] }
  0x78   :  { %v13173_v56 = vld [vmem:[#allocation6 + $0x604] sm:$0xf]  ;;  %v10705_v17 = vld [vmem:[#allocation6 + $0xe70] sm:$0xf0] }
  0x79   :  { %3524 = vmatpush.bf16.msra.mxu1 %v10752_v11  ;;  %3537 = vmatpush.bf16.msra.mxu2 %v9220_v16  ;;  %v9985_v11 = vld [vmem:[#allocation6 + $0x8d0] sm:$0xf0]  ;;  %v9652_v58 = vor.u32 %v13173_v56, %v9649_v57  ;;  %v13353_v1 = vld [vmem:[#allocation6 + $0xba4] sm:$0xf]  ;;  %v13048_v56 = vld [vmem:[#allocation6 + $0x214] sm:$0xf0] }
  0x7a   :  { %3550 = vmatpush.bf16.msra.mxu3 %v9604_v23  ;;  %v9988_v13 = vor.u32 %v13257_v10, %v9985_v11  ;;  %v13113_v23 = vld [vmem:[#allocation6 + $0x424] sm:$0xf]  ;;  %v10372_v9 = vor.u32 %v13353_v1, %v10369_v2 }
  0x7b   :  { %3512 = vmatpush.bf16.msra.mxu0 %v10320_v14  ;;  %v13245_v14 = vld [vmem:[#allocation6 + $0x844] sm:$0xf] }
  0x7c   :  { %v9940_v16 = vor.u32 %v13245_v14, %v9937_v15  ;;  %v13449_v4 = vld [vmem:[#allocation6 + $0xea4] sm:$0xf]  ;;  %v10321_v14 = vld [vmem:[#allocation6 + $0xb70] sm:$0xf0] }
  0x7d   :  { %3525 = vmatpush.bf16.msra.mxu1 %v10704_v24  ;;  %3538 = vmatpush.bf16.msra.mxu2 %v9172_v29  ;;  %v9409_v24 = vld [vmem:[#allocation6 + $0x450] sm:$0xf0]  ;;  %v10463_v29 = vld [vmem:[#allocation6 + $0xc60] sm:$0xf]  ;;  %v13425_v33 = vld [vmem:[#allocation6 + $0xde4] sm:$0xf] }
  0x7e   :  { %3551 = vmatpush.bf16.msra.mxu3 %v9556_v36  ;;  %v9412_v26 = vor.u32 %v13113_v23, %v9409_v24  ;;  %v10464_v31 = vor.u32 %v13383_v30, %v10463_v29  ;;  %v13101_v36 = vld [vmem:[#allocation6 + $0x3c4] sm:$0xf]  ;;  %v9223_v23 = vld [vmem:[#allocation6 + $0x2a8] sm:$0xf]  ;;  %v13072_v24 = vld [vmem:[#allocation6 + $0x2d4] sm:$0xf0] }
  0x7f   :  { %3513 = vmatpush.bf16.msra.mxu0 %v10272_v27  ;;  %v9793_v27 = vld [vmem:[#allocation6 + $0x750] sm:$0xf0]  ;;  %v13168_v29 = vld [vmem:[#allocation6 + $0x5d4] sm:$0xf0]  ;;  %v13329_v30 = vld [vmem:[#allocation6 + $0xae4] sm:$0xf] }
  0x80   :  { %v9796_v28 = vor.u32 %v13209_v25, %v9793_v27  ;;  %v9607_v25 = vld [vmem:[#allocation6 + $0x5a8] sm:$0xf] }
  0x81   :  { %3526 = vmatpush.bf16.msra.mxu1 %v10656_v35  ;;  %3539 = vmatpush.bf16.msra.mxu2 %v9124_v41  ;;  %v9361_v35 = vld [vmem:[#allocation6 + $0x3f0] sm:$0xf0]  ;;  %v10415_v41 = vld [vmem:[#allocation6 + $0xc00] sm:$0xf] }
  0x82   :  { %3552 = vmatpush.bf16.msra.mxu3 %v9508_v47  ;;  %v9364_v38 = vor.u32 %v13101_v36, %v9361_v35  ;;  %v10416_v44 = vor.u32 %v13371_v42, %v10415_v41  ;;  %v13089_v47 = vld [vmem:[#allocation6 + $0x364] sm:$0xf]  ;;  %v9224_v35 = vor.u32 %v13072_v24, %v9223_v23  ;;  %v13060_v41 = vld [vmem:[#allocation6 + $0x274] sm:$0xf0]  ;;  %v9559_v42 = vld [vmem:[#allocation6 + $0x548] sm:$0xf] }
  0x83   :  { %3514 = vmatpush.bf16.msra.mxu0 %v10224_v39  ;;  %v9745_v39 = vld [vmem:[#allocation6 + $0x6f0] sm:$0xf0]  ;;  %v13281_v23 = vld [vmem:[#allocation6 + $0x964] sm:$0xf] }
  0x84   :  { %v9748_v40 = vor.u32 %v13197_v37, %v9745_v39  ;;  %v10081_v24 = vld [vmem:[#allocation6 + $0x990] sm:$0xf0] }
  0x85   :  { %3527 = vmatpush.bf16.msra.mxu1 %v10608_v48  ;;  %3540 = vmatpush.bf16.msra.mxu2 %v9076_v53  ;;  %v9313_v48 = vld [vmem:[#allocation6 + $0x390] sm:$0xf0]  ;;  %v13077_v53 = vld [vmem:[#allocation6 + $0x304] sm:$0xf] }
  0x86   :  { %3553 = vmatpush.bf16.msra.mxu3 %v9460_v59  ;;  %v9316_v49 = vor.u32 %v13089_v47, %v9313_v48  ;;  %v9268_v55 = vor.u32 %v13077_v53, %v9265_v54  ;;  %v14458_v59 = vld [vmem:[#allocation4] sm:$0x1f]  ;;  %v10225_v47 = vld [vmem:[#allocation6 + $0xab0] sm:$0xf0]  ;;  %v13413_v48 = vld [vmem:[#allocation6 + $0xd84] sm:$0xf]  ;;  %v9560_v53 = vor.u32 %v13156_v45, %v9559_v42 }
  0x87   :  { %3515 = vmatpush.bf16.msra.mxu0 %v10176_v51  ;;  %v9697_v51 = vld [vmem:[#allocation6 + $0x690] sm:$0xf0]  ;;  %v273_v8 = vperm.slane %v14458_v59, 2  ;;  %v274_v11 = vperm.slane %v14458_v59, 3  ;;  %v10375_v45 = vld [vmem:[#allocation6 + $0xba8] sm:$0xf] }
  0x88   :  { %v9700_v52 = vor.u32 %v13185_v50, %v9697_v51 }
  0x89   :  { %3528 = vmatpush.bf16.msra.mxu1 %v10560_v60  ;;  %3541 = vmatpush.bf16.msra.mxu2 %v9028_v63  ;;  %v271_v60 = vperm.slane %v14458_v59, 0 }
  0x8a   :  { %3554 = vmatpush.bf16.msra.mxu3 %v9412_v26 }
  0x8b   :  { %3516 = vmatpush.bf16.msra.mxu0 %v10128_v61  ;;  %v272_v61 = vperm.slane %v14458_v59, 1 }
  0x8d   :  { %3529 = vmatpush.bf16.msra.mxu1 %v10512_v5  ;;  %3542 = vmatpush.bf16.msra.mxu2 %v8980_v7  ;;  %v10753_v5 = vld [vmem:[#allocation6 + $0xed0] sm:$0xf0] }
  0x8e   :  { %3555 = vmatpush.bf16.msra.mxu3 %v9364_v38  ;;  %v9608_v38 = vor.u32 %v13168_v29, %v9607_v25  ;;  %v13377_v25 = vld [vmem:[#allocation6 + $0xc64] sm:$0xf] }
  0x8f   :  { %3517 = vmatpush.bf16.msra.mxu0 %v10080_v6 }
  0x91   :  { %3530 = vmatpush.bf16.msra.mxu1 %v10464_v31  ;;  %3543 = vmatpush.bf16.msra.mxu2 %v8932_v34  ;;  %v10273_v31 = vld [vmem:[#allocation6 + $0xb10] sm:$0xf0] }
  0x92   :  { %3556 = vmatpush.bf16.msra.mxu3 %v9316_v49  ;;  %v10657_v34 = vld [vmem:[#allocation6 + $0xe10] sm:$0xf0]  ;;  %v10276_v39 = vor.u32 %v13329_v30, %v10273_v31  ;;  %v8983_v30 = vld [vmem:[#allocation6 + $0xc8] sm:$0xf]  ;;  %v13012_v31 = vld [vmem:[#allocation6 + $0xf4] sm:$0xf0] }
  0x93   :  { %3518 = vmatpush.bf16.msra.mxu0 %v10032_v12  ;;  %v10756_v12 = vor.u32 %v13449_v4, %v10753_v5  ;;  %v10609_v49 = vld [vmem:[#allocation6 + $0xdb0] sm:$0xf0]  ;;  %v13036_v4 = vld [vmem:[#allocation6 + $0x1b4] sm:$0xf0] }
  0x94   :  { %v10612_v57 = vor.u32 %v13413_v48, %v10609_v49  ;;  %v13264_v48 = vld [vmem:[#allocation6 + $0x8d4] sm:$0xf0]  ;;  %v8935_v49 = vld [vmem:[#allocation6 + $0x68] sm:$0xf] }
  0x95   :  { %3531 = vmatpush.bf16.msra.mxu1 %v10416_v44  ;;  %3544 = vmatpush.bf16.msra.mxu2 %v8884_v46  ;;  %v10660_v44 = vor.u32 %v13425_v33, %v10657_v34  ;;  %v13317_v46 = vld [vmem:[#allocation6 + $0xa84] sm:$0xf]  ;;  %v9367_v34 = vld [vmem:[#allocation6 + $0x3c8] sm:$0xf] }
  0x96   :  { %3557 = vmatpush.bf16.msra.mxu3 %v9268_v55  ;;  %v10228_v54 = vor.u32 %v13317_v46, %v10225_v47  ;;  %v9127_v55 = vld [vmem:[#allocation6 + $0x1e8] sm:$0xf]  ;;  %v13360_v46 = vld [vmem:[#allocation6 + $0xbd4] sm:$0xf0] }
  0x97   :  { %3563 = vmatpush.bf16.msrb.mxu0 %v9988_v13  ;;  %v13341_v13 = vld [vmem:[#allocation6 + $0xb44] sm:$0xf]  ;;  %v9128_v1 = vor.u32 %v13048_v56, %v9127_v55  ;;  %v13096_v55 = vld [vmem:[#allocation6 + $0x394] sm:$0xf0]  ;;  %v10376_v56 = vor.u32 %v13360_v46, %v10375_v45  ;;  %v9799_v45 = vld [vmem:[#allocation6 + $0x728] sm:$0xf] }
  0x98   :  { %v13216_v46 = vld [vmem:[#allocation6 + $0x754] sm:$0xf0] }
  0x9b   :  { %3564 = vmatpush.bf16.msrb.mxu0 %v9940_v16  ;;  %v13437_v16 = vld [vmem:[#allocation6 + $0xe44] sm:$0xf] }
  0x9f   :  { %3565 = vmatpush.bf16.msrb.mxu0 %v9892_v19 }
  0xa3   :  { %3566 = vmatpush.bf16.msrb.mxu0 %v9844_v22  ;;  %v10324_v22 = vor.u32 %v13341_v13, %v10321_v14  ;;  %v10513_v13 = vld [vmem:[#allocation6 + $0xcf0] sm:$0xf0] }
  0xa7   :  { %3567 = vmatpush.bf16.msrb.mxu0 %v9796_v28  ;;  %v10708_v28 = vor.u32 %v13437_v16, %v10705_v17  ;;  %v9031_v17 = vld [vmem:[#allocation6 + $0x128] sm:$0xf] }
  0xab   :  { %3568 = vmatpush.bf16.msrb.mxu0 %v9748_v40  ;;  %v9175_v40 = vld [vmem:[#allocation6 + $0x248] sm:$0xf] }
  0xac   :  { %v9176_v51 = vor.u32 %v13060_v41, %v9175_v40  ;;  %v13365_v40 = vld [vmem:[#allocation6 + $0xc04] sm:$0xf]  ;;  %v10417_v41 = vld [vmem:[#allocation6 + $0xc30] sm:$0xf0] }
  0xaf   :  { %3569 = vmatpush.bf16.msrb.mxu0 %v9700_v52 }
  0xb3   :  { %3570 = vmatpush.bf16.msrb.mxu0 %v9652_v58  ;;  %v9511_v58 = vld [vmem:[#allocation6 + $0x4e8] sm:$0xf] }
  0xd3   :  { %v498_v62 = vpop.f32.mrf.mxu0 }
  0xd4   :  { %v499_v63 = vadd.f32 %v498_v62, %v271_v60  ;;  %v511_v0 = vpop.f32.mrf.mxu1  ;;  %v13144_v60 = vld [vmem:[#allocation6 + $0x514] sm:$0xf0]  ;;  %v10177_v62 = vld [vmem:[#allocation6 + $0xa50] sm:$0xf0] }
  0xd5   :  { %v512_v3 = vadd.f32 %v511_v0, %v272_v61  ;;  %v13305_v61 = vld [vmem:[#allocation6 + $0xa24] sm:$0xf]  ;;  %v10561_v0 = vld [vmem:[#allocation6 + $0xd50] sm:$0xf0]  ;;  %v9512_v2 = vor.u32 %v13144_v60, %v9511_v58 }
  0xd6   :  { %v554_v6 = vmax.f32 %v499_v63, 0.0  ;;  %v13401_v63 = vld [vmem:[#allocation6 + $0xd24] sm:$0xf]  ;;  %v10180_v5 = vor.u32 %v13305_v61, %v10177_v62  ;;  %v13252_v62 = vld [vmem:[#allocation6 + $0x874] sm:$0xf0] }
  0xd7   :  { %v555_v7 = vmax.f32 %v512_v3, 0.0  ;;  %v9079_v3 = vld [vmem:[#allocation6 + $0x188] sm:$0xf] }
  0xd8   :  { %v14463_v10 = vpack.c.bf16 %v554_v6, %v554_v6  ;;  %v10564_v6 = vor.u32 %v13401_v63, %v10561_v0  ;;  %v9080_v14 = vor.u32 %v13036_v4, %v9079_v3  ;;  %v10327_v63 = vld [vmem:[#allocation6 + $0xb48] sm:$0xf]  ;;  %v13348_v0 = vld [vmem:[#allocation6 + $0xb74] sm:$0xf0] }
  0xd9   :  { %v14466_v15 = vpack.c.bf16 %v555_v7, %v555_v7  ;;  %v9463_v7 = vld [vmem:[#allocation6 + $0x488] sm:$0xf]  ;;  %v12988_v3 = vld [vmem:[#allocation6 + $0x34] sm:$0xf0] }
  0xda   :  { %3480 = vmatmul.bf16.vlgmr.msrb.gmra.mxu1 %v14463_v10  ;;  %v9271_v4 = vld [vmem:[#allocation6 + $0x308] sm:$0xf] }
  0xdb   :  { %v524_v18 = vpop.f32.mrf.mxu2  ;;  %v537_v20 = vpop.f32.mrf.mxu3  ;;  %3493 = vmatmul.bf16.vlgmr.msrb.gmra.mxu2 %v14466_v15  ;;  %3576 = vmatpush.bf16.msrb.mxu1 %v10372_v9  ;;  %v13293_v9 = vld [vmem:[#allocation6 + $0x9c4] sm:$0xf] }
  0xdc   :  { %v525_v19 = vadd.f32 %v524_v18, %v273_v8  ;;  %v500_v21 = vpop.f32.mrf.mxu0  ;;  %v538_v26 = vadd.f32 %v537_v20, %v274_v11  ;;  %3589 = vmatpush.bf16.msrb.mxu2 %v10756_v12  ;;  %v513_v27 = vpop.f32.mrf.mxu1  ;;  %v13132_v8 = vld [vmem:[#allocation6 + $0x4b4] sm:$0xf0]  ;;  %v10129_v11 = vld [vmem:[#allocation6 + $0x9f0] sm:$0xf0]  ;;  %v13389_v12 = vld [vmem:[#allocation6 + $0xcc4] sm:$0xf] }
  0xdd   :  { %v9464_v16 = vor.u32 %v13132_v8, %v9463_v7  ;;  %v13024_v18 = vld [vmem:[#allocation6 + $0x154] sm:$0xf0]  ;;  %v10516_v20 = vor.u32 %v13389_v12, %v10513_v13  ;;  %v9415_v21 = vld [vmem:[#allocation6 + $0x428] sm:$0xf]  ;;  %v275_v27 = vperm.slane %v14458_v59, 4  ;;  %v8984_v59 = vor.u32 %v13012_v31, %v8983_v30 }
  0xde   :  { %v556_v32 = vmax.f32 %v525_v19, 0.0  ;;  %v557_v36 = vmax.f32 %v538_v26, 0.0  ;;  %v10132_v19 = vor.u32 %v13293_v9, %v10129_v11  ;;  %v10465_v26 = vld [vmem:[#allocation6 + $0xc90] sm:$0xf0]  ;;  %v13456_v7 = vld [vmem:[#allocation6 + $0xed4] sm:$0xf0]  ;;  %v10328_v9 = vor.u32 %v13348_v0, %v10327_v63 }
  0xdf   :  { %3577 = vmatpush.bf16.msrb.mxu1 %v10324_v22  ;;  %v13120_v22 = vld [vmem:[#allocation6 + $0x454] sm:$0xf0]  ;;  %v10468_v33 = vor.u32 %v13377_v25, %v10465_v26  ;;  %v13066_v11 = vld [vmem:[#allocation6 + $0x2ac] sm:$0xf]  ;;  %v9225_v12 = vld [vmem:[#allocation6 + $0x2d8] sm:$0xf0] }
  0xe0   :  { %v14470_v37 = vpack.c.bf16 %v556_v32, %v556_v32  ;;  %v14472_v43 = vpack.c.bf16 %v557_v36, %v557_v36  ;;  %3590 = vmatpush.bf16.msrb.mxu2 %v10708_v28  ;;  %v9032_v28 = vor.u32 %v13024_v18, %v9031_v17  ;;  %v9416_v29 = vor.u32 %v13120_v22, %v9415_v21  ;;  %v13108_v36 = vld [vmem:[#allocation6 + $0x3f4] sm:$0xf0]  ;;  %v13054_v26 = vld [vmem:[#allocation6 + $0x24c] sm:$0xf] }
  0xe1   :  { %v10084_v32 = vor.u32 %v13281_v23, %v10081_v24  ;;  %v9368_v47 = vor.u32 %v13108_v36, %v9367_v34  ;;  %v13336_v17 = vld [vmem:[#allocation6 + $0xb14] sm:$0xf0]  ;;  %v9228_v22 = vor.u32 %v13066_v11, %v9225_v12  ;;  %v10711_v23 = vld [vmem:[#allocation6 + $0xe48] sm:$0xf] }
  0xe2   :  { %3506 = vmatmul.bf16.vlgmr.msrb.gmra.mxu3 %v14470_v37  ;;  %3519 = vmatmul.bf16.vlgmr.msra.gmra.mxu0 %v14472_v43  ;;  %v13240_v21 = vld [vmem:[#allocation6 + $0x814] sm:$0xf0]  ;;  %v10663_v36 = vld [vmem:[#allocation6 + $0xde8] sm:$0xf] }
  0xe3   :  { %3602 = vmatpush.bf16.msrb.mxu3 %v9224_v35  ;;  %v526_v50 = vpop.f32.mrf.mxu2  ;;  %3615 = vmatpush.bf16.msra.mxu0 %v9608_v38  ;;  %v539_v52 = vpop.f32.mrf.mxu3  ;;  %v13269_v35 = vld [vmem:[#allocation6 + $0x904] sm:$0xf]  ;;  %v13444_v24 = vld [vmem:[#allocation6 + $0xe74] sm:$0xf0]  ;;  %v10519_v11 = vld [vmem:[#allocation6 + $0xcc8] sm:$0xf] }
  0xe4   :  { %3578 = vmatpush.bf16.msrb.mxu1 %v10276_v39  ;;  %3591 = vmatpush.bf16.msrb.mxu2 %v10660_v44  ;;  %v10033_v39 = vld [vmem:[#allocation6 + $0x930] sm:$0xf0]  ;;  %v9991_v44 = vld [vmem:[#allocation6 + $0x8a8] sm:$0xf]  ;;  %v13000_v50 = vld [vmem:[#allocation6 + $0x94] sm:$0xf0]  ;;  %v10712_v31 = vor.u32 %v13444_v24, %v10711_v23 }
  0xe5   :  { %v10036_v52 = vor.u32 %v13269_v35, %v10033_v39  ;;  %v9992_v60 = vor.u32 %v13264_v48, %v9991_v44  ;;  %v8936_v61 = vor.u32 %v13000_v50, %v8935_v49  ;;  %v13324_v30 = vld [vmem:[#allocation6 + $0xab4] sm:$0xf0]  ;;  %v13042_v39 = vld [vmem:[#allocation6 + $0x1ec] sm:$0xf]  ;;  %v10615_v48 = vld [vmem:[#allocation6 + $0xd88] sm:$0xf] }
  0xe6   :  { %v13432_v35 = vld [vmem:[#allocation6 + $0xe14] sm:$0xf0]  ;;  %v13162_v23 = vld [vmem:[#allocation6 + $0x5ac] sm:$0xf] }
  0xe7   :  { %3603 = vmatpush.bf16.msrb.mxu3 %v9176_v51  ;;  %3616 = vmatpush.bf16.msra.mxu0 %v9560_v53  ;;  %v10420_v53 = vor.u32 %v13365_v40, %v10417_v41  ;;  %v9129_v40 = vld [vmem:[#allocation6 + $0x218] sm:$0xf0]  ;;  %v10664_v44 = vor.u32 %v13432_v35, %v10663_v36  ;;  %v13420_v49 = vld [vmem:[#allocation6 + $0xdb4] sm:$0xf0]  ;;  %v13258_v24 = vld [vmem:[#allocation6 + $0x8ac] sm:$0xf] }
  0xe8   :  { %3579 = vmatpush.bf16.msrb.mxu1 %v10228_v54  ;;  %3592 = vmatpush.bf16.msrb.mxu2 %v10612_v57  ;;  %v9319_v54 = vld [vmem:[#allocation6 + $0x368] sm:$0xf]  ;;  %v13408_v63 = vld [vmem:[#allocation6 + $0xd54] sm:$0xf0]  ;;  %v13150_v36 = vld [vmem:[#allocation6 + $0x54c] sm:$0xf] }
  0xe9   :  { %v9943_v57 = vld [vmem:[#allocation6 + $0x848] sm:$0xf]  ;;  %v13396_v12 = vld [vmem:[#allocation6 + $0xcf4] sm:$0xf0] }
  0xea   :  { %v9944_v13 = vor.u32 %v13252_v62, %v9943_v57  ;;  %v9751_v57 = vld [vmem:[#allocation6 + $0x6c8] sm:$0xf] }
  0xeb   :  { %3604 = vmatpush.bf16.msrb.mxu3 %v9128_v1  ;;  %3617 = vmatpush.bf16.msra.mxu0 %v9512_v2  ;;  %v9320_v1 = vor.u32 %v13096_v55, %v9319_v54  ;;  %v8887_v2 = vld [vmem:[#allocation6 + $0x8] sm:$0xf]  ;;  %v13300_v55 = vld [vmem:[#allocation6 + $0x9f4] sm:$0xf0] }
  0xec   :  { %3545 = vmatmul.bf16.vlgmr.msra.gmra.mxu2 %v14463_v10  ;;  %3580 = vmatpush.bf16.msrb.mxu1 %v10180_v5  ;;  %v13084_v5 = vld [vmem:[#allocation6 + $0x334] sm:$0xf0]  ;;  %v10135_v54 = vld [vmem:[#allocation6 + $0x9c8] sm:$0xf] }
  0xed   :  { %3593 = vmatpush.bf16.msrb.mxu2 %v10564_v6  ;;  %v10759_v6 = vld [vmem:[#allocation6 + $0xea8] sm:$0xf]  ;;  %v9272_v18 = vor.u32 %v13084_v5, %v9271_v4  ;;  %v10136_v0 = vor.u32 %v13300_v55, %v10135_v54  ;;  %v13288_v5 = vld [vmem:[#allocation6 + $0x994] sm:$0xf0]  ;;  %v13234_v54 = vld [vmem:[#allocation6 + $0x7ec] sm:$0xf] }
  0xee   :  { %v10567_v62 = vld [vmem:[#allocation6 + $0xd28] sm:$0xf]  ;;  %v9897_v55 = vld [vmem:[#allocation6 + $0x818] sm:$0xf0] }
  0xef   :  { %3605 = vmatpush.bf16.msrb.mxu3 %v9080_v14  ;;  %3618 = vmatpush.bf16.msra.mxu0 %v9464_v16  ;;  %v8888_v14 = vor.u32 %v12988_v3, %v8887_v2  ;;  %v10279_v16 = vld [vmem:[#allocation6 + $0xae8] sm:$0xf]  ;;  %v9033_v2 = vld [vmem:[#allocation6 + $0x158] sm:$0xf0] }
  0xf0   :  { %3581 = vmatpush.bf16.msrb.mxu1 %v10132_v19  ;;  %v10760_v19 = vor.u32 %v13456_v7, %v10759_v6  ;;  %v10280_v25 = vor.u32 %v13336_v17, %v10279_v16  ;;  %v10087_v4 = vld [vmem:[#allocation6 + $0x968] sm:$0xf]  ;;  %v10568_v6 = vor.u32 %v13408_v63, %v10567_v62  ;;  %v8985_v16 = vld [vmem:[#allocation6 + $0xf8] sm:$0xf0]  ;;  %v13342_v63 = vld [vmem:[#allocation6 + $0xb4c] sm:$0xf] }
  0xf1   :  { %3594 = vmatpush.bf16.msrb.mxu2 %v10516_v20  ;;  %v9895_v20 = vld [vmem:[#allocation6 + $0x7e8] sm:$0xf] }
  0xf2   :  { %3558 = vmatmul.bf16.vlgmr.msra.gmra.mxu3 %v14466_v15  ;;  %3571 = vmatmul.bf16.vlgmr.msrb.gmra.mxu0 %v14470_v37  ;;  %v9703_v7 = vld [vmem:[#allocation6 + $0x668] sm:$0xf] }
  0xf3   :  { %v550_v38 = vpop.f32.mrf.mxu0  ;;  %3606 = vmatpush.bf16.msrb.mxu3 %v9032_v28  ;;  %3619 = vmatpush.bf16.msra.mxu0 %v9416_v29  ;;  %v9896_v28 = vor.u32 %v13240_v21, %v9895_v20  ;;  %v10231_v29 = vld [vmem:[#allocation6 + $0xa88] sm:$0xf]  ;;  %v13276_v21 = vld [vmem:[#allocation6 + $0x934] sm:$0xf0] }
  0xf4   :  { %v551_v42 = vadd.f32 %v550_v38, %v275_v27  ;;  %3582 = vmatpush.bf16.msrb.mxu1 %v10084_v32  ;;  %v9177_v27 = vld [vmem:[#allocation6 + $0x278] sm:$0xf0]  ;;  %v9847_v32 = vld [vmem:[#allocation6 + $0x788] sm:$0xf]  ;;  %v10232_v38 = vor.u32 %v13324_v30, %v10231_v29  ;;  %v13384_v29 = vld [vmem:[#allocation6 + $0xc94] sm:$0xf0] }
  0xf5   :  { %3595 = vmatpush.bf16.msrb.mxu2 %v10468_v33  ;;  %v13228_v33 = vld [vmem:[#allocation6 + $0x7b4] sm:$0xf0]  ;;  %v9180_v34 = vor.u32 %v13054_v26, %v9177_v27  ;;  %v9655_v17 = vld [vmem:[#allocation6 + $0x608] sm:$0xf]  ;;  %v9609_v27 = vld [vmem:[#allocation6 + $0x5d8] sm:$0xf0] }
  0xf6   :  { %v558_v51 = vmax.f32 %v551_v42, 0.0  ;;  %v9848_v41 = vor.u32 %v13228_v33, %v9847_v32  ;;  %v10183_v42 = vld [vmem:[#allocation6 + $0xa28] sm:$0xf]  ;;  %v8937_v32 = vld [vmem:[#allocation6 + $0x98] sm:$0xf0]  ;;  %v9612_v35 = vor.u32 %v13162_v23, %v9609_v27 }
  0xf7   :  { %3607 = vmatpush.bf16.msrb.mxu3 %v8984_v59  ;;  %3620 = vmatpush.bf16.msra.mxu0 %v9368_v47  ;;  %v13312_v59 = vld [vmem:[#allocation6 + $0xa54] sm:$0xf0]  ;;  %v9132_v47 = vor.u32 %v13042_v39, %v9129_v40  ;;  %v10039_v20 = vld [vmem:[#allocation6 + $0x908] sm:$0xf]  ;;  %v9561_v39 = vld [vmem:[#allocation6 + $0x578] sm:$0xf0] }
  0xf8   :  { %v14480_v58 = vpack.c.bf16 %v558_v51, %v558_v51  ;;  %3583 = vmatpush.bf16.msrb.mxu1 %v10036_v52  ;;  %v10184_v50 = vor.u32 %v13312_v59, %v10183_v42  ;;  %v13030_v51 = vld [vmem:[#allocation6 + $0x18c] sm:$0xf]  ;;  %v9081_v52 = vld [vmem:[#allocation6 + $0x1b8] sm:$0xf0]  ;;  %v10040_v30 = vor.u32 %v13276_v21, %v10039_v20  ;;  %v10423_v59 = vld [vmem:[#allocation6 + $0xc08] sm:$0xf] }
  0xf9   :  { %3596 = vmatpush.bf16.msrb.mxu2 %v10420_v53  ;;  %v9800_v53 = vor.u32 %v13216_v46, %v9799_v45  ;;  %v13246_v40 = vld [vmem:[#allocation6 + $0x84c] sm:$0xf]  ;;  %v8889_v46 = vld [vmem:[#allocation6 + $0x38] sm:$0xf0] }
  0xfa   :  { %3532 = vmatmul.bf16.vlgmr.msra.gmra.mxu1 %v14480_v58  ;;  %v12982_v45 = vld [vmem:[#allocation6 + $0xc] sm:$0xf]  ;;  %v9801_v20 = vld [vmem:[#allocation6 + $0x758] sm:$0xf0] }
  0xfb   :  { %v552_v8 = vpop.f32.mrf.mxu0  ;;  %3608 = vmatpush.bf16.msrb.mxu3 %v8936_v61  ;;  %3621 = vmatpush.bf16.msra.mxu0 %v9320_v1  ;;  %v9084_v61 = vor.u32 %v13030_v51, %v9081_v52  ;;  %v13018_v1 = vld [vmem:[#allocation6 + $0x12c] sm:$0xf]  ;;  %v10761_v51 = vld [vmem:[#allocation6 + $0xed8] sm:$0xf0]  ;;  %v9564_v52 = vor.u32 %v13150_v36, %v9561_v39 }
  0xfc   :  { %3628 = vmatpush.bf16.msra.mxu1 %v9992_v60  ;;  %3597 = vmatmul.bf16.vlgmr.msrb.gmra.mxu2 %v14480_v58  ;;  %v13204_v60 = vld [vmem:[#allocation6 + $0x6f4] sm:$0xf0]  ;;  %v9417_v23 = vld [vmem:[#allocation6 + $0x458] sm:$0xf0] }
  0xfd   :  { %3641 = vmatpush.bf16.msra.mxu2 %v10376_v56  ;;  %v10616_v56 = vor.u32 %v13420_v49, %v10615_v48  ;;  %v9752_v3 = vor.u32 %v13204_v60, %v9751_v57  ;;  %v13192_v8 = vld [vmem:[#allocation6 + $0x694] sm:$0xf0]  ;;  %v10377_v48 = vld [vmem:[#allocation6 + $0xbd8] sm:$0xf0]  ;;  %v13138_v60 = vld [vmem:[#allocation6 + $0x4ec] sm:$0xf] }
  0xfe   :  { %v9369_v36 = vld [vmem:[#allocation6 + $0x3f8] sm:$0xf0] }
  0xff   :  { %3609 = vmatpush.bf16.msrb.mxu3 %v8888_v14  ;;  %3622 = vmatpush.bf16.msra.mxu0 %v9272_v18  ;;  %v13006_v14 = vld [vmem:[#allocation6 + $0xcc] sm:$0xf]  ;;  %v9704_v18 = vor.u32 %v13192_v8, %v9703_v7  ;;  %v10185_v39 = vld [vmem:[#allocation6 + $0xa58] sm:$0xf0] }
 0x100   :  { %3629 = vmatpush.bf16.msra.mxu1 %v9944_v13  ;;  %v10088_v13 = vor.u32 %v13288_v5, %v10087_v4  ;;  %v8988_v26 = vor.u32 %v13006_v14, %v8985_v16  ;;  %v13222_v5 = vld [vmem:[#allocation6 + $0x78c] sm:$0xf] }
 0x101   :  { %3642 = vmatpush.bf16.msra.mxu2 %v10328_v9  ;;  %v9036_v9 = vor.u32 %v13018_v1, %v9033_v2  ;;  %v9900_v1 = vor.u32 %v13234_v54, %v9897_v55  ;;  %v13438_v2 = vld [vmem:[#allocation6 + $0xe4c] sm:$0xf]  ;;  %v10521_v54 = vld [vmem:[#allocation6 + $0xcf8] sm:$0xf0] }
 0x102   :  { %3610 = vmatmul.bf16.vlgmr.msrb.gmra.mxu3 %v14463_v10  ;;  %3623 = vmatmul.bf16.vlgmr.msra.gmra.mxu0 %v14466_v15  ;;  %v13126_v8 = vld [vmem:[#allocation6 + $0x48c] sm:$0xf] }
 0x103   :  { %3654 = vmatpush.bf16.msra.mxu3 %v10760_v19  ;;  %3667 = vmatpush.bf16.msrb.mxu0 %v9228_v22  ;;  %v13180_v19 = vld [vmem:[#allocation6 + $0x634] sm:$0xf0]  ;;  %v10520_v22 = vor.u32 %v13396_v12, %v10519_v11  ;;  %v13330_v12 = vld [vmem:[#allocation6 + $0xaec] sm:$0xf] }
 0x104   :  { %3630 = vmatpush.bf16.msra.mxu1 %v9896_v28  ;;  %v10471_v28 = vld [vmem:[#allocation6 + $0xc68] sm:$0xf]  ;;  %v9656_v33 = vor.u32 %v13180_v19, %v9655_v17  ;;  %v13426_v16 = vld [vmem:[#allocation6 + $0xdec] sm:$0xf]  ;;  %v10665_v17 = vld [vmem:[#allocation6 + $0xe18] sm:$0xf0] }
 0x105   :  { %3643 = vmatpush.bf16.msra.mxu2 %v10280_v25  ;;  %v9993_v25 = vld [vmem:[#allocation6 + $0x8d8] sm:$0xf0]  ;;  %v13210_v19 = vld [vmem:[#allocation6 + $0x72c] sm:$0xf] }
 0x106   :  { %v9804_v27 = vor.u32 %v13210_v19, %v9801_v20  ;;  %v13078_v55 = vld [vmem:[#allocation6 + $0x30c] sm:$0xf] }
 0x107   :  { %3655 = vmatpush.bf16.msra.mxu3 %v10712_v31  ;;  %3668 = vmatpush.bf16.msrb.mxu0 %v9180_v34  ;;  %v12994_v31 = vld [vmem:[#allocation6 + $0x6c] sm:$0xf]  ;;  %v9996_v34 = vor.u32 %v13258_v24, %v9993_v25  ;;  %v10668_v24 = vor.u32 %v13426_v16, %v10665_v17  ;;  %v13061_v16 = vld [vmem:[#allocation6 + $0x27c] sm:$0xf0]  ;;  %v9567_v17 = vld [vmem:[#allocation6 + $0x550] sm:$0xf] }
 0x108   :  { %3631 = vmatpush.bf16.msra.mxu1 %v9848_v41  ;;  %v9945_v41 = vld [vmem:[#allocation6 + $0x878] sm:$0xf0]  ;;  %v8940_v42 = vor.u32 %v12994_v31, %v8937_v32  ;;  %v13318_v25 = vld [vmem:[#allocation6 + $0xa8c] sm:$0xf] }
 0x109   :  { %3644 = vmatpush.bf16.msra.mxu2 %v10232_v38  ;;  %v10472_v38 = vor.u32 %v13384_v29, %v10471_v28  ;;  %v9948_v49 = vor.u32 %v13246_v40, %v9945_v41  ;;  %v13414_v28 = vld [vmem:[#allocation6 + $0xd8c] sm:$0xf]  ;;  %v10617_v29 = vld [vmem:[#allocation6 + $0xdb8] sm:$0xf0] }
 0x10a   :  { %3584 = vmatmul.bf16.vlgmr.msrb.gmra.mxu1 %v14472_v43  ;;  %v13198_v31 = vld [vmem:[#allocation6 + $0x6cc] sm:$0xf]  ;;  %v9753_v32 = vld [vmem:[#allocation6 + $0x6f8] sm:$0xf0] }
 0x10b   :  { %3656 = vmatpush.bf16.msra.mxu3 %v10664_v44  ;;  %3669 = vmatpush.bf16.msrb.mxu0 %v9132_v47  ;;  %v13372_v44 = vld [vmem:[#allocation6 + $0xc34] sm:$0xf0]  ;;  %v13354_v47 = vld [vmem:[#allocation6 + $0xbac] sm:$0xf]  ;;  %v9756_v40 = vor.u32 %v13198_v31, %v9753_v32  ;;  %v9519_v31 = vld [vmem:[#allocation6 + $0x4f0] sm:$0xf] }
 0x10c   :  { %3632 = vmatpush.bf16.msra.mxu1 %v9800_v53  ;;  %v10424_v53 = vor.u32 %v13372_v44, %v10423_v59  ;;  %v10380_v57 = vor.u32 %v13354_v47, %v10377_v48  ;;  %v13402_v41 = vld [vmem:[#allocation6 + $0xd2c] sm:$0xf]  ;;  %v9321_v48 = vld [vmem:[#allocation6 + $0x398] sm:$0xf0]  ;;  %v13145_v32 = vld [vmem:[#allocation6 + $0x51c] sm:$0xf0] }
 0x10d   :  { %3645 = vmatpush.bf16.msra.mxu2 %v10184_v50  ;;  %v13450_v50 = vld [vmem:[#allocation6 + $0xeac] sm:$0xf] }
 0x10e   :  { %v10764_v62 = vor.u32 %v13450_v50, %v10761_v51  ;;  %v13186_v44 = vld [vmem:[#allocation6 + $0x66c] sm:$0xf]  ;;  %v10137_v51 = vld [vmem:[#allocation6 + $0x9f8] sm:$0xf0] }
 0x10f   :  { %3657 = vmatpush.bf16.msra.mxu3 %v10616_v56  ;;  %3670 = vmatpush.bf16.msrb.mxu0 %v9084_v61  ;;  %v8892_v56 = vor.u32 %v12982_v45, %v8889_v46  ;;  %v9513_v61 = vld [vmem:[#allocation6 + $0x518] sm:$0xf0]  ;;  %v13090_v47 = vld [vmem:[#allocation6 + $0x36c] sm:$0xf] }
 0x110   :  { %3633 = vmatpush.bf16.msra.mxu1 %v9752_v3  ;;  %v10713_v3 = vld [vmem:[#allocation6 + $0xe78] sm:$0xf0]  ;;  %v9516_v4 = vor.u32 %v13138_v60, %v9513_v61  ;;  %v13294_v50 = vld [vmem:[#allocation6 + $0x9cc] sm:$0xf] }
 0x111   :  { %3646 = vmatpush.bf16.msra.mxu2 %v10136_v0  ;;  %v10329_v0 = vld [vmem:[#allocation6 + $0xb78] sm:$0xf0]  ;;  %v10716_v11 = vor.u32 %v13438_v2, %v10713_v3  ;;  %v13174_v60 = vld [vmem:[#allocation6 + $0x60c] sm:$0xf]  ;;  %v13073_v3 = vld [vmem:[#allocation6 + $0x2dc] sm:$0xf0] }
 0x112   :  { %v10332_v7 = vor.u32 %v13342_v63, %v10329_v0  ;;  %v9705_v45 = vld [vmem:[#allocation6 + $0x698] sm:$0xf0]  ;;  %v9231_v63 = vld [vmem:[#allocation6 + $0x2b0] sm:$0xf]  ;;  %v13270_v20 = vld [vmem:[#allocation6 + $0x90c] sm:$0xf] }
 0x113   :  { %3658 = vmatpush.bf16.msra.mxu3 %v10568_v6  ;;  %3671 = vmatpush.bf16.msrb.mxu0 %v9036_v9  ;;  %v9849_v6 = vld [vmem:[#allocation6 + $0x7b8] sm:$0xf0]  ;;  %v9615_v0 = vld [vmem:[#allocation6 + $0x5b0] sm:$0xf] }
 0x114   :  { %3634 = vmatpush.bf16.msra.mxu1 %v9704_v18  ;;  %v9465_v9 = vld [vmem:[#allocation6 + $0x4b8] sm:$0xf0]  ;;  %v9852_v14 = vor.u32 %v13222_v5, %v9849_v6 }
 0x115   :  { %3647 = vmatpush.bf16.msra.mxu2 %v10088_v13  ;;  %v10281_v13 = vld [vmem:[#allocation6 + $0xb18] sm:$0xf0]  ;;  %v9468_v18 = vor.u32 %v13126_v8, %v9465_v9 }
 0x116   :  { %v10284_v21 = vor.u32 %v13330_v12, %v10281_v13  ;;  %v9657_v61 = vld [vmem:[#allocation6 + $0x638] sm:$0xf0]  ;;  %v9183_v12 = vld [vmem:[#allocation6 + $0x250] sm:$0xf]  ;;  %v9232_v13 = vor.u32 %v13073_v3, %v9231_v63  ;;  %v13025_v63 = vld [vmem:[#allocation6 + $0x15c] sm:$0xf0] }
 0x117   :  { %3659 = vmatpush.bf16.msra.mxu3 %v10520_v22  ;;  %3672 = vmatpush.bf16.msrb.mxu0 %v8988_v26  ;;  %v13114_v22 = vld [vmem:[#allocation6 + $0x42c] sm:$0xf]  ;;  %v10233_v26 = vld [vmem:[#allocation6 + $0xab8] sm:$0xf0]  ;;  %v9660_v6 = vor.u32 %v13174_v60, %v9657_v61  ;;  %v13121_v60 = vld [vmem:[#allocation6 + $0x45c] sm:$0xf0] }
 0x118   :  { %3635 = vmatpush.bf16.msra.mxu1 %v9656_v33  ;;  %v10236_v33 = vor.u32 %v13318_v25, %v10233_v26  ;;  %v10089_v5 = vld [vmem:[#allocation6 + $0x998] sm:$0xf0]  ;;  %v13265_v25 = vld [vmem:[#allocation6 + $0x8dc] sm:$0xf0] }
 0x119   :  { %3648 = vmatpush.bf16.msra.mxu2 %v10040_v30  ;;  %v9420_v30 = vor.u32 %v13114_v22, %v9417_v23  ;;  %v10473_v8 = vld [vmem:[#allocation6 + $0xc98] sm:$0xf0]  ;;  %v13366_v22 = vld [vmem:[#allocation6 + $0xc0c] sm:$0xf] }
 0x11a   :  { %v10425_v23 = vld [vmem:[#allocation6 + $0xc38] sm:$0xf0] }
 0x11b   :  { %3660 = vmatpush.bf16.msra.mxu3 %v10472_v38  ;;  %3673 = vmatpush.bf16.msrb.mxu0 %v8940_v42  ;;  %v13306_v38 = vld [vmem:[#allocation6 + $0xa2c] sm:$0xf]  ;;  %v10569_v42 = vld [vmem:[#allocation6 + $0xd58] sm:$0xf0] }
 0x11c   :  { %3680 = vmatpush.bf16.msrb.mxu1 %v9612_v35  ;;  %3649 = vmatmul.bf16.vlgmr.msra.gmra.mxu2 %v14472_v43  ;;  %v10620_v35 = vor.u32 %v13414_v28, %v10617_v29  ;;  %v10188_v46 = vor.u32 %v13306_v38, %v10185_v39  ;;  %v13361_v28 = vld [vmem:[#allocation6 + $0xbdc] sm:$0xf0]  ;;  %v9184_v29 = vor.u32 %v13061_v16, %v9183_v12  ;;  %v9951_v39 = vld [vmem:[#allocation6 + $0x850] sm:$0xf] }
 0x11d   :  { %3693 = vmatpush.bf16.msrb.mxu2 %v9996_v34  ;;  %3636 = vmatmul.bf16.vlgmr.msra.gmra.mxu1 %v14470_v37  ;;  %v13102_v34 = vld [vmem:[#allocation6 + $0x3cc] sm:$0xf]  ;;  %v13013_v12 = vld [vmem:[#allocation6 + $0xfc] sm:$0xf0] }
 0x11e   :  { %v9372_v59 = vor.u32 %v13102_v34, %v9369_v36  ;;  %v9135_v36 = vld [vmem:[#allocation6 + $0x1f0] sm:$0xf]  ;;  %v13217_v16 = vld [vmem:[#allocation6 + $0x75c] sm:$0xf0] }
 0x11f   :  { %3661 = vmatpush.bf16.msra.mxu3 %v10424_v53  ;;  %3674 = vmatpush.bf16.msrb.mxu0 %v8892_v56  ;;  %v13390_v53 = vld [vmem:[#allocation6 + $0xccc] sm:$0xf]  ;;  %v9324_v56 = vor.u32 %v13090_v47, %v9321_v48  ;;  %v9087_v48 = vld [vmem:[#allocation6 + $0x190] sm:$0xf] }
 0x120   :  { %3681 = vmatpush.bf16.msrb.mxu1 %v9564_v52  ;;  %v9708_v52 = vor.u32 %v13186_v44, %v9705_v45  ;;  %v10524_v2 = vor.u32 %v13390_v53, %v10521_v54  ;;  %v9471_v45 = vld [vmem:[#allocation6 + $0x490] sm:$0xf] }
 0x121   :  { %3694 = vmatpush.bf16.msrb.mxu2 %v9948_v49  ;;  %v10572_v49 = vor.u32 %v13402_v41, %v10569_v42  ;;  %v9520_v41 = vor.u32 %v13145_v32, %v9519_v31  ;;  %v10335_v42 = vld [vmem:[#allocation6 + $0xb50] sm:$0xf]  ;;  %v13301_v31 = vld [vmem:[#allocation6 + $0x9fc] sm:$0xf0] }
 0x122   :  { %3662 = vmatmul.bf16.vlgmr.msra.gmra.mxu3 %v14480_v58  ;;  %3675 = vmatmul.bf16.vlgmr.msrb.gmra.mxu0 %v14463_v10  ;;  %v10287_v54 = vld [vmem:[#allocation6 + $0xaf0] sm:$0xf] }
 0x123   :  { %3706 = vmatpush.bf16.msrb.mxu3 %v10380_v57  ;;  %3719 = vmatpush.bf16.msra.mxu0 %v10764_v62  ;;  %v9273_v57 = vld [vmem:[#allocation6 + $0x338] sm:$0xf0]  ;;  %v10140_v62 = vor.u32 %v13294_v50, %v10137_v51  ;;  %v9903_v51 = vld [vmem:[#allocation6 + $0x7f0] sm:$0xf] }
 0x124   :  { %3682 = vmatpush.bf16.msrb.mxu1 %v9516_v4  ;;  %v13282_v4 = vld [vmem:[#allocation6 + $0x96c] sm:$0xf]  ;;  %v9276_v9 = vor.u32 %v13078_v55, %v9273_v57  ;;  %v13337_v55 = vld [vmem:[#allocation6 + $0xb1c] sm:$0xf0]  ;;  %v9423_v57 = vld [vmem:[#allocation6 + $0x430] sm:$0xf] }
 0x125   :  { %3695 = vmatpush.bf16.msrb.mxu2 %v9900_v1  ;;  %v13169_v1 = vld [vmem:[#allocation6 + $0x5dc] sm:$0xf0]  ;;  %v9424_v3 = vor.u32 %v13121_v60, %v9423_v57  ;;  %v8895_v32 = vld [vmem:[#allocation6 + $0x10] sm:$0xf] }
 0x126   :  { %v9663_v60 = vld [vmem:[#allocation6 + $0x610] sm:$0xf] }
 0x127   :  { %3707 = vmatpush.bf16.msrb.mxu3 %v10332_v7  ;;  %3720 = vmatpush.bf16.msra.mxu0 %v10716_v11  ;;  %v13378_v7 = vld [vmem:[#allocation6 + $0xc6c] sm:$0xf]  ;;  %v9616_v11 = vor.u32 %v13169_v1, %v9615_v0  ;;  %v10288_v0 = vor.u32 %v13337_v55, %v10287_v54  ;;  %v9855_v1 = vld [vmem:[#allocation6 + $0x790] sm:$0xf]  ;;  %v13445_v54 = vld [vmem:[#allocation6 + $0xe7c] sm:$0xf0] }
 0x128   :  { %3683 = vmatpush.bf16.msrb.mxu1 %v9468_v18  ;;  %v13157_v18 = vld [vmem:[#allocation6 + $0x57c] sm:$0xf0]  ;;  %v10476_v19 = vor.u32 %v13378_v7, %v10473_v8  ;;  %v9375_v7 = vld [vmem:[#allocation6 + $0x3d0] sm:$0xf]  ;;  %v13055_v55 = vld [vmem:[#allocation6 + $0x254] sm:$0xf] }
 0x129   :  { %3696 = vmatpush.bf16.msrb.mxu2 %v9852_v14  ;;  %v10092_v14 = vor.u32 %v13282_v4, %v10089_v5  ;;  %v9568_v26 = vor.u32 %v13157_v18, %v9567_v17  ;;  %v10239_v4 = vld [vmem:[#allocation6 + $0xa90] sm:$0xf]  ;;  %v13325_v5 = vld [vmem:[#allocation6 + $0xabc] sm:$0xf0] }
 0x12a   :  { %v13109_v8 = vld [vmem:[#allocation6 + $0x3fc] sm:$0xf0]  ;;  %v10191_v18 = vld [vmem:[#allocation6 + $0xa30] sm:$0xf] }
 0x12b   :  { %3708 = vmatpush.bf16.msrb.mxu3 %v10284_v21  ;;  %3721 = vmatpush.bf16.msra.mxu0 %v10668_v24  ;;  %v10041_v21 = vld [vmem:[#allocation6 + $0x938] sm:$0xf0]  ;;  %v9999_v24 = vld [vmem:[#allocation6 + $0x8b0] sm:$0xf]  ;;  %v9376_v17 = vor.u32 %v13109_v8, %v9375_v7  ;;  %v13043_v7 = vld [vmem:[#allocation6 + $0x1f4] sm:$0xf] }
 0x12c   :  { %3684 = vmatpush.bf16.msrb.mxu1 %v9420_v30  ;;  %v10044_v30 = vor.u32 %v13270_v20, %v10041_v21  ;;  %v10000_v34 = vor.u32 %v13265_v25, %v9999_v24  ;;  %v9327_v21 = vld [vmem:[#allocation6 + $0x370] sm:$0xf]  ;;  %v13001_v25 = vld [vmem:[#allocation6 + $0x9c] sm:$0xf0]  ;;  %v9137_v8 = vld [vmem:[#allocation6 + $0x220] sm:$0xf0] }
 0x12d   :  { %3697 = vmatpush.bf16.msrb.mxu2 %v9804_v27  ;;  %v10383_v27 = vld [vmem:[#allocation6 + $0xbb0] sm:$0xf] }
 0x12e   :  { %v10384_v38 = vor.u32 %v13361_v28, %v10383_v27  ;;  %v8943_v24 = vld [vmem:[#allocation6 + $0x70] sm:$0xf]  ;;  %v13205_v28 = vld [vmem:[#allocation6 + $0x6fc] sm:$0xf0] }
 0x12f   :  { %3709 = vmatpush.bf16.msrb.mxu3 %v10236_v33  ;;  %3722 = vmatpush.bf16.msra.mxu0 %v10620_v35  ;;  %v10428_v33 = vor.u32 %v13366_v22, %v10425_v23  ;;  %v13049_v35 = vld [vmem:[#allocation6 + $0x21c] sm:$0xf0]  ;;  %v9759_v27 = vld [vmem:[#allocation6 + $0x6d0] sm:$0xf] }
 0x130   :  { %3685 = vmatpush.bf16.msrb.mxu1 %v9372_v59  ;;  %v13349_v59 = vld [vmem:[#allocation6 + $0xb7c] sm:$0xf0]  ;;  %v9136_v44 = vor.u32 %v13049_v35, %v9135_v36  ;;  %v9279_v36 = vld [vmem:[#allocation6 + $0x310] sm:$0xf] }
 0x131   :  { %3698 = vmatpush.bf16.msrb.mxu2 %v9756_v40  ;;  %v13253_v40 = vld [vmem:[#allocation6 + $0x87c] sm:$0xf0]  ;;  %v10336_v50 = vor.u32 %v13349_v59, %v10335_v42 }
 0x132   :  { %v9952_v47 = vor.u32 %v13253_v40, %v9951_v39  ;;  %v13097_v22 = vld [vmem:[#allocation6 + $0x39c] sm:$0xf0]  ;;  %v10767_v39 = vld [vmem:[#allocation6 + $0xeb0] sm:$0xf]  ;;  %v13067_v40 = vld [vmem:[#allocation6 + $0x2b4] sm:$0xf] }
 0x133   :  { %3710 = vmatpush.bf16.msrb.mxu3 %v10188_v46  ;;  %3723 = vmatpush.bf16.msra.mxu0 %v10572_v49  ;;  %v13133_v46 = vld [vmem:[#allocation6 + $0x4bc] sm:$0xf0] }
 0x134   :  { %3686 = vmatpush.bf16.msrb.mxu1 %v9324_v56  ;;  %v13037_v49 = vld [vmem:[#allocation6 + $0x1bc] sm:$0xf0]  ;;  %v9472_v53 = vor.u32 %v13133_v46, %v9471_v45 }
 0x135   :  { %3699 = vmatpush.bf16.msrb.mxu2 %v9708_v52  ;;  %v13241_v52 = vld [vmem:[#allocation6 + $0x81c] sm:$0xf0]  ;;  %v9088_v56 = vor.u32 %v13037_v49, %v9087_v48 }
 0x136   :  { %v9904_v61 = vor.u32 %v13241_v52, %v9903_v51  ;;  %v13085_v35 = vld [vmem:[#allocation6 + $0x33c] sm:$0xf0]  ;;  %v10719_v51 = vld [vmem:[#allocation6 + $0xe50] sm:$0xf] }
 0x137   :  { %3711 = vmatpush.bf16.msrb.mxu3 %v10140_v62  ;;  %3724 = vmatpush.bf16.msra.mxu0 %v10524_v2  ;;  %v9039_v62 = vld [vmem:[#allocation6 + $0x130] sm:$0xf]  ;;  %v13229_v2 = vld [vmem:[#allocation6 + $0x7bc] sm:$0xf0]  ;;  %v9280_v46 = vor.u32 %v13085_v35, %v9279_v36  ;;  %v9905_v36 = vld [vmem:[#allocation6 + $0x820] sm:$0xf0] }
 0x138   :  { %3687 = vmatpush.bf16.msrb.mxu1 %v9276_v9  ;;  %v9856_v9 = vor.u32 %v13229_v2, %v9855_v1  ;;  %v13457_v59 = vld [vmem:[#allocation6 + $0xedc] sm:$0xf0]  ;;  %v9617_v1 = vld [vmem:[#allocation6 + $0x5e0] sm:$0xf0] }
 0x139   :  { %3700 = vmatpush.bf16.msrb.mxu2 %v9660_v6  ;;  %v9040_v6 = vor.u32 %v13025_v63, %v9039_v62  ;;  %v13193_v45 = vld [vmem:[#allocation6 + $0x69c] sm:$0xf0]  ;;  %v10768_v52 = vor.u32 %v13457_v59, %v10767_v39  ;;  %v10047_v62 = vld [vmem:[#allocation6 + $0x910] sm:$0xf]  ;;  %v9041_v39 = vld [vmem:[#allocation6 + $0x160] sm:$0xf0] }
 0x13a   :  { %v13289_v48 = vld [vmem:[#allocation6 + $0x99c] sm:$0xf0] }
 0x13b   :  { %3712 = vmatpush.bf16.msrb.mxu3 %v10092_v14  ;;  %3725 = vmatpush.bf16.msra.mxu0 %v10476_v19  ;;  %v9807_v14 = vld [vmem:[#allocation6 + $0x730] sm:$0xf]  ;;  %v13313_v19 = vld [vmem:[#allocation6 + $0xa5c] sm:$0xf0] }
 0x13c   :  { %3732 = vmatpush.bf16.msra.mxu1 %v9232_v13  ;;  %3701 = vmatmul.bf16.vlgmr.msrb.gmra.mxu2 %v14470_v37  ;;  %v10240_v13 = vor.u32 %v13325_v5, %v10239_v4  ;;  %v9808_v23 = vor.u32 %v13217_v16, %v9807_v14  ;;  %v13277_v63 = vld [vmem:[#allocation6 + $0x93c] sm:$0xf0]  ;;  %v10001_v4 = vld [vmem:[#allocation6 + $0x8e0] sm:$0xf0]  ;;  %v10720_v5 = vor.u32 %v13445_v54, %v10719_v51  ;;  %v13151_v16 = vld [vmem:[#allocation6 + $0x554] sm:$0xf] }
 0x13d   :  { %3745 = vmatpush.bf16.msra.mxu2 %v9616_v11  ;;  %3688 = vmatmul.bf16.vlgmr.msrb.gmra.mxu1 %v14466_v15  ;;  %v8991_v11 = vld [vmem:[#allocation6 + $0xd0] sm:$0xf]  ;;  %v13007_v51 = vld [vmem:[#allocation6 + $0xd4] sm:$0xf] }
 0x13e   :  { %v8992_v20 = vor.u32 %v13013_v12, %v8991_v11  ;;  %v10671_v12 = vld [vmem:[#allocation6 + $0xdf0] sm:$0xf] }
 0x13f   :  { %3713 = vmatpush.bf16.msrb.mxu3 %v10044_v30  ;;  %3726 = vmatpush.bf16.msra.mxu0 %v10428_v33  ;;  %v10143_v30 = vld [vmem:[#allocation6 + $0x9d0] sm:$0xf]  ;;  %v8944_v33 = vor.u32 %v13001_v25, %v8943_v24  ;;  %v9089_v24 = vld [vmem:[#allocation6 + $0x1c0] sm:$0xf0] }
 0x140   :  { %3733 = vmatpush.bf16.msra.mxu1 %v9184_v29  ;;  %v9328_v29 = vor.u32 %v13097_v22, %v9327_v21  ;;  %v10144_v42 = vor.u32 %v13301_v31, %v10143_v30  ;;  %v9953_v21 = vld [vmem:[#allocation6 + $0x880] sm:$0xf0]  ;;  %v13139_v31 = vld [vmem:[#allocation6 + $0x4f4] sm:$0xf] }
 0x141   :  { %3746 = vmatpush.bf16.msra.mxu2 %v9568_v26  ;;  %v10192_v26 = vor.u32 %v13313_v19, %v10191_v18  ;;  %v9140_v18 = vor.u32 %v13043_v7, %v9137_v8  ;;  %v14497_v19 = vld [vmem:[#allocation7] sm:$0xff]  ;;  %v10479_v8 = vld [vmem:[#allocation6 + $0xc70] sm:$0xf] }
 0x142   :  { %3714 = vmatmul.bf16.vlgmr.msrb.gmra.mxu3 %v14472_v43  ;;  %3727 = vmatmul.bf16.vlgmr.msra.gmra.mxu0 %v14480_v58 }
 0x143   :  { %3758 = vmatpush.bf16.msra.mxu3 %v10000_v34  ;;  %3771 = vmatpush.bf16.msrb.mxu0 %v10384_v38  ;;  %v12989_v34 = vld [vmem:[#allocation6 + $0x3c] sm:$0xf0]  ;;  %v9760_v38 = vor.u32 %v13205_v28, %v9759_v27  ;;  %v1048_v28 = vperm.slane %v14497_v19, 0 }
 0x144   :  { %3734 = vmatpush.bf16.msra.mxu1 %v9136_v44  ;;  %v9711_v44 = vld [vmem:[#allocation6 + $0x670] sm:$0xf]  ;;  %v8896_v49 = vor.u32 %v12989_v34, %v8895_v32  ;;  %v13421_v27 = vld [vmem:[#allocation6 + $0xdbc] sm:$0xf0]  ;;  %v9521_v32 = vld [vmem:[#allocation6 + $0x520] sm:$0xf0] }
 0x145   :  { %3747 = vmatpush.bf16.msra.mxu2 %v9520_v41  ;;  %v9233_v41 = vld [vmem:[#allocation6 + $0x2e0] sm:$0xf0]  ;;  %v13235_v34 = vld [vmem:[#allocation6 + $0x7f4] sm:$0xf] }
 0x147   :  { %3759 = vmatpush.bf16.msra.mxu3 %v9952_v47  ;;  %3772 = vmatpush.bf16.msrb.mxu0 %v10336_v50  ;;  %v10095_v47 = vld [vmem:[#allocation6 + $0x970] sm:$0xf]  ;;  %v9236_v50 = vor.u32 %v13067_v40, %v9233_v41  ;;  %v9524_v40 = vor.u32 %v13139_v31, %v9521_v32 }
 0x148   :  { %3735 = vmatpush.bf16.msra.mxu1 %v9088_v56  ;;  %v9185_v56 = vld [vmem:[#allocation6 + $0x280] sm:$0xf0]  ;;  %v10096_v57 = vor.u32 %v13289_v48, %v10095_v47  ;;  %v10575_v41 = vld [vmem:[#allocation6 + $0xd30] sm:$0xf]  ;;  %v13223_v48 = vld [vmem:[#allocation6 + $0x794] sm:$0xf] }
 0x149   :  { %3748 = vmatpush.bf16.msra.mxu2 %v9472_v53  ;;  %v9712_v53 = vor.u32 %v13193_v45, %v9711_v44  ;;  %v9188_v2 = vor.u32 %v13055_v55, %v9185_v56  ;;  %v9908_v44 = vor.u32 %v13235_v34, %v9905_v36  ;;  %v13127_v45 = vld [vmem:[#allocation6 + $0x494] sm:$0xf]  ;;  %v10527_v55 = vld [vmem:[#allocation6 + $0xcd0] sm:$0xf]  ;;  %v13397_v56 = vld [vmem:[#allocation6 + $0xcfc] sm:$0xf0] }
 0x14a   :  { %v13091_v34 = vld [vmem:[#allocation6 + $0x374] sm:$0xf]  ;;  %v9329_v36 = vld [vmem:[#allocation6 + $0x3a0] sm:$0xf0] }
 0x14b   :  { %3760 = vmatpush.bf16.msra.mxu3 %v9904_v61  ;;  %3773 = vmatpush.bf16.msrb.mxu0 %v10288_v0  ;;  %v13181_v61 = vld [vmem:[#allocation6 + $0x63c] sm:$0xf0]  ;;  %v13163_v0 = vld [vmem:[#allocation6 + $0x5b4] sm:$0xf] }
 0x14c   :  { %3736 = vmatpush.bf16.msra.mxu1 %v9040_v6  ;;  %v9664_v6 = vor.u32 %v13181_v61, %v9663_v60  ;;  %v9620_v11 = vor.u32 %v13163_v0, %v9617_v1  ;;  %v9425_v0 = vld [vmem:[#allocation6 + $0x460] sm:$0xf0] }
 0x14d   :  { %3749 = vmatpush.bf16.msra.mxu2 %v9424_v3  ;;  %v13259_v3 = vld [vmem:[#allocation6 + $0x8b4] sm:$0xf] }
 0x14e   :  { %v10004_v14 = vor.u32 %v13259_v3, %v10001_v4  ;;  %v9809_v3 = vld [vmem:[#allocation6 + $0x760] sm:$0xf0]  ;;  %v10528_v4 = vor.u32 %v13397_v56, %v10527_v55  ;;  %v9239_v55 = vld [vmem:[#allocation6 + $0x2b8] sm:$0xf]  ;;  %v13074_v56 = vld [vmem:[#allocation6 + $0x2e4] sm:$0xf0] }
 0x14f   :  { %3761 = vmatpush.bf16.msra.mxu3 %v9856_v9  ;;  %3774 = vmatpush.bf16.msrb.mxu0 %v10240_v13  ;;  %v10048_v9 = vor.u32 %v13277_v63, %v10047_v62  ;;  %v13433_v13 = vld [vmem:[#allocation6 + $0xe1c] sm:$0xf0]  ;;  %v13115_v63 = vld [vmem:[#allocation6 + $0x434] sm:$0xf] }
 0x150   :  { %3737 = vmatpush.bf16.msra.mxu1 %v8992_v20  ;;  %v13247_v20 = vld [vmem:[#allocation6 + $0x854] sm:$0xf]  ;;  %v10672_v22 = vor.u32 %v13433_v13, %v10671_v12  ;;  %v9428_v7 = vor.u32 %v13115_v63, %v9425_v0  ;;  %v9377_v13 = vld [vmem:[#allocation6 + $0x400] sm:$0xf0] }
 0x151   :  { %3750 = vmatpush.bf16.msra.mxu2 %v9376_v17  ;;  %v9569_v17 = vld [vmem:[#allocation6 + $0x580] sm:$0xf0]  ;;  %v9956_v30 = vor.u32 %v13247_v20, %v9953_v21  ;;  %v13103_v12 = vld [vmem:[#allocation6 + $0x3d4] sm:$0xf]  ;;  %v10431_v20 = vld [vmem:[#allocation6 + $0xc10] sm:$0xf] }
 0x152   :  { %v9572_v25 = vor.u32 %v13151_v16, %v9569_v17  ;;  %v13199_v17 = vld [vmem:[#allocation6 + $0x6d4] sm:$0xf] }
 0x153   :  { %3762 = vmatpush.bf16.msra.mxu3 %v9808_v23  ;;  %3775 = vmatpush.bf16.msrb.mxu0 %v10192_v26  ;;  %v13031_v23 = vld [vmem:[#allocation6 + $0x194] sm:$0xf]  ;;  %v10623_v26 = vld [vmem:[#allocation6 + $0xd90] sm:$0xf] }
 0x154   :  { %3738 = vmatpush.bf16.msra.mxu1 %v8944_v33  ;;  %v9092_v33 = vor.u32 %v13031_v23, %v9089_v24  ;;  %v10624_v35 = vor.u32 %v13421_v27, %v10623_v26  ;;  %v13373_v23 = vld [vmem:[#allocation6 + $0xc3c] sm:$0xf0]  ;;  %v12983_v24 = vld [vmem:[#allocation6 + $0x14] sm:$0xf]  ;;  %v9380_v27 = vor.u32 %v13103_v12, %v9377_v13  ;;  %v13062_v12 = vld [vmem:[#allocation6 + $0x284] sm:$0xf0] }
 0x155   :  { %3751 = vmatpush.bf16.msra.mxu2 %v9328_v29 }
 0x157   :  { %3763 = vmatpush.bf16.msra.mxu3 %v9760_v38  ;;  %3776 = vmatpush.bf16.msrb.mxu0 %v10144_v42  ;;  %v3481_v29 = vpop.f32.mrf.mxu1  ;;  %v13019_v38 = vld [vmem:[#allocation6 + $0x134] sm:$0xf]  ;;  %v13409_v42 = vld [vmem:[#allocation6 + $0xd5c] sm:$0xf0] }
 0x158   :  { %3739 = vmatpush.bf16.msra.mxu1 %v8896_v49  ;;  %v3482_v59 = vadd.f32 %v3481_v29, %v1048_v28  ;;  %v9044_v47 = vor.u32 %v13019_v38, %v9041_v39  ;;  %v9857_v49 = vld [vmem:[#allocation6 + $0x7c0] sm:$0xf0]  ;;  %v13355_v28 = vld [vmem:[#allocation6 + $0xbb4] sm:$0xf] }
 0x159   :  { %3752 = vmatpush.bf16.msra.mxu2 %v9280_v46  ;;  %v9473_v46 = vld [vmem:[#allocation6 + $0x4c0] sm:$0xf0]  ;;  %v9860_v62 = vor.u32 %v13223_v48, %v9857_v49  ;;  %v13451_v29 = vld [vmem:[#allocation6 + $0xeb4] sm:$0xf] }
 0x15a   :  { %v9476_v54 = vor.u32 %v13127_v45, %v9473_v46  ;;  %v13187_v39 = vld [vmem:[#allocation6 + $0x674] sm:$0xf]  ;;  %v9332_v45 = vor.u32 %v13091_v34, %v9329_v36  ;;  %v10337_v46 = vld [vmem:[#allocation6 + $0xb80] sm:$0xf0] }
 0x15b   :  { %3764 = vmatpush.bf16.msra.mxu3 %v9712_v53  ;;  %3777 = vmatpush.bf16.msrb.mxu0 %v10096_v57  ;;  %v10721_v48 = vld [vmem:[#allocation6 + $0xe80] sm:$0xf0] }
 0x15c   :  { %3784 = vmatpush.bf16.msrb.mxu1 %v10768_v52  ;;  %3753 = vmatmul.bf16.vlgmr.msra.gmra.mxu2 %v14466_v15  ;;  %v8993_v52 = vld [vmem:[#allocation6 + $0x100] sm:$0xf0] }
 0x15d   :  { %3797 = vmatpush.bf16.msrb.mxu2 %v9236_v50  ;;  %3740 = vmatmul.bf16.vlgmr.msra.gmra.mxu1 %v14463_v10  ;;  %v10576_v50 = vor.u32 %v13409_v42, %v10575_v41  ;;  %v8996_v1 = vor.u32 %v13007_v51, %v8993_v52  ;;  %v10432_v41 = vor.u32 %v13373_v23, %v10431_v20  ;;  %v9281_v51 = vld [vmem:[#allocation6 + $0x340] sm:$0xf0]  ;;  %v13175_v52 = vld [vmem:[#allocation6 + $0x614] sm:$0xf] }
 0x15e   :  { %v3494_v53 = vpop.f32.mrf.mxu2  ;;  %v10625_v20 = vld [vmem:[#allocation6 + $0xdc0] sm:$0xf0]  ;;  %v13319_v23 = vld [vmem:[#allocation6 + $0xa94] sm:$0xf] }
 0x15f   :  { %3765 = vmatpush.bf16.msra.mxu3 %v9664_v6  ;;  %3778 = vmatpush.bf16.msrb.mxu0 %v10048_v9  ;;  %v3495_v57 = vadd.f32 %v3494_v53, %v3482_v59  ;;  %v3520_v60 = vpop.f32.mrf.mxu0  ;;  %v3483_v61 = vpop.f32.mrf.mxu1  ;;  %v8945_v6 = vld [vmem:[#allocation6 + $0xa0] sm:$0xf0]  ;;  %v13385_v9 = vld [vmem:[#allocation6 + $0xc9c] sm:$0xf0]  ;;  %v13343_v59 = vld [vmem:[#allocation6 + $0xb54] sm:$0xf] }
 0x160   :  { %3785 = vmatpush.bf16.msrb.mxu1 %v10720_v5  ;;  %v12995_v5 = vld [vmem:[#allocation6 + $0x74] sm:$0xf]  ;;  %v13170_v61 = vld [vmem:[#allocation6 + $0x5e4] sm:$0xf0]  ;;  %v10340_v63 = vor.u32 %v13343_v59, %v10337_v46 }
 0x161   :  { %3798 = vmatpush.bf16.msrb.mxu2 %v9188_v2  ;;  %v13211_v2 = vld [vmem:[#allocation6 + $0x734] sm:$0xf]  ;;  %v8948_v16 = vor.u32 %v12995_v5, %v8945_v6  ;;  %v9240_v6 = vor.u32 %v13074_v56, %v9239_v55  ;;  %v10145_v56 = vld [vmem:[#allocation6 + $0xa00] sm:$0xf0] }
 0x162   :  { %3766 = vmatmul.bf16.vlgmr.msra.gmra.mxu3 %v14470_v37  ;;  %3779 = vmatmul.bf16.vlgmr.msrb.gmra.mxu0 %v14472_v43  ;;  %v13307_v59 = vld [vmem:[#allocation6 + $0xa34] sm:$0xf] }
 0x163   :  { %3810 = vmatpush.bf16.msrb.mxu3 %v9620_v11  ;;  %3823 = vmatpush.bf16.msra.mxu0 %v10004_v14  ;;  %v9812_v11 = vor.u32 %v13211_v2, %v9809_v3  ;;  %v10673_v2 = vld [vmem:[#allocation6 + $0xe20] sm:$0xf0]  ;;  %v1049_v3 = vperm.slane %v14497_v19, 1  ;;  %v13295_v55 = vld [vmem:[#allocation6 + $0x9d4] sm:$0xf] }
 0x164   :  { %3786 = vmatpush.bf16.msrb.mxu1 %v10672_v22  ;;  %v10480_v22 = vor.u32 %v13385_v9, %v10479_v8  ;;  %v10289_v8 = vld [vmem:[#allocation6 + $0xb20] sm:$0xf0] }
 0x165   :  { %3799 = vmatpush.bf16.msrb.mxu2 %v9140_v18  ;;  %v3507_v14 = vpop.f32.mrf.mxu3  ;;  %v9761_v18 = vld [vmem:[#allocation6 + $0x700] sm:$0xf0] }
 0x166   :  { %v3508_v21 = vadd.f32 %v3507_v14, %v3495_v57  ;;  %v3496_v26 = vpop.f32.mrf.mxu2  ;;  %v9764_v32 = vor.u32 %v13199_v17, %v9761_v18  ;;  %v9575_v14 = vld [vmem:[#allocation6 + $0x558] sm:$0xf]  ;;  %v13415_v18 = vld [vmem:[#allocation6 + $0xd94] sm:$0xf] }
 0x167   :  { %3811 = vmatpush.bf16.msrb.mxu3 %v9572_v25  ;;  %3824 = vmatpush.bf16.msra.mxu0 %v9956_v30  ;;  %v8897_v25 = vld [vmem:[#allocation6 + $0x40] sm:$0xf0]  ;;  %v3522_v31 = vpop.f32.mrf.mxu0 }
 0x168   :  { %3787 = vmatpush.bf16.msrb.mxu1 %v10624_v35  ;;  %v10769_v30 = vld [vmem:[#allocation6 + $0xee0] sm:$0xf0]  ;;  %v14502_v35 = vadd.f32 %v3520_v60, %v3508_v21  ;;  %v8900_v38 = vor.u32 %v12983_v24, %v8897_v25  ;;  %v9623_v60 = vld [vmem:[#allocation6 + $0x5b8] sm:$0xf] }
 0x169   :  { %3800 = vmatpush.bf16.msrb.mxu2 %v9092_v33  ;;  %v10385_v33 = vld [vmem:[#allocation6 + $0xbe0] sm:$0xf0]  ;;  %v10772_v42 = vor.u32 %v13451_v29, %v10769_v30  ;;  %v9624_v9 = vor.u32 %v13170_v61, %v9623_v60  ;;  %v10628_v30 = vor.u32 %v13415_v18, %v10625_v20  ;;  %v9527_v31 = vld [vmem:[#allocation6 + $0x4f8] sm:$0xf]  ;;  %v13110_v20 = vld [vmem:[#allocation6 + $0x404] sm:$0xf0] }
 0x16a   :  { %v10241_v24 = vld [vmem:[#allocation6 + $0xac0] sm:$0xf0]  ;;  %v9047_v61 = vld [vmem:[#allocation6 + $0x138] sm:$0xf] }
 0x16b   :  { %3812 = vmatpush.bf16.msrb.mxu3 %v9524_v40  ;;  %3825 = vmatpush.bf16.msra.mxu0 %v9908_v44  ;;  %v9713_v40 = vld [vmem:[#allocation6 + $0x6a0] sm:$0xf0]  ;;  %v10388_v44 = vor.u32 %v13355_v28, %v10385_v33  ;;  %v13050_v28 = vld [vmem:[#allocation6 + $0x224] sm:$0xf0]  ;;  %v10244_v36 = vor.u32 %v13319_v23, %v10241_v24  ;;  %v9383_v18 = vld [vmem:[#allocation6 + $0x3d8] sm:$0xf] }
 0x16c   :  { %3788 = vmatpush.bf16.msrb.mxu1 %v10576_v50  ;;  %v9716_v49 = vor.u32 %v13187_v39, %v9713_v40  ;;  %v13079_v50 = vld [vmem:[#allocation6 + $0x314] sm:$0xf]  ;;  %v10577_v39 = vld [vmem:[#allocation6 + $0xd60] sm:$0xf0] }
 0x16d   :  { %3801 = vmatpush.bf16.msrb.mxu2 %v9044_v47  ;;  %v13439_v47 = vld [vmem:[#allocation6 + $0xe54] sm:$0xf]  ;;  %v3509_v53 = vpop.f32.mrf.mxu3  ;;  %v9284_v0 = vor.u32 %v13079_v50, %v9281_v51  ;;  %v9479_v50 = vld [vmem:[#allocation6 + $0x498] sm:$0xf]  ;;  %v13134_v51 = vld [vmem:[#allocation6 + $0x4c4] sm:$0xf0] }
 0x16e   :  { %v10724_v57 = vor.u32 %v13439_v47, %v10721_v48  ;;  %v9095_v47 = vld [vmem:[#allocation6 + $0x198] sm:$0xf]  ;;  %v13038_v48 = vld [vmem:[#allocation6 + $0x1c4] sm:$0xf0]  ;;  %v13391_v53 = vld [vmem:[#allocation6 + $0xcd4] sm:$0xf]  ;;  %v9480_v60 = vor.u32 %v13134_v51, %v9479_v50 }
 0x16f   :  { %3813 = vmatpush.bf16.msrb.mxu3 %v9476_v54  ;;  %3826 = vmatpush.bf16.msra.mxu0 %v9860_v62  ;;  %v9665_v54 = vld [vmem:[#allocation6 + $0x640] sm:$0xf0]  ;;  %v3546_v62 = vpop.f32.mrf.mxu2  ;;  %v13367_v24 = vld [vmem:[#allocation6 + $0xc14] sm:$0xf] }
 0x170   :  { %3789 = vmatpush.bf16.msrb.mxu1 %v10528_v4  ;;  %v3572_v4 = vpop.f32.mrf.mxu0  ;;  %v9668_v5 = vor.u32 %v13175_v52, %v9665_v54  ;;  %v3547_v21 = vadd.f32 %v3546_v62, %v1049_v3  ;;  %v9096_v54 = vor.u32 %v13038_v48, %v9095_v47  ;;  %v13026_v62 = vld [vmem:[#allocation6 + $0x164] sm:$0xf0]  ;;  %v10049_v23 = vld [vmem:[#allocation6 + $0x940] sm:$0xf0]  ;;  %v9959_v47 = vld [vmem:[#allocation6 + $0x858] sm:$0xf] }
 0x171   :  { %3802 = vmatpush.bf16.msrb.mxu2 %v8996_v1  ;;  %v13427_v1 = vld [vmem:[#allocation6 + $0xdf4] sm:$0xf] }
 0x172   :  { %v10676_v13 = vor.u32 %v13427_v1, %v10673_v2  ;;  %v13122_v1 = vld [vmem:[#allocation6 + $0x464] sm:$0xf0] }
 0x173   :  { %3814 = vmatpush.bf16.msrb.mxu3 %v9428_v7  ;;  %3827 = vmatpush.bf16.msra.mxu0 %v9812_v11  ;;  %v13331_v7 = vld [vmem:[#allocation6 + $0xaf4] sm:$0xf]  ;;  %v9191_v11 = vld [vmem:[#allocation6 + $0x258] sm:$0xf] }
 0x174   :  { %3790 = vmatpush.bf16.msrb.mxu1 %v10480_v22  ;;  %v10292_v17 = vor.u32 %v13331_v7, %v10289_v8  ;;  %v9192_v22 = vor.u32 %v13062_v12, %v9191_v11  ;;  %v9048_v8 = vor.u32 %v13026_v62, %v9047_v61  ;;  %v10097_v11 = vld [vmem:[#allocation6 + $0x9a0] sm:$0xf0]  ;;  %v13086_v62 = vld [vmem:[#allocation6 + $0x344] sm:$0xf0] }
 0x175   :  { %3803 = vmatpush.bf16.msrb.mxu2 %v8948_v16  ;;  %v13158_v16 = vld [vmem:[#allocation6 + $0x584] sm:$0xf0]  ;;  %v3559_v25 = vpop.f32.mrf.mxu3 }
 0x176   :  { %v9576_v26 = vor.u32 %v13158_v16, %v9575_v14  ;;  %v3560_v29 = vadd.f32 %v3559_v25, %v3547_v21  ;;  %v8999_v14 = vld [vmem:[#allocation6 + $0xd8] sm:$0xf]  ;;  %v13014_v16 = vld [vmem:[#allocation6 + $0x104] sm:$0xf0]  ;;  %v13271_v21 = vld [vmem:[#allocation6 + $0x914] sm:$0xf] }
 0x177   :  { %3815 = vmatpush.bf16.msrb.mxu3 %v9380_v27  ;;  %3828 = vmatpush.bf16.msra.mxu0 %v9764_v32  ;;  %v9143_v27 = vld [vmem:[#allocation6 + $0x1f8] sm:$0xf]  ;;  %v13146_v32 = vld [vmem:[#allocation6 + $0x524] sm:$0xf0]  ;;  %v3533_v33 = vpop.f32.mrf.mxu1  ;;  %v3548_v34 = vpop.f32.mrf.mxu2  ;;  %v10433_v25 = vld [vmem:[#allocation6 + $0xc40] sm:$0xf0] }
 0x178   :  { %3791 = vmatpush.bf16.msrb.mxu1 %v10432_v41  ;;  %v14510_v40 = vadd.f32 %v3533_v33, %v14502_v35  ;;  %v3574_v41 = vpop.f32.mrf.mxu0  ;;  %v9528_v46 = vor.u32 %v13146_v32, %v9527_v31  ;;  %v10529_v35 = vld [vmem:[#allocation6 + $0xd00] sm:$0xf0]  ;;  %v9384_v31 = vor.u32 %v13110_v20, %v9383_v18  ;;  %v13266_v32 = vld [vmem:[#allocation6 + $0x8e4] sm:$0xf0]  ;;  %v8951_v33 = vld [vmem:[#allocation6 + $0x78] sm:$0xf] }
 0x179   :  { %3804 = vmatpush.bf16.msrb.mxu2 %v8900_v38  ;;  %v13403_v38 = vld [vmem:[#allocation6 + $0xd34] sm:$0xf]  ;;  %v13002_v34 = vld [vmem:[#allocation6 + $0xa4] sm:$0xf0]  ;;  %v13056_v20 = vld [vmem:[#allocation6 + $0x25c] sm:$0xf] }
 0x17a   :  { %v13098_v41 = vld [vmem:[#allocation6 + $0x3a4] sm:$0xf0]  ;;  %v8952_v51 = vor.u32 %v13002_v34, %v8951_v33  ;;  %v9145_v33 = vld [vmem:[#allocation6 + $0x228] sm:$0xf0] }
 0x17b   :  { %3816 = vmatpush.bf16.msrb.mxu3 %v9332_v45  ;;  %3829 = vmatpush.bf16.msra.mxu0 %v9716_v49  ;;  %v14512_v45 = vadd.f32 %v3572_v4, %v3560_v29  ;;  %v10580_v49 = vor.u32 %v13403_v38, %v10577_v39  ;;  %v10148_v4 = vor.u32 %v13295_v55, %v10145_v56  ;;  %v13362_v29 = vld [vmem:[#allocation6 + $0xbe4] sm:$0xf0]  ;;  %v9335_v39 = vld [vmem:[#allocation6 + $0x378] sm:$0xf] }
 0x17c   :  { %3836 = vmatpush.bf16.msra.mxu1 %v10388_v44  ;;  %3805 = vmatmul.bf16.vlgmr.msrb.gmra.mxu2 %v14463_v10  ;;  %v10193_v44 = vld [vmem:[#allocation6 + $0xa60] sm:$0xf0]  ;;  %v10436_v38 = vor.u32 %v13367_v24, %v10433_v25  ;;  %v9336_v55 = vor.u32 %v13098_v41, %v9335_v39  ;;  %v8903_v56 = vld [vmem:[#allocation6 + $0x18] sm:$0xf]  ;;  %v13326_v24 = vld [vmem:[#allocation6 + $0xac4] sm:$0xf0] }
 0x17d   :  { %3849 = vmatpush.bf16.msra.mxu2 %v10772_v42  ;;  %3792 = vmatmul.bf16.vlgmr.msrb.gmra.mxu1 %v14480_v58  ;;  %v9144_v42 = vor.u32 %v13050_v28, %v9143_v27  ;;  %v10196_v52 = vor.u32 %v13307_v59, %v10193_v44  ;;  %v10007_v27 = vld [vmem:[#allocation6 + $0x8b8] sm:$0xf]  ;;  %v10052_v44 = vor.u32 %v13271_v21, %v10049_v23  ;;  %v9193_v21 = vld [vmem:[#allocation6 + $0x288] sm:$0xf0] }
 0x17e   :  { %v10391_v28 = vld [vmem:[#allocation6 + $0xbb8] sm:$0xf]  ;;  %v10008_v50 = vor.u32 %v13266_v32, %v10007_v27  ;;  %v13230_v27 = vld [vmem:[#allocation6 + $0x7c4] sm:$0xf0]  ;;  %v13044_v32 = vld [vmem:[#allocation6 + $0x1fc] sm:$0xf] }
 0x17f   :  { %3817 = vmatpush.bf16.msrb.mxu3 %v9284_v0  ;;  %3830 = vmatpush.bf16.msra.mxu0 %v9668_v5  ;;  %v9431_v0 = vld [vmem:[#allocation6 + $0x438] sm:$0xf]  ;;  %v3535_v2 = vpop.f32.mrf.mxu1  ;;  %v3598_v3 = vpop.f32.mrf.mxu2  ;;  %v13379_v5 = vld [vmem:[#allocation6 + $0xc74] sm:$0xf] }
 0x180   :  { %3837 = vmatpush.bf16.msra.mxu1 %v10340_v63  ;;  %v10532_v63 = vor.u32 %v13391_v53, %v10529_v35  ;;  %v3624_v7 = vpop.f32.mrf.mxu0  ;;  %v9432_v12 = vor.u32 %v13122_v1, %v9431_v0  ;;  %v10343_v53 = vld [vmem:[#allocation6 + $0xb58] sm:$0xf]  ;;  %v13350_v35 = vld [vmem:[#allocation6 + $0xb84] sm:$0xf0]  ;;  %v13068_v1 = vld [vmem:[#allocation6 + $0x2bc] sm:$0xf] }
 0x181   :  { %3850 = vmatpush.bf16.msra.mxu2 %v10724_v57  ;;  %v3561_v57 = vpop.f32.mrf.mxu3  ;;  %v10344_v0 = vor.u32 %v13350_v35, %v10343_v53  ;;  %v9241_v2 = vld [vmem:[#allocation6 + $0x2e8] sm:$0xf0]  ;;  %v10247_v23 = vld [vmem:[#allocation6 + $0xa98] sm:$0xf]  ;;  %v13302_v35 = vld [vmem:[#allocation6 + $0xa04] sm:$0xf0] }
 0x182   :  { %3818 = vmatmul.bf16.vlgmr.msrb.gmra.mxu3 %v14466_v15  ;;  %3831 = vmatmul.bf16.vlgmr.msra.gmra.mxu0 %v14470_v37  ;;  %v12990_v57 = vld [vmem:[#allocation6 + $0x44] sm:$0xf0]  ;;  %v9815_v41 = vld [vmem:[#allocation6 + $0x738] sm:$0xf] }
 0x183   :  { %3862 = vmatpush.bf16.msra.mxu3 %v9240_v6  ;;  %3875 = vmatpush.bf16.msrb.mxu0 %v9624_v9  ;;  %v10481_v6 = vld [vmem:[#allocation6 + $0xca0] sm:$0xf0]  ;;  %v13283_v9 = vld [vmem:[#allocation6 + $0x974] sm:$0xf]  ;;  %v10151_v53 = vld [vmem:[#allocation6 + $0x9d8] sm:$0xf] }
 0x184   :  { %3838 = vmatpush.bf16.msra.mxu1 %v10292_v17  ;;  %v10484_v17 = vor.u32 %v13379_v5, %v10481_v6  ;;  %v8904_v5 = vor.u32 %v12990_v57, %v8903_v56  ;;  %v10295_v6 = vld [vmem:[#allocation6 + $0xaf8] sm:$0xf]  ;;  %v13206_v57 = vld [vmem:[#allocation6 + $0x704] sm:$0xf0] }
 0x185   :  { %3851 = vmatpush.bf16.msra.mxu2 %v10676_v13  ;;  %v1050_v13 = vperm.slane %v14497_v19, 2  ;;  %v9767_v56 = vld [vmem:[#allocation6 + $0x6d8] sm:$0xf] }
 0x187   :  { %3863 = vmatpush.bf16.msra.mxu3 %v9192_v22  ;;  %3876 = vmatpush.bf16.msrb.mxu0 %v9576_v26  ;;  %v10100_v22 = vor.u32 %v13283_v9, %v10097_v11  ;;  %v9000_v26 = vor.u32 %v13014_v16, %v8999_v14  ;;  %v3600_v59 = vpop.f32.mrf.mxu2  ;;  %v9911_v11 = vld [vmem:[#allocation6 + $0x7f8] sm:$0xf]  ;;  %v13446_v16 = vld [vmem:[#allocation6 + $0xe84] sm:$0xf0] }
 0x188   :  { %3839 = vmatpush.bf16.msra.mxu1 %v10244_v36  ;;  %v10727_v14 = vld [vmem:[#allocation6 + $0xe58] sm:$0xf]  ;;  %v9148_v59 = vor.u32 %v13044_v32, %v9145_v33  ;;  %v13386_v33 = vld [vmem:[#allocation6 + $0xca4] sm:$0xf0] }
 0x189   :  { %3852 = vmatpush.bf16.msra.mxu2 %v10628_v30  ;;  %v3611_v30 = vpop.f32.mrf.mxu3  ;;  %v10728_v25 = vor.u32 %v13446_v16, %v10727_v14  ;;  %v10487_v32 = vld [vmem:[#allocation6 + $0xc78] sm:$0xf] }
 0x18a   :  { %v3612_v36 = vadd.f32 %v3611_v30, %v1050_v13  ;;  %v9244_v13 = vor.u32 %v13068_v1, %v9241_v2  ;;  %v13434_v30 = vld [vmem:[#allocation6 + $0xe24] sm:$0xf0]  ;;  %v9049_v1 = vld [vmem:[#allocation6 + $0x168] sm:$0xf0] }
 0x18b   :  { %3864 = vmatpush.bf16.msra.mxu3 %v9144_v42  ;;  %3877 = vmatpush.bf16.msrb.mxu0 %v9528_v46  ;;  %v3585_v42 = vpop.f32.mrf.mxu1  ;;  %v10392_v46 = vor.u32 %v13362_v29, %v10391_v28  ;;  %v9196_v28 = vor.u32 %v13056_v20, %v9193_v21  ;;  %v10679_v29 = vld [vmem:[#allocation6 + $0xdf8] sm:$0xf] }
 0x18c   :  { %3840 = vmatpush.bf16.msra.mxu1 %v10196_v52  ;;  %v3586_v48 = vadd.f32 %v3585_v42, %v14512_v45  ;;  %v13254_v52 = vld [vmem:[#allocation6 + $0x884] sm:$0xf0]  ;;  %v10680_v39 = vor.u32 %v13434_v30, %v10679_v29  ;;  %v9671_v20 = vld [vmem:[#allocation6 + $0x618] sm:$0xf] }
 0x18d   :  { %3853 = vmatpush.bf16.msra.mxu2 %v10580_v49  ;;  %v3626_v49 = vpop.f32.mrf.mxu0  ;;  %v13458_v45 = vld [vmem:[#allocation6 + $0xee4] sm:$0xf0] }
 0x18e   :  { %v14518_v61 = vadd.f32 %v3598_v3, %v3586_v48  ;;  %v13218_v42 = vld [vmem:[#allocation6 + $0x764] sm:$0xf0]  ;;  %v13032_v49 = vld [vmem:[#allocation6 + $0x19c] sm:$0xf] }
 0x18f   :  { %3865 = vmatpush.bf16.msra.mxu3 %v9096_v54  ;;  %3878 = vmatpush.bf16.msrb.mxu0 %v9480_v60  ;;  %v14516_v54 = vadd.f32 %v3624_v7, %v3612_v36  ;;  %v9287_v60 = vld [vmem:[#allocation6 + $0x318] sm:$0xf]  ;;  %v13338_v7 = vld [vmem:[#allocation6 + $0xb24] sm:$0xf0] }
 0x190   :  { %3841 = vmatpush.bf16.msra.mxu1 %v10148_v4  ;;  %v9960_v4 = vor.u32 %v13254_v52, %v9959_v47  ;;  %v10296_v18 = vor.u32 %v13338_v7, %v10295_v6  ;;  %v10199_v36 = vld [vmem:[#allocation6 + $0xa38] sm:$0xf]  ;;  %v9816_v52 = vor.u32 %v13218_v42, %v9815_v41 }
 0x191   :  { %3854 = vmatpush.bf16.msra.mxu2 %v10532_v63  ;;  %v10775_v63 = vld [vmem:[#allocation6 + $0xeb8] sm:$0xf]  ;;  %v3613_v3 = vpop.f32.mrf.mxu3 }
 0x192   :  { %v10776_v9 = vor.u32 %v13458_v45, %v10775_v63  ;;  %v13410_v63 = vld [vmem:[#allocation6 + $0xd64] sm:$0xf0]  ;;  %v10152_v45 = vor.u32 %v13302_v35, %v10151_v53  ;;  %v10439_v53 = vld [vmem:[#allocation6 + $0xc18] sm:$0xf] }
 0x193   :  { %3866 = vmatpush.bf16.msra.mxu3 %v9048_v8  ;;  %3879 = vmatpush.bf16.msrb.mxu0 %v9432_v12  ;;  %v9288_v8 = vor.u32 %v13086_v62, %v9287_v60  ;;  %v13242_v12 = vld [vmem:[#allocation6 + $0x824] sm:$0xf0]  ;;  %v10583_v62 = vld [vmem:[#allocation6 + $0xd38] sm:$0xf] }
 0x194   :  { %3842 = vmatpush.bf16.msra.mxu1 %v10100_v22  ;;  %v9912_v22 = vor.u32 %v13242_v12, %v9911_v11  ;;  %v10584_v3 = vor.u32 %v13410_v63, %v10583_v62  ;;  %v10535_v12 = vld [vmem:[#allocation6 + $0xcd8] sm:$0xf]  ;;  %v13374_v35 = vld [vmem:[#allocation6 + $0xc44] sm:$0xf0]  ;;  %v13452_v63 = vld [vmem:[#allocation6 + $0xebc] sm:$0xf] }
 0x195   :  { %3855 = vmatpush.bf16.msra.mxu2 %v10484_v17  ;;  %v3587_v17 = vpop.f32.mrf.mxu1 }
 0x196   :  { %v13008_v17 = vld [vmem:[#allocation6 + $0xdc] sm:$0xf] }
 0x197   :  { %3867 = vmatpush.bf16.msra.mxu3 %v9000_v26  ;;  %3880 = vmatpush.bf16.msrb.mxu0 %v9384_v31  ;;  %v9863_v26 = vld [vmem:[#allocation6 + $0x798] sm:$0xf]  ;;  %v10248_v31 = vor.u32 %v13326_v24, %v10247_v23  ;;  %v13278_v24 = vld [vmem:[#allocation6 + $0x944] sm:$0xf0] }
 0x198   :  { %3843 = vmatpush.bf16.msra.mxu1 %v10052_v44  ;;  %v9864_v34 = vor.u32 %v13230_v27, %v9863_v26  ;;  %v10631_v44 = vld [vmem:[#allocation6 + $0xd98] sm:$0xf]  ;;  %v13164_v26 = vld [vmem:[#allocation6 + $0x5bc] sm:$0xf] }
 0x199   :  { %3856 = vmatpush.bf16.msra.mxu2 %v10436_v38  ;;  %v13314_v38 = vld [vmem:[#allocation6 + $0xa64] sm:$0xf0]  ;;  %v10055_v23 = vld [vmem:[#allocation6 + $0x918] sm:$0xf]  ;;  %v13260_v27 = vld [vmem:[#allocation6 + $0x8bc] sm:$0xf] }
 0x19a   :  { %v10200_v48 = vor.u32 %v13314_v38, %v10199_v36  ;;  %v10056_v36 = vor.u32 %v13278_v24, %v10055_v23  ;;  %v12996_v38 = vld [vmem:[#allocation6 + $0x7c] sm:$0xf]  ;;  %v9481_v23 = vld [vmem:[#allocation6 + $0x4c8] sm:$0xf0]  ;;  %v1051_v24 = vperm.slane %v14497_v19, 3 }
 0x19b   :  { %3868 = vmatpush.bf16.msra.mxu3 %v8952_v51  ;;  %3881 = vmatpush.bf16.msrb.mxu0 %v9336_v55  ;;  %v9433_v19 = vld [vmem:[#allocation6 + $0x468] sm:$0xf0] }
 0x19c   :  { %3888 = vmatpush.bf16.msrb.mxu1 %v10008_v50  ;;  %3857 = vmatmul.bf16.vlgmr.msra.gmra.mxu2 %v14480_v58  ;;  %v9097_v50 = vld [vmem:[#allocation6 + $0x1c8] sm:$0xf0] }
 0x19d   :  { %3901 = vmatpush.bf16.msrb.mxu2 %v10392_v46  ;;  %3844 = vmatmul.bf16.vlgmr.msra.gmra.mxu1 %v14472_v43  ;;  %v13422_v46 = vld [vmem:[#allocation6 + $0xdc4] sm:$0xf0]  ;;  %v3637_v47 = vpop.f32.mrf.mxu1  ;;  %v9100_v60 = vor.u32 %v13032_v49, %v9097_v50  ;;  %v9577_v49 = vld [vmem:[#allocation6 + $0x588] sm:$0xf0]  ;;  %v13248_v50 = vld [vmem:[#allocation6 + $0x85c] sm:$0xf] }
 0x19e   :  { %v3638_v51 = vadd.f32 %v3637_v47, %v14516_v54  ;;  %v10632_v55 = vor.u32 %v13422_v46, %v10631_v44  ;;  %v10103_v54 = vld [vmem:[#allocation6 + $0x978] sm:$0xf]  ;;  %v13152_v44 = vld [vmem:[#allocation6 + $0x55c] sm:$0xf] }
 0x19f   :  { %3869 = vmatpush.bf16.msra.mxu3 %v8904_v5  ;;  %3882 = vmatpush.bf16.msrb.mxu0 %v9288_v8  ;;  %v3650_v2 = vpop.f32.mrf.mxu2  ;;  %v13290_v5 = vld [vmem:[#allocation6 + $0x9a4] sm:$0xf0]  ;;  %v14525_v7 = vpop.f32.mrf.mxu0  ;;  %v9719_v8 = vld [vmem:[#allocation6 + $0x678] sm:$0xf] }
 0x1a0   :  { %3889 = vmatpush.bf16.msrb.mxu1 %v9960_v4  ;;  %v9768_v4 = vor.u32 %v13206_v57, %v9767_v56  ;;  %v3651_v6 = vadd.f32 %v3650_v2, %v3638_v51  ;;  %v10104_v16 = vor.u32 %v13290_v5, %v10103_v54  ;;  %v9961_v51 = vld [vmem:[#allocation6 + $0x888] sm:$0xf0]  ;;  %v13356_v57 = vld [vmem:[#allocation6 + $0xbbc] sm:$0xf] }
 0x1a1   :  { %3902 = vmatpush.bf16.msrb.mxu2 %v10344_v0  ;;  %v13020_v0 = vld [vmem:[#allocation6 + $0x13c] sm:$0xf]  ;;  %v8905_v56 = vld [vmem:[#allocation6 + $0x48] sm:$0xf0]  ;;  %v9964_v62 = vor.u32 %v13248_v50, %v9961_v51 }
 0x1a2   :  { %3870 = vmatmul.bf16.vlgmr.msra.gmra.mxu3 %v14463_v10  ;;  %3883 = vmatmul.bf16.vlgmr.msrb.gmra.mxu0 %v14466_v15  ;;  %v9052_v11 = vor.u32 %v13020_v0, %v9049_v1  ;;  %v9580_v0 = vor.u32 %v13152_v44, %v9577_v49  ;;  %v10440_v1 = vor.u32 %v13374_v35, %v10439_v53  ;;  %v13236_v2 = vld [vmem:[#allocation6 + $0x7fc] sm:$0xf] }
 0x1a3   :  { %3914 = vmatpush.bf16.msrb.mxu3 %v10776_v9  ;;  %3927 = vmatpush.bf16.msra.mxu0 %v9244_v13  ;;  %v13194_v9 = vld [vmem:[#allocation6 + $0x6a4] sm:$0xf0]  ;;  %v13200_v51 = vld [vmem:[#allocation6 + $0x6dc] sm:$0xf] }
 0x1a4   :  { %3890 = vmatpush.bf16.msrb.mxu1 %v9912_v22  ;;  %v13398_v13 = vld [vmem:[#allocation6 + $0xd04] sm:$0xf0]  ;;  %v9720_v21 = vor.u32 %v13194_v9, %v9719_v8  ;;  %v9529_v8 = vld [vmem:[#allocation6 + $0x528] sm:$0xf0]  ;;  %v13104_v35 = vld [vmem:[#allocation6 + $0x3dc] sm:$0xf] }
 0x1a5   :  { %3903 = vmatpush.bf16.msrb.mxu2 %v10296_v18  ;;  %v3639_v14 = vpop.f32.mrf.mxu1  ;;  %v9001_v18 = vld [vmem:[#allocation6 + $0x108] sm:$0xf0]  ;;  %v13182_v22 = vld [vmem:[#allocation6 + $0x644] sm:$0xf0]  ;;  %v3663_v29 = vpop.f32.mrf.mxu3 }
 0x1a6   :  { %v9004_v30 = vor.u32 %v13008_v17, %v9001_v18  ;;  %v9672_v42 = vor.u32 %v13182_v22, %v9671_v20  ;;  %v13440_v14 = vld [vmem:[#allocation6 + $0xe5c] sm:$0xf]  ;;  %v9865_v20 = vld [vmem:[#allocation6 + $0x7c8] sm:$0xf0] }
 0x1a7   :  { %3915 = vmatpush.bf16.msrb.mxu3 %v10728_v25  ;;  %3928 = vmatpush.bf16.msra.mxu0 %v9196_v28  ;;  %v10536_v25 = vor.u32 %v13398_v13, %v10535_v12  ;;  %v10009_v28 = vld [vmem:[#allocation6 + $0x8e8] sm:$0xf0]  ;;  %v3652_v41 = vpop.f32.mrf.mxu2  ;;  %v3678_v46 = vpop.f32.mrf.mxu0  ;;  %v13224_v18 = vld [vmem:[#allocation6 + $0x79c] sm:$0xf] }
 0x1a8   :  { %3891 = vmatpush.bf16.msrb.mxu1 %v9864_v34  ;;  %v14527_v34 = vadd.f32 %v3663_v29, %v3651_v6  ;;  %v10345_v12 = vld [vmem:[#allocation6 + $0xb88] sm:$0xf0]  ;;  %v13128_v22 = vld [vmem:[#allocation6 + $0x49c] sm:$0xf] }
 0x1a9   :  { %3904 = vmatpush.bf16.msrb.mxu2 %v10248_v31  ;;  %v9625_v31 = vld [vmem:[#allocation6 + $0x5e8] sm:$0xf0]  ;;  %v13428_v29 = vld [vmem:[#allocation6 + $0xdfc] sm:$0xf] }
 0x1aa   :  { %v9628_v47 = vor.u32 %v13164_v26, %v9625_v31  ;;  %v13332_v26 = vld [vmem:[#allocation6 + $0xafc] sm:$0xf]  ;;  %v9484_v31 = vor.u32 %v13128_v22, %v9481_v23  ;;  %v9673_v22 = vld [vmem:[#allocation6 + $0x648] sm:$0xf0] }
 0x1ab   :  { %3916 = vmatpush.bf16.msrb.mxu3 %v10680_v39  ;;  %3929 = vmatpush.bf16.msra.mxu0 %v9148_v59  ;;  %v8953_v39 = vld [vmem:[#allocation6 + $0xa8] sm:$0xf0]  ;;  %v10012_v59 = vor.u32 %v13260_v27, %v10009_v28  ;;  %v9868_v28 = vor.u32 %v13224_v18, %v9865_v20 }
 0x1ac   :  { %3892 = vmatpush.bf16.msrb.mxu1 %v9816_v52  ;;  %v8956_v52 = vor.u32 %v12996_v38, %v8953_v39  ;;  %v10297_v27 = vld [vmem:[#allocation6 + $0xb28] sm:$0xf0]  ;;  %v13116_v38 = vld [vmem:[#allocation6 + $0x43c] sm:$0xf]  ;;  %v3677_v39 = vadd.f32 %v14525_v7, %v1051_v24  ;;  %v9247_v24 = vld [vmem:[#allocation6 + $0x2c0] sm:$0xf] }
 0x1ad   :  { %3905 = vmatpush.bf16.msrb.mxu2 %v10200_v48  ;;  %v10488_v48 = vor.u32 %v13386_v33, %v10487_v32  ;;  %v3665_v54 = vpop.f32.mrf.mxu3  ;;  %v13212_v32 = vld [vmem:[#allocation6 + $0x73c] sm:$0xf]  ;;  %v9817_v33 = vld [vmem:[#allocation6 + $0x768] sm:$0xf0]  ;;  %v9436_v50 = vor.u32 %v13116_v38, %v9433_v19 }
 0x1ae   :  { %v9820_v46 = vor.u32 %v13212_v32, %v9817_v33  ;;  %v9289_v20 = vld [vmem:[#allocation6 + $0x348] sm:$0xf0] }
 0x1af   :  { %3917 = vmatpush.bf16.msrb.mxu3 %v10632_v55  ;;  %3930 = vmatpush.bf16.msra.mxu0 %v9100_v60  ;;  %v12984_v55 = vld [vmem:[#allocation6 + $0x1c] sm:$0xf]  ;;  %v10393_v60 = vld [vmem:[#allocation6 + $0xbe8] sm:$0xf0] }
 0x1b0   :  { %3893 = vmatpush.bf16.msrb.mxu1 %v9768_v4  ;;  %v9913_v4 = vld [vmem:[#allocation6 + $0x828] sm:$0xf0]  ;;  %v8908_v5 = vor.u32 %v12984_v55, %v8905_v56  ;;  %v10396_v6 = vor.u32 %v13356_v57, %v10393_v60  ;;  %v13308_v56 = vld [vmem:[#allocation6 + $0xa3c] sm:$0xf] }
 0x1b1   :  { %3906 = vmatpush.bf16.msrb.mxu2 %v10152_v45  ;;  %v10777_v45 = vld [vmem:[#allocation6 + $0xee8] sm:$0xf0]  ;;  %v9916_v13 = vor.u32 %v13236_v2, %v9913_v4 }
 0x1b2   :  { %v10780_v9 = vor.u32 %v13452_v63, %v10777_v45  ;;  %v9385_v55 = vld [vmem:[#allocation6 + $0x408] sm:$0xf0] }
 0x1b3   :  { %3918 = vmatpush.bf16.msrb.mxu3 %v10584_v3  ;;  %3931 = vmatpush.bf16.msra.mxu0 %v9052_v11  ;;  %v13140_v3 = vld [vmem:[#allocation6 + $0x4fc] sm:$0xf]  ;;  %v10201_v57 = vld [vmem:[#allocation6 + $0xa68] sm:$0xf0] }
 0x1b4   :  { %3894 = vmatpush.bf16.msrb.mxu1 %v9720_v21  ;;  %v13344_v11 = vld [vmem:[#allocation6 + $0xb5c] sm:$0xf]  ;;  %v9532_v17 = vor.u32 %v13140_v3, %v9529_v8  ;;  %v10585_v63 = vld [vmem:[#allocation6 + $0xd68] sm:$0xf0] }
 0x1b5   :  { %3907 = vmatpush.bf16.msrb.mxu2 %v10104_v16  ;;  %v10729_v16 = vld [vmem:[#allocation6 + $0xe88] sm:$0xf0]  ;;  %v10348_v21 = vor.u32 %v13344_v11, %v10345_v12 }
 0x1b6   :  { %v9721_v2 = vld [vmem:[#allocation6 + $0x6a8] sm:$0xf0] }
 0x1b7   :  { %3919 = vmatpush.bf16.msrb.mxu3 %v10536_v25  ;;  %3932 = vmatpush.bf16.msra.mxu0 %v9004_v30  ;;  %v10732_v25 = vor.u32 %v13440_v14, %v10729_v16  ;;  %v10681_v30 = vld [vmem:[#allocation6 + $0xe28] sm:$0xf0]  ;;  %v13392_v14 = vld [vmem:[#allocation6 + $0xcdc] sm:$0xf] }
 0x1b8   :  { %3895 = vmatpush.bf16.msrb.mxu1 %v9672_v42  ;;  %v10684_v41 = vor.u32 %v13428_v29, %v10681_v30  ;;  %v13320_v42 = vld [vmem:[#allocation6 + $0xa9c] sm:$0xf]  ;;  %v9337_v3 = vld [vmem:[#allocation6 + $0x3a8] sm:$0xf0]  ;;  %v13075_v29 = vld [vmem:[#allocation6 + $0x2ec] sm:$0xf0] }
 0x1b9   :  { %3908 = vmatpush.bf16.msrb.mxu2 %v10056_v36  ;;  %v10300_v36 = vor.u32 %v13332_v26, %v10297_v27  ;;  %v10153_v11 = vld [vmem:[#allocation6 + $0xa08] sm:$0xf0]  ;;  %v13171_v26 = vld [vmem:[#allocation6 + $0x5ec] sm:$0xf0]  ;;  %v13284_v30 = vld [vmem:[#allocation6 + $0x97c] sm:$0xf] }
 0x1ba   :  { %v3689_v44 = vpop.f32.mrf.mxu1  ;;  %v10537_v16 = vld [vmem:[#allocation6 + $0xd08] sm:$0xf0] }
 0x1bb   :  { %3920 = vmatpush.bf16.msrb.mxu3 %v10488_v48  ;;  %3933 = vmatpush.bf16.msra.mxu0 %v8956_v52  ;;  %v10633_v48 = vld [vmem:[#allocation6 + $0xdc8] sm:$0xf0]  ;;  %v3690_v49 = vadd.f32 %v3689_v44, %v3677_v39 }
 0x1bc   :  { %3940 = vmatpush.bf16.msra.mxu1 %v9628_v47  ;;  %3909 = vmatmul.bf16.vlgmr.msrb.gmra.mxu2 %v14472_v43  ;;  %v13416_v47 = vld [vmem:[#allocation6 + $0xd9c] sm:$0xf]  ;;  %v9769_v52 = vld [vmem:[#allocation6 + $0x708] sm:$0xf0] }
 0x1bd   :  { %3953 = vmatpush.bf16.msra.mxu2 %v10012_v59  ;;  %3896 = vmatmul.bf16.vlgmr.msrb.gmra.mxu1 %v14470_v37  ;;  %v10249_v59 = vld [vmem:[#allocation6 + $0xac8] sm:$0xf0]  ;;  %v10636_v7 = vor.u32 %v13416_v47, %v10633_v48  ;;  %v9772_v60 = vor.u32 %v13200_v51, %v9769_v52  ;;  %v13063_v48 = vld [vmem:[#allocation6 + $0x28c] sm:$0xf0]  ;;  %v13272_v52 = vld [vmem:[#allocation6 + $0x91c] sm:$0xf] }
 0x1be   :  { %v10252_v53 = vor.u32 %v13320_v42, %v10249_v59  ;;  %v10489_v38 = vld [vmem:[#allocation6 + $0xca8] sm:$0xf0]  ;;  %v9199_v42 = vld [vmem:[#allocation6 + $0x260] sm:$0xf] }
 0x1bf   :  { %3921 = vmatpush.bf16.msrb.mxu3 %v10440_v1  ;;  %3934 = vmatpush.bf16.msra.mxu0 %v8908_v5  ;;  %v3702_v45 = vpop.f32.mrf.mxu2  ;;  %v13188_v1 = vld [vmem:[#allocation6 + $0x67c] sm:$0xf]  ;;  %v3728_v54 = vpop.f32.mrf.mxu0  ;;  %v10204_v5 = vor.u32 %v13308_v56, %v10201_v57  ;;  %v13267_v56 = vld [vmem:[#allocation6 + $0x8ec] sm:$0xf0] }
 0x1c0   :  { %3941 = vmatpush.bf16.msra.mxu1 %v9580_v0  ;;  %v9388_v0 = vor.u32 %v13104_v35, %v9385_v55  ;;  %v3703_v4 = vadd.f32 %v3702_v45, %v3690_v49  ;;  %v9583_v49 = vld [vmem:[#allocation6 + $0x560] sm:$0xf]  ;;  %v13368_v35 = vld [vmem:[#allocation6 + $0xc1c] sm:$0xf]  ;;  %v10441_v55 = vld [vmem:[#allocation6 + $0xc48] sm:$0xf0] }
 0x1c1   :  { %3954 = vmatpush.bf16.msra.mxu2 %v9964_v62  ;;  %v13404_v62 = vld [vmem:[#allocation6 + $0xd3c] sm:$0xf] }
 0x1c2   :  { %3922 = vmatmul.bf16.vlgmr.msrb.gmra.mxu3 %v14480_v58  ;;  %3935 = vmatmul.bf16.vlgmr.msra.gmra.mxu0 %v14463_v10  ;;  %v10588_v8 = vor.u32 %v13404_v62, %v10585_v63  ;;  %v3691_v12 = vpop.f32.mrf.mxu1  ;;  %v13363_v62 = vld [vmem:[#allocation6 + $0xbec] sm:$0xf0]  ;;  %v9200_v63 = vor.u32 %v13063_v48, %v9199_v42 }
 0x1c3   :  { %3966 = vmatpush.bf16.msra.mxu3 %v10396_v6  ;;  %3979 = vmatpush.bf16.msrb.mxu0 %v10780_v9  ;;  %v13092_v6 = vld [vmem:[#allocation6 + $0x37c] sm:$0xf]  ;;  %v10351_v12 = vld [vmem:[#allocation6 + $0xb60] sm:$0xf] }
 0x1c4   :  { %3942 = vmatpush.bf16.msra.mxu1 %v9532_v17  ;;  %v13296_v9 = vld [vmem:[#allocation6 + $0x9dc] sm:$0xf]  ;;  %v9340_v18 = vor.u32 %v13092_v6, %v9337_v3  ;;  %v13051_v6 = vld [vmem:[#allocation6 + $0x22c] sm:$0xf0] }
 0x1c5   :  { %3955 = vmatpush.bf16.msra.mxu2 %v9916_v13  ;;  %v9724_v13 = vor.u32 %v13188_v1, %v9721_v2  ;;  %v13080_v17 = vld [vmem:[#allocation6 + $0x31c] sm:$0xf]  ;;  %v10156_v23 = vor.u32 %v13296_v9, %v10153_v11  ;;  %v3715_v27 = vpop.f32.mrf.mxu3  ;;  %v13147_v1 = vld [vmem:[#allocation6 + $0x52c] sm:$0xf0] }
 0x1c6   :  { %v3716_v32 = vadd.f32 %v3715_v27, %v3703_v4  ;;  %v9292_v39 = vor.u32 %v13080_v17, %v9289_v20  ;;  %v10444_v4 = vor.u32 %v13368_v35, %v10441_v55  ;;  %v13255_v9 = vld [vmem:[#allocation6 + $0x88c] sm:$0xf0]  ;;  %v9103_v20 = vld [vmem:[#allocation6 + $0x1a0] sm:$0xf] }
 0x1c7   :  { %3967 = vmatpush.bf16.msra.mxu3 %v10348_v21  ;;  %3980 = vmatpush.bf16.msrb.mxu0 %v10732_v25  ;;  %v13176_v21 = vld [vmem:[#allocation6 + $0x61c] sm:$0xf]  ;;  %v9631_v25 = vld [vmem:[#allocation6 + $0x5c0] sm:$0xf]  ;;  %v3704_v19 = vpop.f32.mrf.mxu2  ;;  %v3730_v44 = vpop.f32.mrf.mxu0  ;;  %v13135_v17 = vld [vmem:[#allocation6 + $0x4cc] sm:$0xf0] }
 0x1c8   :  { %3943 = vmatpush.bf16.msra.mxu1 %v9484_v31  ;;  %v10105_v31 = vld [vmem:[#allocation6 + $0x9a8] sm:$0xf0]  ;;  %v9676_v33 = vor.u32 %v13176_v21, %v9673_v22  ;;  %v14535_v59 = vadd.f32 %v3728_v54, %v3716_v32  ;;  %v13039_v21 = vld [vmem:[#allocation6 + $0x1cc] sm:$0xf0]  ;;  %v9055_v32 = vld [vmem:[#allocation6 + $0x140] sm:$0xf] }
 0x1c9   :  { %3956 = vmatpush.bf16.msra.mxu2 %v9868_v28  ;;  %v10540_v28 = vor.u32 %v13392_v14, %v10537_v16  ;;  %v10108_v47 = vor.u32 %v13284_v30, %v10105_v31  ;;  %v9487_v16 = vld [vmem:[#allocation6 + $0x4a0] sm:$0xf]  ;;  %v13339_v27 = vld [vmem:[#allocation6 + $0xb2c] sm:$0xf0] }
 0x1ca   :  { %v13123_v30 = vld [vmem:[#allocation6 + $0x46c] sm:$0xf0]  ;;  %v9823_v55 = vld [vmem:[#allocation6 + $0x740] sm:$0xf] }
 0x1cb   :  { %3968 = vmatpush.bf16.msra.mxu3 %v10300_v36  ;;  %3981 = vmatpush.bf16.msrb.mxu0 %v10684_v41  ;;  %v13380_v36 = vld [vmem:[#allocation6 + $0xc7c] sm:$0xf]  ;;  %v9632_v41 = vor.u32 %v13171_v26, %v9631_v25  ;;  %v9488_v25 = vor.u32 %v13135_v17, %v9487_v16  ;;  %v10303_v26 = vld [vmem:[#allocation6 + $0xb00] sm:$0xf]  ;;  %v13231_v19 = vld [vmem:[#allocation6 + $0x7cc] sm:$0xf0] }
 0x1cc   :  { %3944 = vmatpush.bf16.msra.mxu1 %v9436_v50  ;;  %v13159_v50 = vld [vmem:[#allocation6 + $0x58c] sm:$0xf0]  ;;  %v10492_v51 = vor.u32 %v13380_v36, %v10489_v38  ;;  %v10304_v36 = vor.u32 %v13339_v27, %v10303_v26  ;;  %v9871_v38 = vld [vmem:[#allocation6 + $0x7a0] sm:$0xf] }
 0x1cd   :  { %3957 = vmatpush.bf16.msra.mxu2 %v9820_v46  ;;  %v9248_v46 = vor.u32 %v13075_v29, %v9247_v24  ;;  %v9584_v57 = vor.u32 %v13159_v50, %v9583_v49  ;;  %v3717_v2 = vpop.f32.mrf.mxu3  ;;  %v13243_v24 = vld [vmem:[#allocation6 + $0x82c] sm:$0xf0]  ;;  %v9439_v29 = vld [vmem:[#allocation6 + $0x440] sm:$0xf] }
 0x1ce   :  { %v9440_v44 = vor.u32 %v13123_v30, %v9439_v29  ;;  %v9391_v49 = vld [vmem:[#allocation6 + $0x3e0] sm:$0xf]  ;;  %v13111_v50 = vld [vmem:[#allocation6 + $0x40c] sm:$0xf0] }
 0x1cf   :  { %3969 = vmatpush.bf16.msra.mxu3 %v10252_v53  ;;  %3982 = vmatpush.bf16.msrb.mxu0 %v10636_v7  ;;  %v10057_v53 = vld [vmem:[#allocation6 + $0x948] sm:$0xf0]  ;;  %v10015_v7 = vld [vmem:[#allocation6 + $0x8c0] sm:$0xf]  ;;  %v13195_v30 = vld [vmem:[#allocation6 + $0x6ac] sm:$0xf0] }
 0x1d0   :  { %3945 = vmatpush.bf16.msra.mxu1 %v9388_v0  ;;  %v10060_v45 = vor.u32 %v13272_v52, %v10057_v53  ;;  %v9535_v0 = vld [vmem:[#allocation6 + $0x500] sm:$0xf]  ;;  %v10016_v54 = vor.u32 %v13267_v56, %v10015_v7  ;;  %v13015_v53 = vld [vmem:[#allocation6 + $0x10c] sm:$0xf0] }
 0x1d1   :  { %3958 = vmatpush.bf16.msra.mxu2 %v9772_v60  ;;  %v10399_v60 = vld [vmem:[#allocation6 + $0xbc0] sm:$0xf]  ;;  %v9536_v11 = vor.u32 %v13147_v1, %v9535_v0  ;;  %v13219_v7 = vld [vmem:[#allocation6 + $0x76c] sm:$0xf0] }
 0x1d2   :  { %v10400_v3 = vor.u32 %v13363_v62, %v10399_v60  ;;  %v9007_v52 = vld [vmem:[#allocation6 + $0xe0] sm:$0xf]  ;;  %v13315_v62 = vld [vmem:[#allocation6 + $0xa6c] sm:$0xf0] }
 0x1d3   :  { %3970 = vmatpush.bf16.msra.mxu3 %v10204_v5  ;;  %3983 = vmatpush.bf16.msrb.mxu0 %v10588_v8  ;;  %v9151_v5 = vld [vmem:[#allocation6 + $0x200] sm:$0xf]  ;;  %v13099_v1 = vld [vmem:[#allocation6 + $0x3ac] sm:$0xf0] }
 0x1d4   :  { %3946 = vmatpush.bf16.msra.mxu1 %v9340_v18  ;;  %v9967_v8 = vld [vmem:[#allocation6 + $0x860] sm:$0xf]  ;;  %v9152_v14 = vor.u32 %v13051_v6, %v9151_v5  ;;  %v13003_v6 = vld [vmem:[#allocation6 + $0xac] sm:$0xf0] }
 0x1d5   :  { %3959 = vmatpush.bf16.msra.mxu2 %v9724_v13  ;;  %v13351_v13 = vld [vmem:[#allocation6 + $0xb8c] sm:$0xf0]  ;;  %v9968_v18 = vor.u32 %v13255_v9, %v9967_v8  ;;  %v10207_v60 = vld [vmem:[#allocation6 + $0xa40] sm:$0xf] }
 0x1d6   :  { %v10352_v22 = vor.u32 %v13351_v13, %v10351_v12  ;;  %v9343_v0 = vld [vmem:[#allocation6 + $0x380] sm:$0xf]  ;;  %v13207_v9 = vld [vmem:[#allocation6 + $0x70c] sm:$0xf0] }
 0x1d7   :  { %3971 = vmatpush.bf16.msra.mxu3 %v10156_v23  ;;  %3984 = vmatpush.bf16.msrb.mxu0 %v10540_v28  ;;  %v9919_v23 = vld [vmem:[#allocation6 + $0x800] sm:$0xf]  ;;  %v9104_v28 = vor.u32 %v13039_v21, %v9103_v20  ;;  %v9344_v12 = vor.u32 %v13099_v1, %v9343_v0  ;;  %v13087_v21 = vld [vmem:[#allocation6 + $0x34c] sm:$0xf0]  ;;  %v13045_v1 = vld [vmem:[#allocation6 + $0x204] sm:$0xf] }
 0x1d8   :  { %3947 = vmatpush.bf16.msra.mxu1 %v9292_v39  ;;  %v9920_v31 = vor.u32 %v13243_v24, %v9919_v23  ;;  %v14541_v39 = vld [vmem:[#allocation7] sm:$0xff] }
 0x1d9   :  { %3960 = vmatpush.bf16.msra.mxu2 %v9676_v33  ;;  %v13027_v33 = vld [vmem:[#allocation6 + $0x16c] sm:$0xf0]  ;;  %v8959_v5 = vld [vmem:[#allocation6 + $0x80] sm:$0xf]  ;;  %v13069_v24 = vld [vmem:[#allocation6 + $0x2c4] sm:$0xf] }
 0x1da   :  { %v3741_v42 = vpop.f32.mrf.mxu1  ;;  %v9056_v48 = vor.u32 %v13027_v33, %v9055_v32  ;;  %v9775_v8 = vld [vmem:[#allocation6 + $0x6e0] sm:$0xf]  ;;  %v8960_v17 = vor.u32 %v13003_v6, %v8959_v5 }
 0x1db   :  { %3972 = vmatpush.bf16.msra.mxu3 %v10108_v47  ;;  %3985 = vmatpush.bf16.msrb.mxu0 %v10492_v51  ;;  %v13327_v47 = vld [vmem:[#allocation6 + $0xacc] sm:$0xf0]  ;;  %v9872_v51 = vor.u32 %v13231_v19, %v9871_v38  ;;  %v10159_v13 = vld [vmem:[#allocation6 + $0x9e0] sm:$0xf] }
 0x1dc   :  { %3992 = vmatpush.bf16.msrb.mxu1 %v9248_v46  ;;  %3961 = vmatmul.bf16.vlgmr.msra.gmra.mxu2 %v14470_v37  ;;  %v10255_v46 = vld [vmem:[#allocation6 + $0xaa0] sm:$0xf] }
 0x1dd   :  { %4005 = vmatpush.bf16.msrb.mxu2 %v9632_v41  ;;  %3948 = vmatmul.bf16.vlgmr.msra.gmra.mxu1 %v14466_v15  ;;  %v1052_v41 = vperm.slane %v14541_v39, 4  ;;  %v10256_v35 = vor.u32 %v13327_v47, %v10255_v46  ;;  %v8911_v16 = vld [vmem:[#allocation6 + $0x20] sm:$0xf] }
 0x1de   :  { %v9295_v20 = vld [vmem:[#allocation6 + $0x320] sm:$0xf] }
 0x1df   :  { %3973 = vmatpush.bf16.msra.mxu3 %v10060_v45  ;;  %3986 = vmatpush.bf16.msrb.mxu0 %v10444_v4  ;;  %v3742_v56 = vadd.f32 %v3741_v42, %v1052_v41  ;;  %v9008_v45 = vor.u32 %v13015_v53, %v9007_v52  ;;  %v3780_v4 = vpop.f32.mrf.mxu0  ;;  %v10783_v23 = vld [vmem:[#allocation6 + $0xec0] sm:$0xf]  ;;  %v9296_v32 = vor.u32 %v13087_v21, %v9295_v20 }
 0x1e0   :  { %3993 = vmatpush.bf16.msrb.mxu1 %v9200_v63  ;;  %v3754_v63 = vpop.f32.mrf.mxu2  ;;  %v9727_v29 = vld [vmem:[#allocation6 + $0x680] sm:$0xf] }
 0x1e1   :  { %4006 = vmatpush.bf16.msrb.mxu2 %v9584_v57  ;;  %v9392_v57 = vor.u32 %v13111_v50, %v9391_v49  ;;  %v3755_v2 = vadd.f32 %v3754_v63, %v3742_v56  ;;  %v10111_v33 = vld [vmem:[#allocation6 + $0x980] sm:$0xf]  ;;  %v9728_v47 = vor.u32 %v13195_v30, %v9727_v29  ;;  %v13057_v49 = vld [vmem:[#allocation6 + $0x264] sm:$0xf]  ;;  %v9201_v50 = vld [vmem:[#allocation6 + $0x290] sm:$0xf0] }
 0x1e2   :  { %3974 = vmatmul.bf16.vlgmr.msra.gmra.mxu3 %v14472_v43  ;;  %3987 = vmatmul.bf16.vlgmr.msrb.gmra.mxu0 %v14480_v58  ;;  %v10735_v42 = vld [vmem:[#allocation6 + $0xe60] sm:$0xf]  ;;  %v13165_v56 = vld [vmem:[#allocation6 + $0x5c4] sm:$0xf]  ;;  %v10017_v63 = vld [vmem:[#allocation6 + $0x8f0] sm:$0xf0] }
 0x1e3   :  { %4018 = vmatpush.bf16.msrb.mxu3 %v10016_v54  ;;  %4031 = vmatpush.bf16.msra.mxu0 %v10400_v3  ;;  %v9824_v54 = vor.u32 %v13219_v7, %v9823_v55  ;;  %v10208_v3 = vor.u32 %v13315_v62, %v10207_v60  ;;  %v9679_v53 = vld [vmem:[#allocation6 + $0x620] sm:$0xf]  ;;  %v13279_v7 = vld [vmem:[#allocation6 + $0x94c] sm:$0xf0]  ;;  %v9204_v60 = vor.u32 %v13057_v49, %v9201_v50  ;;  %v13261_v62 = vld [vmem:[#allocation6 + $0x8c4] sm:$0xf] }
 0x1e4   :  { %3994 = vmatpush.bf16.msrb.mxu1 %v9152_v14  ;;  %v13303_v14 = vld [vmem:[#allocation6 + $0xa0c] sm:$0xf0]  ;;  %v10063_v55 = vld [vmem:[#allocation6 + $0x920] sm:$0xf]  ;;  %v13021_v30 = vld [vmem:[#allocation6 + $0x144] sm:$0xf] }
 0x1e5   :  { %4007 = vmatpush.bf16.msrb.mxu2 %v9536_v11  ;;  %v3743_v11 = vpop.f32.mrf.mxu1  ;;  %v3767_v26 = vpop.f32.mrf.mxu3  ;;  %v10160_v27 = vor.u32 %v13303_v14, %v10159_v13  ;;  %v10687_v6 = vld [vmem:[#allocation6 + $0xe00] sm:$0xf]  ;;  %v13249_v13 = vld [vmem:[#allocation6 + $0x864] sm:$0xf]  ;;  %v9969_v14 = vld [vmem:[#allocation6 + $0x890] sm:$0xf0] }
 0x1e6   :  { %v9585_v11 = vld [vmem:[#allocation6 + $0x590] sm:$0xf0]  ;;  %v10639_v21 = vld [vmem:[#allocation6 + $0xda0] sm:$0xf]  ;;  %v13009_v50 = vld [vmem:[#allocation6 + $0xe4] sm:$0xf] }
 0x1e7   :  { %4019 = vmatpush.bf16.msrb.mxu3 %v9968_v18  ;;  %4032 = vmatpush.bf16.msra.mxu0 %v10352_v22  ;;  %v12991_v18 = vld [vmem:[#allocation6 + $0x4c] sm:$0xf0]  ;;  %v9776_v22 = vor.u32 %v13207_v9, %v9775_v8  ;;  %v10020_v8 = vor.u32 %v13261_v62, %v10017_v63  ;;  %v13153_v9 = vld [vmem:[#allocation6 + $0x564] sm:$0xf]  ;;  %v9825_v63 = vld [vmem:[#allocation6 + $0x770] sm:$0xf0] }
 0x1e8   :  { %3995 = vmatpush.bf16.msrb.mxu1 %v9104_v28  ;;  %v13459_v28 = vld [vmem:[#allocation6 + $0xeec] sm:$0xf0]  ;;  %v3756_v38 = vpop.f32.mrf.mxu2  ;;  %v8912_v19 = vor.u32 %v12991_v18, %v8911_v16  ;;  %v9105_v18 = vld [vmem:[#allocation6 + $0x1d0] sm:$0xf0]  ;;  %v9588_v20 = vor.u32 %v13153_v9, %v9585_v11  ;;  %v13213_v62 = vld [vmem:[#allocation6 + $0x744] sm:$0xf] }
 0x1e9   :  { %4008 = vmatpush.bf16.msrb.mxu2 %v9488_v25  ;;  %v9249_v25 = vld [vmem:[#allocation6 + $0x2f0] sm:$0xf0]  ;;  %v10784_v46 = vor.u32 %v13459_v28, %v10783_v23  ;;  %v9972_v23 = vor.u32 %v13249_v13, %v9969_v14  ;;  %v13201_v13 = vld [vmem:[#allocation6 + $0x6e4] sm:$0xf] }
 0x1ea   :  { %v9252_v41 = vor.u32 %v13069_v24, %v9249_v25  ;;  %v13141_v24 = vld [vmem:[#allocation6 + $0x504] sm:$0xf]  ;;  %v9537_v25 = vld [vmem:[#allocation6 + $0x530] sm:$0xf0] }
 0x1eb   :  { %4020 = vmatpush.bf16.msrb.mxu3 %v9920_v31  ;;  %4033 = vmatpush.bf16.msra.mxu0 %v10304_v36  ;;  %v3768_v31 = vadd.f32 %v3767_v26, %v3755_v2  ;;  %v13291_v36 = vld [vmem:[#allocation6 + $0x9ac] sm:$0xf0]  ;;  %v9153_v2 = vld [vmem:[#allocation6 + $0x230] sm:$0xf0] }
 0x1ec   :  { %3996 = vmatpush.bf16.msrb.mxu1 %v9056_v48  ;;  %v13447_v48 = vld [vmem:[#allocation6 + $0xe8c] sm:$0xf0]  ;;  %v10112_v52 = vor.u32 %v13291_v36, %v10111_v33  ;;  %v9921_v28 = vld [vmem:[#allocation6 + $0x830] sm:$0xf0]  ;;  %v10591_v33 = vld [vmem:[#allocation6 + $0xd40] sm:$0xf] }
 0x1ed   :  { %4009 = vmatpush.bf16.msrb.mxu2 %v9440_v44  ;;  %v3782_v44 = vpop.f32.mrf.mxu0  ;;  %v13411_v36 = vld [vmem:[#allocation6 + $0xd6c] sm:$0xf0]  ;;  %v9393_v9 = vld [vmem:[#allocation6 + $0x410] sm:$0xf0] }
 0x1ee   :  { %v10592_v49 = vor.u32 %v13411_v36, %v10591_v33  ;;  %v9777_v14 = vld [vmem:[#allocation6 + $0x710] sm:$0xf0]  ;;  %v13189_v36 = vld [vmem:[#allocation6 + $0x684] sm:$0xf] }
 0x1ef   :  { %4021 = vmatpush.bf16.msrb.mxu3 %v9872_v51  ;;  %4034 = vmatpush.bf16.msra.mxu0 %v10256_v35  ;;  %v14544_v51 = vadd.f32 %v3780_v4, %v3768_v31  ;;  %v13183_v35 = vld [vmem:[#allocation6 + $0x64c] sm:$0xf0]  ;;  %v3769_v4 = vpop.f32.mrf.mxu3  ;;  %v9057_v31 = vld [vmem:[#allocation6 + $0x170] sm:$0xf0] }
 0x1f0   :  { %3997 = vmatpush.bf16.msrb.mxu1 %v9008_v45  ;;  %v10736_v45 = vor.u32 %v13447_v48, %v10735_v42  ;;  %v9680_v0 = vor.u32 %v13183_v35, %v9679_v53  ;;  %v9060_v44 = vor.u32 %v13021_v30, %v9057_v31  ;;  %v10543_v35 = vld [vmem:[#allocation6 + $0xce0] sm:$0xf]  ;;  %v13093_v30 = vld [vmem:[#allocation6 + $0x384] sm:$0xf]  ;;  %v9345_v31 = vld [vmem:[#allocation6 + $0x3b0] sm:$0xf0] }
 0x1f1   :  { %4010 = vmatpush.bf16.msrb.mxu2 %v9392_v57  ;;  %v9633_v57 = vld [vmem:[#allocation6 + $0x5f0] sm:$0xf0] }
 0x1f2   :  { %v9636_v5 = vor.u32 %v13165_v56, %v9633_v57  ;;  %v13117_v56 = vld [vmem:[#allocation6 + $0x444] sm:$0xf]  ;;  %v9441_v57 = vld [vmem:[#allocation6 + $0x470] sm:$0xf0] }
 0x1f3   :  { %4022 = vmatpush.bf16.msrb.mxu3 %v9824_v54  ;;  %4035 = vmatpush.bf16.msra.mxu0 %v10208_v3  ;;  %v10064_v54 = vor.u32 %v13279_v7, %v10063_v55  ;;  %v13435_v3 = vld [vmem:[#allocation6 + $0xe2c] sm:$0xf0] }
 0x1f4   :  { %3998 = vmatpush.bf16.msrb.mxu1 %v8960_v17  ;;  %v10688_v16 = vor.u32 %v13435_v3, %v10687_v6  ;;  %v13033_v17 = vld [vmem:[#allocation6 + $0x1a4] sm:$0xf]  ;;  %v13399_v55 = vld [vmem:[#allocation6 + $0xd0c] sm:$0xf0]  ;;  %v9828_v3 = vor.u32 %v13213_v62, %v9825_v63  ;;  %v9255_v62 = vld [vmem:[#allocation6 + $0x2c8] sm:$0xf] }
 0x1f5   :  { %4011 = vmatpush.bf16.msrb.mxu2 %v9344_v12  ;;  %v9156_v12 = vor.u32 %v13045_v1, %v9153_v2  ;;  %v9108_v26 = vor.u32 %v13033_v17, %v9105_v18  ;;  %v8961_v1 = vld [vmem:[#allocation6 + $0xb0] sm:$0xf0]  ;;  %v1053_v2 = vperm.slane %v14541_v39, 5  ;;  %v13387_v6 = vld [vmem:[#allocation6 + $0xcac] sm:$0xf0] }
 0x1f6   :  { %v13375_v18 = vld [vmem:[#allocation6 + $0xc4c] sm:$0xf0]  ;;  %v13076_v63 = vld [vmem:[#allocation6 + $0x2f4] sm:$0xf0] }
 0x1f7   :  { %4023 = vmatpush.bf16.msrb.mxu3 %v9776_v22  ;;  %4036 = vmatpush.bf16.msra.mxu0 %v10160_v27  ;;  %v13423_v22 = vld [vmem:[#allocation6 + $0xdcc] sm:$0xf0]  ;;  %v13237_v27 = vld [vmem:[#allocation6 + $0x804] sm:$0xf] }
 0x1f8   :  { %3999 = vmatpush.bf16.msrb.mxu1 %v8912_v19  ;;  %v10640_v29 = vor.u32 %v13423_v22, %v10639_v21  ;;  %v9924_v38 = vor.u32 %v13237_v27, %v9921_v28  ;;  %v13129_v19 = vld [vmem:[#allocation6 + $0x4a4] sm:$0xf]  ;;  %v8913_v21 = vld [vmem:[#allocation6 + $0x50] sm:$0xf0]  ;;  %v9780_v28 = vor.u32 %v13201_v13, %v9777_v14  ;;  %v13064_v13 = vld [vmem:[#allocation6 + $0x294] sm:$0xf0] }
 0x1f9   :  { %4012 = vmatpush.bf16.msrb.mxu2 %v9296_v32  ;;  %v9540_v32 = vor.u32 %v13141_v24, %v9537_v25  ;;  %v13357_v24 = vld [vmem:[#allocation6 + $0xbc4] sm:$0xf] }
 0x1fa   :  { %v3793_v42 = vpop.f32.mrf.mxu1  ;;  %v13453_v25 = vld [vmem:[#allocation6 + $0xec4] sm:$0xf] }
 0x1fb   :  { %4024 = vmatpush.bf16.msrb.mxu3 %v9728_v47  ;;  %4037 = vmatpush.bf16.msra.mxu0 %v10112_v52  ;;  %v9873_v47 = vld [vmem:[#allocation6 + $0x7d0] sm:$0xf0]  ;;  %v14551_v48 = vadd.f32 %v3793_v42, %v14544_v51  ;;  %v10544_v51 = vor.u32 %v13399_v55, %v10543_v35 }
 0x1fc   :  { %4044 = vmatpush.bf16.msra.mxu1 %v10784_v46  ;;  %4013 = vmatmul.bf16.vlgmr.msrb.gmra.mxu2 %v14466_v15  ;;  %v13225_v46 = vld [vmem:[#allocation6 + $0x7a4] sm:$0xf]  ;;  %v9009_v52 = vld [vmem:[#allocation6 + $0x110] sm:$0xf0] }
 0x1fd   :  { %4057 = vmatpush.bf16.msra.mxu2 %v9252_v41  ;;  %4000 = vmatmul.bf16.vlgmr.msrb.gmra.mxu1 %v14463_v10  ;;  %v9489_v41 = vld [vmem:[#allocation6 + $0x4d0] sm:$0xf0]  ;;  %v9876_v7 = vor.u32 %v13225_v46, %v9873_v47 }
 0x1fe   :  { %v9492_v53 = vor.u32 %v13129_v19, %v9489_v41 }
 0x1ff   :  { %4025 = vmatpush.bf16.msrb.mxu3 %v9680_v0  ;;  %4038 = vmatpush.bf16.msra.mxu0 %v10064_v54  ;;  %v12997_v0 = vld [vmem:[#allocation6 + $0x84] sm:$0xf]  ;;  %v3832_v4 = vpop.f32.mrf.mxu0  ;;  %v9444_v54 = vor.u32 %v13117_v56, %v9441_v57  ;;  %v9297_v56 = vld [vmem:[#allocation6 + $0x350] sm:$0xf0] }
 0x200   :  { %4045 = vmatpush.bf16.msra.mxu1 %v10736_v45  ;;  %v3806_v45 = vpop.f32.mrf.mxu2  ;;  %v13177_v57 = vld [vmem:[#allocation6 + $0x624] sm:$0xf] }
 0x201   :  { %4058 = vmatpush.bf16.msra.mxu2 %v9204_v60  ;;  %v9012_v60 = vor.u32 %v13009_v50, %v9009_v52  ;;  %v3807_v22 = vadd.f32 %v3806_v45, %v1053_v2  ;;  %v10353_v50 = vld [vmem:[#allocation6 + $0xb90] sm:$0xf0]  ;;  %v13441_v52 = vld [vmem:[#allocation6 + $0xe64] sm:$0xf] }
 0x202   :  { %4026 = vmatmul.bf16.vlgmr.msrb.gmra.mxu3 %v14470_v37  ;;  %4039 = vmatmul.bf16.vlgmr.msra.gmra.mxu0 %v14472_v43  ;;  %v3795_v11 = vpop.f32.mrf.mxu1 }
 0x203   :  { %4070 = vmatpush.bf16.msra.mxu3 %v9636_v5  ;;  %4083 = vmatpush.bf16.msrb.mxu0 %v10020_v8  ;;  %v10495_v5 = vld [vmem:[#allocation6 + $0xc80] sm:$0xf]  ;;  %v13105_v8 = vld [vmem:[#allocation6 + $0x3e4] sm:$0xf] }
 0x204   :  { %4046 = vmatpush.bf16.msra.mxu1 %v10688_v16  ;;  %v10447_v16 = vld [vmem:[#allocation6 + $0xc20] sm:$0xf]  ;;  %v10496_v17 = vor.u32 %v13387_v6, %v10495_v5 }
 0x205   :  { %4059 = vmatpush.bf16.msra.mxu2 %v9156_v12  ;;  %v8964_v12 = vor.u32 %v12997_v0, %v8961_v1  ;;  %v3819_v27 = vpop.f32.mrf.mxu3  ;;  %v10448_v41 = vor.u32 %v13375_v18, %v10447_v16  ;;  %v13172_v0 = vld [vmem:[#allocation6 + $0x5f4] sm:$0xf0]  ;;  %v9591_v16 = vld [vmem:[#allocation6 + $0x568] sm:$0xf] }
 0x207   :  { %4071 = vmatpush.bf16.msra.mxu3 %v9588_v20  ;;  %4084 = vmatpush.bf16.msrb.mxu0 %v9972_v23  ;;  %v12985_v20 = vld [vmem:[#allocation6 + $0x24] sm:$0xf]  ;;  %v9396_v23 = vor.u32 %v13105_v8, %v9393_v9  ;;  %v3834_v46 = vpop.f32.mrf.mxu0  ;;  %v10305_v9 = vld [vmem:[#allocation6 + $0xb30] sm:$0xf0] }
 0x208   :  { %4047 = vmatpush.bf16.msra.mxu1 %v10640_v29  ;;  %v10401_v29 = vld [vmem:[#allocation6 + $0xbf0] sm:$0xf0]  ;;  %v8916_v33 = vor.u32 %v12985_v20, %v8913_v21  ;;  %v3808_v19 = vpop.f32.mrf.mxu2  ;;  %v13333_v8 = vld [vmem:[#allocation6 + $0xb04] sm:$0xf] }
 0x209   :  { %4060 = vmatpush.bf16.msra.mxu2 %v9108_v26  ;;  %v10785_v26 = vld [vmem:[#allocation6 + $0xef0] sm:$0xf0]  ;;  %v10404_v47 = vor.u32 %v13357_v24, %v10401_v29  ;;  %v10308_v18 = vor.u32 %v13333_v8, %v10305_v9  ;;  %v13417_v20 = vld [vmem:[#allocation6 + $0xda4] sm:$0xf]  ;;  %v9543_v29 = vld [vmem:[#allocation6 + $0x508] sm:$0xf] }
 0x20a   :  { %v10788_v42 = vor.u32 %v13453_v25, %v10785_v26  ;;  %v10641_v21 = vld [vmem:[#allocation6 + $0xdd0] sm:$0xf0]  ;;  %v9159_v26 = vld [vmem:[#allocation6 + $0x208] sm:$0xf]  ;;  %v13285_v8 = vld [vmem:[#allocation6 + $0x984] sm:$0xf] }
 0x20b   :  { %4072 = vmatpush.bf16.msra.mxu3 %v9540_v32  ;;  %4085 = vmatpush.bf16.msrb.mxu0 %v9924_v38  ;;  %v3820_v32 = vadd.f32 %v3819_v27, %v3807_v22  ;;  %v9729_v38 = vld [vmem:[#allocation6 + $0x6b0] sm:$0xf0]  ;;  %v13052_v27 = vld [vmem:[#allocation6 + $0x234] sm:$0xf0] }
 0x20c   :  { %4048 = vmatpush.bf16.msra.mxu1 %v10592_v49  ;;  %v9348_v49 = vor.u32 %v13093_v30, %v9345_v31  ;;  %v9732_v55 = vor.u32 %v13189_v36, %v9729_v38  ;;  %v10257_v24 = vld [vmem:[#allocation6 + $0xad0] sm:$0xf0]  ;;  %v13148_v30 = vld [vmem:[#allocation6 + $0x534] sm:$0xf0]  ;;  %v9160_v36 = vor.u32 %v13052_v27, %v9159_v26  ;;  %v13309_v38 = vld [vmem:[#allocation6 + $0xa44] sm:$0xf] }
 0x20d   :  { %4061 = vmatpush.bf16.msra.mxu2 %v9060_v44  ;;  %v13345_v44 = vld [vmem:[#allocation6 + $0xb64] sm:$0xf]  ;;  %v14554_v35 = vadd.f32 %v3832_v4, %v3820_v32  ;;  %v3821_v5 = vpop.f32.mrf.mxu3  ;;  %v10209_v19 = vld [vmem:[#allocation6 + $0xa70] sm:$0xf0]  ;;  %v10023_v27 = vld [vmem:[#allocation6 + $0x8c8] sm:$0xf] }
 0x20e   :  { %v10356_v1 = vor.u32 %v13345_v44, %v10353_v50  ;;  %v13429_v4 = vld [vmem:[#allocation6 + $0xe04] sm:$0xf]  ;;  %v13040_v44 = vld [vmem:[#allocation6 + $0x1d4] sm:$0xf0]  ;;  %v10113_v9 = vld [vmem:[#allocation6 + $0x9b0] sm:$0xf0] }
 0x20f   :  { %4073 = vmatpush.bf16.msra.mxu3 %v9492_v53  ;;  %4086 = vmatpush.bf16.msrb.mxu0 %v9876_v7  ;;  %v10737_v53 = vld [vmem:[#allocation6 + $0xe90] sm:$0xf0]  ;;  %v13081_v7 = vld [vmem:[#allocation6 + $0x324] sm:$0xf]  ;;  %v13136_v50 = vld [vmem:[#allocation6 + $0x4d4] sm:$0xf0] }
 0x210   :  { %4049 = vmatpush.bf16.msra.mxu1 %v10544_v51  ;;  %v10740_v45 = vor.u32 %v13441_v52, %v10737_v53  ;;  %v9639_v51 = vld [vmem:[#allocation6 + $0x5c8] sm:$0xf]  ;;  %v9300_v2 = vor.u32 %v13081_v7, %v9297_v56  ;;  %v13405_v32 = vld [vmem:[#allocation6 + $0xd44] sm:$0xf]  ;;  %v10212_v53 = vor.u32 %v13309_v38, %v10209_v19  ;;  %v10545_v7 = vld [vmem:[#allocation6 + $0xd10] sm:$0xf0] }
 0x211   :  { %4062 = vmatpush.bf16.msra.mxu2 %v9012_v60  ;;  %v9681_v60 = vld [vmem:[#allocation6 + $0x650] sm:$0xf0]  ;;  %v9640_v11 = vor.u32 %v13172_v0, %v9639_v51  ;;  %v9447_v0 = vld [vmem:[#allocation6 + $0x448] sm:$0xf] }
 0x212   :  { %v9684_v6 = vor.u32 %v13177_v57, %v9681_v60  ;;  %v13297_v57 = vld [vmem:[#allocation6 + $0x9e4] sm:$0xf]  ;;  %v10161_v60 = vld [vmem:[#allocation6 + $0xa10] sm:$0xf0]  ;;  %v9351_v19 = vld [vmem:[#allocation6 + $0x388] sm:$0xf] }
 0x213   :  { %4074 = vmatpush.bf16.msra.mxu3 %v9444_v54  ;;  %4087 = vmatpush.bf16.msrb.mxu0 %v9828_v3  ;;  %v10689_v54 = vld [vmem:[#allocation6 + $0xe30] sm:$0xf0]  ;;  %v9256_v3 = vor.u32 %v13076_v63, %v9255_v62  ;;  %v9063_v63 = vld [vmem:[#allocation6 + $0x148] sm:$0xf] }
 0x214   :  { %4050 = vmatpush.bf16.msra.mxu1 %v10496_v17  ;;  %v10692_v14 = vor.u32 %v13429_v4, %v10689_v54  ;;  %v13160_v17 = vld [vmem:[#allocation6 + $0x594] sm:$0xf0]  ;;  %v10164_v4 = vor.u32 %v13297_v57, %v10161_v60  ;;  %v10497_v54 = vld [vmem:[#allocation6 + $0xcb0] sm:$0xf0]  ;;  %v8919_v60 = vld [vmem:[#allocation6 + $0x28] sm:$0xf] }
 0x215   :  { %4063 = vmatpush.bf16.msra.mxu2 %v8964_v12  ;;  %v9207_v12 = vld [vmem:[#allocation6 + $0x268] sm:$0xf]  ;;  %v9592_v25 = vor.u32 %v13160_v17, %v9591_v16 }
 0x216   :  { %v9208_v22 = vor.u32 %v13064_v13, %v9207_v12  ;;  %v1054_v12 = vperm.slane %v14541_v39, 6  ;;  %v9015_v13 = vld [vmem:[#allocation6 + $0xe8] sm:$0xf] }
 0x217   :  { %4075 = vmatpush.bf16.msra.mxu3 %v9396_v23  ;;  %4088 = vmatpush.bf16.msrb.mxu0 %v9780_v28  ;;  %v13321_v23 = vld [vmem:[#allocation6 + $0xaa4] sm:$0xf]  ;;  %v10644_v28 = vor.u32 %v13417_v20, %v10641_v21  ;;  %v13112_v20 = vld [vmem:[#allocation6 + $0x414] sm:$0xf0] }
 0x218   :  { %4051 = vmatpush.bf16.msra.mxu1 %v10448_v41  ;;  %v10260_v31 = vor.u32 %v13321_v23, %v10257_v24  ;;  %v9544_v41 = vor.u32 %v13148_v30, %v9543_v29  ;;  %v13273_v21 = vld [vmem:[#allocation6 + $0x924] sm:$0xf]  ;;  %v10065_v23 = vld [vmem:[#allocation6 + $0x950] sm:$0xf0]  ;;  %v13364_v29 = vld [vmem:[#allocation6 + $0xbf4] sm:$0xf0] }
 0x219   :  { %4064 = vmatpush.bf16.msra.mxu2 %v8916_v33  ;;  %v10593_v33 = vld [vmem:[#allocation6 + $0xd70] sm:$0xf0]  ;;  %v13369_v24 = vld [vmem:[#allocation6 + $0xc24] sm:$0xf] }
 0x21a   :  { %v3845_v46 = vpop.f32.mrf.mxu1 }
 0x21b   :  { %4076 = vmatpush.bf16.msra.mxu3 %v9348_v49  ;;  %4089 = vmatpush.bf16.msrb.mxu0 %v9732_v55  ;;  %v9495_v49 = vld [vmem:[#allocation6 + $0x4a8] sm:$0xf]  ;;  %v3846_v52 = vadd.f32 %v3845_v46, %v14554_v35  ;;  %v13393_v55 = vld [vmem:[#allocation6 + $0xce4] sm:$0xf] }
 0x21c   :  { %4096 = vmatpush.bf16.msrb.mxu1 %v10404_v47  ;;  %4065 = vmatmul.bf16.vlgmr.msra.gmra.mxu2 %v14463_v10  ;;  %v10596_v47 = vor.u32 %v13405_v32, %v10593_v33  ;;  %v9496_v62 = vor.u32 %v13136_v50, %v9495_v49  ;;  %v10548_v51 = vor.u32 %v13393_v55, %v10545_v7  ;;  %v13381_v35 = vld [vmem:[#allocation6 + $0xc84] sm:$0xf]  ;;  %v8967_v32 = vld [vmem:[#allocation6 + $0x88] sm:$0xf]  ;;  %v13004_v33 = vld [vmem:[#allocation6 + $0xb4] sm:$0xf0] }
 0x21d   :  { %4109 = vmatpush.bf16.msrb.mxu2 %v10788_v42  ;;  %4052 = vmatmul.bf16.vlgmr.msra.gmra.mxu1 %v14480_v58  ;;  %v9111_v42 = vld [vmem:[#allocation6 + $0x1a8] sm:$0xf]  ;;  %v10500_v17 = vor.u32 %v13381_v35, %v10497_v54  ;;  %v13352_v7 = vld [vmem:[#allocation6 + $0xb94] sm:$0xf0] }
 0x21e   :  { %v9112_v56 = vor.u32 %v13040_v44, %v9111_v42  ;;  %v10068_v44 = vor.u32 %v13273_v21, %v10065_v23  ;;  %v10359_v55 = vld [vmem:[#allocation6 + $0xb68] sm:$0xf]  ;;  %v9209_v21 = vld [vmem:[#allocation6 + $0x298] sm:$0xf0] }
 0x21f   :  { %4077 = vmatpush.bf16.msra.mxu3 %v9300_v2  ;;  %4090 = vmatpush.bf16.msrb.mxu0 %v9684_v6  ;;  %v3858_v2 = vpop.f32.mrf.mxu2  ;;  %v3884_v6 = vpop.f32.mrf.mxu0  ;;  %v10263_v23 = vld [vmem:[#allocation6 + $0xaa8] sm:$0xf] }
 0x220   :  { %4097 = vmatpush.bf16.msrb.mxu1 %v10356_v1  ;;  %v13124_v1 = vld [vmem:[#allocation6 + $0x474] sm:$0xf0]  ;;  %v14561_v5 = vadd.f32 %v3858_v2, %v3846_v52  ;;  %v8968_v52 = vor.u32 %v13004_v33, %v8967_v32  ;;  %v13070_v2 = vld [vmem:[#allocation6 + $0x2cc] sm:$0xf]  ;;  %v9161_v32 = vld [vmem:[#allocation6 + $0x238] sm:$0xf0] }
 0x221   :  { %4110 = vmatpush.bf16.msrb.mxu2 %v10740_v45  ;;  %v13028_v45 = vld [vmem:[#allocation6 + $0x174] sm:$0xf0] }
 0x222   :  { %4078 = vmatmul.bf16.vlgmr.msra.gmra.mxu3 %v14466_v15  ;;  %4091 = vmatmul.bf16.vlgmr.msrb.gmra.mxu0 %v14470_v37  ;;  %v3847_v16 = vpop.f32.mrf.mxu1 }
 0x223   :  { %4122 = vmatpush.bf16.msrb.mxu3 %v9256_v3  ;;  %4135 = vmatpush.bf16.msra.mxu0 %v9640_v11  ;;  %v9064_v3 = vor.u32 %v13028_v45, %v9063_v63  ;;  %v9448_v11 = vor.u32 %v13124_v1, %v9447_v0  ;;  %v9303_v63 = vld [vmem:[#allocation6 + $0x328] sm:$0xf]  ;;  %v13088_v45 = vld [vmem:[#allocation6 + $0x354] sm:$0xf0]  ;;  %v10360_v1 = vor.u32 %v13352_v7, %v10359_v55 }
 0x224   :  { %4098 = vmatpush.bf16.msrb.mxu1 %v10308_v18  ;;  %v9399_v18 = vld [vmem:[#allocation6 + $0x3e8] sm:$0xf]  ;;  %v13460_v0 = vld [vmem:[#allocation6 + $0xef4] sm:$0xf0] }
 0x225   :  { %4111 = vmatpush.bf16.msrb.mxu2 %v10692_v14  ;;  %v13016_v14 = vld [vmem:[#allocation6 + $0x114] sm:$0xf0]  ;;  %v3871_v39 = vpop.f32.mrf.mxu3  ;;  %v9400_v30 = vor.u32 %v13112_v20, %v9399_v18  ;;  %v10743_v16 = vld [vmem:[#allocation6 + $0xe68] sm:$0xf]  ;;  %v13058_v20 = vld [vmem:[#allocation6 + $0x26c] sm:$0xf] }
 0x226   :  { %v9016_v26 = vor.u32 %v13016_v14, %v9015_v13  ;;  %v13244_v13 = vld [vmem:[#allocation6 + $0x834] sm:$0xf0] }
 0x227   :  { %4123 = vmatpush.bf16.msrb.mxu3 %v9208_v22  ;;  %4136 = vmatpush.bf16.msra.mxu0 %v9592_v25  ;;  %v10116_v22 = vor.u32 %v13285_v8, %v10113_v9  ;;  %v10449_v25 = vld [vmem:[#allocation6 + $0xc50] sm:$0xf0]  ;;  %v3860_v42 = vpop.f32.mrf.mxu2  ;;  %v3886_v49 = vpop.f32.mrf.mxu0  ;;  %v9304_v9 = vor.u32 %v13088_v45, %v9303_v63  ;;  %v9783_v63 = vld [vmem:[#allocation6 + $0x6e8] sm:$0xf]  ;;  %v13208_v45 = vld [vmem:[#allocation6 + $0x714] sm:$0xf0] }
 0x228   :  { %4099 = vmatpush.bf16.msrb.mxu1 %v10260_v31  ;;  %v13268_v31 = vld [vmem:[#allocation6 + $0x8f4] sm:$0xf0]  ;;  %v10452_v38 = vor.u32 %v13369_v24, %v10449_v25 }
 0x229   :  { %4112 = vmatpush.bf16.msrb.mxu2 %v10644_v28  ;;  %v10407_v28 = vld [vmem:[#allocation6 + $0xbc8] sm:$0xf]  ;;  %v10024_v50 = vor.u32 %v13268_v31, %v10023_v27  ;;  %v13328_v24 = vld [vmem:[#allocation6 + $0xad4] sm:$0xf0]  ;;  %v13046_v31 = vld [vmem:[#allocation6 + $0x20c] sm:$0xf] }
 0x22a   :  { %v10408_v46 = vor.u32 %v13364_v29, %v10407_v28  ;;  %v13232_v27 = vld [vmem:[#allocation6 + $0x7d4] sm:$0xf0]  ;;  %v9212_v28 = vor.u32 %v13058_v20, %v9209_v21  ;;  %v10695_v29 = vld [vmem:[#allocation6 + $0xe08] sm:$0xf]  ;;  %v13010_v21 = vld [vmem:[#allocation6 + $0xec] sm:$0xf] }
 0x22b   :  { %4124 = vmatpush.bf16.msrb.mxu3 %v9160_v36  ;;  %4137 = vmatpush.bf16.msra.mxu0 %v9544_v41  ;;  %v3872_v36 = vadd.f32 %v3871_v39, %v1054_v12  ;;  %v13100_v41 = vld [vmem:[#allocation6 + $0x3b4] sm:$0xf0]  ;;  %v9927_v12 = vld [vmem:[#allocation6 + $0x808] sm:$0xf] }
 0x22c   :  { %4100 = vmatpush.bf16.msrb.mxu1 %v10212_v53  ;;  %v13256_v53 = vld [vmem:[#allocation6 + $0x894] sm:$0xf0]  ;;  %v9352_v57 = vor.u32 %v13100_v41, %v9351_v19  ;;  %v9831_v41 = vld [vmem:[#allocation6 + $0x748] sm:$0xf] }
 0x22d   :  { %4113 = vmatpush.bf16.msrb.mxu2 %v10596_v47  ;;  %v9975_v47 = vld [vmem:[#allocation6 + $0x868] sm:$0xf]  ;;  %v3873_v8 = vpop.f32.mrf.mxu3  ;;  %v13436_v39 = vld [vmem:[#allocation6 + $0xe34] sm:$0xf0] }
 0x22e   :  { %v9976_v35 = vor.u32 %v13256_v53, %v9975_v47  ;;  %v10696_v19 = vor.u32 %v13436_v39, %v10695_v29  ;;  %v13220_v42 = vld [vmem:[#allocation6 + $0x774] sm:$0xf0]  ;;  %v9113_v53 = vld [vmem:[#allocation6 + $0x1d8] sm:$0xf0]  ;;  %v13166_v29 = vld [vmem:[#allocation6 + $0x5cc] sm:$0xf] }
 0x22f   :  { %4125 = vmatpush.bf16.msrb.mxu3 %v9112_v56  ;;  %4138 = vmatpush.bf16.msra.mxu0 %v9496_v62  ;;  %v14564_v56 = vadd.f32 %v3884_v6, %v3872_v36  ;;  %v12992_v62 = vld [vmem:[#allocation6 + $0x54] sm:$0xf0]  ;;  %v10311_v6 = vld [vmem:[#allocation6 + $0xb08] sm:$0xf]  ;;  %v9832_v7 = vor.u32 %v13220_v42, %v9831_v41  ;;  %v13262_v39 = vld [vmem:[#allocation6 + $0x8cc] sm:$0xf] }
 0x230   :  { %4101 = vmatpush.bf16.msrb.mxu1 %v10164_v4  ;;  %v9257_v4 = vld [vmem:[#allocation6 + $0x2f8] sm:$0xf0]  ;;  %v8920_v54 = vor.u32 %v12992_v62, %v8919_v60  ;;  %v10215_v36 = vld [vmem:[#allocation6 + $0xa48] sm:$0xf]  ;;  %v13424_v47 = vld [vmem:[#allocation6 + $0xdd4] sm:$0xf0] }
 0x231   :  { %4114 = vmatpush.bf16.msrb.mxu2 %v10548_v51  ;;  %v10791_v51 = vld [vmem:[#allocation6 + $0xec8] sm:$0xf]  ;;  %v9260_v14 = vor.u32 %v13070_v2, %v9257_v4  ;;  %v13304_v60 = vld [vmem:[#allocation6 + $0xa14] sm:$0xf0]  ;;  %v13022_v4 = vld [vmem:[#allocation6 + $0x14c] sm:$0xf] }
 0x232   :  { %v12998_v42 = vld [vmem:[#allocation6 + $0x8c] sm:$0xf] }
 0x233   :  { %4126 = vmatpush.bf16.msrb.mxu3 %v9064_v3  ;;  %4139 = vmatpush.bf16.msra.mxu0 %v9448_v11  ;;  %v13340_v3 = vld [vmem:[#allocation6 + $0xb34] sm:$0xf0]  ;;  %v10792_v11 = vor.u32 %v13460_v0, %v10791_v51  ;;  %v10599_v0 = vld [vmem:[#allocation6 + $0xd48] sm:$0xf] }
 0x234   :  { %4102 = vmatpush.bf16.msrb.mxu1 %v10116_v22  ;;  %v10312_v18 = vor.u32 %v13340_v3, %v10311_v6  ;;  %v9928_v22 = vor.u32 %v13244_v13, %v9927_v12  ;;  %v9784_v6 = vor.u32 %v13208_v45, %v9783_v63  ;;  %v13292_v3 = vld [vmem:[#allocation6 + $0x9b4] sm:$0xf0]  ;;  %v9735_v12 = vld [vmem:[#allocation6 + $0x688] sm:$0xf] }
 0x235   :  { %4115 = vmatpush.bf16.msrb.mxu2 %v10500_v17  ;;  %v13448_v17 = vld [vmem:[#allocation6 + $0xe94] sm:$0xf0]  ;;  %v10455_v63 = vld [vmem:[#allocation6 + $0xc28] sm:$0xf] }
 0x236   :  { %v10744_v25 = vor.u32 %v13448_v17, %v10743_v16  ;;  %v13196_v13 = vld [vmem:[#allocation6 + $0x6b4] sm:$0xf0]  ;;  %v10551_v16 = vld [vmem:[#allocation6 + $0xce8] sm:$0xf] }
 0x237   :  { %4127 = vmatpush.bf16.msrb.mxu3 %v9016_v26  ;;  %4140 = vmatpush.bf16.msra.mxu0 %v9400_v30  ;;  %v9879_v26 = vld [vmem:[#allocation6 + $0x7a8] sm:$0xf]  ;;  %v10264_v30 = vor.u32 %v13328_v24, %v10263_v23  ;;  %v13400_v17 = vld [vmem:[#allocation6 + $0xd14] sm:$0xf0]  ;;  %v9736_v24 = vor.u32 %v13196_v13, %v9735_v12 }
 0x238   :  { %4103 = vmatpush.bf16.msrb.mxu1 %v10068_v44  ;;  %v9880_v33 = vor.u32 %v13232_v27, %v9879_v26  ;;  %v9164_v44 = vor.u32 %v13046_v31, %v9161_v32  ;;  %v9687_v23 = vld [vmem:[#allocation6 + $0x628] sm:$0xf]  ;;  %v13280_v27 = vld [vmem:[#allocation6 + $0x954] sm:$0xf0] }
 0x239   :  { %4116 = vmatpush.bf16.msrb.mxu2 %v10452_v38  ;;  %v13316_v38 = vld [vmem:[#allocation6 + $0xa74] sm:$0xf0]  ;;  %v10071_v26 = vld [vmem:[#allocation6 + $0x928] sm:$0xf] }
 0x23a   :  { %v3897_v49 = vpop.f32.mrf.mxu1  ;;  %v10072_v41 = vor.u32 %v13280_v27, %v10071_v26  ;;  %v13376_v45 = vld [vmem:[#allocation6 + $0xc54] sm:$0xf0]  ;;  %v9881_v26 = vld [vmem:[#allocation6 + $0x7d8] sm:$0xf0] }
 0x23b   :  { %4128 = vmatpush.bf16.msrb.mxu3 %v8968_v52  ;;  %4141 = vmatpush.bf16.msra.mxu0 %v9352_v57  ;;  %v13034_v52 = vld [vmem:[#allocation6 + $0x1ac] sm:$0xf]  ;;  %v3898_v55 = vadd.f32 %v3897_v49, %v14564_v56  ;;  %v10167_v57 = vld [vmem:[#allocation6 + $0x9e8] sm:$0xf] }
 0x23c   :  { %4148 = vmatpush.bf16.msra.mxu1 %v10024_v50  ;;  %4117 = vmatmul.bf16.vlgmr.msrb.gmra.mxu2 %v14480_v58  ;;  %v10216_v50 = vor.u32 %v13316_v38, %v10215_v36  ;;  %v9116_v51 = vor.u32 %v13034_v52, %v9113_v53  ;;  %v10168_v2 = vor.u32 %v13304_v60, %v10167_v57  ;;  %v10119_v56 = vld [vmem:[#allocation6 + $0x988] sm:$0xf]  ;;  %v13388_v38 = vld [vmem:[#allocation6 + $0xcb4] sm:$0xf0]  ;;  %v13250_v57 = vld [vmem:[#allocation6 + $0x86c] sm:$0xf] }
 0x23d   :  { %4161 = vmatpush.bf16.msra.mxu2 %v10408_v46  ;;  %4104 = vmatmul.bf16.vlgmr.msrb.gmra.mxu1 %v14472_v43  ;;  %v10647_v46 = vld [vmem:[#allocation6 + $0xda8] sm:$0xf]  ;;  %v10120_v20 = vor.u32 %v13292_v3, %v10119_v56  ;;  %v9977_v60 = vld [vmem:[#allocation6 + $0x898] sm:$0xf0]  ;;  %v10456_v56 = vor.u32 %v13376_v45, %v10455_v63  ;;  %v13238_v3 = vld [vmem:[#allocation6 + $0x80c] sm:$0xf] }
 0x23e   :  { %v10648_v62 = vor.u32 %v13424_v47, %v10647_v46  ;;  %v10503_v36 = vld [vmem:[#allocation6 + $0xc88] sm:$0xf]  ;;  %v10649_v63 = vld [vmem:[#allocation6 + $0xdd8] sm:$0xf0] }
 0x23f   :  { %4129 = vmatpush.bf16.msrb.mxu3 %v8920_v54  ;;  %4142 = vmatpush.bf16.msra.mxu0 %v9304_v9  ;;  %v3910_v54 = vpop.f32.mrf.mxu2  ;;  %v14571_v9 = vpop.f32.mrf.mxu0 }
 0x240   :  { %4149 = vmatpush.bf16.msra.mxu1 %v9976_v35  ;;  %v9065_v35 = vld [vmem:[#allocation6 + $0x178] sm:$0xf0]  ;;  %v3911_v8 = vadd.f32 %v3910_v54, %v3898_v55  ;;  %v10504_v55 = vor.u32 %v13388_v38, %v10503_v36  ;;  %v13430_v38 = vld [vmem:[#allocation6 + $0xe0c] sm:$0xf] }
 0x241   :  { %4162 = vmatpush.bf16.msra.mxu2 %v10360_v1  ;;  %v13412_v1 = vld [vmem:[#allocation6 + $0xd74] sm:$0xf0]  ;;  %v10793_v54 = vld [vmem:[#allocation6 + $0xef8] sm:$0xf0] }
 0x242   :  { %4130 = vmatmul.bf16.vlgmr.msrb.gmra.mxu3 %v14463_v10  ;;  %4143 = vmatmul.bf16.vlgmr.msra.gmra.mxu0 %v14466_v15 }
 0x243   :  { %4174 = vmatpush.bf16.msra.mxu3 %v10792_v11  ;;  %4187 = vmatpush.bf16.msrb.mxu0 %v9260_v14  ;;  %v10600_v11 = vor.u32 %v13412_v1, %v10599_v0  ;;  %v9068_v14 = vor.u32 %v13022_v4, %v9065_v35  ;;  %v8921_v0 = vld [vmem:[#allocation6 + $0x58] sm:$0xf0]  ;;  %v13358_v1 = vld [vmem:[#allocation6 + $0xbcc] sm:$0xf]  ;;  %v9980_v4 = vor.u32 %v13250_v57, %v9977_v60 }
 0x244   :  { %4150 = vmatpush.bf16.msra.mxu1 %v9928_v22  ;;  %v9017_v22 = vld [vmem:[#allocation6 + $0x118] sm:$0xf0]  ;;  %v13454_v35 = vld [vmem:[#allocation6 + $0xecc] sm:$0xf] }
 0x245   :  { %4163 = vmatpush.bf16.msra.mxu2 %v10312_v18  ;;  %v3899_v18 = vpop.f32.mrf.mxu1  ;;  %v3923_v31 = vpop.f32.mrf.mxu3  ;;  %v9020_v32 = vor.u32 %v13010_v21, %v9017_v22  ;;  %v13442_v22 = vld [vmem:[#allocation6 + $0xe6c] sm:$0xf] }
 0x246   :  { %v13346_v18 = vld [vmem:[#allocation6 + $0xb6c] sm:$0xf] }
 0x247   :  { %4175 = vmatpush.bf16.msra.mxu3 %v10744_v25  ;;  %4188 = vmatpush.bf16.msrb.mxu0 %v9212_v28  ;;  %v13184_v25 = vld [vmem:[#allocation6 + $0x654] sm:$0xf0]  ;;  %v10552_v28 = vor.u32 %v13400_v17, %v10551_v16  ;;  %v3912_v46 = vpop.f32.mrf.mxu2  ;;  %v3938_v52 = vpop.f32.mrf.mxu0  ;;  %v9545_v16 = vld [vmem:[#allocation6 + $0x538] sm:$0xf0]  ;;  %v10796_v17 = vor.u32 %v13454_v35, %v10793_v54  ;;  %v13310_v35 = vld [vmem:[#allocation6 + $0xa4c] sm:$0xf] }
 0x248   :  { %4151 = vmatpush.bf16.msra.mxu1 %v9880_v33  ;;  %v9641_v33 = vld [vmem:[#allocation6 + $0x5f8] sm:$0xf0]  ;;  %v9688_v47 = vor.u32 %v13184_v25, %v9687_v23  ;;  %v13226_v25 = vld [vmem:[#allocation6 + $0x7ac] sm:$0xf] }
 0x249   :  { %4164 = vmatpush.bf16.msra.mxu2 %v10264_v30  ;;  %v10025_v30 = vld [vmem:[#allocation6 + $0x8f8] sm:$0xf0]  ;;  %v9644_v53 = vor.u32 %v13166_v29, %v9641_v33  ;;  %v9884_v36 = vor.u32 %v13226_v25, %v9881_v26  ;;  %v13394_v26 = vld [vmem:[#allocation6 + $0xcec] sm:$0xf] }
 0x24a   :  { %v10028_v49 = vor.u32 %v13262_v39, %v10025_v30  ;;  %v10745_v23 = vld [vmem:[#allocation6 + $0xe98] sm:$0xf0]  ;;  %v14019_v39 = vld [vmem:[#allocation7] sm:$0xff] }
 0x24b   :  { %4176 = vmatpush.bf16.msra.mxu3 %v10696_v19  ;;  %4189 = vmatpush.bf16.msrb.mxu0 %v9164_v44  ;;  %v14573_v19 = vadd.f32 %v3923_v31, %v3911_v8  ;;  %v8969_v44 = vld [vmem:[#allocation6 + $0xb8] sm:$0xf0]  ;;  %v1055_v30 = vperm.slane %v14019_v39, 7  ;;  %v10748_v31 = vor.u32 %v13442_v22, %v10745_v23  ;;  %v13298_v22 = vld [vmem:[#allocation6 + $0x9ec] sm:$0xf] }
 0x24c   :  { %4152 = vmatpush.bf16.msra.mxu1 %v9832_v7  ;;  %v9593_v7 = vld [vmem:[#allocation6 + $0x598] sm:$0xf0] }
 0x24d   :  { %4165 = vmatpush.bf16.msra.mxu2 %v10216_v50  ;;  %v13154_v50 = vld [vmem:[#allocation6 + $0x56c] sm:$0xf]  ;;  %v9929_v8 = vld [vmem:[#allocation6 + $0x838] sm:$0xf0]  ;;  %v3937_v52 = vadd.f32 %v14571_v9, %v1055_v30 }
 0x24e   :  { %v9932_v21 = vor.u32 %v13238_v3, %v9929_v8  ;;  %v9497_v29 = vld [vmem:[#allocation6 + $0x4d8] sm:$0xf0]  ;;  %v13178_v30 = vld [vmem:[#allocation6 + $0x62c] sm:$0xf] }
 0x24f   :  { %4177 = vmatpush.bf16.msra.mxu3 %v10648_v62  ;;  %4190 = vmatpush.bf16.msrb.mxu0 %v9116_v51  ;;  %v8972_v62 = vor.u32 %v12998_v42, %v8969_v44  ;;  %v12986_v51 = vld [vmem:[#allocation6 + $0x2c] sm:$0xf]  ;;  %v10313_v33 = vld [vmem:[#allocation6 + $0xb38] sm:$0xf0] }
 0x250   :  { %4153 = vmatpush.bf16.msra.mxu1 %v9784_v6  ;;  %v9596_v6 = vor.u32 %v13154_v50, %v9593_v7  ;;  %v8924_v12 = vor.u32 %v12986_v51, %v8921_v0  ;;  %v13214_v44 = vld [vmem:[#allocation6 + $0x74c] sm:$0xf]  ;;  %v9833_v46 = vld [vmem:[#allocation6 + $0x778] sm:$0xf0] }
 0x251   :  { %4166 = vmatpush.bf16.msra.mxu2 %v10168_v2  ;;  %v10409_v2 = vld [vmem:[#allocation6 + $0xbf8] sm:$0xf0]  ;;  %v9836_v60 = vor.u32 %v13214_v44, %v9833_v46  ;;  %v13202_v51 = vld [vmem:[#allocation6 + $0x6ec] sm:$0xf]  ;;  %v13498_v44 = vld [vmem:[#allocation9 + $0x128] sm:$0xf0] }
 0x252   :  { %v10412_v13 = vor.u32 %v13358_v1, %v10409_v2  ;;  %v9449_v50 = vld [vmem:[#allocation6 + $0x478] sm:$0xf0]  ;;  %v13106_v2 = vld [vmem:[#allocation6 + $0x3ec] sm:$0xf] }
 0x253   :  { %4178 = vmatpush.bf16.msra.mxu3 %v10600_v11  ;;  %4191 = vmatpush.bf16.msrb.mxu0 %v9068_v14  ;;  %v3925_v11 = vpop.f32.mrf.mxu3  ;;  %v13142_v14 = vld [vmem:[#allocation6 + $0x50c] sm:$0xf]  ;;  %v10265_v7 = vld [vmem:[#allocation6 + $0xad8] sm:$0xf0] }
 0x254   :  { %4154 = vmatpush.bf16.msra.mxu1 %v9736_v24  ;;  %v9548_v24 = vor.u32 %v13142_v14, %v9545_v16  ;;  %v9785_v0 = vld [vmem:[#allocation6 + $0x718] sm:$0xf0]  ;;  %v13286_v46 = vld [vmem:[#allocation6 + $0x98c] sm:$0xf] }
 0x255   :  { %4167 = vmatpush.bf16.msra.mxu2 %v10120_v20  ;;  %v10361_v20 = vld [vmem:[#allocation6 + $0xb98] sm:$0xf0] }
 0x256   :  { %v10364_v27 = vor.u32 %v13346_v18, %v10361_v20  ;;  %v10217_v54 = vld [vmem:[#allocation6 + $0xa78] sm:$0xf0]  ;;  %v13094_v18 = vld [vmem:[#allocation6 + $0x38c] sm:$0xf] }
 0x257   :  { %4179 = vmatpush.bf16.msra.mxu3 %v10552_v28  ;;  %4192 = vmatpush.bf16.msrb.mxu0 %v9020_v32  ;;  %v13130_v28 = vld [vmem:[#allocation6 + $0x4ac] sm:$0xf]  ;;  %v10601_v3 = vld [vmem:[#allocation6 + $0xd78] sm:$0xf0] }
 0x258   :  { %4155 = vmatpush.bf16.msra.mxu1 %v9688_v47  ;;  %v13334_v32 = vld [vmem:[#allocation6 + $0xb0c] sm:$0xf]  ;;  %v9500_v42 = vor.u32 %v13130_v28, %v9497_v29  ;;  %v9353_v20 = vld [vmem:[#allocation6 + $0x3b8] sm:$0xf0] }
 0x259   :  { %4168 = vmatpush.bf16.msra.mxu2 %v10072_v41  ;;  %v10697_v41 = vld [vmem:[#allocation6 + $0xe38] sm:$0xf0]  ;;  %v10316_v47 = vor.u32 %v13334_v32, %v10313_v33  ;;  %v13082_v28 = vld [vmem:[#allocation6 + $0x32c] sm:$0xf]  ;;  %v9356_v29 = vor.u32 %v13094_v18, %v9353_v20  ;;  %v10939_v33 = vld [vmem:[#allocation9 + $0x118] sm:$0xf] }
 0x25a   :  { %v3949_v57 = vpop.f32.mrf.mxu1  ;;  %v10169_v23 = vld [vmem:[#allocation6 + $0xa18] sm:$0xf0] }
 0x25b   :  { %4180 = vmatpush.bf16.msra.mxu3 %v10504_v55  ;;  %4193 = vmatpush.bf16.msrb.mxu0 %v8972_v62  ;;  %v13322_v55 = vld [vmem:[#allocation6 + $0xaac] sm:$0xf]  ;;  %v9305_v39 = vld [vmem:[#allocation6 + $0x358] sm:$0xf0]  ;;  %v10172_v32 = vor.u32 %v13298_v22, %v10169_v23  ;;  %v13488_v22 = vld [vmem:[#allocation9 + $0xd8] sm:$0xf0] }
 0x25c   :  { %4200 = vmatpush.bf16.msrb.mxu1 %v9644_v53  ;;  %4169 = vmatmul.bf16.vlgmr.msra.gmra.mxu2 %v14472_v43  ;;  %v10700_v53 = vor.u32 %v13430_v38, %v10697_v41  ;;  %v13418_v62 = vld [vmem:[#allocation6 + $0xdac] sm:$0xf]  ;;  %v10268_v1 = vor.u32 %v13322_v55, %v10265_v7  ;;  %v13538_v38 = vld [vmem:[#allocation9 + $0x268] sm:$0xf0]  ;;  %v9308_v7 = vor.u32 %v13082_v28, %v9305_v39  ;;  %v13613_v28 = vld [vmem:[#allocation9 + $0x4c0] sm:$0xf0] }
 0x25d   :  { %4213 = vmatpush.bf16.msrb.mxu2 %v10028_v49  ;;  %4156 = vmatmul.bf16.vlgmr.msra.gmra.mxu1 %v14470_v37  ;;  %v13118_v49 = vld [vmem:[#allocation6 + $0x44c] sm:$0xf]  ;;  %v10652_v9 = vor.u32 %v13418_v62, %v10649_v63 }
 0x25e   :  { %v9452_v45 = vor.u32 %v13118_v49, %v9449_v50  ;;  %v11039_v39 = vld [vmem:[#allocation9 + $0x1e0] sm:$0xf] }
 0x25f   :  { %4181 = vmatpush.bf16.msra.mxu3 %v10456_v56  ;;  %4194 = vmatpush.bf16.msrb.mxu0 %v8924_v12  ;;  %v13406_v56 = vld [vmem:[#allocation6 + $0xd4c] sm:$0xf]  ;;  %v3962_v8 = vpop.f32.mrf.mxu2  ;;  %v3988_v16 = vpop.f32.mrf.mxu0 }
 0x260   :  { %4201 = vmatpush.bf16.msrb.mxu1 %v9596_v6  ;;  %v9788_v6 = vor.u32 %v13202_v51, %v9785_v0  ;;  %v13190_v12 = vld [vmem:[#allocation6 + $0x68c] sm:$0xf]  ;;  %v13493_v51 = vld [vmem:[#allocation9 + $0x100] sm:$0xf0]  ;;  %v11079_v0 = vld [vmem:[#allocation9 + $0x230] sm:$0xf] }
 0x261   :  { %4214 = vmatpush.bf16.msrb.mxu2 %v9980_v4  ;;  %v9401_v4 = vld [vmem:[#allocation6 + $0x418] sm:$0xf0] }
 0x262   :  { %4182 = vmatmul.bf16.vlgmr.msra.gmra.mxu3 %v14480_v58  ;;  %4195 = vmatmul.bf16.vlgmr.msrb.gmra.mxu0 %v14463_v10  ;;  %v3950_v10 = vadd.f32 %v3949_v57, %v3937_v52  ;;  %v9404_v11 = vor.u32 %v13106_v2, %v9401_v4  ;;  %v13382_v52 = vld [vmem:[#allocation6 + $0xc8c] sm:$0xf] }
 0x263   :  { %4226 = vmatpush.bf16.msrb.mxu3 %v10412_v13  ;;  %4239 = vmatpush.bf16.msra.mxu0 %v10796_v17  ;;  %v9737_v13 = vld [vmem:[#allocation6 + $0x6b8] sm:$0xf0]  ;;  %v10220_v17 = vor.u32 %v13310_v35, %v10217_v54  ;;  %v13274_v4 = vld [vmem:[#allocation6 + $0x92c] sm:$0xf] }
 0x264   :  { %4202 = vmatpush.bf16.msrb.mxu1 %v9548_v24  ;;  %v3963_v14 = vadd.f32 %v3962_v8, %v3950_v10  ;;  %v3951_v24 = vpop.f32.mrf.mxu1  ;;  %v9740_v25 = vor.u32 %v13190_v12, %v9737_v13  ;;  %v10940_v10 = vor.u32 %v13498_v44, %v10939_v33  ;;  %v13370_v35 = vld [vmem:[#allocation6 + $0xc2c] sm:$0xf]  ;;  %v10457_v54 = vld [vmem:[#allocation6 + $0xc58] sm:$0xf0]  ;;  %v11419_v8 = vld [vmem:[#allocation9 + $0x4d8] sm:$0xf] }
 0x265   :  { %4215 = vmatpush.bf16.msrb.mxu2 %v9932_v21  ;;  %v10604_v21 = vor.u32 %v13406_v56, %v10601_v3  ;;  %v3975_v41 = vpop.f32.mrf.mxu3  ;;  %v13578_v56 = vld [vmem:[#allocation9 + $0x3a8] sm:$0xf0]  ;;  %v10460_v18 = vor.u32 %v13370_v35, %v10457_v54  ;;  %v11239_v24 = vld [vmem:[#allocation9 + $0x370] sm:$0xf]  ;;  %v11339_v54 = vld [vmem:[#allocation9 + $0x438] sm:$0xf] }
 0x266   :  { %v3976_v49 = vadd.f32 %v3975_v41, %v3963_v14  ;;  %v11059_v14 = vld [vmem:[#allocation9 + $0x208] sm:$0xf] }
 0x267   :  { %4227 = vmatpush.bf16.msrb.mxu3 %v10364_v27  ;;  %4240 = vmatpush.bf16.msra.mxu0 %v10748_v31  ;;  %v10553_v27 = vld [vmem:[#allocation6 + $0xd18] sm:$0xf0]  ;;  %v3964_v55 = vpop.f32.mrf.mxu2  ;;  %v3990_v63 = vpop.f32.mrf.mxu0  ;;  %v11379_v41 = vld [vmem:[#allocation9 + $0x488] sm:$0xf] }
 0x268   :  { %4203 = vmatpush.bf16.msrb.mxu1 %v9500_v42  ;;  %v9689_v31 = vld [vmem:[#allocation6 + $0x658] sm:$0xf0]  ;;  %v10556_v42 = vor.u32 %v13394_v26, %v10553_v27  ;;  %v14580_v62 = vadd.f32 %v3988_v16, %v3976_v49  ;;  %v13528_v16 = vld [vmem:[#allocation9 + $0x218] sm:$0xf0]  ;;  %v11199_v55 = vld [vmem:[#allocation9 + $0x320] sm:$0xf] }
 0x269   :  { %4216 = vmatpush.bf16.msrb.mxu2 %v9884_v36  ;;  %v11099_v36 = vld [vmem:[#allocation9 + $0x258] sm:$0xf]  ;;  %v9692_v50 = vor.u32 %v13178_v30, %v9689_v31  ;;  %v11060_v26 = vor.u32 %v13528_v16, %v11059_v14  ;;  %v11399_v27 = vld [vmem:[#allocation9 + $0x4b0] sm:$0xf]  ;;  %v13523_v30 = vld [vmem:[#allocation9 + $0x1f0] sm:$0xf0] }
 0x26a   :  { %v11100_v57 = vor.u32 %v13538_v38, %v11099_v36  ;;  %v10879_v31 = vld [vmem:[#allocation9 + $0xa0] sm:$0xf]  ;;  %v11400_v33 = vor.u32 %v13613_v28, %v11399_v27  ;;  %v13568_v36 = vld [vmem:[#allocation9 + $0x358] sm:$0xf0]  ;;  %v11040_v38 = vor.u32 %v13523_v30, %v11039_v39  ;;  %v13603_v63 = vld [vmem:[#allocation9 + $0x470] sm:$0xf0] }
 0x26b   :  { %4228 = vmatpush.bf16.msrb.mxu3 %v10316_v47  ;;  %4241 = vmatpush.bf16.msra.mxu0 %v10700_v53  ;;  %v10121_v47 = vld [vmem:[#allocation6 + $0x9b8] sm:$0xf0]  ;;  %v10819_v14 = vld [vmem:[#allocation9 + $0x28] sm:$0xf]  ;;  %v13468_v16 = vld [vmem:[#allocation9 + $0x38] sm:$0xf0] }
 0x26c   :  { %4204 = vmatpush.bf16.msrb.mxu1 %v9452_v45  ;;  %v10505_v53 = vld [vmem:[#allocation6 + $0xcb8] sm:$0xf0]  ;;  %v10124_v45 = vor.u32 %v13286_v46, %v10121_v47  ;;  %v11019_v46 = vld [vmem:[#allocation9 + $0x1b8] sm:$0xf]  ;;  %v13518_v47 = vld [vmem:[#allocation9 + $0x1c8] sm:$0xf0] }
 0x26d   :  { %4217 = vmatpush.bf16.msrb.mxu2 %v9836_v60  ;;  %v10919_v60 = vld [vmem:[#allocation9 + $0xf0] sm:$0xf]  ;;  %v10508_v2 = vor.u32 %v13382_v52, %v10505_v53  ;;  %v13478_v52 = vld [vmem:[#allocation9 + $0x88] sm:$0xf0]  ;;  %v13463_v27 = vld [vmem:[#allocation9 + $0x10] sm:$0xf0] }
 0x26e   :  { %v10920_v12 = vor.u32 %v13493_v51, %v10919_v60  ;;  %v11359_v60 = vld [vmem:[#allocation9 + $0x460] sm:$0xf]  ;;  %v11579_v30 = vld [vmem:[#allocation9 + $0x618] sm:$0xf] }
 0x26f   :  { %4229 = vmatpush.bf16.msrb.mxu3 %v10268_v1  ;;  %4242 = vmatpush.bf16.msra.mxu0 %v10652_v9  ;;  %v13533_v1 = vld [vmem:[#allocation9 + $0x240] sm:$0xf0]  ;;  %v10073_v9 = vld [vmem:[#allocation6 + $0x958] sm:$0xf0]  ;;  %v10959_v28 = vld [vmem:[#allocation9 + $0x140] sm:$0xf] }
 0x270   :  { %4205 = vmatpush.bf16.msrb.mxu1 %v9404_v11  ;;  %v11080_v3 = vor.u32 %v13533_v1, %v11079_v0  ;;  %v13618_v11 = vld [vmem:[#allocation9 + $0x4e8] sm:$0xf0]  ;;  %v10076_v13 = vor.u32 %v13274_v4, %v10073_v9  ;;  %v10839_v0 = vld [vmem:[#allocation9 + $0x50] sm:$0xf]  ;;  %v13473_v1 = vld [vmem:[#allocation9 + $0x60] sm:$0xf0] }
 0x271   :  { %4218 = vmatpush.bf16.msrb.mxu2 %v9788_v6  ;;  %v11259_v6 = vld [vmem:[#allocation9 + $0x398] sm:$0xf]  ;;  %v11420_v23 = vor.u32 %v13618_v11, %v11419_v8  ;;  %v13558_v9 = vld [vmem:[#allocation9 + $0x308] sm:$0xf0]  ;;  %v10979_v8 = vld [vmem:[#allocation9 + $0x168] sm:$0xf] }
 0x272   :  { %v11260_v20 = vor.u32 %v13578_v56, %v11259_v6  ;;  %v11179_v4 = vld [vmem:[#allocation9 + $0x2f8] sm:$0xf]  ;;  %v13598_v6 = vld [vmem:[#allocation9 + $0x448] sm:$0xf0]  ;;  %v13508_v11 = vld [vmem:[#allocation9 + $0x178] sm:$0xf0] }
 0x273   :  { %4230 = vmatpush.bf16.msrb.mxu3 %v10220_v17  ;;  %4243 = vmatpush.bf16.msra.mxu0 %v10604_v21  ;;  %v3977_v17 = vpop.f32.mrf.mxu3  ;;  %v10899_v21 = vld [vmem:[#allocation9 + $0xc8] sm:$0xf] }
 0x274   :  { %4206 = vmatpush.bf16.msrb.mxu1 %v9356_v29  ;;  %v10900_v29 = vor.u32 %v13488_v22, %v10899_v21  ;;  %v11340_v17 = vor.u32 %v13598_v6, %v11339_v54  ;;  %v10980_v22 = vor.u32 %v13508_v11, %v10979_v8  ;;  %v11699_v8 = vld [vmem:[#allocation9 + $0x708] sm:$0xf]  ;;  %v13688_v11 = vld [vmem:[#allocation9 + $0x718] sm:$0xf0] }
 0x275   :  { %4219 = vmatpush.bf16.msrb.mxu2 %v9740_v25  ;;  %v13573_v25 = vld [vmem:[#allocation9 + $0x380] sm:$0xf0] }
 0x277   :  { %4231 = vmatpush.bf16.msrb.mxu3 %v10172_v32  ;;  %4244 = vmatpush.bf16.msra.mxu0 %v10556_v42  ;;  %v13483_v32 = vld [vmem:[#allocation9 + $0xb0] sm:$0xf0]  ;;  %v13608_v42 = vld [vmem:[#allocation9 + $0x498] sm:$0xf0] }
 0x278   :  { %4207 = vmatpush.bf16.msrb.mxu1 %v9308_v7  ;;  %v10880_v44 = vor.u32 %v13483_v32, %v10879_v31  ;;  %v11380_v53 = vor.u32 %v13608_v42, %v11379_v41  ;;  %v13563_v7 = vld [vmem:[#allocation9 + $0x330] sm:$0xf0]  ;;  %v13698_v31 = vld [vmem:[#allocation9 + $0x768] sm:$0xf0]  ;;  %v11299_v42 = vld [vmem:[#allocation9 + $0x3e8] sm:$0xf] }
 0x279   :  { %4220 = vmatpush.bf16.msrb.mxu2 %v9692_v50  ;;  %v10859_v50 = vld [vmem:[#allocation9 + $0x78] sm:$0xf]  ;;  %v11200_v51 = vor.u32 %v13563_v7, %v11199_v55 }
 0x27b   :  { %4232 = vmatpush.bf16.msrb.mxu3 %v10124_v45  ;;  %4245 = vmatpush.bf16.msra.mxu0 %v10508_v2  ;;  %v13513_v45 = vld [vmem:[#allocation9 + $0x1a0] sm:$0xf0]  ;;  %v11360_v2 = vor.u32 %v13603_v63, %v11359_v60  ;;  %v11719_v63 = vld [vmem:[#allocation9 + $0x730] sm:$0xf] }
 0x27c   :  { %7360 = vmatpush.bf16.msra.mxu1 %v10940_v10  ;;  %4221 = vmatmul.bf16.vlgmr.msrb.gmra.mxu2 %v14470_v37  ;;  %v11240_v37 = vor.u32 %v13573_v25, %v11239_v24  ;;  %v10999_v10 = vld [vmem:[#allocation9 + $0x190] sm:$0xf]  ;;  %v13593_v24 = vld [vmem:[#allocation9 + $0x420] sm:$0xf0]  ;;  %v10799_v25 = vld [vmem:[#allocation9] sm:$0xf] }
 0x27d   :  { %7373 = vmatpush.bf16.msra.mxu2 %v11100_v57  ;;  %4208 = vmatmul.bf16.vlgmr.msrb.gmra.mxu1 %v14466_v15  ;;  %v11219_v15 = vld [vmem:[#allocation9 + $0x348] sm:$0xf]  ;;  %v14586_v57 = vpop.f32.mrf.mxu1  ;;  %v11000_v35 = vor.u32 %v13513_v45, %v10999_v10  ;;  %v13653_v60 = vld [vmem:[#allocation9 + $0x600] sm:$0xf0]  ;;  %v11119_v45 = vld [vmem:[#allocation9 + $0x280] sm:$0xf] }
 0x27e   :  { %v11220_v49 = vor.u32 %v13568_v36, %v11219_v15  ;;  %v13658_v15 = vld [vmem:[#allocation9 + $0x628] sm:$0xf0]  ;;  %v11139_v36 = vld [vmem:[#allocation9 + $0x2a8] sm:$0xf] }
 0x27f   :  { %4233 = vmatpush.bf16.msrb.mxu3 %v10076_v13  ;;  %4246 = vmatpush.bf16.msra.mxu0 %v10460_v18  ;;  %v14588_v56 = vpop.f32.mrf.mxu2  ;;  %v11180_v13 = vor.u32 %v13558_v9, %v11179_v4  ;;  %v11159_v18 = vld [vmem:[#allocation9 + $0x2d0] sm:$0xf]  ;;  %v11580_v7 = vor.u32 %v13658_v15, %v11579_v30  ;;  %v12059_v9 = vld [vmem:[#allocation9 + $0x9d8] sm:$0xf]  ;;  %v11859_v15 = vld [vmem:[#allocation9 + $0x848] sm:$0xf] }
 0x280   :  { %7361 = vmatpush.bf16.msra.mxu1 %v10920_v12  ;;  %v14590_v12 = vpop.f32.mrf.mxu0 }
 0x281   :  { %7374 = vmatpush.bf16.msra.mxu2 %v11080_v3  ;;  %v10840_v3 = vor.u32 %v13473_v1, %v10839_v0  ;;  %v11279_v0 = vld [vmem:[#allocation9 + $0x3c0] sm:$0xf]  ;;  %v13738_v1 = vld [vmem:[#allocation9 + $0x8a8] sm:$0xf0] }
 0x282   :  { %4234 = vmatmul.bf16.vlgmr.msrb.gmra.mxu3 %v14472_v43  ;;  %4247 = vmatmul.bf16.vlgmr.msra.gmra.mxu0 %v14480_v58  ;;  %v11020_v43 = vor.u32 %v13518_v47, %v11019_v46  ;;  %v10860_v58 = vor.u32 %v13478_v52, %v10859_v50  ;;  %v4252_v46 = vmax.f32 %v14510_v40, 0.0  ;;  %v4253_v47 = vmax.f32 %v14518_v61, 0.0  ;;  %v13583_v40 = vld [vmem:[#allocation9 + $0x3d0] sm:$0xf0]  ;;  %v11899_v61 = vld [vmem:[#allocation9 + $0x898] sm:$0xf] }
 0x283   :  { %7386 = vmatpush.bf16.msra.mxu3 %v11260_v20  ;;  %7399 = vmatpush.bf16.msrb.mxu0 %v11420_v23  ;;  %v13553_v20 = vld [vmem:[#allocation9 + $0x2e0] sm:$0xf0]  ;;  %v11319_v23 = vld [vmem:[#allocation9 + $0x410] sm:$0xf]  ;;  %v10800_v50 = vor.u32 %v13463_v27, %v10799_v25  ;;  %v11700_v25 = vor.u32 %v13688_v11, %v11699_v8 }
 0x284   :  { %7362 = vmatpush.bf16.msra.mxu1 %v10900_v29  ;;  %v13503_v29 = vld [vmem:[#allocation9 + $0x150] sm:$0xf0]  ;;  %v11160_v39 = vor.u32 %v13553_v20, %v11159_v18  ;;  %v14598_v54 = vpack.c.bf16 %v4252_v46, %v4252_v46  ;;  %v11539_v18 = vld [vmem:[#allocation9 + $0x5c8] sm:$0xf]  ;;  %v13648_v20 = vld [vmem:[#allocation9 + $0x5d8] sm:$0xf0] }
 0x285   :  { %7375 = vmatpush.bf16.msra.mxu2 %v11060_v26  ;;  %v4003_v21 = vpop.f32.mrf.mxu1  ;;  %v10820_v26 = vor.u32 %v13468_v16, %v10819_v14  ;;  %v14592_v32 = vpop.f32.mrf.mxu3  ;;  %v10960_v41 = vor.u32 %v13503_v29, %v10959_v28  ;;  %v11280_v16 = vor.u32 %v13583_v40, %v11279_v0  ;;  %v13773_v27 = vld [vmem:[#allocation9 + $0x9c0] sm:$0xf0]  ;;  %v11679_v28 = vld [vmem:[#allocation9 + $0x6e0] sm:$0xf]  ;;  %v13683_v29 = vld [vmem:[#allocation9 + $0x6f0] sm:$0xf0] }
 0x286   :  { %v4255_v21 = vmax.f32 %v14535_v59, 0.0  ;;  %v11519_v59 = vld [vmem:[#allocation9 + $0x5a0] sm:$0xf]  ;;  %v11659_v46 = vld [vmem:[#allocation9 + $0x6b8] sm:$0xf] }
 0x287   :  { %7387 = vmatpush.bf16.msra.mxu3 %v11240_v37  ;;  %7400 = vmatpush.bf16.msrb.mxu0 %v11400_v33  ;;  %v11739_v37 = vld [vmem:[#allocation9 + $0x758] sm:$0xf]  ;;  %v11320_v33 = vor.u32 %v13593_v24, %v11319_v23  ;;  %v11879_v23 = vld [vmem:[#allocation9 + $0x870] sm:$0xf]  ;;  %v13733_v24 = vld [vmem:[#allocation9 + $0x880] sm:$0xf0] }
 0x288   :  { %7363 = vmatpush.bf16.msra.mxu1 %v10880_v44  ;;  %v13588_v44 = vld [vmem:[#allocation9 + $0x3f8] sm:$0xf0]  ;;  %v11740_v52 = vor.u32 %v13698_v31, %v11739_v37  ;;  %v4042_v55 = vpop.f32.mrf.mxu0  ;;  %v11880_v30 = vor.u32 %v13733_v24, %v11879_v23  ;;  %v13643_v37 = vld [vmem:[#allocation9 + $0x5b0] sm:$0xf0]  ;;  %v14606_v31 = vpack.c.bf16 %v4255_v21, %v4255_v21  ;;  %v11479_v40 = vld [vmem:[#allocation9 + $0x550] sm:$0xf] }
 0x289   :  { %7376 = vmatpush.bf16.msra.mxu2 %v11040_v38  ;;  %v13548_v38 = vld [vmem:[#allocation9 + $0x2b8] sm:$0xf0]  ;;  %v11300_v10 = vor.u32 %v13588_v44, %v11299_v42  ;;  %v11520_v44 = vor.u32 %v13643_v37, %v11519_v59  ;;  %v11839_v55 = vld [vmem:[#allocation9 + $0x820] sm:$0xf]  ;;  %v13713_v23 = vld [vmem:[#allocation9 + $0x7e0] sm:$0xf0] }
 0x28a   :  { %v13768_v42 = vld [vmem:[#allocation9 + $0x998] sm:$0xf0]  ;;  %v13663_v59 = vld [vmem:[#allocation9 + $0x650] sm:$0xf0] }
 0x28b   :  { %7388 = vmatpush.bf16.msra.mxu3 %v11220_v49  ;;  %7401 = vmatpush.bf16.msrb.mxu0 %v11380_v53  ;;  %v4016_v49 = vpop.f32.mrf.mxu2  ;;  %v11559_v53 = vld [vmem:[#allocation9 + $0x5f0] sm:$0xf] }
 0x28c   :  { %7364 = vmatpush.bf16.msra.mxu1 %v10860_v58  ;;  %v13693_v58 = vld [vmem:[#allocation9 + $0x740] sm:$0xf0]  ;;  %v11560_v6 = vor.u32 %v13653_v60, %v11559_v53 }
 0x28d   :  { %7377 = vmatpush.bf16.msra.mxu2 %v11020_v43  ;;  %v11140_v43 = vor.u32 %v13548_v38, %v11139_v36  ;;  %v11720_v4 = vor.u32 %v13693_v58, %v11719_v63  ;;  %v4029_v14 = vpop.f32.mrf.mxu3  ;;  %v13728_v36 = vld [vmem:[#allocation9 + $0x858] sm:$0xf0]  ;;  %v11680_v38 = vor.u32 %v13683_v29, %v11679_v28  ;;  %v11999_v63 = vld [vmem:[#allocation9 + $0x960] sm:$0xf]  ;;  %v13763_v58 = vld [vmem:[#allocation9 + $0x970] sm:$0xf0] }
 0x28e   :  { %v11860_v49 = vor.u32 %v13728_v36, %v11859_v15  ;;  %v13668_v14 = vld [vmem:[#allocation9 + $0x678] sm:$0xf0]  ;;  %v13623_v29 = vld [vmem:[#allocation9 + $0x510] sm:$0xf0]  ;;  %v12379_v15 = vld [vmem:[#allocation9 + $0xc58] sm:$0xf] }
 0x28f   :  { %7389 = vmatpush.bf16.msra.mxu3 %v11200_v51  ;;  %7402 = vmatpush.bf16.msrb.mxu0 %v11360_v2  ;;  %v13543_v51 = vld [vmem:[#allocation9 + $0x290] sm:$0xf0]  ;;  %v14596_v2 = vpack.c.bf16 %v4253_v47, %v4253_v47  ;;  %v13678_v47 = vld [vmem:[#allocation9 + $0x6c8] sm:$0xf0] }
 0x290   :  { %7365 = vmatpush.bf16.msra.mxu1 %v10840_v3  ;;  %v11120_v3 = vor.u32 %v13543_v51, %v11119_v45  ;;  %v11660_v60 = vor.u32 %v13678_v47, %v11659_v46  ;;  %v11639_v45 = vld [vmem:[#allocation9 + $0x690] sm:$0xf]  ;;  %v13673_v51 = vld [vmem:[#allocation9 + $0x6a0] sm:$0xf0]  ;;  %v13858_v36 = vld [vmem:[#allocation9 + $0xc68] sm:$0xf0] }
 0x291   :  { %7378 = vmatpush.bf16.msra.mxu2 %v11000_v35  ;;  %v13778_v35 = vld [vmem:[#allocation9 + $0x9e8] sm:$0xf0]  ;;  %v13708_v46 = vld [vmem:[#allocation9 + $0x7b8] sm:$0xf0] }
 0x293   :  { %7390 = vmatpush.bf16.msra.mxu3 %v11180_v13  ;;  %7403 = vmatpush.bf16.msrb.mxu0 %v11340_v17  ;;  %v4254_v13 = vmax.f32 %v14527_v34, 0.0  ;;  %v11900_v17 = vor.u32 %v13738_v1, %v11899_v61  ;;  %v11540_v34 = vor.u32 %v13648_v20, %v11539_v18  ;;  %v13633_v61 = vld [vmem:[#allocation9 + $0x560] sm:$0xf0]  ;;  %v12000_v1 = vor.u32 %v13763_v58, %v11999_v63  ;;  %v11459_v18 = vld [vmem:[#allocation9 + $0x528] sm:$0xf] }
 0x294   :  { %7366 = vmatpush.bf16.msra.mxu1 %v10820_v26  ;;  %v12039_v26 = vld [vmem:[#allocation9 + $0x9b0] sm:$0xf]  ;;  %v11480_v11 = vor.u32 %v13633_v61, %v11479_v40  ;;  %v13628_v20 = vld [vmem:[#allocation9 + $0x538] sm:$0xf0]  ;;  %v13853_v40 = vld [vmem:[#allocation9 + $0xc40] sm:$0xf0] }
 0x295   :  { %7379 = vmatpush.bf16.msra.mxu2 %v10980_v22  ;;  %v12060_v22 = vor.u32 %v13778_v35, %v12059_v9  ;;  %v13718_v9 = vld [vmem:[#allocation9 + $0x808] sm:$0xf0]  ;;  %v11640_v35 = vor.u32 %v13673_v51, %v11639_v45  ;;  %v11460_v28 = vor.u32 %v13628_v20, %v11459_v18  ;;  %v12199_v63 = vld [vmem:[#allocation9 + $0xaf0] sm:$0xf]  ;;  %v13813_v51 = vld [vmem:[#allocation9 + $0xb00] sm:$0xf0] }
 0x296   :  { %v12339_v20 = vld [vmem:[#allocation9 + $0xc08] sm:$0xf] }
 0x297   :  { %7391 = vmatpush.bf16.msra.mxu3 %v11160_v39  ;;  %7404 = vmatpush.bf16.msrb.mxu0 %v11320_v33  ;;  %v14604_v39 = vpack.c.bf16 %v4254_v13, %v4254_v13  ;;  %v12040_v33 = vor.u32 %v13773_v27, %v12039_v26  ;;  %v11619_v13 = vld [vmem:[#allocation9 + $0x668] sm:$0xf]  ;;  %v11959_v26 = vld [vmem:[#allocation9 + $0x910] sm:$0xf]  ;;  %v13753_v27 = vld [vmem:[#allocation9 + $0x920] sm:$0xf0] }
 0x298   :  { %7367 = vmatpush.bf16.msra.mxu1 %v10800_v50  ;;  %v11499_v50 = vld [vmem:[#allocation9 + $0x578] sm:$0xf] }
 0x299   :  { %7380 = vmatpush.bf16.msra.mxu2 %v10960_v41  ;;  %v12019_v41 = vld [vmem:[#allocation9 + $0x988] sm:$0xf] }
 0x29a   :  { %v12020_v53 = vor.u32 %v13768_v42, %v12019_v41  ;;  %v11960_v41 = vor.u32 %v13753_v27, %v11959_v26  ;;  %v13818_v42 = vld [vmem:[#allocation9 + $0xb28] sm:$0xf0]  ;;  %v12179_v26 = vld [vmem:[#allocation9 + $0xac8] sm:$0xf]  ;;  %v13808_v27 = vld [vmem:[#allocation9 + $0xad8] sm:$0xf0] }
 0x29b   :  { %7392 = vmatpush.bf16.msra.mxu3 %v11140_v43  ;;  %7405 = vmatpush.bf16.msrb.mxu0 %v11300_v10  ;;  %v14610_v43 = vpop.f32.mrf.mxu1 }
 0x29c   :  { %7412 = vmatpush.bf16.msrb.mxu1 %v11580_v7  ;;  %7381 = vmatmul.bf16.vlgmr.msra.gmra.mxu2 %v14596_v2  ;;  %v13723_v7 = vld [vmem:[#allocation9 + $0x830] sm:$0xf0] }
 0x29d   :  { %7425 = vmatpush.bf16.msrb.mxu2 %v11740_v52  ;;  %7368 = vmatmul.bf16.vlgmr.msra.gmra.mxu1 %v14598_v54  ;;  %v13638_v52 = vld [vmem:[#allocation9 + $0x588] sm:$0xf0]  ;;  %v11840_v0 = vor.u32 %v13723_v7, %v11839_v55 }
 0x29e   :  { %v11500_v10 = vor.u32 %v13638_v52, %v11499_v50  ;;  %v13748_v50 = vld [vmem:[#allocation9 + $0x8f8] sm:$0xf0]  ;;  %v4256_v52 = vmax.f32 %v14551_v48, 0.0  ;;  %v13743_v48 = vld [vmem:[#allocation9 + $0x8d0] sm:$0xf0] }
 0x29f   :  { %7393 = vmatpush.bf16.msra.mxu3 %v11120_v3  ;;  %7406 = vmatpush.bf16.msrb.mxu0 %v11280_v16  ;;  %v13758_v3 = vld [vmem:[#allocation9 + $0x948] sm:$0xf0]  ;;  %v14612_v8 = vpop.f32.mrf.mxu2  ;;  %v14614_v16 = vpop.f32.mrf.mxu0 }
 0x2a0   :  { %7413 = vmatpush.bf16.msrb.mxu1 %v11560_v6  ;;  %v11979_v6 = vld [vmem:[#allocation9 + $0x938] sm:$0xf] }
 0x2a1   :  { %7426 = vmatpush.bf16.msrb.mxu2 %v11720_v4  ;;  %v11819_v4 = vld [vmem:[#allocation9 + $0x7f8] sm:$0xf]  ;;  %v11980_v21 = vor.u32 %v13758_v3, %v11979_v6 }
 0x2a2   :  { %7394 = vmatmul.bf16.vlgmr.msra.gmra.mxu3 %v14604_v39  ;;  %7407 = vmatmul.bf16.vlgmr.msrb.gmra.mxu0 %v14606_v31 }
 0x2a3   :  { %7438 = vmatpush.bf16.msrb.mxu3 %v11900_v17  ;;  %7451 = vmatpush.bf16.msra.mxu0 %v12060_v22  ;;  %v11820_v17 = vor.u32 %v13718_v9, %v11819_v4  ;;  %v11799_v22 = vld [vmem:[#allocation9 + $0x7d0] sm:$0xf]  ;;  %v4055_v24 = vpop.f32.mrf.mxu1  ;;  %v13703_v4 = vld [vmem:[#allocation9 + $0x790] sm:$0xf0]  ;;  %v11919_v9 = vld [vmem:[#allocation9 + $0x8c0] sm:$0xf] }
 0x2a4   :  { %7414 = vmatpush.bf16.msrb.mxu1 %v11540_v34  ;;  %v11439_v34 = vld [vmem:[#allocation9 + $0x500] sm:$0xf]  ;;  %v11800_v37 = vor.u32 %v13713_v23, %v11799_v22  ;;  %v4258_v22 = vmax.f32 %v14573_v19, 0.0  ;;  %v11920_v24 = vor.u32 %v13743_v48, %v11919_v9  ;;  %v12679_v19 = vld [vmem:[#allocation9 + $0xeb0] sm:$0xf] }
 0x2a5   :  { %7427 = vmatpush.bf16.msrb.mxu2 %v11700_v25  ;;  %v11620_v25 = vor.u32 %v13668_v14, %v11619_v13  ;;  %v11440_v7 = vor.u32 %v13623_v29, %v11439_v34  ;;  %v13938_v13 = vld [vmem:[#allocation9 + $0xee8] sm:$0xf0]  ;;  %v14622_v14 = vpack.c.bf16 %v4256_v52, %v4256_v52  ;;  %v4259_v34 = vmax.f32 %v14580_v62, 0.0  ;;  %v13893_v29 = vld [vmem:[#allocation9 + $0xd80] sm:$0xf0] }
 0x2a6   :  { %v12499_v52 = vld [vmem:[#allocation9 + $0xd48] sm:$0xf]  ;;  %v13883_v9 = vld [vmem:[#allocation9 + $0xd30] sm:$0xf0] }
 0x2a7   :  { %7439 = vmatpush.bf16.msrb.mxu3 %v11880_v30  ;;  %7452 = vmatpush.bf16.msra.mxu0 %v12040_v33  ;;  %v11599_v30 = vld [vmem:[#allocation9 + $0x640] sm:$0xf]  ;;  %v12219_v33 = vld [vmem:[#allocation9 + $0xb18] sm:$0xf]  ;;  %v4068_v55 = vpop.f32.mrf.mxu2  ;;  %v4094_v58 = vpop.f32.mrf.mxu0 }
 0x2a8   :  { %7415 = vmatpush.bf16.msrb.mxu1 %v11520_v44  ;;  %v11779_v44 = vld [vmem:[#allocation9 + $0x7a8] sm:$0xf]  ;;  %v11600_v47 = vor.u32 %v13663_v59, %v11599_v30  ;;  %v14628_v59 = vld [vmem:[#allocation7 + $0x8] sm:$0xf] }
 0x2a9   :  { %7428 = vmatpush.bf16.msrb.mxu2 %v11680_v38  ;;  %v14616_v38 = vpop.f32.mrf.mxu3  ;;  %v11780_v45 = vor.u32 %v13708_v46, %v11779_v44  ;;  %v12159_v44 = vld [vmem:[#allocation9 + $0xaa0] sm:$0xf]  ;;  %v13803_v46 = vld [vmem:[#allocation9 + $0xab0] sm:$0xf0] }
 0x2aa   :  { %v12160_v58 = vor.u32 %v13803_v46, %v12159_v44  ;;  %v13873_v44 = vld [vmem:[#allocation9 + $0xce0] sm:$0xf0] }
 0x2ab   :  { %7440 = vmatpush.bf16.msrb.mxu3 %v11860_v49  ;;  %7453 = vmatpush.bf16.msra.mxu0 %v12020_v53  ;;  %v11939_v49 = vld [vmem:[#allocation9 + $0x8e8] sm:$0xf]  ;;  %v4257_v53 = vmax.f32 %v14561_v5, 0.0  ;;  %v12539_v5 = vld [vmem:[#allocation9 + $0xd98] sm:$0xf] }
 0x2ac   :  { %7416 = vmatpush.bf16.msrb.mxu1 %v11500_v10  ;;  %v12220_v10 = vor.u32 %v13818_v42, %v12219_v33  ;;  %v11940_v61 = vor.u32 %v13748_v50, %v11939_v49  ;;  %v13933_v33 = vld [vmem:[#allocation9 + $0xec0] sm:$0xf0]  ;;  %v14630_v42 = vpack.c.bf16 %v4258_v22, %v4258_v22  ;;  %v1056_v49 = vperm.slane %v14628_v59, 0 }
 0x2ad   :  { %7429 = vmatpush.bf16.msrb.mxu2 %v11660_v60  ;;  %v12380_v60 = vor.u32 %v13858_v36, %v12379_v15  ;;  %v14620_v6 = vpack.c.bf16 %v4257_v53, %v4257_v53  ;;  %v12180_v15 = vor.u32 %v13808_v27, %v12179_v26  ;;  %v12319_v36 = vld [vmem:[#allocation9 + $0xbe0] sm:$0xf]  ;;  %v1057_v50 = vperm.slane %v14628_v59, 1  ;;  %v13888_v53 = vld [vmem:[#allocation9 + $0xd58] sm:$0xf0] }
 0x2ae   :  { %v12680_v55 = vor.u32 %v13933_v33, %v12679_v19  ;;  %v13793_v22 = vld [vmem:[#allocation9 + $0xa60] sm:$0xf0] }
 0x2af   :  { %7441 = vmatpush.bf16.msrb.mxu3 %v11840_v0  ;;  %7454 = vmatpush.bf16.msra.mxu0 %v12000_v1  ;;  %v12359_v0 = vld [vmem:[#allocation9 + $0xc30] sm:$0xf]  ;;  %v11759_v1 = vld [vmem:[#allocation9 + $0x780] sm:$0xf] }
 0x2b0   :  { %7417 = vmatpush.bf16.msrb.mxu1 %v11480_v11  ;;  %v12360_v3 = vor.u32 %v13853_v40, %v12359_v0  ;;  %v12699_v11 = vld [vmem:[#allocation9 + $0xed8] sm:$0xf]  ;;  %v11760_v18 = vor.u32 %v13703_v4, %v11759_v1  ;;  %v13798_v40 = vld [vmem:[#allocation9 + $0xa88] sm:$0xf0]  ;;  %v4067_v1 = vadd.f32 %v14612_v8, %v1057_v50  ;;  %v12479_v4 = vld [vmem:[#allocation9 + $0xd20] sm:$0xf] }
 0x2b1   :  { %7430 = vmatpush.bf16.msrb.mxu2 %v11640_v35  ;;  %v13898_v35 = vld [vmem:[#allocation9 + $0xda8] sm:$0xf0]  ;;  %v4081_v23 = vpop.f32.mrf.mxu3  ;;  %v12700_v30 = vor.u32 %v13938_v13, %v12699_v11  ;;  %v12139_v0 = vld [vmem:[#allocation9 + $0xa78] sm:$0xf]  ;;  %v13923_v11 = vld [vmem:[#allocation9 + $0xe70] sm:$0xf0] }
 0x2b2   :  { %v12119_v8 = vld [vmem:[#allocation9 + $0xa50] sm:$0xf]  ;;  %v12079_v50 = vld [vmem:[#allocation9 + $0xa00] sm:$0xf] }
 0x2b3   :  { %7442 = vmatpush.bf16.msrb.mxu3 %v11820_v17  ;;  %7455 = vmatpush.bf16.msra.mxu0 %v11980_v21  ;;  %v12200_v17 = vor.u32 %v13813_v51, %v12199_v63  ;;  %v13848_v21 = vld [vmem:[#allocation9 + $0xc18] sm:$0xf0]  ;;  %v12500_v51 = vor.u32 %v13888_v53, %v12499_v52  ;;  %v12599_v52 = vld [vmem:[#allocation9 + $0xe10] sm:$0xf]  ;;  %v13913_v53 = vld [vmem:[#allocation9 + $0xe20] sm:$0xf0] }
 0x2b4   :  { %7418 = vmatpush.bf16.msrb.mxu1 %v11460_v28  ;;  %v12519_v28 = vld [vmem:[#allocation9 + $0xd70] sm:$0xf]  ;;  %v13928_v63 = vld [vmem:[#allocation9 + $0xe98] sm:$0xf0] }
 0x2b5   :  { %7431 = vmatpush.bf16.msrb.mxu2 %v11620_v25  ;;  %v12540_v25 = vor.u32 %v13898_v35, %v12539_v5  ;;  %v12520_v62 = vor.u32 %v13893_v29, %v12519_v28  ;;  %v12120_v29 = vor.u32 %v13793_v22, %v12119_v8  ;;  %v10921_v8 = vld [vmem:[#allocation9 + $0x104] sm:$0xf0]  ;;  %v13531_v22 = vld [vmem:[#allocation9 + $0x234] sm:$0xf] }
 0x2b7   :  { %7443 = vmatpush.bf16.msrb.mxu3 %v11800_v37  ;;  %7456 = vmatpush.bf16.msra.mxu0 %v11960_v41  ;;  %v12340_v37 = vor.u32 %v13848_v21, %v12339_v20  ;;  %v13843_v41 = vld [vmem:[#allocation9 + $0xbf0] sm:$0xf0]  ;;  %v12279_v20 = vld [vmem:[#allocation9 + $0xb90] sm:$0xf]  ;;  %v13833_v21 = vld [vmem:[#allocation9 + $0xba0] sm:$0xf0] }
 0x2b8   :  { %7419 = vmatpush.bf16.msrb.mxu1 %v11440_v7  ;;  %v12320_v7 = vor.u32 %v13843_v41, %v12319_v36  ;;  %v12280_v27 = vor.u32 %v13833_v21, %v12279_v20 }
 0x2b9   :  { %7432 = vmatpush.bf16.msrb.mxu2 %v11600_v47  ;;  %v14632_v47 = vpack.c.bf16 %v4259_v34, %v4259_v34  ;;  %v12619_v34 = vld [vmem:[#allocation9 + $0xe38] sm:$0xf] }
 0x2ba   :  { %v4105_v5 = vpop.f32.mrf.mxu1 }
 0x2bb   :  { %7444 = vmatpush.bf16.msrb.mxu3 %v11780_v45  ;;  %7457 = vmatpush.bf16.msra.mxu0 %v11940_v61  ;;  %v13838_v45 = vld [vmem:[#allocation9 + $0xbc8] sm:$0xf0]  ;;  %v4002_v61 = vadd.f32 %v14586_v57, %v1056_v49  ;;  %v12480_v57 = vor.u32 %v13883_v9, %v12479_v4  ;;  %v13868_v4 = vld [vmem:[#allocation9 + $0xcb8] sm:$0xf0]  ;;  %v12600_v9 = vor.u32 %v13913_v53, %v12599_v52  ;;  %v11241_v52 = vld [vmem:[#allocation9 + $0x384] sm:$0xf0] }
 0x2bc   :  { %7464 = vmatpush.bf16.msra.mxu1 %v12220_v10  ;;  %7433 = vmatmul.bf16.vlgmr.msrb.gmra.mxu2 %v14620_v6  ;;  %v12299_v10 = vld [vmem:[#allocation9 + $0xbb8] sm:$0xf] }
 0x2bd   :  { %7477 = vmatpush.bf16.msra.mxu2 %v12380_v60  ;;  %7420 = vmatmul.bf16.vlgmr.msrb.gmra.mxu1 %v14622_v14  ;;  %v12659_v60 = vld [vmem:[#allocation9 + $0xe88] sm:$0xf]  ;;  %v12300_v35 = vor.u32 %v13838_v45, %v12299_v10  ;;  %v4015_v13 = vadd.f32 %v14588_v56, %v4002_v61  ;;  %v13918_v56 = vld [vmem:[#allocation9 + $0xe48] sm:$0xf0]  ;;  %v13823_v10 = vld [vmem:[#allocation9 + $0xb50] sm:$0xf0] }
 0x2be   :  { %v12660_v48 = vor.u32 %v13928_v63, %v12659_v60  ;;  %v12620_v46 = vor.u32 %v13918_v56, %v12619_v34  ;;  %v13783_v63 = vld [vmem:[#allocation9 + $0xa10] sm:$0xf0]  ;;  %v13496_v45 = vld [vmem:[#allocation9 + $0x11c] sm:$0xf]  ;;  %v10941_v61 = vld [vmem:[#allocation9 + $0x12c] sm:$0xf0] }
 0x2bf   :  { %7445 = vmatpush.bf16.msrb.mxu3 %v11760_v18  ;;  %7458 = vmatpush.bf16.msra.mxu0 %v11920_v24  ;;  %v12140_v18 = vor.u32 %v13798_v40, %v12139_v0  ;;  %v4028_v23 = vadd.f32 %v14592_v32, %v4015_v13  ;;  %v12459_v24 = vld [vmem:[#allocation9 + $0xcf8] sm:$0xf]  ;;  %v4118_v28 = vpop.f32.mrf.mxu2  ;;  %v14644_v19 = vpop.f32.mrf.mxu0  ;;  %v12099_v32 = vld [vmem:[#allocation9 + $0xa28] sm:$0xf]  ;;  %v11101_v0 = vld [vmem:[#allocation9 + $0x26c] sm:$0xf0]  ;;  %v12080_v13 = vor.u32 %v13783_v63, %v12079_v50 }
 0x2c0   :  { %7465 = vmatpush.bf16.msra.mxu1 %v12200_v17  ;;  %v4080_v17 = vadd.f32 %v14616_v38, %v4067_v1  ;;  %v12419_v1 = vld [vmem:[#allocation9 + $0xca8] sm:$0xf]  ;;  %v10944_v21 = vor.u32 %v13496_v45, %v10941_v61  ;;  %v11261_v34 = vld [vmem:[#allocation9 + $0x3ac] sm:$0xf0]  ;;  %v12559_v56 = vld [vmem:[#allocation9 + $0xdc0] sm:$0xf] }
 0x2c1   :  { %7478 = vmatpush.bf16.msra.mxu2 %v12360_v3  ;;  %v12639_v3 = vld [vmem:[#allocation9 + $0xe60] sm:$0xf]  ;;  %v4041_v36 = vadd.f32 %v14590_v12, %v4028_v23  ;;  %v11081_v23 = vld [vmem:[#allocation9 + $0x244] sm:$0xf0]  ;;  %v13571_v50 = vld [vmem:[#allocation9 + $0x374] sm:$0xf] }
 0x2c2   :  { %7446 = vmatmul.bf16.vlgmr.msrb.gmra.mxu3 %v14630_v42  ;;  %7459 = vmatmul.bf16.vlgmr.msra.gmra.mxu0 %v14632_v47  ;;  %v12640_v26 = vor.u32 %v13923_v11, %v12639_v3  ;;  %v4093_v38 = vadd.f32 %v14614_v16, %v4080_v17  ;;  %v4107_v49 = vpop.f32.mrf.mxu1  ;;  %v13481_v45 = vld [vmem:[#allocation9 + $0xa4] sm:$0xf]  ;;  %v11221_v61 = vld [vmem:[#allocation9 + $0x35c] sm:$0xf0] }
 0x2c3   :  { %7490 = vmatpush.bf16.msra.mxu3 %v12540_v25  ;;  %7503 = vmatpush.bf16.msrb.mxu0 %v12700_v30  ;;  %v13878_v25 = vld [vmem:[#allocation9 + $0xd08] sm:$0xf0]  ;;  %v12259_v30 = vld [vmem:[#allocation9 + $0xb68] sm:$0xf]  ;;  %v10901_v49 = vld [vmem:[#allocation9 + $0xdc] sm:$0xf0] }
 0x2c4   :  { %7466 = vmatpush.bf16.msra.mxu1 %v12180_v15  ;;  %v12460_v33 = vor.u32 %v13878_v25, %v12459_v24  ;;  %v13788_v15 = vld [vmem:[#allocation9 + $0xa38] sm:$0xf0]  ;;  %v4106_v41 = vadd.f32 %v4105_v5, %v4093_v38  ;;  %v12399_v24 = vld [vmem:[#allocation9 + $0xc80] sm:$0xf]  ;;  %v13863_v25 = vld [vmem:[#allocation9 + $0xc90] sm:$0xf0] }
 0x2c5   :  { %7479 = vmatpush.bf16.msra.mxu2 %v12340_v37  ;;  %v13828_v37 = vld [vmem:[#allocation9 + $0xb78] sm:$0xf0]  ;;  %v12100_v60 = vor.u32 %v13788_v15, %v12099_v32  ;;  %v14648_v40 = vpop.f32.mrf.mxu3  ;;  %v13903_v38 = vld [vmem:[#allocation9 + $0xdd0] sm:$0xf0]  ;;  %v12400_v15 = vor.u32 %v13863_v25, %v12399_v24 }
 0x2c6   :  { %v12260_v16 = vor.u32 %v13828_v37, %v12259_v30  ;;  %v13908_v5 = vld [vmem:[#allocation9 + $0xdf8] sm:$0xf0]  ;;  %v11421_v37 = vld [vmem:[#allocation9 + $0x4ec] sm:$0xf0]  ;;  %v13511_v25 = vld [vmem:[#allocation9 + $0x194] sm:$0xf] }
 0x2c7   :  { %7491 = vmatpush.bf16.msra.mxu3 %v12520_v62  ;;  %7504 = vmatpush.bf16.msrb.mxu0 %v12680_v55  ;;  %v12439_v62 = vld [vmem:[#allocation9 + $0xcd0] sm:$0xf]  ;;  %v4054_v55 = vadd.f32 %v14610_v43, %v4041_v36  ;;  %v4120_v11 = vpop.f32.mrf.mxu2  ;;  %v4146_v20 = vpop.f32.mrf.mxu0  ;;  %v13616_v30 = vld [vmem:[#allocation9 + $0x4dc] sm:$0xf]  ;;  %v13526_v36 = vld [vmem:[#allocation9 + $0x20c] sm:$0xf] }
 0x2c8   :  { %7467 = vmatpush.bf16.msra.mxu1 %v12160_v58  ;;  %v12239_v58 = vld [vmem:[#allocation9 + $0xb40] sm:$0xf]  ;;  %v12440_v12 = vor.u32 %v13873_v44, %v12439_v62  ;;  %v11424_v53 = vor.u32 %v13616_v30, %v11421_v37  ;;  %v11201_v20 = vld [vmem:[#allocation9 + $0x334] sm:$0xf0]  ;;  %v11181_v30 = vld [vmem:[#allocation9 + $0x30c] sm:$0xf0] }
 0x2c9   :  { %7480 = vmatpush.bf16.msra.mxu2 %v12320_v7  ;;  %v4119_v7 = vadd.f32 %v4118_v28, %v4106_v41  ;;  %v12240_v43 = vor.u32 %v13823_v10, %v12239_v58  ;;  %v11061_v41 = vld [vmem:[#allocation9 + $0x21c] sm:$0xf0]  ;;  %v13521_v58 = vld [vmem:[#allocation9 + $0x1e4] sm:$0xf]  ;;  %v11041_v10 = vld [vmem:[#allocation9 + $0x1f4] sm:$0xf0] }
 0x2cb   :  { %7492 = vmatpush.bf16.msra.mxu3 %v12500_v51  ;;  %7505 = vmatpush.bf16.msrb.mxu0 %v12660_v48  ;;  %v13536_v51 = vld [vmem:[#allocation9 + $0x25c] sm:$0xf]  ;;  %v12579_v48 = vld [vmem:[#allocation9 + $0xde8] sm:$0xf]  ;;  %v4261_v3 = vmax.f32 %v4119_v7, 0.0 }
 0x2cc   :  { %7468 = vmatpush.bf16.msra.mxu1 %v12140_v18  ;;  %v11104_v17 = vor.u32 %v13536_v51, %v11101_v0  ;;  %v13491_v18 = vld [vmem:[#allocation9 + $0xf4] sm:$0xf]  ;;  %v10881_v51 = vld [vmem:[#allocation9 + $0xb4] sm:$0xf0]  ;;  %v13566_v0 = vld [vmem:[#allocation9 + $0x34c] sm:$0xf] }
 0x2cd   :  { %7481 = vmatpush.bf16.msra.mxu2 %v12300_v35  ;;  %v4260_v35 = vmax.f32 %v4054_v55, 0.0  ;;  %v14650_v28 = vpack.c.bf16 %v4261_v3, %v4261_v3  ;;  %v10924_v32 = vor.u32 %v13491_v18, %v10921_v8  ;;  %v4133_v62 = vpop.f32.mrf.mxu3  ;;  %v11064_v55 = vor.u32 %v13526_v36, %v11061_v41  ;;  %v13611_v7 = vld [vmem:[#allocation9 + $0x4b4] sm:$0xf]  ;;  %v13561_v18 = vld [vmem:[#allocation9 + $0x324] sm:$0xf] }
 0x2ce   :  { %v1058_v3 = vperm.slane %v14628_v59, 2  ;;  %v11224_v11 = vor.u32 %v13566_v0, %v11221_v61  ;;  %v11341_v36 = vld [vmem:[#allocation9 + $0x44c] sm:$0xf0]  ;;  %v10961_v0 = vld [vmem:[#allocation9 + $0x154] sm:$0xf0] }
 0x2cf   :  { %7493 = vmatpush.bf16.msra.mxu3 %v12480_v57  ;;  %7506 = vmatpush.bf16.msrb.mxu0 %v12640_v26  ;;  %v12420_v57 = vor.u32 %v13868_v4, %v12419_v1  ;;  %v13576_v26 = vld [vmem:[#allocation9 + $0x39c] sm:$0xf]  ;;  %v11044_v4 = vor.u32 %v13521_v58, %v11041_v10  ;;  %v13591_v10 = vld [vmem:[#allocation9 + $0x414] sm:$0xf] }
 0x2d0   :  { %7469 = vmatpush.bf16.msra.mxu1 %v12120_v29  ;;  %v11084_v29 = vor.u32 %v13531_v22, %v11081_v23  ;;  %v11264_v44 = vor.u32 %v13576_v26, %v11261_v34  ;;  %v13601_v22 = vld [vmem:[#allocation9 + $0x464] sm:$0xf]  ;;  %v11361_v23 = vld [vmem:[#allocation9 + $0x474] sm:$0xf0]  ;;  %v11001_v26 = vld [vmem:[#allocation9 + $0x1a4] sm:$0xf0]  ;;  %v11204_v34 = vor.u32 %v13561_v18, %v11201_v20 }
 0x2d1   :  { %7482 = vmatpush.bf16.msra.mxu2 %v12280_v27  ;;  %v12580_v27 = vor.u32 %v13908_v5, %v12579_v48  ;;  %v10884_v48 = vor.u32 %v13481_v45, %v10881_v51  ;;  %v13516_v5 = vld [vmem:[#allocation9 + $0x1bc] sm:$0xf]  ;;  %v11364_v37 = vor.u32 %v13601_v22, %v11361_v23  ;;  %v13461_v51 = vld [vmem:[#allocation9 + $0x4] sm:$0xf]  ;;  %v11141_v18 = vld [vmem:[#allocation9 + $0x2bc] sm:$0xf0] }
 0x2d2   :  { %v11301_v22 = vld [vmem:[#allocation9 + $0x3fc] sm:$0xf0] }
 0x2d3   :  { %7494 = vmatpush.bf16.msra.mxu3 %v12460_v33  ;;  %7507 = vmatpush.bf16.msrb.mxu0 %v12620_v46  ;;  %v14652_v33 = vpack.c.bf16 %v4260_v35, %v4260_v35  ;;  %v13486_v46 = vld [vmem:[#allocation9 + $0xcc] sm:$0xf]  ;;  %v11021_v35 = vld [vmem:[#allocation9 + $0x1cc] sm:$0xf0] }
 0x2d4   :  { %7470 = vmatpush.bf16.msra.mxu1 %v12100_v60  ;;  %v11401_v60 = vld [vmem:[#allocation9 + $0x4c4] sm:$0xf0]  ;;  %v10904_v63 = vor.u32 %v13486_v46, %v10901_v49  ;;  %v11024_v8 = vor.u32 %v13516_v5, %v11021_v35  ;;  %v10981_v46 = vld [vmem:[#allocation9 + $0x17c] sm:$0xf0]  ;;  %v13656_v5 = vld [vmem:[#allocation9 + $0x61c] sm:$0xf] }
 0x2d5   :  { %7483 = vmatpush.bf16.msra.mxu2 %v12260_v16  ;;  %v12560_v16 = vor.u32 %v13903_v38, %v12559_v56  ;;  %v11404_v1 = vor.u32 %v13611_v7, %v11401_v60  ;;  %v13471_v56 = vld [vmem:[#allocation9 + $0x54] sm:$0xf]  ;;  %v10841_v38 = vld [vmem:[#allocation9 + $0x64] sm:$0xf0]  ;;  %v11581_v35 = vld [vmem:[#allocation9 + $0x62c] sm:$0xf0] }
 0x2d6   :  { %v10844_v62 = vor.u32 %v13471_v56, %v10841_v38  ;;  %v13651_v56 = vld [vmem:[#allocation9 + $0x5f4] sm:$0xf]  ;;  %v11561_v38 = vld [vmem:[#allocation9 + $0x604] sm:$0xf0] }
 0x2d7   :  { %7495 = vmatpush.bf16.msra.mxu3 %v12440_v12  ;;  %7508 = vmatpush.bf16.msrb.mxu0 %v12600_v9  ;;  %v11244_v12 = vor.u32 %v13571_v50, %v11241_v52  ;;  %v13606_v9 = vld [vmem:[#allocation9 + $0x48c] sm:$0xf]  ;;  %v10821_v52 = vld [vmem:[#allocation9 + $0x3c] sm:$0xf0] }
 0x2d8   :  { %7471 = vmatpush.bf16.msra.mxu1 %v12080_v13  ;;  %v13476_v13 = vld [vmem:[#allocation9 + $0x7c] sm:$0xf]  ;;  %v13466_v50 = vld [vmem:[#allocation9 + $0x2c] sm:$0xf] }
 0x2d9   :  { %7484 = vmatpush.bf16.msra.mxu2 %v12240_v43  ;;  %v11381_v43 = vld [vmem:[#allocation9 + $0x49c] sm:$0xf0]  ;;  %v10824_v45 = vor.u32 %v13466_v50, %v10821_v52 }
 0x2db   :  { %7496 = vmatpush.bf16.msra.mxu3 %v12420_v57  ;;  %7509 = vmatpush.bf16.msrb.mxu0 %v12580_v27  ;;  %v4157_v57 = vpop.f32.mrf.mxu1  ;;  %v4132_v27 = vadd.f32 %v14648_v40, %v1058_v3 }
 0x2dc   :  { %7516 = vmatpush.bf16.msrb.mxu1 %v10944_v21  ;;  %7485 = vmatmul.bf16.vlgmr.msra.gmra.mxu2 %v14650_v28  ;;  %v11384_v21 = vor.u32 %v13606_v9, %v11381_v43  ;;  %v13696_v9 = vld [vmem:[#allocation9 + $0x75c] sm:$0xf]  ;;  %v11741_v43 = vld [vmem:[#allocation9 + $0x76c] sm:$0xf0] }
 0x2dd   :  { %7529 = vmatpush.bf16.msrb.mxu2 %v11104_v17  ;;  %7472 = vmatmul.bf16.vlgmr.msra.gmra.mxu1 %v14652_v33  ;;  %v10861_v17 = vld [vmem:[#allocation9 + $0x8c] sm:$0xf0]  ;;  %v4145_v49 = vadd.f32 %v14644_v19, %v4132_v27  ;;  %v13501_v19 = vld [vmem:[#allocation9 + $0x144] sm:$0xf]  ;;  %v11721_v27 = vld [vmem:[#allocation9 + $0x744] sm:$0xf0] }
 0x2de   :  { %v10864_v24 = vor.u32 %v13476_v13, %v10861_v17  ;;  %v10964_v13 = vor.u32 %v13501_v19, %v10961_v0  ;;  %v13546_v17 = vld [vmem:[#allocation9 + $0x2ac] sm:$0xf]  ;;  %v13641_v19 = vld [vmem:[#allocation9 + $0x5a4] sm:$0xf]  ;;  %v11521_v0 = vld [vmem:[#allocation9 + $0x5b4] sm:$0xf0] }
 0x2df   :  { %7497 = vmatpush.bf16.msra.mxu3 %v12400_v15  ;;  %7510 = vmatpush.bf16.msrb.mxu0 %v12560_v16  ;;  %v13596_v15 = vld [vmem:[#allocation9 + $0x43c] sm:$0xf]  ;;  %v4170_v41 = vpop.f32.mrf.mxu2  ;;  %v14659_v40 = vpop.f32.mrf.mxu0  ;;  %v4158_v60 = vadd.f32 %v4157_v57, %v4145_v49  ;;  %v11744_v57 = vor.u32 %v13696_v9, %v11741_v43  ;;  %v13686_v49 = vld [vmem:[#allocation9 + $0x70c] sm:$0xf]  ;;  %v11861_v9 = vld [vmem:[#allocation9 + $0x85c] sm:$0xf0]  ;;  %v11524_v43 = vor.u32 %v13641_v19, %v11521_v0 }
 0x2e0   :  { %7517 = vmatpush.bf16.msrb.mxu1 %v10924_v32  ;;  %v11004_v32 = vor.u32 %v13511_v25, %v11001_v26  ;;  %v11344_v7 = vor.u32 %v13596_v15, %v11341_v36  ;;  %v11584_v25 = vor.u32 %v13656_v5, %v11581_v35  ;;  %v13691_v26 = vld [vmem:[#allocation9 + $0x734] sm:$0xf]  ;;  %v11661_v5 = vld [vmem:[#allocation9 + $0x6cc] sm:$0xf0]  ;;  %v13636_v35 = vld [vmem:[#allocation9 + $0x57c] sm:$0xf] }
 0x2e1   :  { %7530 = vmatpush.bf16.msrb.mxu2 %v11084_v29  ;;  %v13556_v29 = vld [vmem:[#allocation9 + $0x2fc] sm:$0xf]  ;;  %v4171_v61 = vadd.f32 %v4170_v41, %v4158_v60  ;;  %v11724_v36 = vor.u32 %v13691_v26, %v11721_v27  ;;  %v11901_v41 = vld [vmem:[#allocation9 + $0x8ac] sm:$0xf0]  ;;  %v13706_v0 = vld [vmem:[#allocation9 + $0x7ac] sm:$0xf] }
 0x2e2   :  { %v11184_v16 = vor.u32 %v13556_v29, %v11181_v30  ;;  %v13541_v30 = vld [vmem:[#allocation9 + $0x284] sm:$0xf]  ;;  %v13716_v27 = vld [vmem:[#allocation9 + $0x7fc] sm:$0xf] }
 0x2e3   :  { %7542 = vmatpush.bf16.msrb.mxu3 %v11264_v44  ;;  %7555 = vmatpush.bf16.msra.mxu0 %v11424_v53  ;;  %v13506_v44 = vld [vmem:[#allocation9 + $0x16c] sm:$0xf]  ;;  %v13551_v53 = vld [vmem:[#allocation9 + $0x2d4] sm:$0xf] }
 0x2e4   :  { %7518 = vmatpush.bf16.msrb.mxu1 %v10904_v63  ;;  %v4159_v63 = vpop.f32.mrf.mxu1  ;;  %v10984_v58 = vor.u32 %v13506_v44, %v10981_v46  ;;  %v11281_v44 = vld [vmem:[#allocation9 + $0x3d4] sm:$0xf0]  ;;  %v11564_v46 = vor.u32 %v13651_v56, %v11561_v38 }
 0x2e5   :  { %7531 = vmatpush.bf16.msrb.mxu2 %v11064_v55  ;;  %v11161_v55 = vld [vmem:[#allocation9 + $0x2e4] sm:$0xf0] }
 0x2e7   :  { %7543 = vmatpush.bf16.msrb.mxu3 %v11244_v12  ;;  %7556 = vmatpush.bf16.msra.mxu0 %v11404_v1  ;;  %v11321_v12 = vld [vmem:[#allocation9 + $0x424] sm:$0xf0]  ;;  %v11164_v1 = vor.u32 %v13551_v53, %v11161_v55  ;;  %v4172_v20 = vpop.f32.mrf.mxu2  ;;  %v13646_v53 = vld [vmem:[#allocation9 + $0x5cc] sm:$0xf]  ;;  %v11541_v55 = vld [vmem:[#allocation9 + $0x5dc] sm:$0xf0] }
 0x2e8   :  { %7519 = vmatpush.bf16.msrb.mxu1 %v10884_v48  ;;  %v4183_v48 = vpop.f32.mrf.mxu3  ;;  %v11324_v3 = vor.u32 %v13591_v10, %v11321_v12  ;;  %v11881_v10 = vld [vmem:[#allocation9 + $0x884] sm:$0xf0]  ;;  %v11544_v12 = vor.u32 %v13646_v53, %v11541_v55  ;;  %v11841_v20 = vld [vmem:[#allocation9 + $0x834] sm:$0xf0]  ;;  %v13661_v53 = vld [vmem:[#allocation9 + $0x644] sm:$0xf] }
 0x2e9   :  { %7532 = vmatpush.bf16.msrb.mxu2 %v11044_v4  ;;  %v10801_v4 = vld [vmem:[#allocation9 + $0x14] sm:$0xf0] }
 0x2ea   :  { %v11601_v55 = vld [vmem:[#allocation9 + $0x654] sm:$0xf0] }
 0x2eb   :  { %7544 = vmatpush.bf16.msrb.mxu3 %v11224_v11  ;;  %7557 = vmatpush.bf16.msra.mxu0 %v11384_v21  ;;  %v4184_v11 = vadd.f32 %v4183_v48, %v4171_v61  ;;  %v10804_v21 = vor.u32 %v13461_v51, %v10801_v4  ;;  %v11681_v51 = vld [vmem:[#allocation9 + $0x6f4] sm:$0xf0]  ;;  %v13726_v4 = vld [vmem:[#allocation9 + $0x84c] sm:$0xf]  ;;  %v13676_v48 = vld [vmem:[#allocation9 + $0x6bc] sm:$0xf]  ;;  %v11604_v19 = vor.u32 %v13661_v53, %v11601_v55 }
 0x2ec   :  { %7520 = vmatpush.bf16.msrb.mxu1 %v10864_v24  ;;  %v4198_v24 = vpop.f32.mrf.mxu0  ;;  %v12321_v53 = vld [vmem:[#allocation9 + $0xbf4] sm:$0xf0]  ;;  %v13801_v55 = vld [vmem:[#allocation9 + $0xaa4] sm:$0xf] }
 0x2ed   :  { %7533 = vmatpush.bf16.msrb.mxu2 %v11024_v8  ;;  %v13586_v8 = vld [vmem:[#allocation9 + $0x3ec] sm:$0xf]  ;;  %v4262_v23 = vmax.f32 %v4184_v11, 0.0  ;;  %v11864_v11 = vor.u32 %v13726_v4, %v11861_v9  ;;  %v11481_v24 = vld [vmem:[#allocation9 + $0x564] sm:$0xf0] }
 0x2ee   :  { %v11304_v15 = vor.u32 %v13586_v8, %v11301_v22  ;;  %v11641_v8 = vld [vmem:[#allocation9 + $0x6a4] sm:$0xf0]  ;;  %v1059_v22 = vperm.slane %v14628_v59, 3  ;;  %v11461_v59 = vld [vmem:[#allocation9 + $0x53c] sm:$0xf0] }
 0x2ef   :  { %7545 = vmatpush.bf16.msrb.mxu3 %v11204_v34  ;;  %7558 = vmatpush.bf16.msra.mxu0 %v11364_v37  ;;  %v11144_v34 = vor.u32 %v13546_v17, %v11141_v18  ;;  %v14661_v29 = vpack.c.bf16 %v4262_v23, %v4262_v23  ;;  %v11121_v37 = vld [vmem:[#allocation9 + $0x294] sm:$0xf0]  ;;  %v11664_v17 = vor.u32 %v13676_v48, %v11661_v5  ;;  %v13721_v18 = vld [vmem:[#allocation9 + $0x824] sm:$0xf]  ;;  %v13631_v23 = vld [vmem:[#allocation9 + $0x554] sm:$0xf] }
 0x2f0   :  { %7521 = vmatpush.bf16.msrb.mxu1 %v10844_v62  ;;  %v13581_v62 = vld [vmem:[#allocation9 + $0x3c4] sm:$0xf]  ;;  %v4185_v50 = vpop.f32.mrf.mxu3  ;;  %v11124_v52 = vor.u32 %v13541_v30, %v11121_v37  ;;  %v11484_v38 = vor.u32 %v13631_v23, %v11481_v24  ;;  %v13666_v30 = vld [vmem:[#allocation9 + $0x66c] sm:$0xf]  ;;  %v11621_v37 = vld [vmem:[#allocation9 + $0x67c] sm:$0xf0] }
 0x2f1   :  { %7534 = vmatpush.bf16.msrb.mxu2 %v11004_v32  ;;  %v13736_v32 = vld [vmem:[#allocation9 + $0x89c] sm:$0xf]  ;;  %7498 = vmatmul.bf16.vlgmr.msra.gmra.mxu3 %v14661_v29  ;;  %v11284_v60 = vor.u32 %v13581_v62, %v11281_v44 }
 0x2f2   :  { %v13896_v24 = vld [vmem:[#allocation9 + $0xd9c] sm:$0xf] }
 0x2f3   :  { %7546 = vmatpush.bf16.msrb.mxu3 %v11184_v16  ;;  %7559 = vmatpush.bf16.msra.mxu0 %v11344_v7  ;;  %v11701_v16 = vld [vmem:[#allocation9 + $0x71c] sm:$0xf0]  ;;  %v11904_v7 = vor.u32 %v13736_v32, %v11901_v41  ;;  %v4197_v32 = vadd.f32 %v14659_v40, %v1059_v22  ;;  %v12381_v40 = vld [vmem:[#allocation9 + $0xc6c] sm:$0xf0] }
 0x2f4   :  { %7522 = vmatpush.bf16.msrb.mxu1 %v10824_v45  ;;  %v11704_v63 = vor.u32 %v13686_v49, %v11701_v16  ;;  %v13681_v45 = vld [vmem:[#allocation9 + $0x6e4] sm:$0xf]  ;;  %v13711_v49 = vld [vmem:[#allocation9 + $0x7d4] sm:$0xf]  ;;  %v11801_v16 = vld [vmem:[#allocation9 + $0x7e4] sm:$0xf0] }
 0x2f5   :  { %7535 = vmatpush.bf16.msrb.mxu2 %v10984_v58  ;;  %v13731_v58 = vld [vmem:[#allocation9 + $0x874] sm:$0xf] }
 0x2f6   :  { %v11884_v61 = vor.u32 %v13731_v58, %v11881_v10  ;;  %v11804_v10 = vor.u32 %v13711_v49, %v11801_v16  ;;  %v13766_v49 = vld [vmem:[#allocation9 + $0x98c] sm:$0xf] }
 0x2f7   :  { %7547 = vmatpush.bf16.msrb.mxu3 %v11164_v1  ;;  %7560 = vmatpush.bf16.msra.mxu0 %v11324_v3  ;;  %v11684_v1 = vor.u32 %v13681_v45, %v11681_v51  ;;  %v11501_v3 = vld [vmem:[#allocation9 + $0x58c] sm:$0xf0] }
 0x2f8   :  { %7523 = vmatpush.bf16.msrb.mxu1 %v10804_v21  ;;  %v11504_v21 = vor.u32 %v13636_v35, %v11501_v3  ;;  %v12221_v45 = vld [vmem:[#allocation9 + $0xb2c] sm:$0xf0] }
 0x2f9   :  { %7536 = vmatpush.bf16.msrb.mxu2 %v10964_v13  ;;  %v12061_v3 = vld [vmem:[#allocation9 + $0x9ec] sm:$0xf0] }
 0x2fa   :  { %v4209_v13 = vpop.f32.mrf.mxu1 }
 0x2fb   :  { %7548 = vmatpush.bf16.msrb.mxu3 %v11144_v34  ;;  %7524 = vmatmul.bf16.vlgmr.msrb.gmra.mxu1 %v14598_v54  ;;  %v11821_v34 = vld [vmem:[#allocation9 + $0x80c] sm:$0xf0]  ;;  %v4210_v62 = vadd.f32 %v4209_v13, %v4197_v32  ;;  %v12361_v13 = vld [vmem:[#allocation9 + $0xc44] sm:$0xf0] }
 0x2fc   :  { %7568 = vmatpush.bf16.msra.mxu1 %v11584_v25  ;;  %7537 = vmatmul.bf16.vlgmr.msrb.gmra.mxu2 %v14596_v2  ;;  %v11844_v25 = vor.u32 %v13721_v18, %v11841_v20  ;;  %v11824_v41 = vor.u32 %v13716_v27, %v11821_v34  ;;  %v13811_v18 = vld [vmem:[#allocation9 + $0xaf4] sm:$0xf]  ;;  %v12201_v20 = vld [vmem:[#allocation9 + $0xb04] sm:$0xf0] }
 0x2fd   :  { %7581 = vmatpush.bf16.msra.mxu2 %v11744_v57  ;;  %7561 = vmatpush.bf16.msra.mxu0 %v11304_v15  ;;  %v13671_v57 = vld [vmem:[#allocation9 + $0x694] sm:$0xf]  ;;  %v12204_v34 = vor.u32 %v13811_v18, %v12201_v20  ;;  %v11981_v18 = vld [vmem:[#allocation9 + $0x94c] sm:$0xf0] }
 0x2fe   :  { %v11644_v26 = vor.u32 %v13671_v57, %v11641_v8  ;;  %v13701_v57 = vld [vmem:[#allocation9 + $0x784] sm:$0xf]  ;;  %v11761_v8 = vld [vmem:[#allocation9 + $0x794] sm:$0xf0]  ;;  %v13831_v20 = vld [vmem:[#allocation9 + $0xb94] sm:$0xf] }
 0x2ff   :  { %7549 = vmatpush.bf16.msrb.mxu3 %v11124_v52  ;;  %v4222_v56 = vpop.f32.mrf.mxu2  ;;  %v4248_v15 = vpop.f32.mrf.mxu0  ;;  %v13621_v52 = vld [vmem:[#allocation9 + $0x504] sm:$0xf]  ;;  %v11764_v32 = vor.u32 %v13701_v57, %v11761_v8  ;;  %v13791_v57 = vld [vmem:[#allocation9 + $0xa54] sm:$0xf]  ;;  %v12121_v8 = vld [vmem:[#allocation9 + $0xa64] sm:$0xf0] }
 0x300   :  { %7569 = vmatpush.bf16.msra.mxu1 %v11564_v46  ;;  %v11624_v46 = vor.u32 %v13666_v30, %v11621_v37  ;;  %v12341_v30 = vld [vmem:[#allocation9 + $0xc1c] sm:$0xf0] }
 0x301   :  { %7582 = vmatpush.bf16.msra.mxu2 %v11724_v36  ;;  %7562 = vmatpush.bf16.msra.mxu0 %v11284_v60  ;;  %v13626_v36 = vld [vmem:[#allocation9 + $0x52c] sm:$0xf]  ;;  %v11441_v60 = vld [vmem:[#allocation9 + $0x514] sm:$0xf0] }
 0x302   :  { %7550 = vmatmul.bf16.vlgmr.msrb.gmra.mxu3 %v14604_v39  ;;  %v4211_v44 = vpop.f32.mrf.mxu1  ;;  %v11464_v50 = vor.u32 %v13626_v36, %v11461_v59  ;;  %v11444_v4 = vor.u32 %v13621_v52, %v11441_v60  ;;  %v12181_v36 = vld [vmem:[#allocation9 + $0xadc] sm:$0xf0]  ;;  %v13841_v52 = vld [vmem:[#allocation9 + $0xbe4] sm:$0xf] }
 0x303   :  { %7594 = vmatpush.bf16.msra.mxu3 %v11904_v7  ;;  %v4223_v7 = vadd.f32 %v4222_v56, %v4210_v62  ;;  %v12041_v56 = vld [vmem:[#allocation9 + $0x9c4] sm:$0xf0]  ;;  %v13891_v44 = vld [vmem:[#allocation9 + $0xd74] sm:$0xf] }
 0x304   :  { %7570 = vmatpush.bf16.msra.mxu1 %v11544_v12  ;;  %v13816_v12 = vld [vmem:[#allocation9 + $0xb1c] sm:$0xf] }
 0x305   :  { %7583 = vmatpush.bf16.msra.mxu2 %v11704_v63  ;;  %v13856_v63 = vld [vmem:[#allocation9 + $0xc5c] sm:$0xf]  ;;  %v4235_v58 = vpop.f32.mrf.mxu3  ;;  %v12224_v35 = vor.u32 %v13816_v12, %v12221_v45  ;;  %v12501_v12 = vld [vmem:[#allocation9 + $0xd5c] sm:$0xf0]  ;;  %v13761_v45 = vld [vmem:[#allocation9 + $0x964] sm:$0xf] }
 0x306   :  { %v4236_v51 = vadd.f32 %v4235_v58, %v4223_v7  ;;  %v12384_v9 = vor.u32 %v13856_v63, %v12381_v40  ;;  %v12161_v7 = vld [vmem:[#allocation9 + $0xab4] sm:$0xf0]  ;;  %v14674_v63 = vld [vmem:[#allocation10] sm:$0x1f]  ;;  %v12324_v58 = vor.u32 %v13841_v52, %v12321_v53  ;;  %v12441_v52 = vld [vmem:[#allocation9 + $0xce4] sm:$0xf0] }
 0x307   :  { %7595 = vmatpush.bf16.msra.mxu3 %v11884_v61  ;;  %v11781_v61 = vld [vmem:[#allocation9 + $0x7bc] sm:$0xf0]  ;;  %v4250_v5 = vpop.f32.mrf.mxu0  ;;  %v13746_v53 = vld [vmem:[#allocation9 + $0x8ec] sm:$0xf] }
 0x308   :  { %7571 = vmatpush.bf16.msra.mxu1 %v11524_v43  ;;  %v13776_v43 = vld [vmem:[#allocation9 + $0x9dc] sm:$0xf]  ;;  %v4249_v48 = vadd.f32 %v4248_v15, %v4236_v51  ;;  %v13806_v15 = vld [vmem:[#allocation9 + $0xacc] sm:$0xf]  ;;  %v12164_v51 = vor.u32 %v13801_v55, %v12161_v7  ;;  %v11941_v55 = vld [vmem:[#allocation9 + $0x8fc] sm:$0xf0] }
 0x309   :  { %7584 = vmatpush.bf16.msra.mxu2 %v11684_v1  ;;  %v4224_v1 = vpop.f32.mrf.mxu2  ;;  %v12064_v22 = vor.u32 %v13776_v43, %v12061_v3  ;;  %v12184_v16 = vor.u32 %v13806_v15, %v12181_v36  ;;  %v13881_v3 = vld [vmem:[#allocation9 + $0xd24] sm:$0xf]  ;;  %v12261_v15 = vld [vmem:[#allocation9 + $0xb7c] sm:$0xf0] }
 0x30a   :  { %v13796_v1 = vld [vmem:[#allocation9 + $0xa7c] sm:$0xf] }
 0x30b   :  { %7596 = vmatpush.bf16.msra.mxu3 %v11864_v11  ;;  %v13851_v11 = vld [vmem:[#allocation9 + $0xc34] sm:$0xf] }
 0x30c   :  { %7572 = vmatpush.bf16.msra.mxu1 %v11504_v21  ;;  %v4263_v21 = vmax.f32 %v4249_v48, 0.0  ;;  %v12364_v23 = vor.u32 %v13851_v11, %v12361_v13  ;;  %v12481_v11 = vld [vmem:[#allocation9 + $0xd34] sm:$0xf0]  ;;  %v13756_v13 = vld [vmem:[#allocation9 + $0x93c] sm:$0xf] }
 0x30d   :  { %7585 = vmatpush.bf16.msra.mxu2 %v11664_v17  ;;  %v11784_v17 = vor.u32 %v13706_v0, %v11781_v61  ;;  %v4237_v37 = vpop.f32.mrf.mxu3  ;;  %v13836_v0 = vld [vmem:[#allocation9 + $0xbbc] sm:$0xf]  ;;  %v12301_v61 = vld [vmem:[#allocation9 + $0xbcc] sm:$0xf0] }
 0x30e   :  { %v14669_v27 = vpack.c.bf16 %v4263_v21, %v4263_v21  ;;  %v12281_v21 = vld [vmem:[#allocation9 + $0xba4] sm:$0xf0] }
 0x30f   :  { %7597 = vmatpush.bf16.msra.mxu3 %v11844_v25  ;;  %v12541_v25 = vld [vmem:[#allocation9 + $0xdac] sm:$0xf0]  ;;  %v11961_v37 = vld [vmem:[#allocation9 + $0x924] sm:$0xf0] }
 0x310   :  { %7573 = vmatpush.bf16.msra.mxu1 %v11484_v38  ;;  %v13846_v38 = vld [vmem:[#allocation9 + $0xc0c] sm:$0xf]  ;;  %7511 = vmatmul.bf16.vlgmr.msrb.gmra.mxu0 %v14669_v27  ;;  %v12544_v59 = vor.u32 %v13896_v24, %v12541_v25  ;;  %v11984_v24 = vor.u32 %v13756_v13, %v11981_v18  ;;  %v12284_v25 = vor.u32 %v13831_v20, %v12281_v21  ;;  %v11921_v13 = vld [vmem:[#allocation9 + $0x8d4] sm:$0xf0]  ;;  %v12701_v21 = vld [vmem:[#allocation9 + $0xeec] sm:$0xf0] }
 0x311   :  { %7586 = vmatpush.bf16.msra.mxu2 %v11644_v26  ;;  %v13771_v26 = vld [vmem:[#allocation9 + $0x9b4] sm:$0xf]  ;;  %7607 = vmatpush.bf16.msrb.mxu0 %v12064_v22  ;;  %v12344_v62 = vor.u32 %v13846_v38, %v12341_v30  ;;  %v12484_v22 = vor.u32 %v13881_v3, %v12481_v11  ;;  %v12124_v30 = vor.u32 %v13791_v57, %v12121_v8  ;;  %v13741_v11 = vld [vmem:[#allocation9 + $0x8c4] sm:$0xf]  ;;  %v11087_v57 = vld [vmem:[#allocation9 + $0x238] sm:$0xf] }
 0x312   :  { %v13534_v8 = vld [vmem:[#allocation9 + $0x248] sm:$0xf0] }
 0x313   :  { %7598 = vmatpush.bf16.msra.mxu3 %v11824_v41  ;;  %v12044_v41 = vor.u32 %v13771_v26, %v12041_v56  ;;  %v13876_v26 = vld [vmem:[#allocation9 + $0xcfc] sm:$0xf]  ;;  %v13751_v56 = vld [vmem:[#allocation9 + $0x914] sm:$0xf] }
 0x314   :  { %7574 = vmatpush.bf16.msra.mxu1 %v11464_v50  ;;  %v12021_v50 = vld [vmem:[#allocation9 + $0x99c] sm:$0xf0] }
 0x315   :  { %7587 = vmatpush.bf16.msra.mxu2 %v11624_v46  ;;  %v12521_v46 = vld [vmem:[#allocation9 + $0xd84] sm:$0xf0]  ;;  %7608 = vmatpush.bf16.msrb.mxu0 %v12044_v41  ;;  %v12024_v40 = vor.u32 %v13766_v49, %v12021_v50  ;;  %v13786_v41 = vld [vmem:[#allocation9 + $0xa2c] sm:$0xf] }
 0x316   :  { %v12524_v60 = vor.u32 %v13891_v44, %v12521_v46  ;;  %v13871_v46 = vld [vmem:[#allocation9 + $0xcd4] sm:$0xf] }
 0x317   :  { %7599 = vmatpush.bf16.msra.mxu3 %v11804_v10  ;;  %v13886_v10 = vld [vmem:[#allocation9 + $0xd4c] sm:$0xf] }
 0x318   :  { %7575 = vmatpush.bf16.msra.mxu1 %v11444_v4  ;;  %v12141_v4 = vld [vmem:[#allocation9 + $0xa8c] sm:$0xf0]  ;;  %v12504_v43 = vor.u32 %v13886_v10, %v12501_v12  ;;  %v12081_v10 = vld [vmem:[#allocation9 + $0xa14] sm:$0xf0]  ;;  %v11107_v12 = vld [vmem:[#allocation9 + $0x260] sm:$0xf] }
 0x319   :  { %7588 = vmatpush.bf16.msra.mxu2 %v11604_v19  ;;  %v12001_v19 = vld [vmem:[#allocation9 + $0x974] sm:$0xf0]  ;;  %7609 = vmatpush.bf16.msrb.mxu0 %v12024_v40  ;;  %v13821_v40 = vld [vmem:[#allocation9 + $0xb44] sm:$0xf] }
 0x31a   :  { %v7369_v48 = vpop.f32.mrf.mxu1  ;;  %v12004_v5 = vor.u32 %v13761_v45, %v12001_v19  ;;  %v13539_v45 = vld [vmem:[#allocation9 + $0x270] sm:$0xf0]  ;;  %v12444_v19 = vor.u32 %v13871_v46, %v12441_v52 }
 0x31b   :  { %7600 = vmatpush.bf16.msra.mxu3 %v11784_v17  ;;  %7576 = vmatmul.bf16.vlgmr.msra.gmra.mxu1 %v14622_v14  ;;  %v12144_v17 = vor.u32 %v13796_v1, %v12141_v4  ;;  %v11944_v4 = vor.u32 %v13746_v53, %v11941_v55  ;;  %v11108_v3 = vor.u32 %v13539_v45, %v11107_v12  ;;  %v11247_v55 = vld [vmem:[#allocation9 + $0x378] sm:$0xf]  ;;  %v13524_v12 = vld [vmem:[#allocation9 + $0x1f8] sm:$0xf0]  ;;  %v10887_v45 = vld [vmem:[#allocation9 + $0xa8] sm:$0xf] }
 0x31c   :  { %7620 = vmatpush.bf16.msrb.mxu1 %v12224_v35  ;;  %7589 = vmatmul.bf16.vlgmr.msra.gmra.mxu2 %v14620_v6  ;;  %v12304_v35 = vor.u32 %v13836_v0, %v12301_v61  ;;  %v10947_v0 = vld [vmem:[#allocation9 + $0x120] sm:$0xf]  ;;  %v13499_v61 = vld [vmem:[#allocation9 + $0x130] sm:$0xf0] }
 0x31d   :  { %7633 = vmatpush.bf16.msrb.mxu2 %v12384_v9  ;;  %v4854_v9 = vperm.slane %v14674_v63, 0  ;;  %7610 = vmatpush.bf16.msrb.mxu0 %v12004_v5  ;;  %v10948_v20 = vor.u32 %v13499_v61, %v10947_v0 }
 0x31f   :  { %7601 = vmatpush.bf16.msra.mxu3 %v11764_v32  ;;  %v7382_v38 = vpop.f32.mrf.mxu2  ;;  %v13826_v32 = vld [vmem:[#allocation9 + $0xb6c] sm:$0xf] }
 0x320   :  { %7621 = vmatpush.bf16.msrb.mxu1 %v12204_v34  ;;  %v12461_v34 = vld [vmem:[#allocation9 + $0xd0c] sm:$0xf0]  ;;  %7563 = vmatmul.bf16.vlgmr.msra.gmra.mxu0 %v14606_v31  ;;  %v12264_v50 = vor.u32 %v13826_v32, %v12261_v15  ;;  %v13579_v32 = vld [vmem:[#allocation9 + $0x3b0] sm:$0xf0] }
 0x321   :  { %7634 = vmatpush.bf16.msrb.mxu2 %v12364_v23  ;;  %v7370_v23 = vadd.f32 %v7369_v48, %v4854_v9  ;;  %v12464_v44 = vor.u32 %v13876_v26, %v12461_v34  ;;  %7611 = vmatpush.bf16.msrb.mxu0 %v11984_v24  ;;  %v12421_v48 = vld [vmem:[#allocation9 + $0xcbc] sm:$0xf0]  ;;  %v10927_v24 = vld [vmem:[#allocation9 + $0xf8] sm:$0xf]  ;;  %v11924_v26 = vor.u32 %v13741_v11, %v11921_v13  ;;  %v13861_v34 = vld [vmem:[#allocation9 + $0xc84] sm:$0xf] }
 0x322   :  { %7602 = vmatmul.bf16.vlgmr.msra.gmra.mxu3 %v14630_v42  ;;  %v7371_v49 = vpop.f32.mrf.mxu1  ;;  %v13931_v15 = vld [vmem:[#allocation9 + $0xeb4] sm:$0xf] }
 0x323   :  { %7646 = vmatpush.bf16.msrb.mxu3 %v12544_v59  ;;  %v7383_v36 = vadd.f32 %v7382_v38, %v7370_v23  ;;  %v7408_v59 = vpop.f32.mrf.mxu0  ;;  %v10907_v49 = vld [vmem:[#allocation9 + $0xd0] sm:$0xf]  ;;  %v13479_v11 = vld [vmem:[#allocation9 + $0x90] sm:$0xf0] }
 0x324   :  { %7622 = vmatpush.bf16.msrb.mxu1 %v12184_v16  ;;  %v11964_v16 = vor.u32 %v13751_v56, %v11961_v37  ;;  %v12401_v56 = vld [vmem:[#allocation9 + $0xc94] sm:$0xf0]  ;;  %v11267_v37 = vld [vmem:[#allocation9 + $0x3a0] sm:$0xf] }
 0x325   :  { %7635 = vmatpush.bf16.msrb.mxu2 %v12344_v62  ;;  %v12101_v62 = vld [vmem:[#allocation9 + $0xa3c] sm:$0xf0]  ;;  %v12404_v46 = vor.u32 %v13861_v34, %v12401_v56  ;;  %v13514_v34 = vld [vmem:[#allocation9 + $0x1a8] sm:$0xf0]  ;;  %v10847_v56 = vld [vmem:[#allocation9 + $0x58] sm:$0xf] }
 0x326   :  { %v12104_v7 = vor.u32 %v13786_v41, %v12101_v62  ;;  %7612 = vmatpush.bf16.msrb.mxu0 %v11964_v16  ;;  %v11067_v41 = vld [vmem:[#allocation9 + $0x210] sm:$0xf]  ;;  %v13529_v62 = vld [vmem:[#allocation9 + $0x220] sm:$0xf0] }
 0x327   :  { %7647 = vmatpush.bf16.msrb.mxu3 %v12524_v60  ;;  %v13781_v60 = vld [vmem:[#allocation9 + $0xa04] sm:$0xf]  ;;  %v7384_v5 = vpop.f32.mrf.mxu2  ;;  %v11068_v53 = vor.u32 %v13529_v62, %v11067_v41 }
 0x328   :  { %7623 = vmatpush.bf16.msrb.mxu1 %v12164_v51  ;;  %v7395_v51 = vpop.f32.mrf.mxu3  ;;  %v13489_v16 = vld [vmem:[#allocation9 + $0xe0] sm:$0xf0]  ;;  %v11027_v5 = vld [vmem:[#allocation9 + $0x1c0] sm:$0xf] }
 0x329   :  { %7636 = vmatpush.bf16.msrb.mxu2 %v12324_v58  ;;  %v12241_v58 = vld [vmem:[#allocation9 + $0xb54] sm:$0xf0]  ;;  %v7396_v1 = vadd.f32 %v7395_v51, %v7383_v36  ;;  %v13484_v51 = vld [vmem:[#allocation9 + $0xb8] sm:$0xf0] }
 0x32a   :  { %v12244_v9 = vor.u32 %v13821_v40, %v12241_v58  ;;  %7613 = vmatpush.bf16.msrb.mxu0 %v11944_v4  ;;  %v10908_v40 = vor.u32 %v13489_v16, %v10907_v49  ;;  %v12661_v58 = vld [vmem:[#allocation9 + $0xe9c] sm:$0xf0]  ;;  %v13569_v4 = vld [vmem:[#allocation9 + $0x360] sm:$0xf0] }
 0x32b   :  { %7648 = vmatpush.bf16.msrb.mxu3 %v12504_v43  ;;  %v13866_v43 = vld [vmem:[#allocation9 + $0xcac] sm:$0xf]  ;;  %v7410_v18 = vpop.f32.mrf.mxu0 }
 0x32c   :  { %7624 = vmatpush.bf16.msrb.mxu1 %v12144_v17  ;;  %v13936_v17 = vld [vmem:[#allocation9 + $0xedc] sm:$0xf]  ;;  %v12424_v23 = vor.u32 %v13866_v43, %v12421_v48  ;;  %v10888_v43 = vor.u32 %v13484_v51, %v10887_v45  ;;  %v12641_v48 = vld [vmem:[#allocation9 + $0xe74] sm:$0xf0]  ;;  %v10807_v51 = vld [vmem:[#allocation9 + $0x8] sm:$0xf] }
 0x32d   :  { %7637 = vmatpush.bf16.msrb.mxu2 %v12304_v35  ;;  %v12084_v35 = vor.u32 %v13781_v60, %v12081_v10  ;;  %v12704_v38 = vor.u32 %v13936_v17, %v12701_v21  ;;  %v13926_v60 = vld [vmem:[#allocation9 + $0xe8c] sm:$0xf]  ;;  %v11047_v10 = vld [vmem:[#allocation9 + $0x1e8] sm:$0xf] }
 0x32e   :  { %7614 = vmatpush.bf16.msrb.mxu0 %v11924_v26  ;;  %v12664_v0 = vor.u32 %v13926_v60, %v12661_v58  ;;  %v11048_v61 = vor.u32 %v13524_v12, %v11047_v10  ;;  %v11207_v21 = vld [vmem:[#allocation9 + $0x328] sm:$0xf]  ;;  %v11007_v26 = vld [vmem:[#allocation9 + $0x198] sm:$0xf]  ;;  %v13554_v58 = vld [vmem:[#allocation9 + $0x2e8] sm:$0xf0] }
 0x32f   :  { %7649 = vmatpush.bf16.msrb.mxu3 %v12484_v22  ;;  %v14679_v22 = vadd.f32 %v7408_v59, %v7396_v1  ;;  %v12681_v59 = vld [vmem:[#allocation9 + $0xec4] sm:$0xf0]  ;;  %v11227_v1 = vld [vmem:[#allocation9 + $0x350] sm:$0xf]  ;;  %v13906_v10 = vld [vmem:[#allocation9 + $0xdec] sm:$0xf] }
 0x330   :  { %7625 = vmatpush.bf16.msrb.mxu1 %v12124_v30  ;;  %v11088_v30 = vor.u32 %v13534_v8, %v11087_v57  ;;  %v12684_v52 = vor.u32 %v13931_v15, %v12681_v59  ;;  %v11228_v13 = vor.u32 %v13569_v4, %v11227_v1  ;;  %v13564_v57 = vld [vmem:[#allocation9 + $0x338] sm:$0xf0]  ;;  %v11187_v15 = vld [vmem:[#allocation9 + $0x300] sm:$0xf]  ;;  %v13911_v59 = vld [vmem:[#allocation9 + $0xe14] sm:$0xf] }
 0x331   :  { %7638 = vmatpush.bf16.msrb.mxu2 %v12284_v25  ;;  %v13494_v25 = vld [vmem:[#allocation9 + $0x108] sm:$0xf0]  ;;  %7615 = vmatmul.bf16.vlgmr.msrb.gmra.mxu0 %v14632_v47  ;;  %v13916_v8 = vld [vmem:[#allocation9 + $0xe3c] sm:$0xf]  ;;  %v12581_v12 = vld [vmem:[#allocation9 + $0xdfc] sm:$0xf0] }
 0x332   :  { %v10928_v36 = vor.u32 %v13494_v25, %v10927_v24  ;;  %7659 = vmatpush.bf16.msra.mxu0 %v12704_v38  ;;  %v12621_v25 = vld [vmem:[#allocation9 + $0xe4c] sm:$0xf0]  ;;  %v13474_v38 = vld [vmem:[#allocation9 + $0x68] sm:$0xf0]  ;;  %v11747_v1 = vld [vmem:[#allocation9 + $0x760] sm:$0xf] }
 0x333   :  { %7650 = vmatpush.bf16.msrb.mxu3 %v12464_v44  ;;  %v7397_v44 = vpop.f32.mrf.mxu3  ;;  %v10848_v62 = vor.u32 %v13474_v38, %v10847_v56  ;;  %v13699_v4 = vld [vmem:[#allocation9 + $0x770] sm:$0xf0]  ;;  %v13694_v56 = vld [vmem:[#allocation9 + $0x748] sm:$0xf0] }
 0x334   :  { %7626 = vmatpush.bf16.msrb.mxu1 %v12104_v7  ;;  %v13574_v7 = vld [vmem:[#allocation9 + $0x388] sm:$0xf0]  ;;  %v10987_v44 = vld [vmem:[#allocation9 + $0x170] sm:$0xf] }
 0x335   :  { %7639 = vmatpush.bf16.msrb.mxu2 %v12264_v50  ;;  %v11268_v50 = vor.u32 %v13579_v32, %v11267_v37  ;;  %v12624_v37 = vor.u32 %v13916_v8, %v12621_v25  ;;  %v11008_v32 = vor.u32 %v13514_v34, %v11007_v26  ;;  %v12561_v8 = vld [vmem:[#allocation9 + $0xdd4] sm:$0xf0]  ;;  %v13619_v26 = vld [vmem:[#allocation9 + $0x4f0] sm:$0xf0] }
 0x336   :  { %7660 = vmatpush.bf16.msra.mxu0 %v12684_v52  ;;  %v13469_v52 = vld [vmem:[#allocation9 + $0x40] sm:$0xf0]  ;;  %v11727_v34 = vld [vmem:[#allocation9 + $0x738] sm:$0xf] }
 0x337   :  { %7651 = vmatpush.bf16.msrb.mxu3 %v12444_v19  ;;  %v11248_v19 = vor.u32 %v13574_v7, %v11247_v55  ;;  %v11167_v55 = vld [vmem:[#allocation9 + $0x2d8] sm:$0xf] }
 0x338   :  { %7627 = vmatpush.bf16.msrb.mxu1 %v12084_v35  ;;  %v13519_v35 = vld [vmem:[#allocation9 + $0x1d0] sm:$0xf0] }
 0x339   :  { %7640 = vmatpush.bf16.msrb.mxu2 %v12244_v9  ;;  %v13921_v9 = vld [vmem:[#allocation9 + $0xe64] sm:$0xf] }
 0x33a   :  { %v7421_v17 = vpop.f32.mrf.mxu1  ;;  %7661 = vmatpush.bf16.msra.mxu0 %v12664_v0  ;;  %v12644_v18 = vor.u32 %v13921_v9, %v12641_v48  ;;  %v13504_v0 = vld [vmem:[#allocation9 + $0x158] sm:$0xf0]  ;;  %v11587_v48 = vld [vmem:[#allocation9 + $0x620] sm:$0xf] }
 0x33b   :  { %7652 = vmatpush.bf16.msrb.mxu3 %v12424_v23  ;;  %7628 = vmatmul.bf16.vlgmr.msrb.gmra.mxu1 %v14652_v33  ;;  %v7422_v23 = vadd.f32 %v7421_v17, %v14679_v22  ;;  %v12601_v22 = vld [vmem:[#allocation9 + $0xe24] sm:$0xf0]  ;;  %v13549_v17 = vld [vmem:[#allocation9 + $0x2c0] sm:$0xf0] }
 0x33c   :  { %7672 = vmatpush.bf16.msra.mxu1 %v10948_v20  ;;  %7641 = vmatmul.bf16.vlgmr.msrb.gmra.mxu2 %v14650_v28  ;;  %v11028_v20 = vor.u32 %v13519_v35, %v11027_v5  ;;  %v12604_v60 = vor.u32 %v13911_v59, %v12601_v22  ;;  %v13659_v5 = vld [vmem:[#allocation9 + $0x630] sm:$0xf0]  ;;  %v13544_v59 = vld [vmem:[#allocation9 + $0x298] sm:$0xf0]  ;;  %v11907_v22 = vld [vmem:[#allocation9 + $0x8a0] sm:$0xf] }
 0x33d   :  { %7685 = vmatpush.bf16.msra.mxu2 %v11108_v3  ;;  %v10867_v3 = vld [vmem:[#allocation9 + $0x80] sm:$0xf]  ;;  %v11588_v25 = vor.u32 %v13659_v5, %v11587_v48 }
 0x33e   :  { %v10868_v24 = vor.u32 %v13479_v11, %v10867_v3  ;;  %7662 = vmatpush.bf16.msra.mxu0 %v12644_v18  ;;  %v12584_v3 = vor.u32 %v13906_v10, %v12581_v12  ;;  %v11887_v12 = vld [vmem:[#allocation9 + $0x878] sm:$0xf] }
 0x33f   :  { %7653 = vmatpush.bf16.msrb.mxu3 %v12404_v46  ;;  %v7434_v41 = vpop.f32.mrf.mxu2  ;;  %v13509_v46 = vld [vmem:[#allocation9 + $0x180] sm:$0xf0]  ;;  %v7460_v16 = vpop.f32.mrf.mxu0 }
 0x340   :  { %7673 = vmatpush.bf16.msra.mxu1 %v10928_v36  ;;  %v13559_v36 = vld [vmem:[#allocation9 + $0x310] sm:$0xf0]  ;;  %v7435_v49 = vadd.f32 %v7434_v41, %v7422_v23  ;;  %v11427_v23 = vld [vmem:[#allocation9 + $0x4e0] sm:$0xf] }
 0x341   :  { %7686 = vmatpush.bf16.msra.mxu2 %v11088_v30  ;;  %v11208_v30 = vor.u32 %v13564_v57, %v11207_v21  ;;  %v11748_v21 = vor.u32 %v13699_v4, %v11747_v1  ;;  %v13901_v57 = vld [vmem:[#allocation9 + $0xdc4] sm:$0xf]  ;;  %v11428_v41 = vor.u32 %v13619_v26, %v11427_v23  ;;  %v13684_v1 = vld [vmem:[#allocation9 + $0x6f8] sm:$0xf0]  ;;  %v11527_v4 = vld [vmem:[#allocation9 + $0x5a8] sm:$0xf] }
 0x342   :  { %7654 = vmatmul.bf16.vlgmr.msrb.gmra.mxu3 %v14661_v29  ;;  %v7423_v7 = vpop.f32.mrf.mxu1  ;;  %7663 = vmatpush.bf16.msra.mxu0 %v12624_v37  ;;  %v11567_v37 = vld [vmem:[#allocation9 + $0x5f8] sm:$0xf]  ;;  %v11847_v26 = vld [vmem:[#allocation9 + $0x828] sm:$0xf] }
 0x343   :  { %7698 = vmatpush.bf16.msra.mxu3 %v11268_v50  ;;  %v10827_v50 = vld [vmem:[#allocation9 + $0x30] sm:$0xf] }
 0x344   :  { %7674 = vmatpush.bf16.msra.mxu1 %v10908_v40  ;;  %v10988_v40 = vor.u32 %v13509_v46, %v10987_v44  ;;  %v10828_v45 = vor.u32 %v13469_v52, %v10827_v50  ;;  %v13739_v44 = vld [vmem:[#allocation9 + $0x8b0] sm:$0xf0]  ;;  %v11407_v46 = vld [vmem:[#allocation9 + $0x4b8] sm:$0xf]  ;;  %v11707_v50 = vld [vmem:[#allocation9 + $0x710] sm:$0xf] }
 0x345   :  { %7687 = vmatpush.bf16.msra.mxu2 %v11068_v53  ;;  %v11188_v53 = vor.u32 %v13559_v36, %v11187_v15  ;;  %v7447_v9 = vpop.f32.mrf.mxu3  ;;  %v12564_v15 = vor.u32 %v13901_v57, %v12561_v8  ;;  %v11127_v36 = vld [vmem:[#allocation9 + $0x288] sm:$0xf]  ;;  %v13689_v52 = vld [vmem:[#allocation9 + $0x720] sm:$0xf0]  ;;  %v11547_v7 = vld [vmem:[#allocation9 + $0x5d0] sm:$0xf] }
 0x346   :  { %v7448_v35 = vadd.f32 %v7447_v9, %v7435_v49  ;;  %7664 = vmatpush.bf16.msra.mxu0 %v12604_v60  ;;  %v13649_v60 = vld [vmem:[#allocation9 + $0x5e0] sm:$0xf0]  ;;  %v11708_v10 = vor.u32 %v13689_v52, %v11707_v50  ;;  %v13644_v9 = vld [vmem:[#allocation9 + $0x5b8] sm:$0xf0]  ;;  %v13639_v57 = vld [vmem:[#allocation9 + $0x590] sm:$0xf0] }
 0x347   :  { %7699 = vmatpush.bf16.msra.mxu3 %v11248_v19  ;;  %v10967_v19 = vld [vmem:[#allocation9 + $0x148] sm:$0xf]  ;;  %v7436_v18 = vpop.f32.mrf.mxu2 }
 0x348   :  { %7675 = vmatpush.bf16.msra.mxu1 %v10888_v43  ;;  %v11168_v43 = vor.u32 %v13554_v58, %v11167_v55  ;;  %v10968_v11 = vor.u32 %v13504_v0, %v10967_v19  ;;  %v14686_v38 = vadd.f32 %v7460_v16, %v7448_v35  ;;  %v13614_v16 = vld [vmem:[#allocation9 + $0x4c8] sm:$0xf0]  ;;  %v11128_v55 = vor.u32 %v13544_v59, %v11127_v36  ;;  %v13609_v0 = vld [vmem:[#allocation9 + $0x4a0] sm:$0xf0]  ;;  %v11867_v35 = vld [vmem:[#allocation9 + $0x850] sm:$0xf] }
 0x349   :  { %7688 = vmatpush.bf16.msra.mxu2 %v11048_v61  ;;  %v13464_v61 = vld [vmem:[#allocation9 + $0x18] sm:$0xf0]  ;;  %v11408_v58 = vor.u32 %v13614_v16, %v11407_v46  ;;  %v11548_v19 = vor.u32 %v13649_v60, %v11547_v7  ;;  %v11667_v18 = vld [vmem:[#allocation9 + $0x6c0] sm:$0xf]  ;;  %v13674_v36 = vld [vmem:[#allocation9 + $0x6a8] sm:$0xf0] }
 0x34a   :  { %7665 = vmatpush.bf16.msra.mxu0 %v12584_v3  ;;  %v13729_v3 = vld [vmem:[#allocation9 + $0x860] sm:$0xf0]  ;;  %v11487_v59 = vld [vmem:[#allocation9 + $0x558] sm:$0xf]  ;;  %v11827_v46 = vld [vmem:[#allocation9 + $0x800] sm:$0xf] }
 0x34b   :  { %7700 = vmatpush.bf16.msra.mxu3 %v11228_v13  ;;  %v11147_v13 = vld [vmem:[#allocation9 + $0x2b0] sm:$0xf]  ;;  %v11868_v8 = vor.u32 %v13729_v3, %v11867_v35  ;;  %v11327_v16 = vld [vmem:[#allocation9 + $0x418] sm:$0xf]  ;;  %v13859_v35 = vld [vmem:[#allocation9 + $0xc70] sm:$0xf0] }
 0x34c   :  { %7676 = vmatpush.bf16.msra.mxu1 %v10868_v24  ;;  %v7462_v24 = vpop.f32.mrf.mxu0  ;;  %v11467_v60 = vld [vmem:[#allocation9 + $0x530] sm:$0xf] }
 0x34d   :  { %7689 = vmatpush.bf16.msra.mxu2 %v11028_v20  ;;  %v10808_v20 = vor.u32 %v13464_v61, %v10807_v51  ;;  %v11387_v51 = vld [vmem:[#allocation9 + $0x490] sm:$0xf]  ;;  %v11687_v61 = vld [vmem:[#allocation9 + $0x6e8] sm:$0xf] }
 0x34e   :  { %7666 = vmatpush.bf16.msra.mxu0 %v12564_v15  ;;  %v11388_v48 = vor.u32 %v13609_v0, %v11387_v51  ;;  %v11688_v5 = vor.u32 %v13684_v1, %v11687_v61  ;;  %v11647_v15 = vld [vmem:[#allocation9 + $0x698] sm:$0xf]  ;;  %v11307_v0 = vld [vmem:[#allocation9 + $0x3f0] sm:$0xf]  ;;  %v13589_v61 = vld [vmem:[#allocation9 + $0x400] sm:$0xf0] }
 0x34f   :  { %7701 = vmatpush.bf16.msra.mxu3 %v11208_v30  ;;  %v11148_v30 = vor.u32 %v13549_v17, %v11147_v13  ;;  %v11528_v13 = vor.u32 %v13644_v9, %v11527_v4  ;;  %v13604_v17 = vld [vmem:[#allocation9 + $0x478] sm:$0xf0]  ;;  %v11447_v4 = vld [vmem:[#allocation9 + $0x508] sm:$0xf] }
 0x350   :  { %7677 = vmatpush.bf16.msra.mxu1 %v10848_v62  ;;  %v11728_v62 = vor.u32 %v13694_v56, %v11727_v34  ;;  %v13724_v34 = vld [vmem:[#allocation9 + $0x838] sm:$0xf0]  ;;  %v11347_v56 = vld [vmem:[#allocation9 + $0x440] sm:$0xf]  ;;  %v11607_v9 = vld [vmem:[#allocation9 + $0x648] sm:$0xf] }
 0x351   :  { %7690 = vmatpush.bf16.msra.mxu2 %v11008_v32  ;;  %v13654_v32 = vld [vmem:[#allocation9 + $0x608] sm:$0xf0]  ;;  %7667 = vmatmul.bf16.vlgmr.msra.gmra.mxu0 %v14669_v27 }
 0x352   :  { %v11568_v49 = vor.u32 %v13654_v32, %v11567_v37  ;;  %7711 = vmatpush.bf16.msrb.mxu0 %v11428_v41  ;;  %v13599_v32 = vld [vmem:[#allocation9 + $0x450] sm:$0xf0]  ;;  %v13634_v41 = vld [vmem:[#allocation9 + $0x568] sm:$0xf0] }
 0x353   :  { %7702 = vmatpush.bf16.msra.mxu3 %v11188_v53  ;;  %v7449_v53 = vpop.f32.mrf.mxu3  ;;  %v11488_v52 = vor.u32 %v13634_v41, %v11487_v59  ;;  %v11767_v41 = vld [vmem:[#allocation9 + $0x788] sm:$0xf] }
 0x354   :  { %7678 = vmatpush.bf16.msra.mxu1 %v10828_v45  ;;  %v13734_v45 = vld [vmem:[#allocation9 + $0x888] sm:$0xf0]  ;;  %v11627_v53 = vld [vmem:[#allocation9 + $0x670] sm:$0xf] }
 0x355   :  { %7691 = vmatpush.bf16.msra.mxu2 %v10988_v40  ;;  %v11908_v40 = vor.u32 %v13739_v44, %v11907_v22  ;;  %v11348_v22 = vor.u32 %v13599_v32, %v11347_v56  ;;  %v11648_v44 = vor.u32 %v13674_v36, %v11647_v15  ;;  %v13779_v56 = vld [vmem:[#allocation9 + $0x9f0] sm:$0xf0]  ;;  %v12207_v15 = vld [vmem:[#allocation9 + $0xaf8] sm:$0xf]  ;;  %v13814_v36 = vld [vmem:[#allocation9 + $0xb08] sm:$0xf0] }
 0x356   :  { %7712 = vmatpush.bf16.msrb.mxu0 %v11408_v58 }
 0x357   :  { %7703 = vmatpush.bf16.msra.mxu3 %v11168_v43  ;;  %v11888_v43 = vor.u32 %v13734_v45, %v11887_v12 }
 0x358   :  { %7679 = vmatpush.bf16.msra.mxu1 %v10808_v20  ;;  %v13679_v20 = vld [vmem:[#allocation9 + $0x6d0] sm:$0xf0] }
 0x359   :  { %7692 = vmatpush.bf16.msra.mxu2 %v10968_v11  ;;  %v11367_v11 = vld [vmem:[#allocation9 + $0x468] sm:$0xf] }
 0x35a   :  { %v7473_v23 = vpop.f32.mrf.mxu1  ;;  %7713 = vmatpush.bf16.msrb.mxu0 %v11388_v48  ;;  %v11368_v24 = vor.u32 %v13604_v17, %v11367_v11  ;;  %v13624_v48 = vld [vmem:[#allocation9 + $0x518] sm:$0xf0]  ;;  %v12227_v11 = vld [vmem:[#allocation9 + $0xb20] sm:$0xf]  ;;  %v11308_v17 = vor.u32 %v13589_v61, %v11307_v0  ;;  %v13769_v61 = vld [vmem:[#allocation9 + $0x9a0] sm:$0xf0] }
 0x35b   :  { %7704 = vmatpush.bf16.msra.mxu3 %v11148_v30  ;;  %7680 = vmatmul.bf16.vlgmr.msra.gmra.mxu1 %v14598_v54  ;;  %v7474_v30 = vadd.f32 %v7473_v23, %v14686_v38  ;;  %v13594_v38 = vld [vmem:[#allocation9 + $0x428] sm:$0xf0] }
 0x35c   :  { %7724 = vmatpush.bf16.msrb.mxu1 %v11588_v25  ;;  %7693 = vmatmul.bf16.vlgmr.msra.gmra.mxu2 %v14596_v2  ;;  %v11668_v25 = vor.u32 %v13679_v20, %v11667_v18  ;;  %v11328_v45 = vor.u32 %v13594_v38, %v11327_v16  ;;  %v11787_v20 = vld [vmem:[#allocation9 + $0x7b0] sm:$0xf]  ;;  %v12047_v16 = vld [vmem:[#allocation9 + $0x9b8] sm:$0xf] }
 0x35d   :  { %7737 = vmatpush.bf16.msrb.mxu2 %v11748_v21  ;;  %v11507_v21 = vld [vmem:[#allocation9 + $0x580] sm:$0xf]  ;;  %v12347_v38 = vld [vmem:[#allocation9 + $0xc10] sm:$0xf] }
 0x35e   :  { %v11508_v37 = vor.u32 %v13639_v57, %v11507_v21  ;;  %7714 = vmatpush.bf16.msrb.mxu0 %v11368_v24  ;;  %v13709_v21 = vld [vmem:[#allocation9 + $0x7c0] sm:$0xf0]  ;;  %v11287_v24 = vld [vmem:[#allocation9 + $0x3c8] sm:$0xf] }
 0x35f   :  { %7705 = vmatpush.bf16.msra.mxu3 %v11128_v55  ;;  %v7486_v50 = vpop.f32.mrf.mxu2  ;;  %v13669_v55 = vld [vmem:[#allocation9 + $0x680] sm:$0xf0]  ;;  %v11788_v32 = vor.u32 %v13709_v21, %v11787_v20  ;;  %v12307_v20 = vld [vmem:[#allocation9 + $0xbc0] sm:$0xf]  ;;  %v13839_v21 = vld [vmem:[#allocation9 + $0xbd0] sm:$0xf0] }
 0x360   :  { %7725 = vmatpush.bf16.msrb.mxu1 %v11568_v49  ;;  %v13719_v49 = vld [vmem:[#allocation9 + $0x810] sm:$0xf0]  ;;  %v14693_v7 = vadd.f32 %v7486_v50, %v7474_v30  ;;  %v11628_v51 = vor.u32 %v13669_v55, %v11627_v53  ;;  %v12367_v30 = vld [vmem:[#allocation9 + $0xc38] sm:$0xf]  ;;  %v12208_v50 = vor.u32 %v13814_v36, %v12207_v15  ;;  %v13849_v53 = vld [vmem:[#allocation9 + $0xc20] sm:$0xf0] }
 0x361   :  { %7738 = vmatpush.bf16.msrb.mxu2 %v11728_v62  ;;  %v11848_v62 = vor.u32 %v13724_v34, %v11847_v26  ;;  %v11828_v58 = vor.u32 %v13719_v49, %v11827_v46  ;;  %v12067_v26 = vld [vmem:[#allocation9 + $0x9e0] sm:$0xf]  ;;  %v13899_v49 = vld [vmem:[#allocation9 + $0xdb0] sm:$0xf0]  ;;  %v12287_v36 = vld [vmem:[#allocation9 + $0xb98] sm:$0xf] }
 0x362   :  { %7706 = vmatmul.bf16.vlgmr.msra.gmra.mxu3 %v14604_v39  ;;  %v7475_v12 = vpop.f32.mrf.mxu1  ;;  %7715 = vmatpush.bf16.msrb.mxu0 %v11348_v22  ;;  %v12068_v22 = vor.u32 %v13779_v56, %v12067_v26  ;;  %v12547_v46 = vld [vmem:[#allocation9 + $0xda0] sm:$0xf]  ;;  %v12487_v56 = vld [vmem:[#allocation9 + $0xd28] sm:$0xf]  ;;  %v13759_v15 = vld [vmem:[#allocation9 + $0x950] sm:$0xf0] }
 0x363   :  { %7750 = vmatpush.bf16.msrb.mxu3 %v11908_v40  ;;  %v13629_v40 = vld [vmem:[#allocation9 + $0x540] sm:$0xf0]  ;;  %v12348_v12 = vor.u32 %v13849_v53, %v12347_v38 }
 0x364   :  { %7726 = vmatpush.bf16.msrb.mxu1 %v11548_v19  ;;  %v13714_v19 = vld [vmem:[#allocation9 + $0x7e8] sm:$0xf0]  ;;  %v11468_v1 = vor.u32 %v13629_v40, %v11467_v60  ;;  %v12187_v60 = vld [vmem:[#allocation9 + $0xad0] sm:$0xf]  ;;  %v13809_v40 = vld [vmem:[#allocation9 + $0xae0] sm:$0xf0] }
 0x365   :  { %7739 = vmatpush.bf16.msrb.mxu2 %v11708_v10  ;;  %v11807_v10 = vld [vmem:[#allocation9 + $0x7d8] sm:$0xf]  ;;  %v12188_v0 = vor.u32 %v13809_v40, %v12187_v60  ;;  %v13754_v60 = vld [vmem:[#allocation9 + $0x928] sm:$0xf0]  ;;  %v12267_v40 = vld [vmem:[#allocation9 + $0xb70] sm:$0xf] }
 0x366   :  { %v11808_v3 = vor.u32 %v13714_v19, %v11807_v10  ;;  %7716 = vmatpush.bf16.msrb.mxu0 %v11328_v45  ;;  %v12527_v45 = vld [vmem:[#allocation9 + $0xd78] sm:$0xf]  ;;  %v12027_v19 = vld [vmem:[#allocation9 + $0x990] sm:$0xf] }
 0x367   :  { %7751 = vmatpush.bf16.msrb.mxu3 %v11888_v43  ;;  %v13664_v43 = vld [vmem:[#allocation9 + $0x658] sm:$0xf0]  ;;  %v7488_v57 = vpop.f32.mrf.mxu2 }
 0x368   :  { %7727 = vmatpush.bf16.msrb.mxu1 %v11528_v13  ;;  %v13819_v13 = vld [vmem:[#allocation9 + $0xb30] sm:$0xf0]  ;;  %v11608_v18 = vor.u32 %v13664_v43, %v11607_v9  ;;  %v12167_v9 = vld [vmem:[#allocation9 + $0xaa8] sm:$0xf]  ;;  %v13804_v43 = vld [vmem:[#allocation9 + $0xab8] sm:$0xf0] }
 0x369   :  { %7740 = vmatpush.bf16.msrb.mxu2 %v11688_v5  ;;  %v12387_v5 = vld [vmem:[#allocation9 + $0xc60] sm:$0xf]  ;;  %v12228_v34 = vor.u32 %v13819_v13, %v12227_v11  ;;  %v13889_v11 = vld [vmem:[#allocation9 + $0xd60] sm:$0xf0]  ;;  %v12007_v13 = vld [vmem:[#allocation9 + $0x968] sm:$0xf] }
 0x36a   :  { %v12388_v23 = vor.u32 %v13859_v35, %v12387_v5  ;;  %7717 = vmatpush.bf16.msrb.mxu0 %v11308_v17  ;;  %v12028_v5 = vor.u32 %v13769_v61, %v12027_v19  ;;  %v12168_v17 = vor.u32 %v13804_v43, %v12167_v9  ;;  %v12147_v57 = vld [vmem:[#allocation9 + $0xa80] sm:$0xf]  ;;  %v12447_v19 = vld [vmem:[#allocation9 + $0xcd8] sm:$0xf]  ;;  %v13749_v9 = vld [vmem:[#allocation9 + $0x900] sm:$0xf0] }
 0x36b   :  { %7752 = vmatpush.bf16.msrb.mxu3 %v11868_v8  ;;  %v11448_v8 = vor.u32 %v13624_v48, %v11447_v4  ;;  %v13844_v4 = vld [vmem:[#allocation9 + $0xbf8] sm:$0xf0] }
 0x36c   :  { %7728 = vmatpush.bf16.msrb.mxu1 %v11508_v37  ;;  %v13854_v37 = vld [vmem:[#allocation9 + $0xc48] sm:$0xf0] }
 0x36d   :  { %7741 = vmatpush.bf16.msrb.mxu2 %v11668_v25  ;;  %v13584_v25 = vld [vmem:[#allocation9 + $0x3d8] sm:$0xf0] }
 0x36e   :  { %v11288_v59 = vor.u32 %v13584_v25, %v11287_v24 }
 0x36f   :  { %7753 = vmatpush.bf16.msrb.mxu3 %v11848_v62  ;;  %v13704_v62 = vld [vmem:[#allocation9 + $0x798] sm:$0xf0] }
 0x370   :  { %7729 = vmatpush.bf16.msrb.mxu1 %v11488_v52  ;;  %v13774_v52 = vld [vmem:[#allocation9 + $0x9c8] sm:$0xf0]  ;;  %v11768_v55 = vor.u32 %v13704_v62, %v11767_v41  ;;  %7718 = vmatpush.bf16.msrb.mxu0 %v11288_v59  ;;  %v12127_v41 = vld [vmem:[#allocation9 + $0xa58] sm:$0xf] }
 0x371   :  { %7742 = vmatpush.bf16.msrb.mxu2 %v11648_v44  ;;  %v12368_v44 = vor.u32 %v13854_v37, %v12367_v30  ;;  %v12048_v10 = vor.u32 %v13774_v52, %v12047_v16  ;;  %v13884_v30 = vld [vmem:[#allocation9 + $0xd38] sm:$0xf0]  ;;  %v11987_v37 = vld [vmem:[#allocation9 + $0x940] sm:$0xf]  ;;  %v13834_v59 = vld [vmem:[#allocation9 + $0xba8] sm:$0xf0] }
 0x372   :  { %v13794_v62 = vld [vmem:[#allocation9 + $0xa68] sm:$0xf0]  ;;  %v12467_v16 = vld [vmem:[#allocation9 + $0xd00] sm:$0xf]  ;;  %v11967_v52 = vld [vmem:[#allocation9 + $0x918] sm:$0xf] }
 0x373   :  { %7754 = vmatpush.bf16.msrb.mxu3 %v11828_v58  ;;  %v12548_v58 = vor.u32 %v13899_v49, %v12547_v46  ;;  %7719 = vmatmul.bf16.vlgmr.msrb.gmra.mxu0 %v14606_v31  ;;  %v11988_v46 = vor.u32 %v13759_v15, %v11987_v37  ;;  %v12288_v49 = vor.u32 %v13834_v59, %v12287_v36  ;;  %v12707_v37 = vld [vmem:[#allocation9 + $0xee0] sm:$0xf]  ;;  %v13939_v15 = vld [vmem:[#allocation9 + $0xef0] sm:$0xf0]  ;;  %v13532_v36 = vld [vmem:[#allocation9 + $0x23c] sm:$0xf] }
 0x374   :  { %7730 = vmatpush.bf16.msrb.mxu1 %v11468_v1  ;;  %7763 = vmatpush.bf16.msra.mxu0 %v12068_v22  ;;  %v12327_v1 = vld [vmem:[#allocation9 + $0xbe8] sm:$0xf]  ;;  %v12488_v22 = vor.u32 %v13884_v30, %v12487_v56  ;;  %v11968_v61 = vor.u32 %v13754_v60, %v11967_v52  ;;  %v13744_v30 = vld [vmem:[#allocation9 + $0x8d8] sm:$0xf0]  ;;  %v11089_v59 = vld [vmem:[#allocation9 + $0x24c] sm:$0xf0] }
 0x375   :  { %7743 = vmatpush.bf16.msrb.mxu2 %v11628_v51  ;;  %v13894_v51 = vld [vmem:[#allocation9 + $0xd88] sm:$0xf0]  ;;  %v12328_v35 = vor.u32 %v13844_v4, %v12327_v1  ;;  %v11947_v4 = vld [vmem:[#allocation9 + $0x8f0] sm:$0xf]  ;;  %v11927_v56 = vld [vmem:[#allocation9 + $0x8c8] sm:$0xf] }
 0x376   :  { %v12528_v48 = vor.u32 %v13894_v51, %v12527_v45  ;;  %v13789_v45 = vld [vmem:[#allocation9 + $0xa40] sm:$0xf0]  ;;  %v11269_v52 = vld [vmem:[#allocation9 + $0x3b4] sm:$0xf0]  ;;  %v13934_v60 = vld [vmem:[#allocation9 + $0xec8] sm:$0xf0] }
 0x377   :  { %7755 = vmatpush.bf16.msrb.mxu3 %v11808_v3  ;;  %v12507_v3 = vld [vmem:[#allocation9 + $0xd50] sm:$0xf] }
 0x378   :  { %7731 = vmatpush.bf16.msrb.mxu1 %v11448_v8  ;;  %7764 = vmatpush.bf16.msra.mxu0 %v12048_v10  ;;  %v13799_v8 = vld [vmem:[#allocation9 + $0xa90] sm:$0xf0]  ;;  %v12508_v24 = vor.u32 %v13889_v11, %v12507_v3  ;;  %v7525_v25 = vpop.f32.mrf.mxu1  ;;  %v13784_v3 = vld [vmem:[#allocation9 + $0xa18] sm:$0xf0]  ;;  %v13537_v11 = vld [vmem:[#allocation9 + $0x264] sm:$0xf] }
 0x379   :  { %7744 = vmatpush.bf16.msrb.mxu2 %v11608_v18  ;;  %v13764_v18 = vld [vmem:[#allocation9 + $0x978] sm:$0xf0] }
 0x37a   :  { %v12008_v26 = vor.u32 %v13764_v18, %v12007_v13  ;;  %v11109_v13 = vld [vmem:[#allocation9 + $0x274] sm:$0xf0]  ;;  %v13497_v18 = vld [vmem:[#allocation9 + $0x124] sm:$0xf] }
 0x37b   :  { %7756 = vmatpush.bf16.msrb.mxu3 %v11788_v32  ;;  %7732 = vmatmul.bf16.vlgmr.msrb.gmra.mxu1 %v14622_v14  ;;  %v12148_v32 = vor.u32 %v13799_v8, %v12147_v57  ;;  %v11948_v57 = vor.u32 %v13749_v9, %v11947_v4  ;;  %v13572_v4 = vld [vmem:[#allocation9 + $0x37c] sm:$0xf]  ;;  %v11249_v9 = vld [vmem:[#allocation9 + $0x38c] sm:$0xf0] }
 0x37c   :  { %7776 = vmatpush.bf16.msra.mxu1 %v12228_v34  ;;  %7745 = vmatmul.bf16.vlgmr.msrb.gmra.mxu2 %v14620_v6  ;;  %v12308_v34 = vor.u32 %v13839_v21, %v12307_v20  ;;  %v10949_v20 = vld [vmem:[#allocation9 + $0x134] sm:$0xf0] }
 0x37d   :  { %7789 = vmatpush.bf16.msra.mxu2 %v12388_v23  ;;  %v4855_v23 = vperm.slane %v14674_v63, 1  ;;  %7765 = vmatpush.bf16.msra.mxu0 %v12028_v5  ;;  %v7499_v63 = vpop.f32.mrf.mxu3  ;;  %v12247_v5 = vld [vmem:[#allocation9 + $0xb48] sm:$0xf] }
 0x37e   :  { %v14701_v38 = vadd.f32 %v7499_v63, %v14693_v7  ;;  %v13874_v7 = vld [vmem:[#allocation9 + $0xce8] sm:$0xf0]  ;;  %v12407_v63 = vld [vmem:[#allocation9 + $0xc88] sm:$0xf] }
 0x37f   :  { %7757 = vmatpush.bf16.msrb.mxu3 %v11768_v55  ;;  %v7538_v53 = vpop.f32.mrf.mxu2  ;;  %v12128_v55 = vor.u32 %v13794_v62, %v12127_v41  ;;  %v13492_v62 = vld [vmem:[#allocation9 + $0xfc] sm:$0xf] }
 0x380   :  { %7777 = vmatpush.bf16.msra.mxu1 %v12208_v50  ;;  %v13879_v50 = vld [vmem:[#allocation9 + $0xd10] sm:$0xf0] }
 0x381   :  { %7790 = vmatpush.bf16.msra.mxu2 %v12368_v44  ;;  %v7526_v44 = vadd.f32 %v7525_v25, %v4855_v23  ;;  %7766 = vmatpush.bf16.msra.mxu0 %v12008_v26  ;;  %v12468_v51 = vor.u32 %v13879_v50, %v12467_v16  ;;  %v12427_v23 = vld [vmem:[#allocation9 + $0xcb0] sm:$0xf]  ;;  %v11092_v16 = vor.u32 %v13532_v36, %v11089_v59  ;;  %v13577_v50 = vld [vmem:[#allocation9 + $0x3a4] sm:$0xf]  ;;  %v13562_v59 = vld [vmem:[#allocation9 + $0x32c] sm:$0xf] }
 0x382   :  { %7758 = vmatmul.bf16.vlgmr.msrb.gmra.mxu3 %v14630_v42 }
 0x383   :  { %7802 = vmatpush.bf16.msra.mxu3 %v12548_v58  ;;  %v13829_v58 = vld [vmem:[#allocation9 + $0xb80] sm:$0xf0]  ;;  %v14703_v10 = vadd.f32 %v7538_v53, %v7526_v44  ;;  %v11928_v44 = vor.u32 %v13744_v30, %v11927_v56  ;;  %v12687_v53 = vld [vmem:[#allocation9 + $0xeb8] sm:$0xf] }
 0x384   :  { %7778 = vmatpush.bf16.msra.mxu1 %v12188_v0  ;;  %v7527_v0 = vpop.f32.mrf.mxu1  ;;  %v12268_v1 = vor.u32 %v13829_v58, %v12267_v40  ;;  %v13527_v40 = vld [vmem:[#allocation9 + $0x214] sm:$0xf]  ;;  %v11069_v58 = vld [vmem:[#allocation9 + $0x224] sm:$0xf0] }
 0x385   :  { %7791 = vmatpush.bf16.msra.mxu2 %v12348_v12  ;;  %v12107_v12 = vld [vmem:[#allocation9 + $0xa30] sm:$0xf]  ;;  %7767 = vmatpush.bf16.msra.mxu0 %v11988_v46  ;;  %v7501_v21 = vpop.f32.mrf.mxu3  ;;  %v13864_v46 = vld [vmem:[#allocation9 + $0xc98] sm:$0xf0]  ;;  %v11272_v0 = vor.u32 %v13577_v50, %v11269_v52 }
 0x386   :  { %v12108_v43 = vor.u32 %v13789_v45, %v12107_v12  ;;  %v12408_v12 = vor.u32 %v13864_v46, %v12407_v63  ;;  %v13487_v45 = vld [vmem:[#allocation9 + $0xd4] sm:$0xf]  ;;  %v11229_v21 = vld [vmem:[#allocation9 + $0x364] sm:$0xf0]  ;;  %v13512_v46 = vld [vmem:[#allocation9 + $0x19c] sm:$0xf] }
 0x387   :  { %7803 = vmatpush.bf16.msra.mxu3 %v12528_v48  ;;  %v12087_v48 = vld [vmem:[#allocation9 + $0xa08] sm:$0xf]  ;;  %v7540_v25 = vpop.f32.mrf.mxu2  ;;  %v13919_v63 = vld [vmem:[#allocation9 + $0xe50] sm:$0xf0]  ;;  %v10849_v50 = vld [vmem:[#allocation9 + $0x6c] sm:$0xf0] }
 0x388   :  { %7779 = vmatpush.bf16.msra.mxu1 %v12168_v17  ;;  %v12448_v17 = vor.u32 %v13874_v7, %v12447_v19  ;;  %v12088_v26 = vor.u32 %v13784_v3, %v12087_v48  ;;  %v11072_v7 = vor.u32 %v13527_v40, %v11069_v58  ;;  %v11049_v3 = vld [vmem:[#allocation9 + $0x1fc] sm:$0xf0]  ;;  %v11029_v25 = vld [vmem:[#allocation9 + $0x1d4] sm:$0xf0] }
 0x389   :  { %7792 = vmatpush.bf16.msra.mxu2 %v12328_v35  ;;  %v13824_v35 = vld [vmem:[#allocation9 + $0xb58] sm:$0xf0]  ;;  %7768 = vmatpush.bf16.msra.mxu0 %v11968_v61  ;;  %v11189_v40 = vld [vmem:[#allocation9 + $0x314] sm:$0xf0] }
 0x38a   :  { %v12248_v8 = vor.u32 %v13824_v35, %v12247_v5  ;;  %v13929_v5 = vld [vmem:[#allocation9 + $0xea0] sm:$0xf0]  ;;  %v13522_v35 = vld [vmem:[#allocation9 + $0x1ec] sm:$0xf]  ;;  %v12607_v58 = vld [vmem:[#allocation9 + $0xe18] sm:$0xf] }
 0x38b   :  { %7804 = vmatpush.bf16.msra.mxu3 %v12508_v24  ;;  %v13869_v24 = vld [vmem:[#allocation9 + $0xcc0] sm:$0xf0] }
 0x38c   :  { %7780 = vmatpush.bf16.msra.mxu1 %v12148_v32  ;;  %v10952_v32 = vor.u32 %v13497_v18, %v10949_v20  ;;  %v12428_v41 = vor.u32 %v13869_v24, %v12427_v23  ;;  %v11052_v18 = vor.u32 %v13522_v35, %v11049_v3  ;;  %v13567_v20 = vld [vmem:[#allocation9 + $0x354] sm:$0xf]  ;;  %v13924_v23 = vld [vmem:[#allocation9 + $0xe78] sm:$0xf0]  ;;  %v13517_v24 = vld [vmem:[#allocation9 + $0x1c4] sm:$0xf] }
 0x38d   :  { %7793 = vmatpush.bf16.msra.mxu2 %v12308_v34  ;;  %v11112_v34 = vor.u32 %v13537_v11, %v11109_v13  ;;  %7769 = vmatpush.bf16.msra.mxu0 %v11948_v57  ;;  %v7551_v19 = vpop.f32.mrf.mxu3  ;;  %v13482_v11 = vld [vmem:[#allocation9 + $0xac] sm:$0xf]  ;;  %v10889_v13 = vld [vmem:[#allocation9 + $0xbc] sm:$0xf0]  ;;  %v12647_v57 = vld [vmem:[#allocation9 + $0xe68] sm:$0xf]  ;;  %v11232_v30 = vor.u32 %v13567_v20, %v11229_v21  ;;  %v11032_v36 = vor.u32 %v13517_v24, %v11029_v25 }
 0x38e   :  { %v14708_v61 = vadd.f32 %v7551_v19, %v14703_v10  ;;  %v11252_v10 = vor.u32 %v13572_v4, %v11249_v9  ;;  %v10989_v19 = vld [vmem:[#allocation9 + $0x184] sm:$0xf0]  ;;  %v13552_v4 = vld [vmem:[#allocation9 + $0x2dc] sm:$0xf]  ;;  %v11169_v35 = vld [vmem:[#allocation9 + $0x2ec] sm:$0xf0] }
 0x38f   :  { %7805 = vmatpush.bf16.msra.mxu3 %v12488_v22  ;;  %v10929_v22 = vld [vmem:[#allocation9 + $0x10c] sm:$0xf0]  ;;  %v10809_v20 = vld [vmem:[#allocation9 + $0x1c] sm:$0xf0]  ;;  %v13697_v21 = vld [vmem:[#allocation9 + $0x764] sm:$0xf] }
 0x390   :  { %7781 = vmatpush.bf16.msra.mxu1 %v12128_v55  ;;  %v10932_v55 = vor.u32 %v13492_v62, %v10929_v22  ;;  %v12627_v62 = vld [vmem:[#allocation9 + $0xe40] sm:$0xf]  ;;  %v12587_v3 = vld [vmem:[#allocation9 + $0xdf0] sm:$0xf]  ;;  %v11589_v24 = vld [vmem:[#allocation9 + $0x634] sm:$0xf0] }
 0x391   :  { %7794 = vmatpush.bf16.msra.mxu2 %v12288_v49  ;;  %v12708_v49 = vor.u32 %v13939_v15, %v12707_v37  ;;  %7770 = vmatpush.bf16.msra.mxu0 %v11928_v44  ;;  %v12648_v15 = vor.u32 %v13924_v23, %v12647_v57  ;;  %v11749_v57 = vld [vmem:[#allocation9 + $0x774] sm:$0xf0]  ;;  %v13657_v23 = vld [vmem:[#allocation9 + $0x624] sm:$0xf] }
 0x393   :  { %7806 = vmatpush.bf16.msra.mxu3 %v12468_v51  ;;  %v10909_v51 = vld [vmem:[#allocation9 + $0xe4] sm:$0xf0] }
 0x394   :  { %7782 = vmatpush.bf16.msra.mxu1 %v12108_v43  ;;  %v12667_v43 = vld [vmem:[#allocation9 + $0xe90] sm:$0xf]  ;;  %v10912_v48 = vor.u32 %v13487_v45, %v10909_v51  ;;  %7771 = vmatmul.bf16.vlgmr.msra.gmra.mxu0 %v14632_v47  ;;  %v13914_v45 = vld [vmem:[#allocation9 + $0xe28] sm:$0xf0]  ;;  %v13507_v51 = vld [vmem:[#allocation9 + $0x174] sm:$0xf] }
 0x395   :  { %7795 = vmatpush.bf16.msra.mxu2 %v12268_v1  ;;  %7815 = vmatpush.bf16.msrb.mxu0 %v12708_v49  ;;  %v12688_v1 = vor.u32 %v13934_v60, %v12687_v53  ;;  %v7553_v56 = vpop.f32.mrf.mxu3  ;;  %v11009_v49 = vld [vmem:[#allocation9 + $0x1ac] sm:$0xf0]  ;;  %v12628_v53 = vor.u32 %v13919_v63, %v12627_v62  ;;  %v13557_v60 = vld [vmem:[#allocation9 + $0x304] sm:$0xf]  ;;  %v11429_v63 = vld [vmem:[#allocation9 + $0x4f4] sm:$0xf0] }
 0x396   :  { %v13547_v56 = vld [vmem:[#allocation9 + $0x2b4] sm:$0xf]  ;;  %v13617_v62 = vld [vmem:[#allocation9 + $0x4e4] sm:$0xf] }
 0x397   :  { %7807 = vmatpush.bf16.msra.mxu3 %v12448_v17  ;;  %v12668_v17 = vor.u32 %v13929_v5, %v12667_v43  ;;  %v10992_v5 = vor.u32 %v13507_v51, %v10989_v19  ;;  %v13737_v51 = vld [vmem:[#allocation9 + $0x8a4] sm:$0xf]  ;;  %v11909_v19 = vld [vmem:[#allocation9 + $0x8b4] sm:$0xf0] }
 0x398   :  { %7783 = vmatpush.bf16.msra.mxu1 %v12088_v26  ;;  %v13477_v26 = vld [vmem:[#allocation9 + $0x84] sm:$0xf]  ;;  %v14712_v37 = vpop.f32.mrf.mxu1 }
 0x399   :  { %7796 = vmatpush.bf16.msra.mxu2 %v12248_v8  ;;  %7816 = vmatpush.bf16.msrb.mxu0 %v12688_v1  ;;  %v10892_v8 = vor.u32 %v13482_v11, %v10889_v13  ;;  %v10829_v1 = vld [vmem:[#allocation9 + $0x44] sm:$0xf0]  ;;  %v13909_v11 = vld [vmem:[#allocation9 + $0xe00] sm:$0xf0] }
 0x39b   :  { %7808 = vmatpush.bf16.msra.mxu3 %v12428_v41  ;;  %7784 = vmatmul.bf16.vlgmr.msra.gmra.mxu1 %v14652_v33  ;;  %v11209_v41 = vld [vmem:[#allocation9 + $0x33c] sm:$0xf0] }
 0x39c   :  { %7828 = vmatpush.bf16.msrb.mxu1 %v10952_v32  ;;  %7797 = vmatmul.bf16.vlgmr.msra.gmra.mxu2 %v14650_v28  ;;  %v7512_v32 = vpop.f32.mrf.mxu0  ;;  %v11212_v52 = vor.u32 %v13562_v59, %v11209_v41  ;;  %v12567_v59 = vld [vmem:[#allocation9 + $0xdc8] sm:$0xf]  ;;  %v13904_v41 = vld [vmem:[#allocation9 + $0xdd8] sm:$0xf0] }
 0x39d   :  { %7841 = vmatpush.bf16.msrb.mxu2 %v11112_v34  ;;  %v10869_v34 = vld [vmem:[#allocation9 + $0x94] sm:$0xf0]  ;;  %7817 = vmatpush.bf16.msrb.mxu0 %v12668_v17  ;;  %v14715_v22 = vadd.f32 %v7512_v32, %v14701_v38  ;;  %v13502_v17 = vld [vmem:[#allocation9 + $0x14c] sm:$0xf] }
 0x39e   :  { %v10872_v44 = vor.u32 %v13477_v26, %v10869_v34  ;;  %v12588_v26 = vor.u32 %v13909_v11, %v12587_v3  ;;  %v11912_v3 = vor.u32 %v13737_v51, %v11909_v19  ;;  %v11489_v51 = vld [vmem:[#allocation9 + $0x56c] sm:$0xf0] }
 0x39f   :  { %7809 = vmatpush.bf16.msra.mxu3 %v12408_v12  ;;  %v14717_v12 = vpop.f32.mrf.mxu2 }
 0x3a0   :  { %7829 = vmatpush.bf16.msrb.mxu1 %v10932_v55  ;;  %v11012_v55 = vor.u32 %v13512_v46, %v11009_v49  ;;  %v7579_v9 = vpop.f32.mrf.mxu1  ;;  %v13692_v46 = vld [vmem:[#allocation9 + $0x73c] sm:$0xf]  ;;  %v11729_v49 = vld [vmem:[#allocation9 + $0x74c] sm:$0xf0] }
 0x3a1   :  { %7842 = vmatpush.bf16.msrb.mxu2 %v11092_v16  ;;  %v13472_v16 = vld [vmem:[#allocation9 + $0x5c] sm:$0xf]  ;;  %7818 = vmatpush.bf16.msrb.mxu0 %v12648_v15  ;;  %v11709_v9 = vld [vmem:[#allocation9 + $0x724] sm:$0xf0] }
 0x3a2   :  { %7810 = vmatmul.bf16.vlgmr.msra.gmra.mxu3 %v14661_v29  ;;  %v10852_v38 = vor.u32 %v13472_v16, %v10849_v50  ;;  %v13652_v50 = vld [vmem:[#allocation9 + $0x5fc] sm:$0xf] }
 0x3a3   :  { %7854 = vmatpush.bf16.msrb.mxu3 %v11272_v0  ;;  %v13467_v0 = vld [vmem:[#allocation9 + $0x34] sm:$0xf] }
 0x3a4   :  { %7830 = vmatpush.bf16.msrb.mxu1 %v10912_v48  ;;  %v7514_v43 = vpop.f32.mrf.mxu0  ;;  %v12608_v48 = vor.u32 %v13914_v45, %v12607_v58  ;;  %v10832_v13 = vor.u32 %v13467_v0, %v10829_v1  ;;  %v11732_v45 = vor.u32 %v13692_v46, %v11729_v49  ;;  %v13612_v0 = vld [vmem:[#allocation9 + $0x4bc] sm:$0xf]  ;;  %v11509_v46 = vld [vmem:[#allocation9 + $0x594] sm:$0xf0] }
 0x3a5   :  { %7843 = vmatpush.bf16.msrb.mxu2 %v11072_v7  ;;  %v11192_v7 = vor.u32 %v13557_v60, %v11189_v40  ;;  %7819 = vmatpush.bf16.msrb.mxu0 %v12628_v53  ;;  %v14719_v25 = vpop.f32.mrf.mxu3  ;;  %v13542_v60 = vld [vmem:[#allocation9 + $0x28c] sm:$0xf]  ;;  %v11129_v40 = vld [vmem:[#allocation9 + $0x29c] sm:$0xf0] }
 0x3a7   :  { %7855 = vmatpush.bf16.msrb.mxu3 %v11252_v10  ;;  %v13462_v10 = vld [vmem:[#allocation9 + $0xc] sm:$0xf]  ;;  %v7592_v32 = vpop.f32.mrf.mxu2 }
 0x3a8   :  { %7831 = vmatpush.bf16.msrb.mxu1 %v10892_v8  ;;  %v11172_v8 = vor.u32 %v13552_v4, %v11169_v35  ;;  %v10812_v15 = vor.u32 %v13462_v10, %v10809_v20  ;;  %v13687_v4 = vld [vmem:[#allocation9 + $0x714] sm:$0xf]  ;;  %v13732_v10 = vld [vmem:[#allocation9 + $0x87c] sm:$0xf] }
 0x3a9   :  { %7844 = vmatpush.bf16.msrb.mxu2 %v11052_v18  ;;  %v10969_v18 = vld [vmem:[#allocation9 + $0x15c] sm:$0xf0]  ;;  %7820 = vmatpush.bf16.msrb.mxu0 %v12608_v48  ;;  %v11132_v48 = vor.u32 %v13542_v60, %v11129_v40  ;;  %v11349_v40 = vld [vmem:[#allocation9 + $0x454] sm:$0xf0] }
 0x3aa   :  { %v10972_v34 = vor.u32 %v13502_v17, %v10969_v18  ;;  %v11889_v17 = vld [vmem:[#allocation9 + $0x88c] sm:$0xf0]  ;;  %v13607_v18 = vld [vmem:[#allocation9 + $0x494] sm:$0xf] }
 0x3ab   :  { %7856 = vmatpush.bf16.msrb.mxu3 %v11232_v30  ;;  %v11149_v30 = vld [vmem:[#allocation9 + $0x2c4] sm:$0xf0] }
 0x3ac   :  { %7832 = vmatpush.bf16.msrb.mxu1 %v10872_v44  ;;  %v11592_v44 = vor.u32 %v13657_v23, %v11589_v24  ;;  %v11152_v16 = vor.u32 %v13547_v56, %v11149_v30  ;;  %v7564_v53 = vpop.f32.mrf.mxu0  ;;  %v13642_v23 = vld [vmem:[#allocation9 + $0x5ac] sm:$0xf]  ;;  %v11529_v24 = vld [vmem:[#allocation9 + $0x5bc] sm:$0xf0]  ;;  %v11892_v56 = vor.u32 %v13732_v10, %v11889_v17  ;;  %v13627_v10 = vld [vmem:[#allocation9 + $0x534] sm:$0xf] }
 0x3ad   :  { %7845 = vmatpush.bf16.msrb.mxu2 %v11032_v36  ;;  %v11752_v36 = vor.u32 %v13697_v21, %v11749_v57  ;;  %7821 = vmatpush.bf16.msrb.mxu0 %v12588_v26  ;;  %v7565_v58 = vadd.f32 %v7564_v53, %v14708_v61  ;;  %v11549_v61 = vld [vmem:[#allocation9 + $0x5e4] sm:$0xf0]  ;;  %v7605_v35 = vpop.f32.mrf.mxu3  ;;  %v13682_v57 = vld [vmem:[#allocation9 + $0x6ec] sm:$0xf]  ;;  %v11849_v53 = vld [vmem:[#allocation9 + $0x83c] sm:$0xf0] }
 0x3ae   :  { %v11389_v21 = vld [vmem:[#allocation9 + $0x4a4] sm:$0xf0]  ;;  %v11329_v35 = vld [vmem:[#allocation9 + $0x42c] sm:$0xf0] }
 0x3af   :  { %7857 = vmatpush.bf16.msrb.mxu3 %v11212_v52  ;;  %v11569_v52 = vld [vmem:[#allocation9 + $0x60c] sm:$0xf0]  ;;  %v7578_v43 = vadd.f32 %v14712_v37, %v7565_v58  ;;  %v11392_v30 = vor.u32 %v13607_v18, %v11389_v21  ;;  %v13672_v58 = vld [vmem:[#allocation9 + $0x69c] sm:$0xf]  ;;  %v11469_v17 = vld [vmem:[#allocation9 + $0x544] sm:$0xf0] }
 0x3b0   :  { %7833 = vmatpush.bf16.msrb.mxu1 %v10852_v38  ;;  %v11432_v38 = vor.u32 %v13617_v62, %v11429_v63  ;;  %v11572_v1 = vor.u32 %v13652_v50, %v11569_v52  ;;  %v13677_v62 = vld [vmem:[#allocation9 + $0x6c4] sm:$0xf]  ;;  %v13722_v52 = vld [vmem:[#allocation9 + $0x82c] sm:$0xf] }
 0x3b1   :  { %7846 = vmatpush.bf16.msrb.mxu2 %v11012_v55  ;;  %v12568_v55 = vor.u32 %v13904_v41, %v12567_v59  ;;  %v7591_v37 = vadd.f32 %v14717_v12, %v7578_v43  ;;  %v13727_v12 = vld [vmem:[#allocation9 + $0x854] sm:$0xf]  ;;  %v11532_v59 = vor.u32 %v13642_v23, %v11529_v24  ;;  %v11369_v41 = vld [vmem:[#allocation9 + $0x47c] sm:$0xf0]  ;;  %v13637_v63 = vld [vmem:[#allocation9 + $0x584] sm:$0xf] }
 0x3b2   :  { %v11512_v60 = vor.u32 %v13637_v63, %v11509_v46  ;;  %v11829_v43 = vld [vmem:[#allocation9 + $0x814] sm:$0xf0]  ;;  %v11809_v23 = vld [vmem:[#allocation9 + $0x7ec] sm:$0xf0]  ;;  %v13587_v24 = vld [vmem:[#allocation9 + $0x3f4] sm:$0xf] }
 0x3b3   :  { %7858 = vmatpush.bf16.msrb.mxu3 %v11192_v7  ;;  %v11409_v7 = vld [vmem:[#allocation9 + $0x4cc] sm:$0xf0]  ;;  %7822 = vmatpush.bf16.msrb.mxu0 %v12568_v55  ;;  %v7604_v26 = vadd.f32 %v14719_v25, %v7591_v37  ;;  %v13597_v55 = vld [vmem:[#allocation9 + $0x444] sm:$0xf]  ;;  %v13712_v37 = vld [vmem:[#allocation9 + $0x7dc] sm:$0xf] }
 0x3b4   :  { %7834 = vmatpush.bf16.msrb.mxu1 %v10832_v13  ;;  %v11412_v11 = vor.u32 %v13612_v0, %v11409_v7  ;;  %v11712_v13 = vor.u32 %v13687_v4, %v11709_v9  ;;  %v11852_v0 = vor.u32 %v13722_v52, %v11849_v53  ;;  %v11352_v7 = vor.u32 %v13597_v55, %v11349_v40  ;;  %v13717_v9 = vld [vmem:[#allocation9 + $0x804] sm:$0xf]  ;;  %v11289_v40 = vld [vmem:[#allocation9 + $0x3dc] sm:$0xf0] }
 0x3b5   :  { %7847 = vmatpush.bf16.msrb.mxu2 %v10992_v5  ;;  %v13647_v5 = vld [vmem:[#allocation9 + $0x5d4] sm:$0xf]  ;;  %v11832_v18 = vor.u32 %v13717_v9, %v11829_v43  ;;  %v13702_v9 = vld [vmem:[#allocation9 + $0x78c] sm:$0xf]  ;;  %v11769_v43 = vld [vmem:[#allocation9 + $0x79c] sm:$0xf0] }
 0x3b6   :  { %v11552_v20 = vor.u32 %v13647_v5, %v11549_v61  ;;  %7823 = vmatmul.bf16.vlgmr.msrb.gmra.mxu0 %v14669_v27 }
 0x3b7   :  { %7859 = vmatpush.bf16.msrb.mxu3 %v11172_v8  ;;  %7867 = vmatpush.bf16.msra.mxu0 %v11432_v38  ;;  %v11689_v8 = vld [vmem:[#allocation9 + $0x6fc] sm:$0xf0]  ;;  %v11649_v38 = vld [vmem:[#allocation9 + $0x6ac] sm:$0xf0] }
 0x3b8   :  { %7835 = vmatpush.bf16.msrb.mxu1 %v10812_v15  ;;  %v11692_v32 = vor.u32 %v13682_v57, %v11689_v8  ;;  %v11869_v15 = vld [vmem:[#allocation9 + $0x864] sm:$0xf0]  ;;  %v7629_v49 = vpop.f32.mrf.mxu1  ;;  %v11652_v4 = vor.u32 %v13672_v58, %v11649_v38  ;;  %v13777_v58 = vld [vmem:[#allocation9 + $0x9e4] sm:$0xf] }
 0x3b9   :  { %7848 = vmatpush.bf16.msrb.mxu2 %v10972_v34  ;;  %v7566_v34 = vpop.f32.mrf.mxu0  ;;  %v11872_v25 = vor.u32 %v13727_v12, %v11869_v15  ;;  %v11449_v12 = vld [vmem:[#allocation9 + $0x51c] sm:$0xf0]  ;;  %v13857_v15 = vld [vmem:[#allocation9 + $0xc64] sm:$0xf] }
 0x3ba   :  { %v11472_v34 = vor.u32 %v13627_v10, %v11469_v17  ;;  %v13847_v10 = vld [vmem:[#allocation9 + $0xc14] sm:$0xf]  ;;  %v12349_v17 = vld [vmem:[#allocation9 + $0xc24] sm:$0xf0] }
 0x3bb   :  { %7860 = vmatpush.bf16.msrb.mxu3 %v11152_v16  ;;  %7836 = vmatmul.bf16.vlgmr.msrb.gmra.mxu1 %v14598_v54 }
 0x3bc   :  { %7880 = vmatpush.bf16.msra.mxu1 %v11592_v44  ;;  %7849 = vmatmul.bf16.vlgmr.msrb.gmra.mxu2 %v14596_v2  ;;  %v11669_v44 = vld [vmem:[#allocation9 + $0x6d4] sm:$0xf0] }
 0x3bd   :  { %7893 = vmatpush.bf16.msra.mxu2 %v11752_v36  ;;  %7868 = vmatpush.bf16.msra.mxu0 %v11412_v11  ;;  %v13602_v36 = vld [vmem:[#allocation9 + $0x46c] sm:$0xf]  ;;  %v11672_v50 = vor.u32 %v13677_v62, %v11669_v44  ;;  %v11629_v11 = vld [vmem:[#allocation9 + $0x684] sm:$0xf0]  ;;  %v13817_v62 = vld [vmem:[#allocation9 + $0xb24] sm:$0xf] }
 0x3be   :  { %v11372_v16 = vor.u32 %v13602_v36, %v11369_v41  ;;  %v12389_v36 = vld [vmem:[#allocation9 + $0xc74] sm:$0xf0]  ;;  %v11812_v41 = vor.u32 %v13712_v37, %v11809_v23  ;;  %v13807_v37 = vld [vmem:[#allocation9 + $0xad4] sm:$0xf]  ;;  %v12352_v23 = vor.u32 %v13847_v10, %v12349_v17  ;;  %v13877_v17 = vld [vmem:[#allocation9 + $0xd04] sm:$0xf] }
 0x3bf   :  { %7861 = vmatpush.bf16.msrb.mxu3 %v11132_v48  ;;  %v13592_v48 = vld [vmem:[#allocation9 + $0x41c] sm:$0xf]  ;;  %v7642_v5 = vpop.f32.mrf.mxu2  ;;  %v12229_v44 = vld [vmem:[#allocation9 + $0xb34] sm:$0xf0]  ;;  %v12392_v55 = vor.u32 %v13857_v15, %v12389_v36  ;;  %v13802_v15 = vld [vmem:[#allocation9 + $0xaac] sm:$0xf] }
 0x3c0   :  { %7881 = vmatpush.bf16.msra.mxu1 %v11572_v1  ;;  %v7631_v21 = vpop.f32.mrf.mxu1  ;;  %v11332_v57 = vor.u32 %v13592_v48, %v11329_v35  ;;  %v12232_v38 = vor.u32 %v13817_v62, %v12229_v44  ;;  %v12549_v35 = vld [vmem:[#allocation9 + $0xdb4] sm:$0xf0]  ;;  %v12169_v36 = vld [vmem:[#allocation9 + $0xabc] sm:$0xf0]  ;;  %v13887_v44 = vld [vmem:[#allocation9 + $0xd54] sm:$0xf] }
 0x3c1   :  { %7894 = vmatpush.bf16.msra.mxu2 %v11732_v45  ;;  %7869 = vmatpush.bf16.msra.mxu0 %v11392_v30  ;;  %v13632_v45 = vld [vmem:[#allocation9 + $0x55c] sm:$0xf]  ;;  %v7616_v19 = vpop.f32.mrf.mxu0  ;;  %v13662_v30 = vld [vmem:[#allocation9 + $0x64c] sm:$0xf] }
 0x3c2   :  { %7862 = vmatmul.bf16.vlgmr.msrb.gmra.mxu3 %v14604_v39  ;;  %v7617_v1 = vadd.f32 %v7616_v19, %v7604_v26  ;;  %v11492_v61 = vor.u32 %v13632_v45, %v11489_v51  ;;  %v11309_v26 = vld [vmem:[#allocation9 + $0x404] sm:$0xf0]  ;;  %v12069_v45 = vld [vmem:[#allocation9 + $0x9f4] sm:$0xf0]  ;;  %v13852_v51 = vld [vmem:[#allocation9 + $0xc3c] sm:$0xf] }
 0x3c3   :  { %7906 = vmatpush.bf16.msra.mxu3 %v11912_v3  ;;  %v13667_v3 = vld [vmem:[#allocation9 + $0x674] sm:$0xf]  ;;  %v11312_v46 = vor.u32 %v13587_v24, %v11309_v26  ;;  %v12369_v19 = vld [vmem:[#allocation9 + $0xc4c] sm:$0xf0]  ;;  %v12072_v48 = vor.u32 %v13777_v58, %v12069_v45  ;;  %v13892_v24 = vld [vmem:[#allocation9 + $0xd7c] sm:$0xf] }
 0x3c4   :  { %7882 = vmatpush.bf16.msra.mxu1 %v11552_v20  ;;  %v11632_v8 = vor.u32 %v13667_v3, %v11629_v11  ;;  %v13772_v3 = vld [vmem:[#allocation9 + $0x9bc] sm:$0xf]  ;;  %v12529_v26 = vld [vmem:[#allocation9 + $0xd8c] sm:$0xf0] }
 0x3c5   :  { %7895 = vmatpush.bf16.msra.mxu2 %v11712_v13  ;;  %7870 = vmatpush.bf16.msra.mxu0 %v11372_v16  ;;  %v7630_v13 = vadd.f32 %v7629_v49, %v7617_v1  ;;  %v7655_v63 = vpop.f32.mrf.mxu3  ;;  %v13707_v49 = vld [vmem:[#allocation9 + $0x7b4] sm:$0xf]  ;;  %v11789_v16 = vld [vmem:[#allocation9 + $0x7c4] sm:$0xf0]  ;;  %v13812_v1 = vld [vmem:[#allocation9 + $0xafc] sm:$0xf] }
 0x3c7   :  { %7907 = vmatpush.bf16.msra.mxu3 %v11892_v56  ;;  %v7643_v20 = vadd.f32 %v7642_v5, %v7630_v13  ;;  %v13622_v56 = vld [vmem:[#allocation9 + $0x50c] sm:$0xf]  ;;  %v7644_v52 = vpop.f32.mrf.mxu2  ;;  %v12372_v5 = vor.u32 %v13852_v51, %v12369_v19  ;;  %v12049_v13 = vld [vmem:[#allocation9 + $0x9cc] sm:$0xf0] }
 0x3c8   :  { %7883 = vmatpush.bf16.msra.mxu1 %v11532_v59  ;;  %v11452_v53 = vor.u32 %v13622_v56, %v11449_v12  ;;  %v12329_v12 = vld [vmem:[#allocation9 + $0xbfc] sm:$0xf0]  ;;  %v12309_v52 = vld [vmem:[#allocation9 + $0xbd4] sm:$0xf0] }
 0x3c9   :  { %7896 = vmatpush.bf16.msra.mxu2 %v11692_v32  ;;  %7871 = vmatpush.bf16.msra.mxu0 %v11352_v7  ;;  %v11609_v32 = vld [vmem:[#allocation9 + $0x65c] sm:$0xf0]  ;;  %v7618_v59 = vpop.f32.mrf.mxu0  ;;  %v12209_v7 = vld [vmem:[#allocation9 + $0xb0c] sm:$0xf0] }
 0x3ca   :  { %v12212_v11 = vor.u32 %v13812_v1, %v12209_v7  ;;  %v12532_v59 = vor.u32 %v13892_v24, %v12529_v26  ;;  %v13757_v1 = vld [vmem:[#allocation9 + $0x944] sm:$0xf]  ;;  %v11989_v7 = vld [vmem:[#allocation9 + $0x954] sm:$0xf0]  ;;  %v13787_v26 = vld [vmem:[#allocation9 + $0xa34] sm:$0xf] }
 0x3cb   :  { %7908 = vmatpush.bf16.msra.mxu3 %v11872_v25  ;;  %v11612_v25 = vor.u32 %v13662_v30, %v11609_v32  ;;  %v12029_v30 = vld [vmem:[#allocation9 + $0x9a4] sm:$0xf0]  ;;  %v13842_v32 = vld [vmem:[#allocation9 + $0xbec] sm:$0xf] }
 0x3cc   :  { %7884 = vmatpush.bf16.msra.mxu1 %v11512_v60  ;;  %v13582_v60 = vld [vmem:[#allocation9 + $0x3cc] sm:$0xf]  ;;  %v12332_v62 = vor.u32 %v13842_v32, %v12329_v12 }
 0x3cd   :  { %7897 = vmatpush.bf16.msra.mxu2 %v11672_v50  ;;  %7872 = vmatpush.bf16.msra.mxu0 %v11332_v57  ;;  %v14729_v50 = vadd.f32 %v7655_v63, %v7643_v20  ;;  %v12189_v20 = vld [vmem:[#allocation9 + $0xae4] sm:$0xf0]  ;;  %v7657_v21 = vpop.f32.mrf.mxu3 }
 0x3ce   :  { %v12192_v56 = vor.u32 %v13807_v37, %v12189_v20  ;;  %v12509_v63 = vld [vmem:[#allocation9 + $0xd64] sm:$0xf0]  ;;  %v13752_v37 = vld [vmem:[#allocation9 + $0x91c] sm:$0xf] }
 0x3cf   :  { %7909 = vmatpush.bf16.msra.mxu3 %v11852_v0  ;;  %v11792_v0 = vor.u32 %v13707_v49, %v11789_v16  ;;  %v12009_v49 = vld [vmem:[#allocation9 + $0x97c] sm:$0xf0]  ;;  %v13837_v16 = vld [vmem:[#allocation9 + $0xbc4] sm:$0xf]  ;;  %v12512_v58 = vor.u32 %v13887_v44, %v12509_v63  ;;  %v13822_v44 = vld [vmem:[#allocation9 + $0xb4c] sm:$0xf] }
 0x3d0   :  { %7885 = vmatpush.bf16.msra.mxu1 %v11492_v61  ;;  %v13897_v61 = vld [vmem:[#allocation9 + $0xda4] sm:$0xf]  ;;  %v12312_v19 = vor.u32 %v13837_v16, %v12309_v52  ;;  %v12249_v63 = vld [vmem:[#allocation9 + $0xb5c] sm:$0xf0] }
 0x3d1   :  { %7898 = vmatpush.bf16.msra.mxu2 %v11652_v4  ;;  %7873 = vmatpush.bf16.msra.mxu0 %v11312_v46  ;;  %v11292_v4 = vor.u32 %v13582_v60, %v11289_v40  ;;  %v12552_v57 = vor.u32 %v13897_v61, %v12549_v35  ;;  %v13762_v46 = vld [vmem:[#allocation9 + $0x96c] sm:$0xf]  ;;  %v14735_v60 = vld [vmem:[#allocation10] sm:$0x1f]  ;;  %v7668_v61 = vpop.f32.mrf.mxu0 }
 0x3d2   :  { %v4856_v40 = vperm.slane %v14735_v60, 2  ;;  %v12012_v51 = vor.u32 %v13762_v46, %v12009_v49  ;;  %v12089_v46 = vld [vmem:[#allocation9 + $0xa1c] sm:$0xf0]  ;;  %v13540_v49 = vld [vmem:[#allocation9 + $0x278] sm:$0xf0] }
 0x3d3   :  { %7910 = vmatpush.bf16.msra.mxu3 %v11832_v18  ;;  %v11772_v18 = vor.u32 %v13702_v9, %v11769_v43  ;;  %v13832_v9 = vld [vmem:[#allocation9 + $0xb9c] sm:$0xf]  ;;  %v12289_v43 = vld [vmem:[#allocation9 + $0xbac] sm:$0xf0] }
 0x3d4   :  { %7886 = vmatpush.bf16.msra.mxu1 %v11472_v34  ;;  %v13767_v34 = vld [vmem:[#allocation9 + $0x994] sm:$0xf]  ;;  %v12292_v10 = vor.u32 %v13832_v9, %v12289_v43  ;;  %v11929_v9 = vld [vmem:[#allocation9 + $0x8dc] sm:$0xf0]  ;;  %v13937_v43 = vld [vmem:[#allocation9 + $0xee4] sm:$0xf] }
 0x3d5   :  { %7899 = vmatpush.bf16.msra.mxu2 %v11632_v8  ;;  %7874 = vmatpush.bf16.msra.mxu0 %v11292_v4  ;;  %v12052_v8 = vor.u32 %v13772_v3, %v12049_v13  ;;  %v11992_v3 = vor.u32 %v13757_v1, %v11989_v7  ;;  %v14739_v13 = vadd.f32 %v7668_v61, %v14729_v50  ;;  %v11095_v61 = vld [vmem:[#allocation9 + $0x240] sm:$0xf] }
 0x3d7   :  { %7911 = vmatpush.bf16.msra.mxu3 %v11812_v41  ;;  %v12032_v41 = vor.u32 %v13767_v34, %v12029_v30  ;;  %v12109_v34 = vld [vmem:[#allocation9 + $0xa44] sm:$0xf0]  ;;  %v13872_v30 = vld [vmem:[#allocation9 + $0xcdc] sm:$0xf] }
 0x3d8   :  { %7887 = vmatpush.bf16.msra.mxu1 %v11452_v53  ;;  %7875 = vmatmul.bf16.vlgmr.msra.gmra.mxu0 %v14606_v31  ;;  %v13797_v53 = vld [vmem:[#allocation9 + $0xa84] sm:$0xf]  ;;  %v7681_v45 = vpop.f32.mrf.mxu1 }
 0x3d9   :  { %7900 = vmatpush.bf16.msra.mxu2 %v11612_v25  ;;  %7919 = vmatpush.bf16.msrb.mxu0 %v12072_v48  ;;  %v12172_v25 = vor.u32 %v13802_v15, %v12169_v36  ;;  %v13792_v48 = vld [vmem:[#allocation9 + $0xa5c] sm:$0xf]  ;;  %v12449_v15 = vld [vmem:[#allocation9 + $0xcec] sm:$0xf0]  ;;  %v13747_v36 = vld [vmem:[#allocation9 + $0x8f4] sm:$0xf]  ;;  %v7670_v16 = vpop.f32.mrf.mxu0 }
 0x3da   :  { %v12452_v52 = vor.u32 %v13872_v30, %v12449_v15  ;;  %v10895_v16 = vld [vmem:[#allocation9 + $0xb0] sm:$0xf] }
 0x3db   :  { %7912 = vmatpush.bf16.msra.mxu3 %v11792_v0  ;;  %7888 = vmatmul.bf16.vlgmr.msra.gmra.mxu1 %v14622_v14  ;;  %v12489_v0 = vld [vmem:[#allocation9 + $0xd3c] sm:$0xf0] }
 0x3dc   :  { %7932 = vmatpush.bf16.msrb.mxu1 %v12232_v38  ;;  %7901 = vmatmul.bf16.vlgmr.msra.gmra.mxu2 %v14620_v6  ;;  %v13882_v38 = vld [vmem:[#allocation9 + $0xd2c] sm:$0xf] }
 0x3dd   :  { %7945 = vmatpush.bf16.msrb.mxu2 %v12392_v55  ;;  %7920 = vmatpush.bf16.msrb.mxu0 %v12052_v8  ;;  %v12149_v55 = vld [vmem:[#allocation9 + $0xa94] sm:$0xf0]  ;;  %v12492_v35 = vor.u32 %v13882_v38, %v12489_v0  ;;  %v13827_v8 = vld [vmem:[#allocation9 + $0xb74] sm:$0xf]  ;;  %v12252_v38 = vor.u32 %v13822_v44, %v12249_v63 }
 0x3de   :  { %v12152_v4 = vor.u32 %v13797_v53, %v12149_v55  ;;  %v10955_v53 = vld [vmem:[#allocation9 + $0x128] sm:$0xf]  ;;  %v13500_v55 = vld [vmem:[#allocation9 + $0x138] sm:$0xf0]  ;;  %v13927_v44 = vld [vmem:[#allocation9 + $0xe94] sm:$0xf] }
 0x3df   :  { %7913 = vmatpush.bf16.msra.mxu3 %v11772_v18  ;;  %v12469_v18 = vld [vmem:[#allocation9 + $0xd14] sm:$0xf0]  ;;  %v7694_v20 = vpop.f32.mrf.mxu2 }
 0x3e0   :  { %7933 = vmatpush.bf16.msrb.mxu1 %v12212_v11  ;;  %v7682_v11 = vadd.f32 %v7681_v45, %v4856_v40  ;;  %v7683_v50 = vpop.f32.mrf.mxu1  ;;  %v13867_v45 = vld [vmem:[#allocation9 + $0xcb4] sm:$0xf] }
 0x3e1   :  { %7946 = vmatpush.bf16.msrb.mxu2 %v12372_v5  ;;  %7921 = vmatpush.bf16.msrb.mxu0 %v12032_v41  ;;  %v12129_v5 = vld [vmem:[#allocation9 + $0xa6c] sm:$0xf0]  ;;  %v12112_v41 = vor.u32 %v13787_v26, %v12109_v34  ;;  %v11075_v34 = vld [vmem:[#allocation9 + $0x218] sm:$0xf] }
 0x3e2   :  { %7914 = vmatmul.bf16.vlgmr.msra.gmra.mxu3 %v14630_v42  ;;  %v12132_v21 = vor.u32 %v13792_v48, %v12129_v5  ;;  %v7695_v24 = vadd.f32 %v7694_v20, %v7682_v11  ;;  %v10956_v48 = vor.u32 %v13500_v55, %v10955_v53  ;;  %v12709_v5 = vld [vmem:[#allocation9 + $0xef4] sm:$0xf0]  ;;  %v10935_v11 = vld [vmem:[#allocation9 + $0x100] sm:$0xf]  ;;  %v12689_v26 = vld [vmem:[#allocation9 + $0xecc] sm:$0xf0] }
 0x3e3   :  { %7958 = vmatpush.bf16.msrb.mxu3 %v12552_v57  ;;  %v11969_v57 = vld [vmem:[#allocation9 + $0x92c] sm:$0xf0]  ;;  %v12712_v20 = vor.u32 %v13937_v43, %v12709_v5  ;;  %v10915_v50 = vld [vmem:[#allocation9 + $0xd8] sm:$0xf] }
 0x3e4   :  { %7934 = vmatpush.bf16.msrb.mxu1 %v12192_v56  ;;  %v12472_v56 = vor.u32 %v13877_v17, %v12469_v18  ;;  %v11972_v32 = vor.u32 %v13752_v37, %v11969_v57  ;;  %v13862_v18 = vld [vmem:[#allocation9 + $0xc8c] sm:$0xf]  ;;  %v12409_v37 = vld [vmem:[#allocation9 + $0xc9c] sm:$0xf0]  ;;  %v11275_v57 = vld [vmem:[#allocation9 + $0x3a8] sm:$0xf] }
 0x3e5   :  { %7947 = vmatpush.bf16.msrb.mxu2 %v12352_v23  ;;  %7922 = vmatpush.bf16.msrb.mxu0 %v12012_v51  ;;  %v12269_v23 = vld [vmem:[#allocation9 + $0xb84] sm:$0xf0]  ;;  %v7707_v40 = vpop.f32.mrf.mxu3  ;;  %v12412_v30 = vor.u32 %v13862_v18, %v12409_v37  ;;  %v11015_v18 = vld [vmem:[#allocation9 + $0x1a0] sm:$0xf]  ;;  %v13515_v37 = vld [vmem:[#allocation9 + $0x1b0] sm:$0xf0] }
 0x3e6   :  { %v12272_v12 = vor.u32 %v13827_v8, %v12269_v23  ;;  %v12429_v51 = vld [vmem:[#allocation9 + $0xcc4] sm:$0xf0]  ;;  %v13580_v8 = vld [vmem:[#allocation9 + $0x3b8] sm:$0xf0] }
 0x3e7   :  { %7959 = vmatpush.bf16.msrb.mxu3 %v12532_v59  ;;  %v11949_v59 = vld [vmem:[#allocation9 + $0x904] sm:$0xf0]  ;;  %v7696_v0 = vpop.f32.mrf.mxu2  ;;  %v13932_v23 = vld [vmem:[#allocation9 + $0xebc] sm:$0xf]  ;;  %v11276_v15 = vor.u32 %v13580_v8, %v11275_v57 }
 0x3e8   :  { %7935 = vmatpush.bf16.msrb.mxu1 %v12172_v25  ;;  %v11115_v25 = vld [vmem:[#allocation9 + $0x268] sm:$0xf]  ;;  %v12649_v0 = vld [vmem:[#allocation9 + $0xe7c] sm:$0xf0] }
 0x3e9   :  { %7948 = vmatpush.bf16.msrb.mxu2 %v12332_v62  ;;  %7923 = vmatpush.bf16.msrb.mxu0 %v11992_v3  ;;  %v13782_v62 = vld [vmem:[#allocation9 + $0xa0c] sm:$0xf]  ;;  %v11116_v7 = vor.u32 %v13540_v49, %v11115_v25  ;;  %v12432_v3 = vor.u32 %v13867_v45, %v12429_v51  ;;  %v11055_v25 = vld [vmem:[#allocation9 + $0x1f0] sm:$0xf]  ;;  %v13525_v49 = vld [vmem:[#allocation9 + $0x200] sm:$0xf0] }
 0x3ea   :  { %v12092_v1 = vor.u32 %v13782_v62, %v12089_v46  ;;  %v13575_v62 = vld [vmem:[#allocation9 + $0x390] sm:$0xf0]  ;;  %v12669_v46 = vld [vmem:[#allocation9 + $0xea4] sm:$0xf0]  ;;  %v13922_v45 = vld [vmem:[#allocation9 + $0xe6c] sm:$0xf] }
 0x3eb   :  { %7960 = vmatpush.bf16.msrb.mxu3 %v12512_v58  ;;  %v11952_v58 = vor.u32 %v13747_v36, %v11949_v59  ;;  %v12692_v36 = vor.u32 %v13932_v23, %v12689_v26  ;;  %v12672_v55 = vor.u32 %v13927_v44, %v12669_v46  ;;  %v12652_v5 = vor.u32 %v13922_v45, %v12649_v0  ;;  %v13465_v45 = vld [vmem:[#allocation9 + $0x20] sm:$0xf0]  ;;  %v13700_v0 = vld [vmem:[#allocation9 + $0x778] sm:$0xf0] }
 0x3ec   :  { %7936 = vmatpush.bf16.msrb.mxu1 %v12152_v4  ;;  %v13742_v4 = vld [vmem:[#allocation9 + $0x8cc] sm:$0xf]  ;;  %v11016_v26 = vor.u32 %v13515_v37, %v11015_v18  ;;  %v12569_v37 = vld [vmem:[#allocation9 + $0xddc] sm:$0xf0] }
 0x3ed   :  { %7949 = vmatpush.bf16.msrb.mxu2 %v12312_v19  ;;  %7924 = vmatpush.bf16.msrb.mxu0 %v11972_v32  ;;  %v14741_v19 = vadd.f32 %v7707_v40, %v7695_v24  ;;  %v11932_v17 = vor.u32 %v13742_v4, %v11929_v9  ;;  %v13490_v32 = vld [vmem:[#allocation9 + $0xe8] sm:$0xf0]  ;;  %v11056_v40 = vor.u32 %v13525_v49, %v11055_v25  ;;  %v10875_v4 = vld [vmem:[#allocation9 + $0x88] sm:$0xf]  ;;  %v13480_v9 = vld [vmem:[#allocation9 + $0x98] sm:$0xf0] }
 0x3ee   :  { %v10916_v63 = vor.u32 %v13490_v32, %v10915_v50  ;;  %v13902_v18 = vld [vmem:[#allocation9 + $0xdcc] sm:$0xf] }
 0x3ef   :  { %7961 = vmatpush.bf16.msrb.mxu3 %v12492_v35  ;;  %v13535_v35 = vld [vmem:[#allocation9 + $0x250] sm:$0xf0] }
 0x3f0   :  { %7937 = vmatpush.bf16.msrb.mxu1 %v12132_v21  ;;  %v11096_v21 = vor.u32 %v13535_v35, %v11095_v61  ;;  %v11215_v35 = vld [vmem:[#allocation9 + $0x330] sm:$0xf]  ;;  %v7720_v57 = vpop.f32.mrf.mxu0 }
 0x3f1   :  { %7950 = vmatpush.bf16.msrb.mxu2 %v12292_v10  ;;  %v13495_v10 = vld [vmem:[#allocation9 + $0x110] sm:$0xf0]  ;;  %7925 = vmatpush.bf16.msrb.mxu0 %v11952_v58  ;;  %v11235_v58 = vld [vmem:[#allocation9 + $0x358] sm:$0xf]  ;;  %v7721_v23 = vadd.f32 %v7720_v57, %v14741_v19  ;;  %v13620_v57 = vld [vmem:[#allocation9 + $0x4f8] sm:$0xf0] }
 0x3f2   :  { %v10936_v24 = vor.u32 %v13495_v10, %v10935_v11  ;;  %v13917_v11 = vld [vmem:[#allocation9 + $0xe44] sm:$0xf]  ;;  %v10876_v10 = vor.u32 %v13480_v9, %v10875_v4  ;;  %v11595_v4 = vld [vmem:[#allocation9 + $0x628] sm:$0xf]  ;;  %v13660_v9 = vld [vmem:[#allocation9 + $0x638] sm:$0xf0] }
 0x3f3   :  { %7962 = vmatpush.bf16.msrb.mxu3 %v12472_v56  ;;  %v13530_v56 = vld [vmem:[#allocation9 + $0x228] sm:$0xf0] }
 0x3f4   :  { %7938 = vmatpush.bf16.msrb.mxu1 %v12112_v41  ;;  %v11076_v59 = vor.u32 %v13530_v56, %v11075_v34  ;;  %v11255_v41 = vld [vmem:[#allocation9 + $0x380] sm:$0xf]  ;;  %v11195_v34 = vld [vmem:[#allocation9 + $0x308] sm:$0xf]  ;;  %v13560_v56 = vld [vmem:[#allocation9 + $0x318] sm:$0xf0] }
 0x3f5   :  { %7951 = vmatpush.bf16.msrb.mxu2 %v12272_v12  ;;  %v7709_v12 = vpop.f32.mrf.mxu3  ;;  %7926 = vmatpush.bf16.msrb.mxu0 %v11932_v17  ;;  %v11256_v53 = vor.u32 %v13575_v62, %v11255_v41  ;;  %v12629_v17 = vld [vmem:[#allocation9 + $0xe54] sm:$0xf0]  ;;  %v13470_v62 = vld [vmem:[#allocation9 + $0x48] sm:$0xf0]  ;;  %v11196_v44 = vor.u32 %v13560_v56, %v11195_v34  ;;  %v13655_v34 = vld [vmem:[#allocation9 + $0x610] sm:$0xf0]  ;;  %v12572_v56 = vor.u32 %v13902_v18, %v12569_v37 }
 0x3f6   :  { %v12609_v12 = vld [vmem:[#allocation9 + $0xe2c] sm:$0xf0]  ;;  %v10835_v41 = vld [vmem:[#allocation9 + $0x38] sm:$0xf] }
 0x3f7   :  { %7963 = vmatpush.bf16.msrb.mxu3 %v12452_v52  ;;  %v13485_v52 = vld [vmem:[#allocation9 + $0xc0] sm:$0xf0] }
 0x3f8   :  { %7939 = vmatpush.bf16.msrb.mxu1 %v12092_v1  ;;  %7927 = vmatmul.bf16.vlgmr.msrb.gmra.mxu0 %v14632_v47  ;;  %v10896_v51 = vor.u32 %v13485_v52, %v10895_v16  ;;  %v11035_v1 = vld [vmem:[#allocation9 + $0x1c8] sm:$0xf]  ;;  %v13555_v16 = vld [vmem:[#allocation9 + $0x2f0] sm:$0xf0] }
 0x3f9   :  { %7952 = vmatpush.bf16.msrb.mxu2 %v12252_v38  ;;  %7971 = vmatpush.bf16.msra.mxu0 %v12712_v20  ;;  %v13570_v38 = vld [vmem:[#allocation9 + $0x368] sm:$0xf0]  ;;  %v10855_v20 = vld [vmem:[#allocation9 + $0x60] sm:$0xf]  ;;  %v13907_v52 = vld [vmem:[#allocation9 + $0xdf4] sm:$0xf] }
 0x3fa   :  { %v11236_v43 = vor.u32 %v13570_v38, %v11235_v58  ;;  %v10975_v58 = vld [vmem:[#allocation9 + $0x150] sm:$0xf]  ;;  %v13505_v38 = vld [vmem:[#allocation9 + $0x160] sm:$0xf0] }
 0x3fb   :  { %7964 = vmatpush.bf16.msrb.mxu3 %v12432_v3  ;;  %7940 = vmatmul.bf16.vlgmr.msrb.gmra.mxu1 %v14652_v33  ;;  %v13565_v3 = vld [vmem:[#allocation9 + $0x340] sm:$0xf0] }
 0x3fc   :  { %7984 = vmatpush.bf16.msra.mxu1 %v10956_v48  ;;  %7953 = vmatmul.bf16.vlgmr.msrb.gmra.mxu2 %v14650_v28  ;;  %v7733_v48 = vpop.f32.mrf.mxu1  ;;  %v11216_v8 = vor.u32 %v13565_v3, %v11215_v35  ;;  %v13550_v35 = vld [vmem:[#allocation9 + $0x2c8] sm:$0xf0] }
 0x3fd   :  { %7997 = vmatpush.bf16.msra.mxu2 %v11116_v7  ;;  %7972 = vmatpush.bf16.msra.mxu0 %v12692_v36  ;;  %v13520_v7 = vld [vmem:[#allocation9 + $0x1d8] sm:$0xf0]  ;;  %v13510_v36 = vld [vmem:[#allocation9 + $0x188] sm:$0xf0] }
 0x3fe   :  { %v11036_v61 = vor.u32 %v13520_v7, %v11035_v1  ;;  %v7722_v1 = vpop.f32.mrf.mxu0 }
 0x3ff   :  { %7965 = vmatpush.bf16.msrb.mxu3 %v12412_v30  ;;  %v13912_v30 = vld [vmem:[#allocation9 + $0xe1c] sm:$0xf]  ;;  %v7746_v50 = vpop.f32.mrf.mxu2  ;;  %v13645_v1 = vld [vmem:[#allocation9 + $0x5c0] sm:$0xf0] }
 0x400   :  { %7985 = vmatpush.bf16.msra.mxu1 %v10936_v24  ;;  %v12632_v24 = vor.u32 %v13917_v11, %v12629_v17  ;;  %v12612_v25 = vor.u32 %v13912_v30, %v12609_v12  ;;  %v11135_v30 = vld [vmem:[#allocation9 + $0x290] sm:$0xf] }
 0x401   :  { %7998 = vmatpush.bf16.msra.mxu2 %v11096_v21  ;;  %7973 = vmatpush.bf16.msra.mxu0 %v12672_v55  ;;  %v13475_v21 = vld [vmem:[#allocation9 + $0x70] sm:$0xf0]  ;;  %v10836_v55 = vor.u32 %v13470_v62, %v10835_v41 }
 0x402   :  { %7966 = vmatmul.bf16.vlgmr.msrb.gmra.mxu3 %v14661_v29  ;;  %v10856_v32 = vor.u32 %v13475_v21, %v10855_v20  ;;  %v11435_v20 = vld [vmem:[#allocation9 + $0x4e8] sm:$0xf]  ;;  %v11596_v21 = vor.u32 %v13660_v9, %v11595_v4  ;;  %v13615_v62 = vld [vmem:[#allocation9 + $0x4d0] sm:$0xf0]  ;;  %v11875_v9 = vld [vmem:[#allocation9 + $0x858] sm:$0xf] }
 0x403   :  { %8010 = vmatpush.bf16.msra.mxu3 %v11276_v15  ;;  %v10995_v15 = vld [vmem:[#allocation9 + $0x178] sm:$0xf] }
 0x404   :  { %7986 = vmatpush.bf16.msra.mxu1 %v10916_v63  ;;  %v11175_v63 = vld [vmem:[#allocation9 + $0x2e0] sm:$0xf]  ;;  %v7735_v46 = vpop.f32.mrf.mxu1  ;;  %v10996_v49 = vor.u32 %v13510_v36, %v10995_v15  ;;  %v11915_v15 = vld [vmem:[#allocation9 + $0x8a8] sm:$0xf]  ;;  %v13740_v36 = vld [vmem:[#allocation9 + $0x8b8] sm:$0xf0] }
 0x405   :  { %7999 = vmatpush.bf16.msra.mxu2 %v11076_v59  ;;  %7974 = vmatpush.bf16.msra.mxu0 %v12652_v5  ;;  %v7734_v59 = vadd.f32 %v7733_v48, %v7721_v23  ;;  %v11176_v7 = vor.u32 %v13555_v16, %v11175_v63  ;;  %v10976_v5 = vor.u32 %v13505_v38, %v10975_v58  ;;  %v13695_v23 = vld [vmem:[#allocation9 + $0x750] sm:$0xf0]  ;;  %v13690_v63 = vld [vmem:[#allocation9 + $0x728] sm:$0xf0]  ;;  %v11555_v46 = vld [vmem:[#allocation9 + $0x5d8] sm:$0xf] }
 0x406   :  { %v11916_v16 = vor.u32 %v13740_v36, %v11915_v15  ;;  %v11395_v58 = vld [vmem:[#allocation9 + $0x498] sm:$0xf] }
 0x407   :  { %8011 = vmatpush.bf16.msra.mxu3 %v11256_v53  ;;  %v7747_v19 = vadd.f32 %v7746_v50, %v7734_v59  ;;  %v12589_v53 = vld [vmem:[#allocation9 + $0xe04] sm:$0xf0]  ;;  %v7748_v11 = vpop.f32.mrf.mxu2  ;;  %v13545_v50 = vld [vmem:[#allocation9 + $0x2a0] sm:$0xf0]  ;;  %v11415_v59 = vld [vmem:[#allocation9 + $0x4c0] sm:$0xf] }
 0x408   :  { %7987 = vmatpush.bf16.msra.mxu1 %v10896_v51  ;;  %v11755_v51 = vld [vmem:[#allocation9 + $0x768] sm:$0xf]  ;;  %v12592_v48 = vor.u32 %v13907_v52, %v12589_v53  ;;  %v11416_v52 = vor.u32 %v13615_v62, %v11415_v59  ;;  %v13680_v11 = vld [vmem:[#allocation9 + $0x6d8] sm:$0xf0]  ;;  %v11335_v62 = vld [vmem:[#allocation9 + $0x420] sm:$0xf] }
 0x409   :  { %8000 = vmatpush.bf16.msra.mxu2 %v11056_v40  ;;  %7975 = vmatpush.bf16.msra.mxu0 %v12632_v24  ;;  %v10815_v40 = vld [vmem:[#allocation9 + $0x10] sm:$0xf]  ;;  %v11756_v17 = vor.u32 %v13700_v0, %v11755_v51  ;;  %v11835_v59 = vld [vmem:[#allocation9 + $0x808] sm:$0xf] }
 0x40a   :  { %v11695_v51 = vld [vmem:[#allocation9 + $0x6f0] sm:$0xf] }
 0x40b   :  { %8012 = vmatpush.bf16.msra.mxu3 %v11236_v43  ;;  %v7759_v43 = vpop.f32.mrf.mxu3  ;;  %v11535_v0 = vld [vmem:[#allocation9 + $0x5b0] sm:$0xf] }
 0x40c   :  { %7988 = vmatpush.bf16.msra.mxu1 %v10876_v10  ;;  %v14748_v3 = vadd.f32 %v7759_v43, %v7747_v19  ;;  %v10816_v10 = vor.u32 %v13465_v45, %v10815_v40  ;;  %v11136_v19 = vor.u32 %v13545_v50, %v11135_v30  ;;  %v13735_v40 = vld [vmem:[#allocation9 + $0x890] sm:$0xf0]  ;;  %v13610_v45 = vld [vmem:[#allocation9 + $0x4a8] sm:$0xf0] }
 0x40d   :  { %8001 = vmatpush.bf16.msra.mxu2 %v11036_v61  ;;  %7976 = vmatpush.bf16.msra.mxu0 %v12612_v25  ;;  %v11155_v61 = vld [vmem:[#allocation9 + $0x2b8] sm:$0xf]  ;;  %v13650_v25 = vld [vmem:[#allocation9 + $0x5e8] sm:$0xf0]  ;;  %v13635_v30 = vld [vmem:[#allocation9 + $0x570] sm:$0xf0] }
 0x40e   :  { %v11156_v24 = vor.u32 %v13550_v35, %v11155_v61  ;;  %v11556_v38 = vor.u32 %v13650_v25, %v11555_v46  ;;  %v13730_v43 = vld [vmem:[#allocation9 + $0x868] sm:$0xf0]  ;;  %v13605_v61 = vld [vmem:[#allocation9 + $0x480] sm:$0xf0]  ;;  %v11675_v35 = vld [vmem:[#allocation9 + $0x6c8] sm:$0xf] }
 0x40f   :  { %8013 = vmatpush.bf16.msra.mxu3 %v11216_v8  ;;  %v11735_v8 = vld [vmem:[#allocation9 + $0x740] sm:$0xf]  ;;  %v11876_v18 = vor.u32 %v13730_v43, %v11875_v9  ;;  %v11635_v46 = vld [vmem:[#allocation9 + $0x678] sm:$0xf]  ;;  %v13670_v25 = vld [vmem:[#allocation9 + $0x688] sm:$0xf0] }
 0x410   :  { %7989 = vmatpush.bf16.msra.mxu1 %v10856_v32  ;;  %v11436_v32 = vor.u32 %v13620_v57, %v11435_v20  ;;  %v11736_v12 = vor.u32 %v13695_v23, %v11735_v8  ;;  %v11855_v57 = vld [vmem:[#allocation9 + $0x830] sm:$0xf]  ;;  %v13725_v8 = vld [vmem:[#allocation9 + $0x840] sm:$0xf0]  ;;  %v11355_v23 = vld [vmem:[#allocation9 + $0x448] sm:$0xf] }
 0x411   :  { %8002 = vmatpush.bf16.msra.mxu2 %v11016_v26  ;;  %v11575_v26 = vld [vmem:[#allocation9 + $0x600] sm:$0xf]  ;;  %7977 = vmatpush.bf16.msra.mxu0 %v12592_v48  ;;  %v11375_v48 = vld [vmem:[#allocation9 + $0x470] sm:$0xf]  ;;  %v7772_v50 = vpop.f32.mrf.mxu0  ;;  %v12395_v9 = vld [vmem:[#allocation9 + $0xc68] sm:$0xf] }
 0x412   :  { %v11576_v41 = vor.u32 %v13655_v34, %v11575_v26  ;;  %v11376_v20 = vor.u32 %v13605_v61, %v11375_v48  ;;  %v11655_v26 = vld [vmem:[#allocation9 + $0x6a0] sm:$0xf]  ;;  %v13675_v34 = vld [vmem:[#allocation9 + $0x6b0] sm:$0xf0]  ;;  %v13860_v43 = vld [vmem:[#allocation9 + $0xc78] sm:$0xf0] }
 0x413   :  { %8014 = vmatpush.bf16.msra.mxu3 %v11196_v44  ;;  %v11715_v44 = vld [vmem:[#allocation9 + $0x718] sm:$0xf]  ;;  %v11656_v36 = vor.u32 %v13675_v34, %v11655_v26  ;;  %v12235_v61 = vld [vmem:[#allocation9 + $0xb28] sm:$0xf]  ;;  %v13780_v26 = vld [vmem:[#allocation9 + $0x9f8] sm:$0xf0] }
 0x414   :  { %7990 = vmatpush.bf16.msra.mxu1 %v10836_v55  ;;  %v11716_v53 = vor.u32 %v13690_v63, %v11715_v44  ;;  %v11895_v55 = vld [vmem:[#allocation9 + $0x880] sm:$0xf] }
 0x415   :  { %8003 = vmatpush.bf16.msra.mxu2 %v10996_v49  ;;  %v7761_v49 = vpop.f32.mrf.mxu3  ;;  %7978 = vmatpush.bf16.msra.mxu0 %v12572_v56  ;;  %v11495_v56 = vld [vmem:[#allocation9 + $0x560] sm:$0xf] }
 0x416   :  { %v11496_v63 = vor.u32 %v13635_v30, %v11495_v56  ;;  %v12375_v34 = vld [vmem:[#allocation9 + $0xc40] sm:$0xf]  ;;  %v13855_v56 = vld [vmem:[#allocation9 + $0xc50] sm:$0xf0] }
 0x417   :  { %8015 = vmatpush.bf16.msra.mxu3 %v11176_v7  ;;  %v11396_v7 = vor.u32 %v13610_v45, %v11395_v58  ;;  %v13715_v45 = vld [vmem:[#allocation9 + $0x7f0] sm:$0xf0] }
 0x418   :  { %7991 = vmatpush.bf16.msra.mxu1 %v10816_v10  ;;  %7979 = vmatmul.bf16.vlgmr.msra.gmra.mxu0 %v14669_v27  ;;  %v11515_v10 = vld [vmem:[#allocation9 + $0x588] sm:$0xf]  ;;  %v7785_v37 = vpop.f32.mrf.mxu1 }
 0x419   :  { %8004 = vmatpush.bf16.msra.mxu2 %v10976_v5  ;;  %8023 = vmatpush.bf16.msrb.mxu0 %v11436_v32  ;;  %v11536_v5 = vor.u32 %v13645_v1, %v11535_v0  ;;  %v11856_v32 = vor.u32 %v13725_v8, %v11855_v57  ;;  %v11455_v1 = vld [vmem:[#allocation9 + $0x510] sm:$0xf]  ;;  %v7774_v48 = vpop.f32.mrf.mxu0  ;;  %v12396_v57 = vor.u32 %v13860_v43, %v12395_v9 }
 0x41a   :  { %v11295_v8 = vld [vmem:[#allocation9 + $0x3d0] sm:$0xf]  ;;  %v12515_v48 = vld [vmem:[#allocation9 + $0xd58] sm:$0xf] }
 0x41b   :  { %8016 = vmatpush.bf16.msra.mxu3 %v11156_v24  ;;  %7992 = vmatmul.bf16.vlgmr.msra.gmra.mxu1 %v14598_v54  ;;  %v11896_v54 = vor.u32 %v13735_v40, %v11895_v55  ;;  %v11815_v55 = vld [vmem:[#allocation9 + $0x7e0] sm:$0xf] }
 0x41c   :  { %8036 = vmatpush.bf16.msrb.mxu1 %v11596_v21  ;;  %8005 = vmatmul.bf16.vlgmr.msra.gmra.mxu2 %v14596_v2  ;;  %v13685_v2 = vld [vmem:[#allocation9 + $0x700] sm:$0xf0]  ;;  %v11676_v21 = vor.u32 %v13680_v11, %v11675_v35  ;;  %v13820_v35 = vld [vmem:[#allocation9 + $0xb38] sm:$0xf0] }
 0x41d   :  { %8049 = vmatpush.bf16.msrb.mxu2 %v11756_v17  ;;  %8024 = vmatpush.bf16.msrb.mxu0 %v11416_v52  ;;  %v11696_v4 = vor.u32 %v13685_v2, %v11695_v51  ;;  %v13640_v17 = vld [vmem:[#allocation9 + $0x598] sm:$0xf0]  ;;  %v13630_v52 = vld [vmem:[#allocation9 + $0x548] sm:$0xf0]  ;;  %v11315_v51 = vld [vmem:[#allocation9 + $0x3f8] sm:$0xf] }
 0x41e   :  { %v11516_v24 = vor.u32 %v13640_v17, %v11515_v10  ;;  %v13590_v2 = vld [vmem:[#allocation9 + $0x408] sm:$0xf0] }
 0x41f   :  { %8017 = vmatpush.bf16.msra.mxu3 %v11136_v19  ;;  %v7798_v44 = vpop.f32.mrf.mxu2  ;;  %v13595_v19 = vld [vmem:[#allocation9 + $0x430] sm:$0xf0]  ;;  %v11316_v10 = vor.u32 %v13590_v2, %v11315_v51  ;;  %v12035_v2 = vld [vmem:[#allocation9 + $0x998] sm:$0xf] }
 0x420   :  { %8037 = vmatpush.bf16.msrb.mxu1 %v11576_v41  ;;  %v13720_v41 = vld [vmem:[#allocation9 + $0x818] sm:$0xf0]  ;;  %v7787_v40 = vpop.f32.mrf.mxu1  ;;  %v11336_v58 = vor.u32 %v13595_v19, %v11335_v62  ;;  %v12555_v62 = vld [vmem:[#allocation9 + $0xda8] sm:$0xf]  ;;  %v13895_v51 = vld [vmem:[#allocation9 + $0xd90] sm:$0xf0] }
 0x421   :  { %8050 = vmatpush.bf16.msrb.mxu2 %v11736_v12  ;;  %8025 = vmatpush.bf16.msrb.mxu0 %v11396_v7  ;;  %v7773_v12 = vadd.f32 %v7772_v50, %v14748_v3  ;;  %v13665_v7 = vld [vmem:[#allocation9 + $0x660] sm:$0xf0]  ;;  %v12215_v50 = vld [vmem:[#allocation9 + $0xb00] sm:$0xf] }
 0x422   :  { %8018 = vmatmul.bf16.vlgmr.msra.gmra.mxu3 %v14604_v39  ;;  %v13600_v39 = vld [vmem:[#allocation9 + $0x458] sm:$0xf0] }
 0x423   :  { %8062 = vmatpush.bf16.msrb.mxu3 %v11916_v16  ;;  %v11356_v15 = vor.u32 %v13600_v39, %v11355_v23  ;;  %v7786_v49 = vadd.f32 %v7785_v37, %v7773_v12  ;;  %v11475_v16 = vld [vmem:[#allocation9 + $0x538] sm:$0xf]  ;;  %v13710_v37 = vld [vmem:[#allocation9 + $0x7c8] sm:$0xf0]  ;;  %v13585_v23 = vld [vmem:[#allocation9 + $0x3e0] sm:$0xf0]  ;;  %v12236_v39 = vor.u32 %v13820_v35, %v12235_v61 }
 0x424   :  { %8038 = vmatpush.bf16.msrb.mxu1 %v11556_v38  ;;  %v11636_v38 = vor.u32 %v13670_v25, %v11635_v46  ;;  %v11476_v0 = vor.u32 %v13630_v52, %v11475_v16  ;;  %v11296_v12 = vor.u32 %v13585_v23, %v11295_v8  ;;  %v13775_v46 = vld [vmem:[#allocation9 + $0x9d0] sm:$0xf0]  ;;  %v12355_v25 = vld [vmem:[#allocation9 + $0xc18] sm:$0xf]  ;;  %v12015_v61 = vld [vmem:[#allocation9 + $0x970] sm:$0xf] }
 0x425   :  { %8051 = vmatpush.bf16.msrb.mxu2 %v11716_v53  ;;  %8026 = vmatpush.bf16.msrb.mxu0 %v11376_v20  ;;  %v11836_v53 = vor.u32 %v13720_v41, %v11835_v59  ;;  %v14755_v3 = vadd.f32 %v7798_v44, %v7786_v49  ;;  %v14757_v11 = vpop.f32.mrf.mxu3  ;;  %v12376_v41 = vor.u32 %v13855_v56, %v12375_v34  ;;  %v13900_v44 = vld [vmem:[#allocation9 + $0xdb8] sm:$0xf0]  ;;  %v13850_v49 = vld [vmem:[#allocation9 + $0xc28] sm:$0xf0]  ;;  %v12195_v52 = vld [vmem:[#allocation9 + $0xad8] sm:$0xf] }
 0x426   :  { %v12556_v40 = vor.u32 %v13900_v44, %v12555_v62  ;;  %v13760_v34 = vld [vmem:[#allocation9 + $0x958] sm:$0xf0]  ;;  %v12295_v56 = vld [vmem:[#allocation9 + $0xba0] sm:$0xf] }
 0x427   :  { %8063 = vmatpush.bf16.msrb.mxu3 %v11896_v54  ;;  %v11615_v54 = vld [vmem:[#allocation9 + $0x650] sm:$0xf]  ;;  %v7800_v20 = vpop.f32.mrf.mxu2  ;;  %v13880_v62 = vld [vmem:[#allocation9 + $0xd18] sm:$0xf0]  ;;  %v11975_v44 = vld [vmem:[#allocation9 + $0x920] sm:$0xf] }
 0x428   :  { %8039 = vmatpush.bf16.msrb.mxu1 %v11536_v5  ;;  %v11816_v5 = vor.u32 %v13715_v45, %v11815_v55  ;;  %v11616_v17 = vor.u32 %v13665_v7, %v11615_v54  ;;  %v12535_v45 = vld [vmem:[#allocation9 + $0xd80] sm:$0xf]  ;;  %v12335_v54 = vld [vmem:[#allocation9 + $0xbf0] sm:$0xf]  ;;  %v4857_v20 = vperm.slane %v14735_v60, 3 }
 0x429   :  { %8052 = vmatpush.bf16.msrb.mxu2 %v11696_v4  ;;  %8027 = vmatpush.bf16.msrb.mxu0 %v11356_v15  ;;  %v13625_v4 = vld [vmem:[#allocation9 + $0x520] sm:$0xf0]  ;;  %v11775_v15 = vld [vmem:[#allocation9 + $0x790] sm:$0xf] }
 0x42a   :  { %v12175_v7 = vld [vmem:[#allocation9 + $0xab0] sm:$0xf] }
 0x42b   :  { %8064 = vmatpush.bf16.msrb.mxu3 %v11876_v18  ;;  %v11795_v18 = vld [vmem:[#allocation9 + $0x7b8] sm:$0xf] }
 0x42c   :  { %8040 = vmatpush.bf16.msrb.mxu1 %v11516_v24  ;;  %v12075_v24 = vld [vmem:[#allocation9 + $0x9e8] sm:$0xf]  ;;  %v11796_v30 = vor.u32 %v13710_v37, %v11795_v18  ;;  %v13840_v18 = vld [vmem:[#allocation9 + $0xbd8] sm:$0xf0] }
 0x42d   :  { %8053 = vmatpush.bf16.msrb.mxu2 %v11676_v21  ;;  %8028 = vmatpush.bf16.msrb.mxu0 %v11336_v58  ;;  %v11456_v21 = vor.u32 %v13625_v4, %v11455_v1  ;;  %v12076_v59 = vor.u32 %v13780_v26, %v12075_v24  ;;  %v7813_v55 = vpop.f32.mrf.mxu3  ;;  %v13770_v1 = vld [vmem:[#allocation9 + $0x9a8] sm:$0xf0]  ;;  %v13805_v4 = vld [vmem:[#allocation9 + $0xac0] sm:$0xf0]  ;;  %v13800_v37 = vld [vmem:[#allocation9 + $0xa98] sm:$0xf0] }
 0x42e   :  { %v12036_v9 = vor.u32 %v13770_v1, %v12035_v2  ;;  %v12176_v35 = vor.u32 %v13805_v4, %v12175_v7  ;;  %v12495_v24 = vld [vmem:[#allocation9 + $0xd30] sm:$0xf]  ;;  %v11995_v26 = vld [vmem:[#allocation9 + $0x948] sm:$0xf]  ;;  %v11955_v2 = vld [vmem:[#allocation9 + $0x8f8] sm:$0xf] }
 0x42f   :  { %8065 = vmatpush.bf16.msrb.mxu3 %v11856_v32  ;;  %v13815_v32 = vld [vmem:[#allocation9 + $0xb10] sm:$0xf0]  ;;  %v13750_v1 = vld [vmem:[#allocation9 + $0x908] sm:$0xf0]  ;;  %v12095_v7 = vld [vmem:[#allocation9 + $0xa10] sm:$0xf] }
 0x430   :  { %8041 = vmatpush.bf16.msrb.mxu1 %v11496_v63  ;;  %v12055_v63 = vld [vmem:[#allocation9 + $0x9c0] sm:$0xf]  ;;  %v12216_v19 = vor.u32 %v13815_v32, %v12215_v50  ;;  %v13795_v32 = vld [vmem:[#allocation9 + $0xa70] sm:$0xf0]  ;;  %v13785_v4 = vld [vmem:[#allocation9 + $0xa20] sm:$0xf0] }
 0x431   :  { %8054 = vmatpush.bf16.msrb.mxu2 %v11656_v36  ;;  %8029 = vmatpush.bf16.msrb.mxu0 %v11316_v10  ;;  %v13705_v36 = vld [vmem:[#allocation9 + $0x7a0] sm:$0xf0]  ;;  %v12056_v58 = vor.u32 %v13775_v46, %v12055_v63  ;;  %v12135_v50 = vld [vmem:[#allocation9 + $0xa60] sm:$0xf]  ;;  %v13755_v46 = vld [vmem:[#allocation9 + $0x930] sm:$0xf0] }
 0x432   :  { %v11776_v16 = vor.u32 %v13705_v36, %v11775_v15  ;;  %v13765_v10 = vld [vmem:[#allocation9 + $0x980] sm:$0xf0]  ;;  %v11996_v36 = vor.u32 %v13760_v34, %v11995_v26  ;;  %v13947_v34 = vld [vmem:[#allocation12 + $0x30] sm:$0xff] }
 0x433   :  { %8066 = vmatpush.bf16.msrb.mxu3 %v11836_v53  ;;  %v13810_v53 = vld [vmem:[#allocation9 + $0xae8] sm:$0xf0]  ;;  %v12016_v8 = vor.u32 %v13765_v10, %v12015_v61  ;;  %v12435_v61 = vld [vmem:[#allocation9 + $0xcb8] sm:$0xf] }
 0x434   :  { %8042 = vmatpush.bf16.msrb.mxu1 %v11476_v0  ;;  %v12196_v0 = vor.u32 %v13810_v53, %v12195_v52  ;;  %v12115_v52 = vld [vmem:[#allocation9 + $0xa38] sm:$0xf]  ;;  %v13790_v53 = vld [vmem:[#allocation9 + $0xa48] sm:$0xf0] }
 0x435   :  { %8055 = vmatpush.bf16.msrb.mxu2 %v11636_v38  ;;  %8030 = vmatpush.bf16.msrb.mxu0 %v11296_v12  ;;  %v12356_v38 = vor.u32 %v13850_v49, %v12355_v25  ;;  %v14764_v12 = vpop.f32.mrf.mxu0  ;;  %v12275_v25 = vld [vmem:[#allocation9 + $0xb78] sm:$0xf]  ;;  %v13830_v49 = vld [vmem:[#allocation9 + $0xb88] sm:$0xf0] }
 0x437   :  { %8067 = vmatpush.bf16.msrb.mxu3 %v11816_v5  ;;  %v13890_v5 = vld [vmem:[#allocation9 + $0xd68] sm:$0xf0] }
 0x438   :  { %8043 = vmatpush.bf16.msrb.mxu1 %v11456_v21  ;;  %8031 = vmatmul.bf16.vlgmr.msrb.gmra.mxu0 %v14606_v31  ;;  %v12155_v31 = vld [vmem:[#allocation9 + $0xa88] sm:$0xf]  ;;  %v12516_v21 = vor.u32 %v13890_v5, %v12515_v48  ;;  %v11956_v48 = vor.u32 %v13750_v1, %v11955_v2  ;;  %v13943_v2 = vld [vmem:[#allocation12 + $0x10] sm:$0xff] }
 0x439   :  { %8056 = vmatpush.bf16.msrb.mxu2 %v11616_v17  ;;  %8075 = vmatpush.bf16.msra.mxu0 %v12076_v59  ;;  %v12315_v17 = vld [vmem:[#allocation9 + $0xbc8] sm:$0xf]  ;;  %v13915_v1 = vld [vmem:[#allocation9 + $0xe30] sm:$0xf0] }
 0x43a   :  { %v12316_v23 = vor.u32 %v13840_v18, %v12315_v17  ;;  %v12096_v17 = vor.u32 %v13785_v4, %v12095_v7  ;;  %v13956_v18 = vld [vmem:[#allocation12 + $0x78] sm:$0xff]  ;;  %v13950_v4 = vld [vmem:[#allocation12 + $0x48] sm:$0xff] }
 0x43b   :  { %8068 = vmatpush.bf16.msrb.mxu3 %v11796_v30  ;;  %8044 = vmatmul.bf16.vlgmr.msrb.gmra.mxu1 %v14622_v14  ;;  %v12536_v14 = vor.u32 %v13895_v51, %v12535_v45  ;;  %v13835_v30 = vld [vmem:[#allocation9 + $0xbb0] sm:$0xf0]  ;;  %v12455_v45 = vld [vmem:[#allocation9 + $0xce0] sm:$0xf] }
 0x43c   :  { %8088 = vmatpush.bf16.msra.mxu1 %v12236_v39  ;;  %8057 = vmatmul.bf16.vlgmr.msrb.gmra.mxu2 %v14620_v6  ;;  %v13845_v6 = vld [vmem:[#allocation9 + $0xc00] sm:$0xf0]  ;;  %v12296_v59 = vor.u32 %v13835_v30, %v12295_v56  ;;  %v13875_v51 = vld [vmem:[#allocation9 + $0xcf0] sm:$0xf0]  ;;  %v12695_v56 = vld [vmem:[#allocation9 + $0xec0] sm:$0xf] }
 0x43d   :  { %8101 = vmatpush.bf16.msra.mxu2 %v12396_v57  ;;  %8076 = vmatpush.bf16.msra.mxu0 %v12056_v58  ;;  %v12336_v43 = vor.u32 %v13845_v6, %v12335_v54  ;;  %v7837_v57 = vpop.f32.mrf.mxu1  ;;  %v13885_v39 = vld [vmem:[#allocation9 + $0xd40] sm:$0xf0]  ;;  %v11976_v58 = vor.u32 %v13755_v46, %v11975_v44  ;;  %v12255_v54 = vld [vmem:[#allocation9 + $0xb50] sm:$0xf]  ;;  %v13935_v30 = vld [vmem:[#allocation9 + $0xed0] sm:$0xf0] }
 0x43e   :  { %v12496_v60 = vor.u32 %v13885_v39, %v12495_v24  ;;  %v7838_v15 = vadd.f32 %v7837_v57, %v4857_v20  ;;  %v13825_v6 = vld [vmem:[#allocation9 + $0xb60] sm:$0xf0]  ;;  %v13940_v57 = vld [vmem:[#allocation9 + $0xef8] sm:$0xf0]  ;;  %v12415_v24 = vld [vmem:[#allocation9 + $0xc90] sm:$0xf] }
 0x43f   :  { %8069 = vmatpush.bf16.msrb.mxu3 %v11776_v16  ;;  %v7850_v63 = vpop.f32.mrf.mxu2  ;;  %v12256_v5 = vor.u32 %v13825_v6, %v12255_v54  ;;  %v13948_v20 = vld [vmem:[#allocation12 + $0x38] sm:$0xff]  ;;  %v13963_v44 = vld [vmem:[#allocation12 + $0xb0] sm:$0xff] }
 0x440   :  { %8089 = vmatpush.bf16.msra.mxu1 %v12216_v19  ;;  %v12136_v19 = vor.u32 %v13795_v32, %v12135_v50  ;;  %v14766_v16 = vadd.f32 %v7850_v63, %v7838_v15  ;;  %v13865_v39 = vld [vmem:[#allocation9 + $0xca0] sm:$0xf0]  ;;  %v12696_v15 = vor.u32 %v13935_v30, %v12695_v56 }
 0x441   :  { %8102 = vmatpush.bf16.msra.mxu2 %v12376_v41  ;;  %8077 = vmatpush.bf16.msra.mxu0 %v12036_v9  ;;  %v12475_v41 = vld [vmem:[#allocation9 + $0xd08] sm:$0xf]  ;;  %v12456_v9 = vor.u32 %v13875_v51, %v12455_v45  ;;  %v12416_v50 = vor.u32 %v13865_v39, %v12415_v24  ;;  %v13925_v46 = vld [vmem:[#allocation9 + $0xe80] sm:$0xf0]  ;;  %v13951_v45 = vld [vmem:[#allocation12 + $0x50] sm:$0xff] }
 0x442   :  { %8070 = vmatmul.bf16.vlgmr.msrb.gmra.mxu3 %v14630_v42  ;;  %v12156_v42 = vor.u32 %v13800_v37, %v12155_v31  ;;  %v12476_v55 = vor.u32 %v13880_v62, %v12475_v41  ;;  %v11935_v31 = vld [vmem:[#allocation9 + $0x8d0] sm:$0xf]  ;;  %v13745_v37 = vld [vmem:[#allocation9 + $0x8e0] sm:$0xf0]  ;;  %v12675_v41 = vld [vmem:[#allocation9 + $0xe98] sm:$0xf] }
 0x443   :  { %8114 = vmatpush.bf16.msra.mxu3 %v12556_v40  ;;  %v13930_v62 = vld [vmem:[#allocation9 + $0xea8] sm:$0xf0]  ;;  %v13960_v54 = vld [vmem:[#allocation12 + $0x98] sm:$0xff] }
 0x444   :  { %8090 = vmatpush.bf16.msra.mxu1 %v12196_v0  ;;  %v12116_v0 = vor.u32 %v13790_v53, %v12115_v52  ;;  %v13953_v63 = vld [vmem:[#allocation12 + $0x60] sm:$0xff]  ;;  %v13952_v52 = vld [vmem:[#allocation12 + $0x58] sm:$0xff] }
 0x445   :  { %8103 = vmatpush.bf16.msra.mxu2 %v12356_v38  ;;  %8078 = vmatpush.bf16.msra.mxu0 %v12016_v8  ;;  %v7839_v40 = vpop.f32.mrf.mxu1  ;;  %v12276_v38 = vor.u32 %v13830_v49, %v12275_v25  ;;  %v13962_v25 = vld [vmem:[#allocation12 + $0xa8] sm:$0xff]  ;;  %v13944_v53 = vld [vmem:[#allocation12 + $0x18] sm:$0xff] }
 0x446   :  { %v13920_v40 = vld [vmem:[#allocation9 + $0xe58] sm:$0xf0] }
 0x447   :  { %8115 = vmatpush.bf16.msra.mxu3 %v12536_v14  ;;  %v7826_v14 = vpop.f32.mrf.mxu0  ;;  %v7852_v10 = vpop.f32.mrf.mxu2 }
 0x448   :  { %8091 = vmatpush.bf16.msra.mxu1 %v12176_v35  ;;  %v13870_v35 = vld [vmem:[#allocation9 + $0xcc8] sm:$0xf0] }
 0x449   :  { %8104 = vmatpush.bf16.msra.mxu2 %v12336_v43  ;;  %8079 = vmatpush.bf16.msra.mxu0 %v11996_v36  ;;  %v14768_v43 = vpop.f32.mrf.mxu3  ;;  %v12436_v8 = vor.u32 %v13870_v35, %v12435_v61  ;;  %v13954_v36 = vld [vmem:[#allocation12 + $0x68] sm:$0xff]  ;;  %v13959_v61 = vld [vmem:[#allocation12 + $0x90] sm:$0xff] }
 0x44a   :  { %v13942_v14 = vld [vmem:[#allocation12 + $0x8] sm:$0xff] }
 0x44b   :  { %8116 = vmatpush.bf16.msra.mxu3 %v12516_v21  ;;  %v12715_v21 = vld [vmem:[#allocation9 + $0xee8] sm:$0xf] }
 0x44c   :  { %8092 = vmatpush.bf16.msra.mxu1 %v12156_v42  ;;  %v12716_v26 = vor.u32 %v13940_v57, %v12715_v21  ;;  %v13955_v42 = vld [vmem:[#allocation12 + $0x70] sm:$0xff]  ;;  %v13905_v21 = vld [vmem:[#allocation9 + $0xde0] sm:$0xf0]  ;;  %v8140_v57 = vmax.f32 %v14715_v22, 0.0 }
 0x44d   :  { %8105 = vmatpush.bf16.msra.mxu2 %v12316_v23  ;;  %8080 = vmatpush.bf16.msra.mxu0 %v11976_v58  ;;  %v11936_v23 = vor.u32 %v13745_v37, %v11935_v31  ;;  %v13941_v37 = vld [vmem:[#allocation12] sm:$0xff]  ;;  %v13971_v22 = vld [vmem:[#allocation12 + $0xf0] sm:$0xff] }
 0x44f   :  { %8117 = vmatpush.bf16.msra.mxu3 %v12496_v60  ;;  %v13964_v60 = vld [vmem:[#allocation12 + $0xb8] sm:$0xff] }
 0x450   :  { %8093 = vmatpush.bf16.msra.mxu1 %v12136_v19  ;;  %v12655_v19 = vld [vmem:[#allocation9 + $0xe70] sm:$0xf] }
 0x451   :  { %8106 = vmatpush.bf16.msra.mxu2 %v12296_v59  ;;  %8081 = vmatpush.bf16.msra.mxu0 %v11956_v48  ;;  %v7865_v32 = vpop.f32.mrf.mxu3  ;;  %v13946_v59 = vld [vmem:[#allocation12 + $0x28] sm:$0xff] }
 0x452   :  { %v13910_v48 = vld [vmem:[#allocation9 + $0xe08] sm:$0xf0] }
 0x453   :  { %8118 = vmatpush.bf16.msra.mxu3 %v12476_v55  ;;  %v12635_v55 = vld [vmem:[#allocation9 + $0xe48] sm:$0xf] }
 0x454   :  { %8094 = vmatpush.bf16.msra.mxu1 %v12116_v0  ;;  %v12615_v0 = vld [vmem:[#allocation9 + $0xe20] sm:$0xf] }
 0x455   :  { %8107 = vmatpush.bf16.msra.mxu2 %v12276_v38  ;;  %8082 = vmatpush.bf16.msra.mxu0 %v11936_v23  ;;  %v14776_v58 = vpop.f32.mrf.mxu0  ;;  %v12636_v38 = vor.u32 %v13920_v40, %v12635_v55  ;;  %v12616_v7 = vor.u32 %v13915_v1, %v12615_v0  ;;  %v13958_v23 = vld [vmem:[#allocation12 + $0x88] sm:$0xff] }
 0x457   :  { %8119 = vmatpush.bf16.msra.mxu3 %v12456_v9  ;;  %v12595_v9 = vld [vmem:[#allocation9 + $0xdf8] sm:$0xf] }
 0x458   :  { %8095 = vmatpush.bf16.msra.mxu1 %v12096_v17  ;;  %8083 = vmatmul.bf16.vlgmr.msra.gmra.mxu0 %v14632_v47  ;;  %v14774_v49 = vpop.f32.mrf.mxu1  ;;  %v12656_v47 = vor.u32 %v13925_v46, %v12655_v19  ;;  %v12596_v10 = vor.u32 %v13910_v48, %v12595_v9  ;;  %v13949_v17 = vld [vmem:[#allocation12 + $0x40] sm:$0xff]  ;;  %v13980_v48 = vld [vmem:[#allocation12 + $0x138] sm:$0xff] }
 0x459   :  { %8108 = vmatpush.bf16.msra.mxu2 %v12256_v5  ;;  %8127 = vmatpush.bf16.msrb.mxu0 %v12716_v26  ;;  %v13965_v19 = vld [vmem:[#allocation12 + $0xc0] sm:$0xff] }
 0x45b   :  { %8120 = vmatpush.bf16.msra.mxu3 %v12436_v8  ;;  %8096 = vmatmul.bf16.vlgmr.msra.gmra.mxu1 %v14652_v33  ;;  %v13945_v33 = vld [vmem:[#allocation12 + $0x20] sm:$0xff]  ;;  %v7812_v8 = vadd.f32 %v14757_v11, %v14755_v3  ;;  %v13970_v11 = vld [vmem:[#allocation12 + $0xe8] sm:$0xff] }
 0x45c   :  { %8474 = vmatpush.bf16.msrb.mxu1 %v13948_v20  ;;  %8109 = vmatmul.bf16.vlgmr.msra.gmra.mxu2 %v14650_v28  ;;  %v12676_v28 = vor.u32 %v13930_v62, %v12675_v41  ;;  %v12575_v20 = vld [vmem:[#allocation9 + $0xdd0] sm:$0xf]  ;;  %v13967_v41 = vld [vmem:[#allocation12 + $0xd0] sm:$0xff] }
 0x45d   :  { %8487 = vmatpush.bf16.msrb.mxu2 %v13956_v18  ;;  %8128 = vmatpush.bf16.msrb.mxu0 %v12696_v15  ;;  %v7878_v5 = vpop.f32.mrf.mxu0  ;;  %v8141_v18 = vmax.f32 %v14739_v13, 0.0  ;;  %v7825_v24 = vadd.f32 %v14764_v12, %v7812_v8  ;;  %v12576_v39 = vor.u32 %v13905_v21, %v12575_v20  ;;  %v13972_v13 = vld [vmem:[#allocation12 + $0xf8] sm:$0xff]  ;;  %v13974_v8 = vld [vmem:[#allocation12 + $0x108] sm:$0xff] }
 0x45e   :  { %v13976_v20 = vld [vmem:[#allocation12 + $0x118] sm:$0xff] }
 0x45f   :  { %8121 = vmatpush.bf16.msra.mxu3 %v12416_v50  ;;  %v14778_v51 = vpop.f32.mrf.mxu2  ;;  %v8146_v26 = vpack.c.bf16 %v8141_v18, %v8141_v18  ;;  %v8142_v56 = vmax.f32 %v7825_v24, 0.0  ;;  %v13969_v50 = vld [vmem:[#allocation12 + $0xe0] sm:$0xff] }
 0x460   :  { %8475 = vmatpush.bf16.msrb.mxu1 %v13947_v34  ;;  %v7891_v6 = vpop.f32.mrf.mxu1  ;;  %v13957_v34 = vld [vmem:[#allocation12 + $0x80] sm:$0xff] }
 0x461   :  { %8488 = vmatpush.bf16.msrb.mxu2 %v13955_v42  ;;  %8129 = vmatpush.bf16.msrb.mxu0 %v12676_v28  ;;  %v8145_v42 = vpack.c.bf16 %v8140_v57, %v8140_v57  ;;  %v8147_v3 = vpack.c.bf16 %v8142_v56, %v8142_v56  ;;  %v13966_v28 = vld [vmem:[#allocation12 + $0xc8] sm:$0xff]  ;;  %v13975_v57 = vld [vmem:[#allocation12 + $0x110] sm:$0xff]  ;;  %v13973_v24 = vld [vmem:[#allocation12 + $0x100] sm:$0xff] }
 0x462   :  { %8122 = vmatmul.bf16.vlgmr.msra.gmra.mxu3 %v14661_v29  ;;  %v13961_v29 = vld [vmem:[#allocation12 + $0xa0] sm:$0xff] }
 0x463   :  { %8500 = vmatpush.bf16.msrb.mxu3 %v13964_v60  ;;  %v13968_v60 = vld [vmem:[#allocation12 + $0xd8] sm:$0xff] }
 0x464   :  { %8476 = vmatpush.bf16.msrb.mxu1 %v13946_v59 }
 0x465   :  { %8489 = vmatpush.bf16.msrb.mxu2 %v13954_v36  ;;  %8130 = vmatpush.bf16.msrb.mxu0 %v12656_v47  ;;  %v7915_v35 = vpop.f32.mrf.mxu3  ;;  %v7864_v36 = vadd.f32 %v14768_v43, %v14766_v16 }
 0x467   :  { %8501 = vmatpush.bf16.msrb.mxu3 %v13963_v44  ;;  %v7904_v31 = vpop.f32.mrf.mxu2 }
 0x468   :  { %8477 = vmatpush.bf16.msrb.mxu1 %v13945_v33 }
 0x469   :  { %8490 = vmatpush.bf16.msrb.mxu2 %v13953_v63  ;;  %8131 = vmatpush.bf16.msrb.mxu0 %v12636_v38 }
 0x46b   :  { %8502 = vmatpush.bf16.msrb.mxu3 %v13962_v25 }
 0x46c   :  { %8478 = vmatpush.bf16.msrb.mxu1 %v13944_v53  ;;  %v14021_v53 = vld [vmem:[#allocation10] sm:$0x1f] }
 0x46d   :  { %8491 = vmatpush.bf16.msrb.mxu2 %v13952_v52  ;;  %8132 = vmatpush.bf16.msrb.mxu0 %v12616_v7  ;;  %v7917_v30 = vpop.f32.mrf.mxu3  ;;  %v4858_v55 = vperm.slane %v14021_v53, 4  ;;  %v13988_v53 = vld [vmem:[#allocation15 + $0x38] sm:$0xff] }
 0x46f   :  { %8503 = vmatpush.bf16.msrb.mxu3 %v13961_v29 }
 0x470   :  { %8479 = vmatpush.bf16.msrb.mxu1 %v13943_v2 }
 0x471   :  { %8492 = vmatpush.bf16.msrb.mxu2 %v13951_v45  ;;  %8133 = vmatpush.bf16.msrb.mxu0 %v12596_v10  ;;  %v13978_v10 = vld [vmem:[#allocation12 + $0x128] sm:$0xff] }
 0x473   :  { %8504 = vmatpush.bf16.msrb.mxu3 %v13960_v54 }
 0x474   :  { %8480 = vmatpush.bf16.msrb.mxu1 %v13942_v14 }
 0x475   :  { %8493 = vmatpush.bf16.msrb.mxu2 %v13950_v4  ;;  %8134 = vmatpush.bf16.msrb.mxu0 %v12576_v39  ;;  %v7928_v32 = vpop.f32.mrf.mxu0 }
 0x477   :  { %8505 = vmatpush.bf16.msrb.mxu3 %v13959_v61  ;;  %v13979_v61 = vld [vmem:[#allocation12 + $0x130] sm:$0xff] }
 0x478   :  { %8481 = vmatpush.bf16.msrb.mxu1 %v13941_v37  ;;  %8135 = vmatmul.bf16.vlgmr.msrb.gmra.mxu0 %v14669_v27  ;;  %v7941_v12 = vpop.f32.mrf.mxu1  ;;  %v7877_v27 = vadd.f32 %v14776_v58, %v7864_v36  ;;  %v13977_v37 = vld [vmem:[#allocation12 + $0x120] sm:$0xff] }
 0x479   :  { %8494 = vmatpush.bf16.msrb.mxu2 %v13949_v17  ;;  %8513 = vmatpush.bf16.msra.mxu0 %v13972_v13  ;;  %v14015_v36 = vld [vmem:[#allocation13] ss:$0 sm:$0xff] }
 0x47a   :  { %v7890_v63 = vadd.f32 %v14774_v49, %v7877_v27 }
 0x47b   :  { %8506 = vmatpush.bf16.msrb.mxu3 %v13958_v23  ;;  %8482 = vmatmul.bf16.vlgmr.msrb.gmra.mxu1 %v8145_v42 }
 0x47c   :  { %8495 = vmatmul.bf16.vlgmr.msrb.gmra.mxu2 %v8146_v26  ;;  %v7903_v46 = vadd.f32 %v14778_v51, %v7890_v63  ;;  %8526 = vmatpush.bf16.msra.mxu1 %v13980_v48 }
 0x47d   :  { %8514 = vmatpush.bf16.msra.mxu0 %v13971_v22  ;;  %v7930_v62 = vpop.f32.mrf.mxu0  ;;  %8609 = vmatpush.bf16.msra.mxu2 %v13988_v53 }
 0x47e   :  { %v7916_v25 = vadd.f32 %v7915_v35, %v7903_v46 }
 0x47f   :  { %8507 = vmatpush.bf16.msrb.mxu3 %v13957_v34  ;;  %v7954_v15 = vpop.f32.mrf.mxu2 }
 0x480   :  { %v7943_v59 = vpop.f32.mrf.mxu1  ;;  %v7929_v16 = vadd.f32 %v7928_v32, %v7916_v25  ;;  %8527 = vmatpush.bf16.msra.mxu1 %v13979_v61 }
 0x481   :  { %8515 = vmatpush.bf16.msra.mxu0 %v13970_v11 }
 0x482   :  { %8508 = vmatmul.bf16.vlgmr.msrb.gmra.mxu3 %v8147_v3  ;;  %v7942_v43 = vadd.f32 %v7941_v12, %v7929_v16 }
 0x484   :  { %v7955_v52 = vadd.f32 %v7954_v15, %v7942_v43  ;;  %8528 = vmatpush.bf16.msra.mxu1 %v13978_v10  ;;  %v13990_v10 = vld [vmem:[#allocation18 + $0x8] sm:$0xff] }
 0x485   :  { %8516 = vmatpush.bf16.msra.mxu0 %v13969_v50  ;;  %v7967_v44 = vpop.f32.mrf.mxu3 }
 0x486   :  { %v7968_v58 = vadd.f32 %v7967_v44, %v7955_v52 }
 0x487   :  { %v7956_v33 = vpop.f32.mrf.mxu2 }
 0x488   :  { %8529 = vmatpush.bf16.msra.mxu1 %v13977_v37 }
 0x489   :  { %8517 = vmatpush.bf16.msra.mxu0 %v13968_v60 }
 0x48c   :  { %8530 = vmatpush.bf16.msra.mxu1 %v13976_v20 }
 0x48d   :  { %8518 = vmatpush.bf16.msra.mxu0 %v13967_v41  ;;  %v7969_v47 = vpop.f32.mrf.mxu3 }
 0x490   :  { %8531 = vmatpush.bf16.msra.mxu1 %v13975_v57 }
 0x491   :  { %8519 = vmatpush.bf16.msra.mxu0 %v13966_v28 }
 0x494   :  { %8532 = vmatpush.bf16.msra.mxu1 %v13974_v8  ;;  %v14017_v8 = vld [vmem:[#allocation19] ss:$0 sm:$0xff] }
 0x495   :  { %8520 = vmatpush.bf16.msra.mxu0 %v13965_v19  ;;  %v7980_v29 = vpop.f32.mrf.mxu0 }
 0x496   :  { %v7981_v45 = vadd.f32 %v7980_v29, %v7968_v58  ;;  %v13985_v58 = vld [vmem:[#allocation15 + $0x20] sm:$0xff]  ;;  %v13984_v29 = vld [vmem:[#allocation15 + $0x18] sm:$0xff] }
 0x498   :  { %v7993_v40 = vpop.f32.mrf.mxu1  ;;  %v8143_v49 = vmax.f32 %v7981_v45, 0.0  ;;  %8533 = vmatpush.bf16.msra.mxu1 %v13973_v24 }
 0x499   :  { %v7994_v38 = vadd.f32 %v7993_v40, %v4858_v55  ;;  %v13987_v55 = vld [vmem:[#allocation15 + $0x30] sm:$0xff]  ;;  %v13986_v40 = vld [vmem:[#allocation15 + $0x28] sm:$0xff] }
 0x49a   :  { %v8148_v1 = vpack.c.bf16 %v8143_v49, %v8143_v49  ;;  %8610 = vmatpush.bf16.msra.mxu2 %v13987_v55 }
 0x49c   :  { %8521 = vmatmul.bf16.vlgmr.msra.gmra.mxu0 %v8148_v1  ;;  %v13981_v1 = vld [vmem:[#allocation15] sm:$0xff] }
 0x49d   :  { %v7982_v51 = vpop.f32.mrf.mxu0 }
 0x49e   :  { %8611 = vmatpush.bf16.msra.mxu2 %v13986_v40  ;;  %v13995_v51 = vld [vmem:[#allocation18 + $0x30] sm:$0xff] }
 0x49f   :  { %v8006_v2 = vpop.f32.mrf.mxu2 }
 0x4a0   :  { %v8007_v0 = vadd.f32 %v8006_v2, %v7994_v38  ;;  %v7995_v54 = vpop.f32.mrf.mxu1  ;;  %v13983_v38 = vld [vmem:[#allocation15 + $0x10] sm:$0xff] }
 0x4a1   :  { %v13996_v54 = vld [vmem:[#allocation18 + $0x38] sm:$0xff] }
 0x4a2   :  { %8612 = vmatpush.bf16.msra.mxu2 %v13985_v58  ;;  %8692 = vmatpush.bf16.msra.mxu3 %v13996_v54 }
 0x4a5   :  { %v8019_v6 = vpop.f32.mrf.mxu3 }
 0x4a6   :  { %v8020_v13 = vadd.f32 %v8019_v6, %v8007_v0  ;;  %8613 = vmatpush.bf16.msra.mxu2 %v13984_v29  ;;  %v13982_v0 = vld [vmem:[#allocation15 + $0x8] sm:$0xff]  ;;  %8693 = vmatpush.bf16.msra.mxu3 %v13995_v51 }
 0x4a7   :  { %v8008_v7 = vpop.f32.mrf.mxu2  ;;  %v13994_v6 = vld [vmem:[#allocation18 + $0x28] sm:$0xff] }
 0x4a8   :  { %v13993_v7 = vld [vmem:[#allocation18 + $0x20] sm:$0xff] }
 0x4aa   :  { %8614 = vmatpush.bf16.msra.mxu2 %v13983_v38  ;;  %8694 = vmatpush.bf16.msra.mxu3 %v13994_v6 }
 0x4ad   :  { %v8021_v4 = vpop.f32.mrf.mxu3 }
 0x4ae   :  { %8615 = vmatpush.bf16.msra.mxu2 %v13982_v0  ;;  %8695 = vmatpush.bf16.msra.mxu3 %v13993_v7  ;;  %v13992_v4 = vld [vmem:[#allocation18 + $0x18] sm:$0xff] }
 0x4b2   :  { %8616 = vmatpush.bf16.msra.mxu2 %v13981_v1  ;;  %8696 = vmatpush.bf16.msra.mxu3 %v13992_v4 }
 0x4b5   :  { %v8032_v9 = vpop.f32.mrf.mxu0 }
 0x4b6   :  { %v8033_v34 = vadd.f32 %v8032_v9, %v8020_v13 }
 0x4b8   :  { %v8045_v14 = vpop.f32.mrf.mxu1 }
 0x4b9   :  { %v8046_v22 = vadd.f32 %v8045_v14, %v8033_v34  ;;  %v13991_v14 = vld [vmem:[#allocation18 + $0x10] sm:$0xff] }
 0x4ba   :  { %8697 = vmatpush.bf16.msra.mxu3 %v13991_v14 }
 0x4bd   :  { %v8034_v17 = vpop.f32.mrf.mxu0 }
 0x4be   :  { %8698 = vmatpush.bf16.msra.mxu3 %v13990_v10  ;;  %v13989_v17 = vld [vmem:[#allocation18] sm:$0xff] }
 0x4bf   :  { %v8058_v5 = vpop.f32.mrf.mxu2 }
 0x4c0   :  { %v8047_v35 = vpop.f32.mrf.mxu1  ;;  %v8059_v11 = vadd.f32 %v8058_v5, %v8046_v22 }
 0x4c2   :  { %8699 = vmatpush.bf16.msra.mxu3 %v13989_v17 }
 0x4c5   :  { %v8071_v18 = vpop.f32.mrf.mxu3 }
 0x4c6   :  { %v8072_v12 = vadd.f32 %v8071_v18, %v8059_v11  ;;  %v14016_v18 = vld [vmem:[#allocation16] ss:$0 sm:$0xff] }
 0x4c7   :  { %v8060_v31 = vpop.f32.mrf.mxu2 }
 0x4cd   :  { %v8073_v21 = vpop.f32.mrf.mxu3 }
 0x4d5   :  { %v8084_v39 = vpop.f32.mrf.mxu0 }
 0x4d6   :  { %v8085_v32 = vadd.f32 %v8084_v39, %v8072_v12 }
 0x4d8   :  { %v8097_v23 = vpop.f32.mrf.mxu1 }
 0x4d9   :  { %v8098_v60 = vadd.f32 %v8097_v23, %v8085_v32 }
 0x4dd   :  { %v8086_v56 = vpop.f32.mrf.mxu0 }
 0x4df   :  { %v8110_v26 = vpop.f32.mrf.mxu2 }
 0x4e0   :  { %v8099_v42 = vpop.f32.mrf.mxu1  ;;  %v8111_v15 = vadd.f32 %v8110_v26, %v8098_v60 }
 0x4e5   :  { %v8123_v30 = vpop.f32.mrf.mxu3 }
 0x4e6   :  { %v8124_v41 = vadd.f32 %v8123_v30, %v8111_v15 }
 0x4e7   :  { %v8112_v3 = vpop.f32.mrf.mxu2 }
 0x4ed   :  { %v8125_v50 = vpop.f32.mrf.mxu3 }
 0x4f5   :  { %v8136_v27 = vpop.f32.mrf.mxu0 }
 0x4f6   :  { %v8137_v44 = vadd.f32 %v8136_v27, %v8124_v41 }
 0x4f8   :  { %v8483_v59 = vpop.f32.mrf.mxu1  ;;  %v8144_v63 = vmax.f32 %v8137_v44, 0.0 }
 0x4f9   :  { %v8484_v62 = vadd.f32 %v14015_v36, %v8483_v59 }
 0x4fa   :  { %v8149_v19 = vpack.c.bf16 %v8144_v63, %v8144_v63 }
 0x4fc   :  { %8534 = vmatmul.bf16.vlgmr.msra.gmra.mxu1 %v8149_v19 }
 0x4fd   :  { %v8138_v25 = vpop.f32.mrf.mxu0 }
 0x4ff   :  { %v8496_v28 = vpop.f32.mrf.mxu2 }
 0x500   :  { %v8497_v33 = vadd.f32 %v8496_v28, %v8484_v62  ;;  %v8485_v46 = vpop.f32.mrf.mxu1 }
 0x505   :  { %v8509_v47 = vpop.f32.mrf.mxu3 }
 0x506   :  { %v8510_v16 = vadd.f32 %v8509_v47, %v8497_v33 }
 0x507   :  { %v8498_v43 = vpop.f32.mrf.mxu2 }
 0x50d   :  { %v8511_v52 = vpop.f32.mrf.mxu3 }
 0x519   :  { %v8522_v45 = vpop.f32.mrf.mxu0 }
 0x51a   :  { %v8523_v2 = vadd.f32 %v8522_v45, %v8510_v16 }
 0x521   :  { %v8524_v49 = vpop.f32.mrf.mxu0 }
 0x579   :  { %v8535_v9 = vpop.f32.mrf.mxu1 }
 0x57a   :  { %v8536_v48 = vadd.f32 %v8535_v9, %v8523_v2 }
 0x57c   :  { %v8539_v5 = vmax.f32 %v8536_v48, 0.0 }
 0x57e   :  { %v8540_v61 = vpack.c.bf16 %v8539_v5, %v8539_v5 }
 0x580   :  { %8617 = vmatmul.bf16.vlgmr.msra.gmra.mxu2 %v8540_v61 }
 0x581   :  { %v8537_v35 = vpop.f32.mrf.mxu1 }
 0x603   :  { %v8618_v31 = vpop.f32.mrf.mxu2 }
 0x604   :  { %v8619_v37 = vadd.f32 %v14016_v18, %v8618_v31 }
 0x606   :  { %v8622_v20 = vmax.f32 %v8619_v37, 0.0 }
 0x608   :  { %v8623_v21 = vpack.c.bf16 %v8622_v20, %v8622_v20 }
 0x60a   :  { %8700 = vmatmul.bf16.vlgmr.msra.gmra.mxu3 %v8623_v21 }
 0x60b   :  { %v8620_v57 = vpop.f32.mrf.mxu2 }
 0x68d   :  { %v8701_v23 = vpop.f32.mrf.mxu3 }
 0x68e   :  { %v8702_v24 = vadd.f32 %v14017_v8, %v8701_v23 }
 0x690   :  { %8705 = vst [vmem:[%s14807_s13] sm:$0xff] %v8702_v24 }
 0x695   :  { %v8703_v39 = vpop.f32.mrf.mxu3 }
 0x696   :  { %8710 = vsyncpa [#allocation3], 1 }
 0x697   :  { %8711 = vsyncpa [#allocation5], 1 }
 0x698   :  { %8712 = vsyncpa [#allocation8], 1 }
 0x699   :  { %8713 = vsyncpa [#allocation11], 1 }
 0x69a   :  { %8714 = vsyncpa [#allocation14], 1 }
 0x69b   :  { %8715 = vsyncpa [#allocation17], 1 }
 0x69c   :  { %8716 = vsyncpa [#allocation20], 1 }

</bundles_post_ra>
